<compile_context>
chip_gen: v7x
topology: tpu7x:2x2x1
jax: 0.10.0
libtpu: 0.0.40
codegen_flags: <defaults>
</compile_context>

<pallas_src>
import functools

import jax
import jax.numpy as jnp
from jax.experimental import pallas as pl
from jax.experimental.pallas import tpu as pltpu


_K_TAPS = 16  # 9 conv taps of layer 1, zero-padded to 16 for clean alignment


def _reflect_pad_1(a):
    """Reflection-pad by 1 on the two leading (H, W) axes of (H, W, C)."""
    H, W = a.shape[0], a.shape[1]
    a = jnp.concatenate([a[1:2], a, a[H - 2:H - 1]], axis=0)
    a = jnp.concatenate([a[:, 1:2, :], a, a[:, W - 2:W - 1, :]], axis=1)
    return a


def _im2col_3x3(ap, H, W):
    """(H+2, W+2, C) padded activation -> (H*W, 9*C) patch slab."""
    C = ap.shape[-1]
    cols = []
    for dy in range(3):
        for dx in range(3):
            cols.append(ap[dy:dy + H, dx:dx + W, :].reshape(H * W, C))
    return jnp.concatenate(cols, axis=-1)


def _n_net_kernel(p1_ref, w1_ref, b1_ref, w234_ref, b234_ref, w5_ref, b5_ref,
                  o_ref, *, H, W, num):
    """Fused 5-layer N_net forward for one batch element.

    p1_ref:   (H*W, 16)        bf16  im2col of the grayscale input (layer 1)
    w1_ref:   (16, num)        bf16  (9 taps zero-padded to 16)
    b1_ref:   (1, num)         f32
    w234_ref: (3, 9*num, num)  bf16  layers 2..4, im2col (9*Cin, Cout) layout
    b234_ref: (3, 1, num)      f32
    w5_ref:   (9*num, 128)     bf16  Cout zero-padded 3 -> 128 (lane dense)
    b5_ref:   (1, 128)         f32
    o_ref:    (H*W, 128)       f32   sigmoid output; channels 0..2 are valid
    """
    # ---- layer 1: (H*W, 16) x (16, num), ReLU ----
    acc = jnp.dot(p1_ref[...], w1_ref[...], preferred_element_type=jnp.float32)
    acc = jnp.maximum(acc + b1_ref[...], 0.0)
    a = acc.astype(jnp.bfloat16).reshape(H, W, num)

    # ---- layers 2..4: im2col (H*W, 9*num) x (9*num, num), ReLU ----
    for layer in range(3):
        patches = _im2col_3x3(_reflect_pad_1(a), H, W)
        acc = jnp.dot(patches, w234_ref[layer],
                      preferred_element_type=jnp.float32)
        acc = jnp.maximum(acc + b234_ref[layer], 0.0)
        a = acc.astype(jnp.bfloat16).reshape(H, W, num)

    # ---- layer 5: im2col (H*W, 9*num) x (9*num, 128), sigmoid, lane-dense ----
    patches = _im2col_3x3(_reflect_pad_1(a), H, W)
    acc = jnp.dot(patches, w5_ref[...], preferred_element_type=jnp.float32)
    o_ref[...] = jax.nn.sigmoid(acc + b5_ref[...])


def n_net_forward(x_nchw, params):
    """Full N_net forward: NCHW (N,1,H,W) f32 in -> NCHW (N,3,H,W) f32 out."""
    N, C, H, W = x_nchw.shape
    assert C == 1, "N_net expects a single-channel input"
    HW = H * W

    (w1, b1), (w2, b2), (w3, b3), (w4, b4), (w5, b5) = params
    num = w1.shape[-1]

    # --- layer-1 im2col of the 1-channel input (cheap XLA glue, done once) ---
    img = x_nchw[:, 0]                                            # (N, H, W)
    xpad = jnp.pad(img, ((0, 0), (1, 1), (1, 1)), mode="reflect")
    taps = [xpad[:, dy:dy + H, dx:dx + W].reshape(N, HW)
            for dy in range(3) for dx in range(3)]
    p1 = jnp.stack(taps, axis=-1)                                 # (N, HW, 9)
    p1 = jnp.pad(p1, ((0, 0), (0, 0), (0, _K_TAPS - 9)))
    p1 = p1.astype(jnp.bfloat16)                                  # (N, HW, 16)

    # --- pack weights into im2col (9*Cin, Cout) layout, bf16 for the MXU ---
    w1_col = jnp.pad(w1.reshape(9, num),
                     ((0, _K_TAPS - 9), (0, 0))).astype(jnp.bfloat16)
    b1_row = b1.reshape(1, num).astype(jnp.float32)
    w234 = jnp.stack([w.reshape(9 * num, num) for w in (w2, w3, w4)],
                     axis=0).astype(jnp.bfloat16)                 # (3,9n,n)
    b234 = jnp.stack([b.reshape(1, num) for b in (b2, b3, b4)],
                     axis=0).astype(jnp.float32)                  # (3,1,n)
    w5_col = jnp.zeros((9 * num, 128), jnp.float32)
    w5_col = w5_col.at[:, :3].set(w5.reshape(9 * num, 3)).astype(jnp.bfloat16)
    b5_row = jnp.zeros((1, 128), jnp.float32).at[0, :3].set(b5)

    kernel = functools.partial(_n_net_kernel, H=H, W=W, num=num)

    out = pl.pallas_call(
        kernel,
        out_shape=jax.ShapeDtypeStruct((N, HW, 128), jnp.float32),
        grid=(N,),
        in_specs=[
            pl.BlockSpec((None, HW, _K_TAPS), lambda n: (n, 0, 0)),
            pl.BlockSpec((_K_TAPS, num), lambda n: (0, 0)),
            pl.BlockSpec((1, num), lambda n: (0, 0)),
            pl.BlockSpec((3, 9 * num, num), lambda n: (0, 0, 0)),
            pl.BlockSpec((3, 1, num), lambda n: (0, 0, 0)),
            pl.BlockSpec((9 * num, 128), lambda n: (0, 0)),
            pl.BlockSpec((1, 128), lambda n: (0, 0)),
        ],
        out_specs=pl.BlockSpec((None, HW, 128), lambda n: (n, 0, 0)),
        compiler_params=pltpu.CompilerParams(
            dimension_semantics=("parallel",),
            vmem_limit_bytes=32 * 1024 * 1024,
        ),
    )(p1, w1_col, b1_row, w234, b234, w5_col, b5_row)

    out = out[:, :, :3].reshape(N, H, W, 3)        # drop lane padding
    return jnp.transpose(out, (0, 3, 1, 2))        # NHWC -> NCHW


def init_n_net_params(key, num=64):
    """Deterministic init matching N_net(num) layer shapes.

    Returns list of (w, b) with w in (kh, kw, Cin, Cout) layout, f32.
    """
    chans = [(1, num), (num, num), (num, num), (num, num), (num, 3)]
    params = []
    for (cin, cout) in chans:
        key, kw_key, kb_key = jax.random.split(key, 3)
        fan_in = cin * 3 * 3
        bound = 1.0 / jnp.sqrt(fan_in)
        w_oihw = jax.random.uniform(
            kw_key, (cout, cin, 3, 3), jnp.float32, -bound, bound)
        w = jnp.transpose(w_oihw, (2, 3, 1, 0))     # -> (kh, kw, Cin, Cout)
        bvec = jax.random.uniform(kb_key, (cout,), jnp.float32, -bound, bound)
        params.append((w, bvec))
    return params


def n_net_reference(x_nchw, params):
    """Pure-JAX reference with matching bf16-matmul / f32-accumulate math."""
    x = x_nchw
    activations = ["relu", "relu", "relu", "relu", "sigmoid"]
    for (w, b), act in zip(params, activations):
        xp = jnp.pad(x, ((0, 0), (0, 0), (1, 1), (1, 1)), mode="reflect")
        w_oihw = jnp.transpose(w, (3, 2, 0, 1)).astype(jnp.bfloat16)
        y = jax.lax.conv_general_dilated(
            xp.astype(jnp.bfloat16), w_oihw, (1, 1), "VALID",
            dimension_numbers=("NCHW", "OIHW", "NCHW"),
            preferred_element_type=jnp.float32,
        )
        y = y + b[None, :, None, None]
        y = jnp.maximum(y, 0.0) if act == "relu" else jax.nn.sigmoid(y)
        x = y
    return x


if __name__ == "__main__":
    key = jax.random.PRNGKey(0)
    key, xkey = jax.random.split(key)

    # Small shapes consistent with N_net: grayscale input, default num=64.
    N, C, H, W = 2, 1, 16, 16
    num = 64
    x = jax.random.uniform(xkey, (N, C, H, W), jnp.float32)
    params = init_n_net_params(key, num=num)

    fwd = jax.jit(n_net_forward)
    out = jax.block_until_ready(fwd(x, params))
    ref = jax.block_until_ready(jax.jit(n_net_reference)(x, params))

    assert out.shape == (N, 3, H, W), out.shape
    max_err = float(jnp.max(jnp.abs(out - ref)))
    assert max_err < 5e-3, max_err

    print("KERNEL_OK")
</pallas_src>

<mosaic_0001>
module attributes {stable_mosaic.version = 11 : i64} {
  func.func @_n_net_kernel(%arg0: i32, %arg1: memref<1x256x16xbf16, #tpu.memory_space<vmem>>, %arg2: memref<16x64xbf16, #tpu.memory_space<vmem>>, %arg3: memref<1x64xf32, #tpu.memory_space<vmem>>, %arg4: memref<3x576x64xbf16, #tpu.memory_space<vmem>>, %arg5: memref<3x1x64xf32, #tpu.memory_space<vmem>>, %arg6: memref<576x128xbf16, #tpu.memory_space<vmem>>, %arg7: memref<1x128xf32, #tpu.memory_space<vmem>>, %arg8: memref<1x256x128xf32, #tpu.memory_space<vmem>>) attributes {dimension_semantics = [#tpu.dimension_semantics<parallel>], iteration_bounds = array<i64: 2>, scalar_prefetch = 0 : i64, scratch_operands = 0 : i64, tpu.core_type = #tpu.core_type<tc>, window_params = [{transform_indices = @transform_0, window_bounds = array<i64: 1, 256, 16>}, {pipeline_mode = #tpu.pipeline_mode<synchronous>, transform_indices = @transform_1, window_bounds = array<i64: 16, 64>}, {pipeline_mode = #tpu.pipeline_mode<synchronous>, transform_indices = @transform_2, window_bounds = array<i64: 1, 64>}, {pipeline_mode = #tpu.pipeline_mode<synchronous>, transform_indices = @transform_3, window_bounds = array<i64: 3, 576, 64>}, {pipeline_mode = #tpu.pipeline_mode<synchronous>, transform_indices = @transform_4, window_bounds = array<i64: 3, 1, 64>}, {pipeline_mode = #tpu.pipeline_mode<synchronous>, transform_indices = @transform_5, window_bounds = array<i64: 576, 128>}, {pipeline_mode = #tpu.pipeline_mode<synchronous>, transform_indices = @transform_6, window_bounds = array<i64: 1, 128>}, {transform_indices = @transform_7, window_bounds = array<i64: 1, 256, 128>}]} {
    %c0 = arith.constant 0 : index
    %c0_0 = arith.constant 0 : index
    %c0_1 = arith.constant 0 : index
    %0 = vector.load %arg1[%c0, %c0_0, %c0_1] : memref<1x256x16xbf16, #tpu.memory_space<vmem>>, vector<1x256x16xbf16>
    %1 = vector.shape_cast %0 : vector<1x256x16xbf16> to vector<256x16xbf16>
    %c0_2 = arith.constant 0 : index
    %c0_3 = arith.constant 0 : index
    %2 = vector.load %arg2[%c0_2, %c0_3] : memref<16x64xbf16, #tpu.memory_space<vmem>>, vector<16x64xbf16>
    %cst = arith.constant dense<0.000000e+00> : vector<256x64xf32>
    %3 = tpu.matmul %1, %2, %cst {dimension_numbers = #tpu.dot_dimension_numbers<[1], [0], [0], [1], [0, 0, 1, 1], [], []>} : vector<256x16xbf16>, vector<16x64xbf16>, vector<256x64xf32> -> vector<256x64xf32>
    %c0_4 = arith.constant 0 : index
    %c0_5 = arith.constant 0 : index
    %4 = vector.load %arg3[%c0_4, %c0_5] : memref<1x64xf32, #tpu.memory_space<vmem>>, vector<1x64xf32>
    %5 = vector.broadcast %4 : vector<1x64xf32> to vector<256x64xf32>
    %6 = arith.addf %3, %5 : vector<256x64xf32>
    %cst_6 = arith.constant 0.000000e+00 : f32
    %7 = vector.broadcast %cst_6 : f32 to vector<256x64xf32>
    %8 = arith.maximumf %6, %7 : vector<256x64xf32>
    %9 = arith.truncf %8 : vector<256x64xf32> to vector<256x64xbf16>
    %10 = vector.shape_cast %9 : vector<256x64xbf16> to vector<16x16x64xbf16>
    %11 = vector.extract_strided_slice %10 {offsets = [1, 0, 0], sizes = [1, 16, 64], strides = [1, 1, 1]} : vector<16x16x64xbf16> to vector<1x16x64xbf16>
    %12 = vector.extract_strided_slice %10 {offsets = [14, 0, 0], sizes = [1, 16, 64], strides = [1, 1, 1]} : vector<16x16x64xbf16> to vector<1x16x64xbf16>
    %13 = tpu.concatenate %11, %10, %12 in 0 : vector<1x16x64xbf16>, vector<16x16x64xbf16>, vector<1x16x64xbf16> -> vector<18x16x64xbf16>
    %14 = vector.extract_strided_slice %13 {offsets = [0, 1, 0], sizes = [18, 1, 64], strides = [1, 1, 1]} : vector<18x16x64xbf16> to vector<18x1x64xbf16>
    %15 = vector.extract_strided_slice %13 {offsets = [0, 14, 0], sizes = [18, 1, 64], strides = [1, 1, 1]} : vector<18x16x64xbf16> to vector<18x1x64xbf16>
    %16 = tpu.concatenate %14, %13, %15 in 1 : vector<18x1x64xbf16>, vector<18x16x64xbf16>, vector<18x1x64xbf16> -> vector<18x18x64xbf16>
    %17 = vector.extract_strided_slice %16 {offsets = [0, 0, 0], sizes = [16, 16, 64], strides = [1, 1, 1]} : vector<18x18x64xbf16> to vector<16x16x64xbf16>
    %18 = vector.shape_cast %17 : vector<16x16x64xbf16> to vector<256x64xbf16>
    %19 = vector.extract_strided_slice %16 {offsets = [0, 1, 0], sizes = [16, 16, 64], strides = [1, 1, 1]} : vector<18x18x64xbf16> to vector<16x16x64xbf16>
    %20 = vector.shape_cast %19 : vector<16x16x64xbf16> to vector<256x64xbf16>
    %21 = vector.extract_strided_slice %16 {offsets = [0, 2, 0], sizes = [16, 16, 64], strides = [1, 1, 1]} : vector<18x18x64xbf16> to vector<16x16x64xbf16>
    %22 = vector.shape_cast %21 : vector<16x16x64xbf16> to vector<256x64xbf16>
    %23 = vector.extract_strided_slice %16 {offsets = [1, 0, 0], sizes = [16, 16, 64], strides = [1, 1, 1]} : vector<18x18x64xbf16> to vector<16x16x64xbf16>
    %24 = vector.shape_cast %23 : vector<16x16x64xbf16> to vector<256x64xbf16>
    %25 = vector.extract_strided_slice %16 {offsets = [1, 1, 0], sizes = [16, 16, 64], strides = [1, 1, 1]} : vector<18x18x64xbf16> to vector<16x16x64xbf16>
    %26 = vector.shape_cast %25 : vector<16x16x64xbf16> to vector<256x64xbf16>
    %27 = vector.extract_strided_slice %16 {offsets = [1, 2, 0], sizes = [16, 16, 64], strides = [1, 1, 1]} : vector<18x18x64xbf16> to vector<16x16x64xbf16>
    %28 = vector.shape_cast %27 : vector<16x16x64xbf16> to vector<256x64xbf16>
    %29 = vector.extract_strided_slice %16 {offsets = [2, 0, 0], sizes = [16, 16, 64], strides = [1, 1, 1]} : vector<18x18x64xbf16> to vector<16x16x64xbf16>
    %30 = vector.shape_cast %29 : vector<16x16x64xbf16> to vector<256x64xbf16>
    %31 = vector.extract_strided_slice %16 {offsets = [2, 1, 0], sizes = [16, 16, 64], strides = [1, 1, 1]} : vector<18x18x64xbf16> to vector<16x16x64xbf16>
    %32 = vector.shape_cast %31 : vector<16x16x64xbf16> to vector<256x64xbf16>
    %33 = vector.extract_strided_slice %16 {offsets = [2, 2, 0], sizes = [16, 16, 64], strides = [1, 1, 1]} : vector<18x18x64xbf16> to vector<16x16x64xbf16>
    %34 = vector.shape_cast %33 : vector<16x16x64xbf16> to vector<256x64xbf16>
    %35 = tpu.concatenate %18, %20, %22, %24, %26, %28, %30, %32, %34 in 1 : vector<256x64xbf16>, vector<256x64xbf16>, vector<256x64xbf16>, vector<256x64xbf16>, vector<256x64xbf16>, vector<256x64xbf16>, vector<256x64xbf16>, vector<256x64xbf16>, vector<256x64xbf16> -> vector<256x576xbf16>
    %c0_7 = arith.constant 0 : index
    %c0_8 = arith.constant 0 : index
    %c0_9 = arith.constant 0 : index
    %36 = vector.load %arg4[%c0_7, %c0_8, %c0_9] : memref<3x576x64xbf16, #tpu.memory_space<vmem>>, vector<1x576x64xbf16>
    %37 = vector.shape_cast %36 : vector<1x576x64xbf16> to vector<576x64xbf16>
    %cst_10 = arith.constant dense<0.000000e+00> : vector<256x64xf32>
    %38 = tpu.matmul %35, %37, %cst_10 {dimension_numbers = #tpu.dot_dimension_numbers<[1], [0], [0], [1], [0, 0, 1, 1], [], []>} : vector<256x576xbf16>, vector<576x64xbf16>, vector<256x64xf32> -> vector<256x64xf32>
    %c0_11 = arith.constant 0 : index
    %c0_12 = arith.constant 0 : index
    %c0_13 = arith.constant 0 : index
    %39 = vector.load %arg5[%c0_11, %c0_12, %c0_13] : memref<3x1x64xf32, #tpu.memory_space<vmem>>, vector<1x1x64xf32>
    %40 = vector.shape_cast %39 : vector<1x1x64xf32> to vector<1x64xf32>
    %41 = vector.broadcast %40 : vector<1x64xf32> to vector<256x64xf32>
    %42 = arith.addf %38, %41 : vector<256x64xf32>
    %cst_14 = arith.constant 0.000000e+00 : f32
    %43 = vector.broadcast %cst_14 : f32 to vector<256x64xf32>
    %44 = arith.maximumf %42, %43 : vector<256x64xf32>
    %45 = arith.truncf %44 : vector<256x64xf32> to vector<256x64xbf16>
    %46 = vector.shape_cast %45 : vector<256x64xbf16> to vector<16x16x64xbf16>
    %47 = vector.extract_strided_slice %46 {offsets = [1, 0, 0], sizes = [1, 16, 64], strides = [1, 1, 1]} : vector<16x16x64xbf16> to vector<1x16x64xbf16>
    %48 = vector.extract_strided_slice %46 {offsets = [14, 0, 0], sizes = [1, 16, 64], strides = [1, 1, 1]} : vector<16x16x64xbf16> to vector<1x16x64xbf16>
    %49 = tpu.concatenate %47, %46, %48 in 0 : vector<1x16x64xbf16>, vector<16x16x64xbf16>, vector<1x16x64xbf16> -> vector<18x16x64xbf16>
    %50 = vector.extract_strided_slice %49 {offsets = [0, 1, 0], sizes = [18, 1, 64], strides = [1, 1, 1]} : vector<18x16x64xbf16> to vector<18x1x64xbf16>
    %51 = vector.extract_strided_slice %49 {offsets = [0, 14, 0], sizes = [18, 1, 64], strides = [1, 1, 1]} : vector<18x16x64xbf16> to vector<18x1x64xbf16>
    %52 = tpu.concatenate %50, %49, %51 in 1 : vector<18x1x64xbf16>, vector<18x16x64xbf16>, vector<18x1x64xbf16> -> vector<18x18x64xbf16>
    %53 = vector.extract_strided_slice %52 {offsets = [0, 0, 0], sizes = [16, 16, 64], strides = [1, 1, 1]} : vector<18x18x64xbf16> to vector<16x16x64xbf16>
    %54 = vector.shape_cast %53 : vector<16x16x64xbf16> to vector<256x64xbf16>
    %55 = vector.extract_strided_slice %52 {offsets = [0, 1, 0], sizes = [16, 16, 64], strides = [1, 1, 1]} : vector<18x18x64xbf16> to vector<16x16x64xbf16>
    %56 = vector.shape_cast %55 : vector<16x16x64xbf16> to vector<256x64xbf16>
    %57 = vector.extract_strided_slice %52 {offsets = [0, 2, 0], sizes = [16, 16, 64], strides = [1, 1, 1]} : vector<18x18x64xbf16> to vector<16x16x64xbf16>
    %58 = vector.shape_cast %57 : vector<16x16x64xbf16> to vector<256x64xbf16>
    %59 = vector.extract_strided_slice %52 {offsets = [1, 0, 0], sizes = [16, 16, 64], strides = [1, 1, 1]} : vector<18x18x64xbf16> to vector<16x16x64xbf16>
    %60 = vector.shape_cast %59 : vector<16x16x64xbf16> to vector<256x64xbf16>
    %61 = vector.extract_strided_slice %52 {offsets = [1, 1, 0], sizes = [16, 16, 64], strides = [1, 1, 1]} : vector<18x18x64xbf16> to vector<16x16x64xbf16>
    %62 = vector.shape_cast %61 : vector<16x16x64xbf16> to vector<256x64xbf16>
    %63 = vector.extract_strided_slice %52 {offsets = [1, 2, 0], sizes = [16, 16, 64], strides = [1, 1, 1]} : vector<18x18x64xbf16> to vector<16x16x64xbf16>
    %64 = vector.shape_cast %63 : vector<16x16x64xbf16> to vector<256x64xbf16>
    %65 = vector.extract_strided_slice %52 {offsets = [2, 0, 0], sizes = [16, 16, 64], strides = [1, 1, 1]} : vector<18x18x64xbf16> to vector<16x16x64xbf16>
    %66 = vector.shape_cast %65 : vector<16x16x64xbf16> to vector<256x64xbf16>
    %67 = vector.extract_strided_slice %52 {offsets = [2, 1, 0], sizes = [16, 16, 64], strides = [1, 1, 1]} : vector<18x18x64xbf16> to vector<16x16x64xbf16>
    %68 = vector.shape_cast %67 : vector<16x16x64xbf16> to vector<256x64xbf16>
    %69 = vector.extract_strided_slice %52 {offsets = [2, 2, 0], sizes = [16, 16, 64], strides = [1, 1, 1]} : vector<18x18x64xbf16> to vector<16x16x64xbf16>
    %70 = vector.shape_cast %69 : vector<16x16x64xbf16> to vector<256x64xbf16>
    %71 = tpu.concatenate %54, %56, %58, %60, %62, %64, %66, %68, %70 in 1 : vector<256x64xbf16>, vector<256x64xbf16>, vector<256x64xbf16>, vector<256x64xbf16>, vector<256x64xbf16>, vector<256x64xbf16>, vector<256x64xbf16>, vector<256x64xbf16>, vector<256x64xbf16> -> vector<256x576xbf16>
    %c1 = arith.constant 1 : index
    %c0_15 = arith.constant 0 : index
    %c0_16 = arith.constant 0 : index
    %72 = vector.load %arg4[%c1, %c0_15, %c0_16] : memref<3x576x64xbf16, #tpu.memory_space<vmem>>, vector<1x576x64xbf16>
    %73 = vector.shape_cast %72 : vector<1x576x64xbf16> to vector<576x64xbf16>
    %cst_17 = arith.constant dense<0.000000e+00> : vector<256x64xf32>
    %74 = tpu.matmul %71, %73, %cst_17 {dimension_numbers = #tpu.dot_dimension_numbers<[1], [0], [0], [1], [0, 0, 1, 1], [], []>} : vector<256x576xbf16>, vector<576x64xbf16>, vector<256x64xf32> -> vector<256x64xf32>
    %c1_18 = arith.constant 1 : index
    %c0_19 = arith.constant 0 : index
    %c0_20 = arith.constant 0 : index
    %75 = vector.load %arg5[%c1_18, %c0_19, %c0_20] : memref<3x1x64xf32, #tpu.memory_space<vmem>>, vector<1x1x64xf32>
    %76 = vector.shape_cast %75 : vector<1x1x64xf32> to vector<1x64xf32>
    %77 = vector.broadcast %76 : vector<1x64xf32> to vector<256x64xf32>
    %78 = arith.addf %74, %77 : vector<256x64xf32>
    %cst_21 = arith.constant 0.000000e+00 : f32
    %79 = vector.broadcast %cst_21 : f32 to vector<256x64xf32>
    %80 = arith.maximumf %78, %79 : vector<256x64xf32>
    %81 = arith.truncf %80 : vector<256x64xf32> to vector<256x64xbf16>
    %82 = vector.shape_cast %81 : vector<256x64xbf16> to vector<16x16x64xbf16>
    %83 = vector.extract_strided_slice %82 {offsets = [1, 0, 0], sizes = [1, 16, 64], strides = [1, 1, 1]} : vector<16x16x64xbf16> to vector<1x16x64xbf16>
    %84 = vector.extract_strided_slice %82 {offsets = [14, 0, 0], sizes = [1, 16, 64], strides = [1, 1, 1]} : vector<16x16x64xbf16> to vector<1x16x64xbf16>
    %85 = tpu.concatenate %83, %82, %84 in 0 : vector<1x16x64xbf16>, vector<16x16x64xbf16>, vector<1x16x64xbf16> -> vector<18x16x64xbf16>
    %86 = vector.extract_strided_slice %85 {offsets = [0, 1, 0], sizes = [18, 1, 64], strides = [1, 1, 1]} : vector<18x16x64xbf16> to vector<18x1x64xbf16>
    %87 = vector.extract_strided_slice %85 {offsets = [0, 14, 0], sizes = [18, 1, 64], strides = [1, 1, 1]} : vector<18x16x64xbf16> to vector<18x1x64xbf16>
    %88 = tpu.concatenate %86, %85, %87 in 1 : vector<18x1x64xbf16>, vector<18x16x64xbf16>, vector<18x1x64xbf16> -> vector<18x18x64xbf16>
    %89 = vector.extract_strided_slice %88 {offsets = [0, 0, 0], sizes = [16, 16, 64], strides = [1, 1, 1]} : vector<18x18x64xbf16> to vector<16x16x64xbf16>
    %90 = vector.shape_cast %89 : vector<16x16x64xbf16> to vector<256x64xbf16>
    %91 = vector.extract_strided_slice %88 {offsets = [0, 1, 0], sizes = [16, 16, 64], strides = [1, 1, 1]} : vector<18x18x64xbf16> to vector<16x16x64xbf16>
    %92 = vector.shape_cast %91 : vector<16x16x64xbf16> to vector<256x64xbf16>
    %93 = vector.extract_strided_slice %88 {offsets = [0, 2, 0], sizes = [16, 16, 64], strides = [1, 1, 1]} : vector<18x18x64xbf16> to vector<16x16x64xbf16>
    %94 = vector.shape_cast %93 : vector<16x16x64xbf16> to vector<256x64xbf16>
    %95 = vector.extract_strided_slice %88 {offsets = [1, 0, 0], sizes = [16, 16, 64], strides = [1, 1, 1]} : vector<18x18x64xbf16> to vector<16x16x64xbf16>
    %96 = vector.shape_cast %95 : vector<16x16x64xbf16> to vector<256x64xbf16>
    %97 = vector.extract_strided_slice %88 {offsets = [1, 1, 0], sizes = [16, 16, 64], strides = [1, 1, 1]} : vector<18x18x64xbf16> to vector<16x16x64xbf16>
    %98 = vector.shape_cast %97 : vector<16x16x64xbf16> to vector<256x64xbf16>
    %99 = vector.extract_strided_slice %88 {offsets = [1, 2, 0], sizes = [16, 16, 64], strides = [1, 1, 1]} : vector<18x18x64xbf16> to vector<16x16x64xbf16>
    %100 = vector.shape_cast %99 : vector<16x16x64xbf16> to vector<256x64xbf16>
    %101 = vector.extract_strided_slice %88 {offsets = [2, 0, 0], sizes = [16, 16, 64], strides = [1, 1, 1]} : vector<18x18x64xbf16> to vector<16x16x64xbf16>
    %102 = vector.shape_cast %101 : vector<16x16x64xbf16> to vector<256x64xbf16>
    %103 = vector.extract_strided_slice %88 {offsets = [2, 1, 0], sizes = [16, 16, 64], strides = [1, 1, 1]} : vector<18x18x64xbf16> to vector<16x16x64xbf16>
    %104 = vector.shape_cast %103 : vector<16x16x64xbf16> to vector<256x64xbf16>
    %105 = vector.extract_strided_slice %88 {offsets = [2, 2, 0], sizes = [16, 16, 64], strides = [1, 1, 1]} : vector<18x18x64xbf16> to vector<16x16x64xbf16>
    %106 = vector.shape_cast %105 : vector<16x16x64xbf16> to vector<256x64xbf16>
    %107 = tpu.concatenate %90, %92, %94, %96, %98, %100, %102, %104, %106 in 1 : vector<256x64xbf16>, vector<256x64xbf16>, vector<256x64xbf16>, vector<256x64xbf16>, vector<256x64xbf16>, vector<256x64xbf16>, vector<256x64xbf16>, vector<256x64xbf16>, vector<256x64xbf16> -> vector<256x576xbf16>
    %c2 = arith.constant 2 : index
    %c0_22 = arith.constant 0 : index
    %c0_23 = arith.constant 0 : index
    %108 = vector.load %arg4[%c2, %c0_22, %c0_23] : memref<3x576x64xbf16, #tpu.memory_space<vmem>>, vector<1x576x64xbf16>
    %109 = vector.shape_cast %108 : vector<1x576x64xbf16> to vector<576x64xbf16>
    %cst_24 = arith.constant dense<0.000000e+00> : vector<256x64xf32>
    %110 = tpu.matmul %107, %109, %cst_24 {dimension_numbers = #tpu.dot_dimension_numbers<[1], [0], [0], [1], [0, 0, 1, 1], [], []>} : vector<256x576xbf16>, vector<576x64xbf16>, vector<256x64xf32> -> vector<256x64xf32>
    %c2_25 = arith.constant 2 : index
    %c0_26 = arith.constant 0 : index
    %c0_27 = arith.constant 0 : index
    %111 = vector.load %arg5[%c2_25, %c0_26, %c0_27] : memref<3x1x64xf32, #tpu.memory_space<vmem>>, vector<1x1x64xf32>
    %112 = vector.shape_cast %111 : vector<1x1x64xf32> to vector<1x64xf32>
    %113 = vector.broadcast %112 : vector<1x64xf32> to vector<256x64xf32>
    %114 = arith.addf %110, %113 : vector<256x64xf32>
    %cst_28 = arith.constant 0.000000e+00 : f32
    %115 = vector.broadcast %cst_28 : f32 to vector<256x64xf32>
    %116 = arith.maximumf %114, %115 : vector<256x64xf32>
    %117 = arith.truncf %116 : vector<256x64xf32> to vector<256x64xbf16>
    %118 = vector.shape_cast %117 : vector<256x64xbf16> to vector<16x16x64xbf16>
    %119 = vector.extract_strided_slice %118 {offsets = [1, 0, 0], sizes = [1, 16, 64], strides = [1, 1, 1]} : vector<16x16x64xbf16> to vector<1x16x64xbf16>
    %120 = vector.extract_strided_slice %118 {offsets = [14, 0, 0], sizes = [1, 16, 64], strides = [1, 1, 1]} : vector<16x16x64xbf16> to vector<1x16x64xbf16>
    %121 = tpu.concatenate %119, %118, %120 in 0 : vector<1x16x64xbf16>, vector<16x16x64xbf16>, vector<1x16x64xbf16> -> vector<18x16x64xbf16>
    %122 = vector.extract_strided_slice %121 {offsets = [0, 1, 0], sizes = [18, 1, 64], strides = [1, 1, 1]} : vector<18x16x64xbf16> to vector<18x1x64xbf16>
    %123 = vector.extract_strided_slice %121 {offsets = [0, 14, 0], sizes = [18, 1, 64], strides = [1, 1, 1]} : vector<18x16x64xbf16> to vector<18x1x64xbf16>
    %124 = tpu.concatenate %122, %121, %123 in 1 : vector<18x1x64xbf16>, vector<18x16x64xbf16>, vector<18x1x64xbf16> -> vector<18x18x64xbf16>
    %125 = vector.extract_strided_slice %124 {offsets = [0, 0, 0], sizes = [16, 16, 64], strides = [1, 1, 1]} : vector<18x18x64xbf16> to vector<16x16x64xbf16>
    %126 = vector.shape_cast %125 : vector<16x16x64xbf16> to vector<256x64xbf16>
    %127 = vector.extract_strided_slice %124 {offsets = [0, 1, 0], sizes = [16, 16, 64], strides = [1, 1, 1]} : vector<18x18x64xbf16> to vector<16x16x64xbf16>
    %128 = vector.shape_cast %127 : vector<16x16x64xbf16> to vector<256x64xbf16>
    %129 = vector.extract_strided_slice %124 {offsets = [0, 2, 0], sizes = [16, 16, 64], strides = [1, 1, 1]} : vector<18x18x64xbf16> to vector<16x16x64xbf16>
    %130 = vector.shape_cast %129 : vector<16x16x64xbf16> to vector<256x64xbf16>
    %131 = vector.extract_strided_slice %124 {offsets = [1, 0, 0], sizes = [16, 16, 64], strides = [1, 1, 1]} : vector<18x18x64xbf16> to vector<16x16x64xbf16>
    %132 = vector.shape_cast %131 : vector<16x16x64xbf16> to vector<256x64xbf16>
    %133 = vector.extract_strided_slice %124 {offsets = [1, 1, 0], sizes = [16, 16, 64], strides = [1, 1, 1]} : vector<18x18x64xbf16> to vector<16x16x64xbf16>
    %134 = vector.shape_cast %133 : vector<16x16x64xbf16> to vector<256x64xbf16>
    %135 = vector.extract_strided_slice %124 {offsets = [1, 2, 0], sizes = [16, 16, 64], strides = [1, 1, 1]} : vector<18x18x64xbf16> to vector<16x16x64xbf16>
    %136 = vector.shape_cast %135 : vector<16x16x64xbf16> to vector<256x64xbf16>
    %137 = vector.extract_strided_slice %124 {offsets = [2, 0, 0], sizes = [16, 16, 64], strides = [1, 1, 1]} : vector<18x18x64xbf16> to vector<16x16x64xbf16>
    %138 = vector.shape_cast %137 : vector<16x16x64xbf16> to vector<256x64xbf16>
    %139 = vector.extract_strided_slice %124 {offsets = [2, 1, 0], sizes = [16, 16, 64], strides = [1, 1, 1]} : vector<18x18x64xbf16> to vector<16x16x64xbf16>
    %140 = vector.shape_cast %139 : vector<16x16x64xbf16> to vector<256x64xbf16>
    %141 = vector.extract_strided_slice %124 {offsets = [2, 2, 0], sizes = [16, 16, 64], strides = [1, 1, 1]} : vector<18x18x64xbf16> to vector<16x16x64xbf16>
    %142 = vector.shape_cast %141 : vector<16x16x64xbf16> to vector<256x64xbf16>
    %143 = tpu.concatenate %126, %128, %130, %132, %134, %136, %138, %140, %142 in 1 : vector<256x64xbf16>, vector<256x64xbf16>, vector<256x64xbf16>, vector<256x64xbf16>, vector<256x64xbf16>, vector<256x64xbf16>, vector<256x64xbf16>, vector<256x64xbf16>, vector<256x64xbf16> -> vector<256x576xbf16>
    %c0_29 = arith.constant 0 : index
    %c0_30 = arith.constant 0 : index
    %144 = vector.load %arg6[%c0_29, %c0_30] : memref<576x128xbf16, #tpu.memory_space<vmem>>, vector<576x128xbf16>
    %cst_31 = arith.constant dense<0.000000e+00> : vector<256x128xf32>
    %145 = tpu.matmul %143, %144, %cst_31 {dimension_numbers = #tpu.dot_dimension_numbers<[1], [0], [0], [1], [0, 0, 1, 1], [], []>} : vector<256x576xbf16>, vector<576x128xbf16>, vector<256x128xf32> -> vector<256x128xf32>
    %c0_32 = arith.constant 0 : index
    %c0_33 = arith.constant 0 : index
    %146 = vector.load %arg7[%c0_32, %c0_33] : memref<1x128xf32, #tpu.memory_space<vmem>>, vector<1x128xf32>
    %147 = vector.broadcast %146 : vector<1x128xf32> to vector<256x128xf32>
    %148 = arith.addf %145, %147 : vector<256x128xf32>
    %149 = arith.negf %148 : vector<256x128xf32>
    %150 = math.exp %149 : vector<256x128xf32>
    %cst_34 = arith.constant 1.000000e+00 : f32
    %151 = vector.broadcast %cst_34 : f32 to vector<256x128xf32>
    %152 = arith.addf %151, %150 : vector<256x128xf32>
    %153 = arith.divf %151, %152 : vector<256x128xf32>
    %c0_35 = arith.constant 0 : index
    %c0_36 = arith.constant 0 : index
    %c0_37 = arith.constant 0 : index
    %154 = vector.load %arg8[%c0_35, %c0_36, %c0_37] : memref<1x256x128xf32, #tpu.memory_space<vmem>>, vector<1x256x128xf32>
    %155 = vector.shape_cast %154 : vector<1x256x128xf32> to vector<256x128xf32>
    %156 = vector.shape_cast %153 : vector<256x128xf32> to vector<1x256x128xf32>
    tpu.vector_store %arg8[%c0_35, %c0_36, %c0_37], %156 {strides = array<i32>} : memref<1x256x128xf32, #tpu.memory_space<vmem>>, vector<1x256x128xf32>,
    return
  }
  func.func @transform_0(%arg0: i32) -> (i32, i32, i32) {
    %c0_i32 = arith.constant 0 : i32
    %c0_i32_0 = arith.constant 0 : i32
    %c0_i32_1 = arith.constant 0 : i32
    return %arg0, %c0_i32, %c0_i32_0 : i32, i32, i32
  }
  func.func @transform_1(%arg0: i32) -> (i32, i32) {
    %c0_i32 = arith.constant 0 : i32
    %c0_i32_0 = arith.constant 0 : i32
    %c0_i32_1 = arith.constant 0 : i32
    return %c0_i32, %c0_i32_0 : i32, i32
  }
  func.func @transform_2(%arg0: i32) -> (i32, i32) {
    %c0_i32 = arith.constant 0 : i32
    %c0_i32_0 = arith.constant 0 : i32
    %c0_i32_1 = arith.constant 0 : i32
    return %c0_i32, %c0_i32_0 : i32, i32
  }
  func.func @transform_3(%arg0: i32) -> (i32, i32, i32) {
    %c0_i32 = arith.constant 0 : i32
    %c0_i32_0 = arith.constant 0 : i32
    %c0_i32_1 = arith.constant 0 : i32
    %c0_i32_2 = arith.constant 0 : i32
    return %c0_i32, %c0_i32_0, %c0_i32_1 : i32, i32, i32
  }
  func.func @transform_4(%arg0: i32) -> (i32, i32, i32) {
    %c0_i32 = arith.constant 0 : i32
    %c0_i32_0 = arith.constant 0 : i32
    %c0_i32_1 = arith.constant 0 : i32
    %c0_i32_2 = arith.constant 0 : i32
    return %c0_i32, %c0_i32_0, %c0_i32_1 : i32, i32, i32
  }
  func.func @transform_5(%arg0: i32) -> (i32, i32) {
    %c0_i32 = arith.constant 0 : i32
    %c0_i32_0 = arith.constant 0 : i32
    %c0_i32_1 = arith.constant 0 : i32
    return %c0_i32, %c0_i32_0 : i32, i32
  }
  func.func @transform_6(%arg0: i32) -> (i32, i32) {
    %c0_i32 = arith.constant 0 : i32
    %c0_i32_0 = arith.constant 0 : i32
    %c0_i32_1 = arith.constant 0 : i32
    return %c0_i32, %c0_i32_0 : i32, i32
  }
  func.func @transform_7(%arg0: i32) -> (i32, i32, i32) {
    %c0_i32 = arith.constant 0 : i32
    %c0_i32_0 = arith.constant 0 : i32
    %c0_i32_1 = arith.constant 0 : i32
    return %arg0, %c0_i32, %c0_i32_0 : i32, i32, i32
  }
}

</mosaic_0001>

<bundles_post_ra>
// kernel: n_net_forward.1
= control target key start
LH: loop header
LB: loop body
LE: loop exit
PB: predicated region body
PF: predicated region fallthrough
CT: control target
= control target key end

     0   :  { %s9375_s24 = smov 0   ;;  %s13611_s0 = inlined_call_operand.vmem [shape: bf16[2,256,16], index: 0, kind: input, shape index: {}]   ;;  %s13612_s1 = inlined_call_operand.vmem [shape: bf16[16,64], index: 1, kind: input, shape index: {}]   ;;  %s13613_s2 = inlined_call_operand.vmem [shape: f32[1,64], index: 2, kind: input, shape index: {}]   ;;  %s13614_s3 = inlined_call_operand.vmem [shape: bf16[3,576,64], index: 3, kind: input, shape index: {}]   ;;  %s13615_s4 = inlined_call_operand.vmem [shape: f32[3,1,64], index: 4, kind: input, shape index: {}]   ;;  %s13616_s5 = inlined_call_operand.vmem [shape: bf16[576,128], index: 5, kind: input, shape index: {}]   ;;  %s13617_s6 = inlined_call_operand.vmem [shape: f32[1,128], index: 6, kind: input, shape index: {}]   ;;  %s13618_s7 = inlined_call_operand.vmem [shape: f32[2,256,128], index: 7, kind: output, shape index: {}]  }
   0x1 LB: > { %s7402_s25 = sadd.s32 4294967295, %s9332_s24   ;;  %p7406_p0 = scmp.ge.s32.totalorder %s9332_s24, 1  ;;  %s9332_s24 = sphi %s9375_s24, %s17_s24  }
   0x2   : > { %p237_p1 = scmp.lt.s32.totalorder %s9332_s24, 3 }
   0x4   : > { %p238_p2 = pnand %p7406_p0, %p237_p1 }
   0x6   : > { %241 = sbr.rel (%p238_p2) target bundleno = 2242 (0x8c2), region = 48 }
   0xd   : > { %v9037_v0 = vld [vmem:[%s13612_s1] sm:$0xff]   ;;  %p269_p3 = scmp.lt.s32.totalorder %s7402_s25, 1  ;;  %vm407_vm0 = vcmask 130048   ;;  %v9056_v19 = vld [vmem:[%s13614_s3 + $0x48] sm:$0xff]   ;;  %v9058_v21 = vld [vmem:[%s13614_s3 + $0x50] sm:$0xff]   ;;  %vm857_vm1 = vcmask 1040384  }
   0xe   : > { %8832 = vmatprep.subr.bf16.mxu0 %v9037_v0  ;;  %9026 = vmatprep.subr.bf16.mxu1 %v9037_v0  ;;  %v9054_v17 = vld [vmem:[%s13614_s3 + $0x40] sm:$0xff]   ;;  %v9057_v20 = vld [vmem:[%s13614_s3 + $0x8] sm:$0xff]   ;;  %v9059_v22 = vld [vmem:[%s13614_s3 + $0x10] sm:$0xff]   ;;  %vm858_vm2 = vsmask.f32 256  ;;  %v13649_v56 = vmov 0 }
   0xf   : > { %s13719_s25 = smov (!%p269_p3, %s7402_s25), 1  ;;  %8833 = vmatpush3.bf16.msra.mxu0 %v9037_v0  ;;  %9027 = vmatpush3.bf16.msra.mxu1 %v9037_v0  ;;  %v9055_v18 = vld [vmem:[%s13614_s3] sm:$0xff]   ;;  %v9060_v23 = vld [vmem:[%s13614_s3 + $0x58] sm:$0xff]   ;;  %v9064_v36 = vld [vmem:[%s13614_s3 + $0x68] sm:$0xff]   ;;  %vm892_vm4 = vsmask.f32 7424 }
  0x10   : > { %s7837_s28 = sshll.u32 %s13719_s25, 7  ;;  %7856 = vmatprep.subr.bf16.mxu1 %v9054_v17  ;;  %v9450_v24 = vld [vmem:[%s13613_s2] ss:$0 sm:$0xff]  ;;  %v9061_v25 = vld [vmem:[%s13614_s3 + $0x18] sm:$0xff]   ;;  %v9065_v42 = vld [vmem:[%s13614_s3 + $0x28] sm:$0xff]   ;;  %s9334_s22 = smov 64  }
  0x11   : > { %s9392_s8 = scalar_lea.vmem %s13611_s0, %s7837_s28  ;;  %v9062_v27 = vld [vmem:[%s13614_s3 + $0x60] sm:$0xff]   ;;  %v9066_v46 = vld [vmem:[%s13614_s3 + $0x70] sm:$0xff]   ;;  %vm9478_vm3 = vmand %vm857_vm1, %vm858_vm2  ;;  %vm1103_vm5 = vcmask 1046528   ;;  %vm1262_vm6 = vcmask 523264   ;;  %s7838_s28 = sshll.u32 %s13719_s25, 8 }
  0x12   : > { %v9038_v1 = vld [vmem:[%s9392_s8] sm:$0xff]   ;;  %v9039_v2 = vld [vmem:[%s9392_s8 + $0x8] sm:$0xff]   ;;  %v9040_v3 = vld [vmem:[%s9392_s8 + $0x10] sm:$0xff]   ;;  %v13650_v56 = vsel %vm9478_vm3, 4294967295, %v13649_v56  ;;  %s13543_s30 = scalar_lea.vmem %s13618_s7, %s7838_s28 }
  0x13   : > { %8834 = vmatprep.mubr.msk.bf16.mxu0 %vm407_vm0, %v9038_v1  ;;  %v9041_v4 = vld [vmem:[%s9392_s8 + $0x18] sm:$0xff]   ;;  %v9042_v5 = vld [vmem:[%s9392_s8 + $0x20] sm:$0xff]   ;;  %v9047_v7 = vld [vmem:[%s9392_s8 + $0x48] sm:$0xff]   ;;  %13651 = vst [vmem:[#allocation2_spill] sm:$0xff] %v13650_v56 }
  0x14   : > { %8835 = vmatmul.mubr.msk.bf16.vlgmr.msra.gmra.mrb[0].mxu0 %vm407_vm0, %v9039_v2  ;;  %v9046_v6 = vld [vmem:[%s9392_s8 + $0x40] sm:$0xff]   ;;  %v9048_v8 = vld [vmem:[%s9392_s8 + $0x50] sm:$0xff]   ;;  %v9043_v9 = vld [vmem:[%s9392_s8 + $0x28] sm:$0xff]  }
  0x15   : > { %8838 = vmatprep.mubr.msk.bf16.mxu0 %vm407_vm0, %v9040_v3  ;;  %8850 = vmatprep.mubr.msk.bf16.mxu1 %vm407_vm0, %v9046_v6  ;;  %v9044_v10 = vld [vmem:[%s9392_s8 + $0x30] sm:$0xff]   ;;  %v9049_v11 = vld [vmem:[%s9392_s8 + $0x58] sm:$0xff]   ;;  %v9050_v12 = vld [vmem:[%s9392_s8 + $0x60] sm:$0xff]  }
  0x16   : > { %8851 = vmatmul.mubr.msk.bf16.vlgmr.msra.gmra.mrb[0].mxu1 %vm407_vm0, %v9047_v7  ;;  %v9045_v13 = vld [vmem:[%s9392_s8 + $0x38] sm:$0xff]   ;;  %v9051_v14 = vld [vmem:[%s9392_s8 + $0x68] sm:$0xff]   ;;  %v9052_v15 = vld [vmem:[%s9392_s8 + $0x70] sm:$0xff]  }
  0x17   : > { %8854 = vmatprep.mubr.msk.bf16.mxu1 %vm407_vm0, %v9048_v8  ;;  %v9053_v16 = vld [vmem:[%s9392_s8 + $0x78] sm:$0xff]   ;;  %7857 = vmatpush3.bf16.msra.mxu1 %v9055_v18  ;;  %v9063_v34 = vld [vmem:[%s13614_s3 + $0x20] sm:$0xff]   ;;  %v9067_v1 = vld [vmem:[%s13614_s3 + $0x30] sm:$0xff]  }
  0x18   : > { %7858 = vmatprep.subr.bf16.mxu1 %v9056_v19  ;;  %v9068_v6 = vld [vmem:[%s13614_s3 + $0x78] sm:$0xff]  }
  0x19   : > { %v9069_v17 = vld [vmem:[%s13614_s3 + $0x38] sm:$0xff]  }
  0x1b   : > { %7859 = vmatpush3.bf16.msra.mxu1 %v9057_v20 }
  0x1c   : > { %8839 = vmatmul.mubr.msk.bf16.gmra.mrb[4].mxu0 %vm407_vm0, %v9041_v4  ;;  %7860 = vmatprep.subr.bf16.mxu1 %v9058_v21 }
  0x1d   : > { %8842 = vmatprep.mubr.msk.bf16.mxu0 %vm407_vm0, %v9042_v5 }
  0x1e   : > { %8855 = vmatmul.mubr.msk.bf16.gmra.mrb[4].mxu1 %vm407_vm0, %v9049_v11 }
  0x1f   : > { %8858 = vmatprep.mubr.msk.bf16.mxu1 %vm407_vm0, %v9050_v12  ;;  %7861 = vmatpush3.bf16.msra.mxu1 %v9059_v22 }
  0x20   : > { %7862 = vmatprep.subr.bf16.mxu1 %v9060_v23 }
  0x23   : > { %7863 = vmatpush3.bf16.msra.mxu1 %v9061_v25  ;;  %v9529_v25 = vld [vmem:[%s13614_s3 + $0x100] sm:$0xff]  }
  0x24   : > { %8843 = vmatmul.mubr.msk.bf16.gmra.mrb[8].mxu0 %vm407_vm0, %v9043_v9  ;;  %7864 = vmatprep.subr.bf16.mxu1 %v9062_v27 }
  0x25   : > { %8846 = vmatprep.mubr.msk.bf16.mxu0 %vm407_vm0, %v9044_v10 }
  0x26   : > { %8859 = vmatmul.mubr.msk.bf16.gmra.mrb[8].mxu1 %vm407_vm0, %v9051_v14 }
  0x27   : > { %8862 = vmatprep.mubr.msk.bf16.mxu1 %vm407_vm0, %v9052_v15  ;;  %7865 = vmatpush3.bf16.msra.mxu1 %v9063_v34 }
  0x28   : > { %7866 = vmatprep.subr.bf16.mxu1 %v9064_v36 }
  0x2b   : > { %7867 = vmatpush3.bf16.msra.mxu1 %v9065_v42 }
  0x2c   : > { %8847 = vmatmul.mubr.msk.bf16.gmra.mrb[12].mxu0 %vm407_vm0, %v9045_v13  ;;  %7868 = vmatprep.subr.bf16.mxu1 %v9066_v46 }
  0x2e   : > { %8863 = vmatmul.mubr.msk.bf16.gmra.mrb[12].mxu1 %vm407_vm0, %v9053_v16 }
  0x2f   : > { %7869 = vmatpush3.bf16.msra.mxu1 %v9067_v1 }
  0x30   : > { %7870 = vmatprep.subr.bf16.mxu1 %v9068_v6 }
  0x33   : > { %7871 = vmatpush3.bf16.msra.mxu1 %v9069_v17 }
  0x34   : > { %8866 = vmatprep.subr.bf16.mxu1 %v9529_v25 }
  0xe7   : > { %v8836_v26 = vpop.f32.mrb[0].mxu0 }
  0xe8   : > { %v499_v28 = vadd.f32 %v8836_v26, %v9450_v24  ;;  %v490_v29 = vpop.f32.mrb[1].mxu0 }
  0xe9   : > { %v491_v30 = vadd.f32 %v9450_v24, %v490_v29  ;;  %v8837_v31 = vpop.f32.mrb[2].mxu0  ;;  %v8852_v45 = vpop.f32.mrb[0].mxu1 }
  0xea   : > { %v502_v32 = vadd.f32 %v8837_v31, %v9450_v24  ;;  %v493_v33 = vpop.f32.mrb[3].mxu0  ;;  %v619_v37 = vmax.f32 %v499_v28, 0.0  ;;  %v554_v51 = vpop.f32.mrb[1].mxu1  ;;  %v9483_v57 = vadd.f32 %v8852_v45, %v9450_v24 }
  0xeb   : > { %v494_v35 = vadd.f32 %v9450_v24, %v493_v33  ;;  %v617_v39 = vmax.f32 %v491_v30, 0.0  ;;  %v9485_v58 = vpop.f32.mrb[2].mxu1  ;;  %v9511_v16 = vadd.f32 %v9450_v24, %v554_v51 }
  0xec   : > { %v620_v38 = vmax.f32 %v502_v32, 0.0  ;;  %v9488_v0 = vpop.f32.mrb[3].mxu1  ;;  %v635_v15 = vmax.f32 %v9483_v57, 0.0 }
  0xed   : > { %v618_v40 = vmax.f32 %v494_v35, 0.0 }
  0xee   : > { %v650_v41 = vpack.c.bf16 %v620_v38, %v619_v37 }
  0xef   : > { %v649_v43 = vpack.c.bf16 %v618_v40, %v617_v39  ;;  %v8840_v44 = vpop.f32.mrb[4].mxu0 }
  0xf0   : > { %v666_v47 = vshrl.u32 %v650_v41, 16  ;;  %v730_v48 = vshll.u32 %v650_v41, 16  ;;  %v515_v49 = vadd.f32 %v8840_v44, %v9450_v24  ;;  %v506_v50 = vpop.f32.mrb[5].mxu0 }
  0xf1   : > { %v669_v52 = vshrl.u32 %v649_v43, 16  ;;  %v734_v53 = vshll.u32 %v649_v43, 16  ;;  %v507_v54 = vadd.f32 %v9450_v24, %v506_v50  ;;  %v8841_v55 = vpop.f32.mrb[6].mxu0  ;;  %v9524_v23 = vpop.f32.mrb[4].mxu1 }
  0xf2   : > { %v729_v59 = vrot.slane %v666_v47, 7  ;;  %v825_v60 = vrot.slane %v730_v48, 7  ;;  %v623_v61 = vmax.f32 %v515_v49, 0.0  ;;  %v518_v62 = vadd.f32 %v8841_v55, %v9450_v24  ;;  %v509_v63 = vpop.f32.mrb[7].mxu0  ;;  %v9535_v31 = vpop.f32.mrb[5].mxu1 }
  0xf3   : > { %v733_v2 = vrot.slane %v669_v52, 7  ;;  %v826_v3 = vrot.slane %v734_v53, 7  ;;  %v621_v4 = vmax.f32 %v507_v54, 0.0  ;;  %v510_v5 = vadd.f32 %v9450_v24, %v509_v63  ;;  %v9538_v37 = vpop.f32.mrb[6].mxu1 }
  0xf4   : > { %v732_v7 = vor.u32 %v730_v48, %v729_v59  ;;  %v624_v8 = vmax.f32 %v518_v62, 0.0  ;;  %v9499_v9 = vsel %vm9478_vm3, %v729_v59, %v825_v60  ;;  %v9544_v43 = vpop.f32.mrb[7].mxu1  ;;  %v633_v55 = vmax.f32 %v9511_v16, 0.0 }
  0xf5   : > { %v736_v10 = vor.u32 %v734_v53, %v733_v2  ;;  %v622_v11 = vmax.f32 %v510_v5, 0.0  ;;  %v9503_v12 = vsel %vm9478_vm3, %v733_v2, %v826_v3  ;;  %v901_v22 = vshll.u32 %v9499_v9, 16 }
  0xf6   : > { %v652_v13 = vpack.c.bf16 %v624_v8, %v623_v61  ;;  %v9507_v14 = vsel %vm9478_vm3, %v666_v47, %v732_v7  ;;  %v913_v30 = vshll.u32 %v9503_v12, 16 }
  0xf7   : > { %v651_v18 = vpack.c.bf16 %v622_v11, %v621_v4  ;;  %1198 = vrot.lane.b32.xlu1 %v9507_v14, %s9334_s22  ;;  %v8844_v19 = vpop.f32.mrb[8].mxu0  ;;  %v9520_v20 = vsel %vm9478_vm3, %v669_v52, %v736_v10  ;;  %v896_v21 = vshll.u32 %v9507_v14, 16  ;;  %v894_v42 = vshrl.u32 %v9507_v14, 16 }
  0xf8   : > { %v675_v26 = vshrl.u32 %v652_v13, 16  ;;  %v742_v27 = vshll.u32 %v652_v13, 16  ;;  %v531_v28 = vadd.f32 %v8844_v19, %v9450_v24  ;;  %v522_v29 = vpop.f32.mrb[9].mxu0  ;;  %1196 = vrot.lane.b32.xlu0 %v9520_v20, %s9334_s22  ;;  %v903_v47 = vrot.slane %v901_v22, 1 }
  0xf9   : > { %v672_v32 = vshrl.u32 %v651_v18, 16  ;;  %v738_v33 = vshll.u32 %v651_v18, 16  ;;  %v523_v34 = vadd.f32 %v9450_v24, %v522_v29  ;;  %v8845_v35 = vpop.f32.mrb[10].mxu0  ;;  %v898_v36 = vrot.slane %v896_v21, 1  ;;  %v9565_v5 = vpop.f32.mrb[8].mxu1 }
  0xfa   : > { %v9540_v38 = vrot.slane %v675_v26, 7  ;;  %v627_v39 = vmax.f32 %v531_v28, 0.0  ;;  %v534_v40 = vadd.f32 %v8845_v35, %v9450_v24  ;;  %v525_v41 = vpop.f32.mrb[11].mxu0  ;;  %v908_v54 = vshll.u32 %v9520_v20, 16  ;;  %v9577_v13 = vpop.f32.mrb[9].mxu1 }
  0xfb   : > { %v737_v44 = vrot.slane %v672_v32, 7  ;;  %v625_v45 = vmax.f32 %v523_v34, 0.0  ;;  %v526_v46 = vadd.f32 %v9450_v24, %v525_v41  ;;  %v827_v49 = vrot.slane %v738_v33, 7  ;;  %v9582_v22 = vpop.f32.mrb[10].mxu1 }
  0xfc   : > { %v744_v48 = vor.u32 %v742_v27, %v9540_v38  ;;  %v628_v50 = vmax.f32 %v534_v40, 0.0  ;;  %v899_v51 = vor.u32 %v898_v36, %v894_v42  ;;  %v828_v59 = vrot.slane %v742_v27, 7 }
  0xfd   : > { %v740_v52 = vor.u32 %v738_v33, %v737_v44  ;;  %v626_v53 = vmax.f32 %v526_v46, 0.0  ;;  %v906_v62 = vshrl.u32 %v9520_v20, 16  ;;  %v910_v2 = vrot.slane %v908_v54, 1 }
  0xfe   : > { %v9551_v60 = vpack.c.bf16 %v628_v50, %v627_v39  ;;  %v9554_v61 = vsel %vm892_vm4, %v899_v51, %v903_v47  ;;  %v915_v3 = vrot.slane %v913_v30, 1  ;;  %v9563_v4 = vsel %vm9478_vm3, %v675_v26, %v744_v48 }
  0xff   : > { %v9557_v63 = vpack.c.bf16 %v626_v53, %v625_v45  ;;  %1166 = vrot.lane.b32.xlu0 %v9554_v61, %s9334_s22  ;;  %v8848_v1 = vpop.f32.mrb[12].mxu0  ;;  %v9571_v10 = vsel %vm9478_vm3, %v672_v32, %v740_v52  ;;  %v9575_v11 = vsel %vm9478_vm3, %v737_v44, %v827_v49  ;;  %v911_v18 = vor.u32 %v910_v2, %v906_v62  ;;  %v9590_v32 = vpop.f32.mrb[11].mxu1 }
 0x100   : > { %v681_v6 = vshrl.u32 %v9551_v60, 16  ;;  %v547_v7 = vadd.f32 %v8848_v1, %v9450_v24  ;;  %v538_v8 = vpop.f32.mrb[13].mxu0  ;;  %v750_v27 = vshll.u32 %v9551_v60, 16  ;;  %v918_v35 = vshrl.u32 %v9571_v10, 16 }
 0x101   : > { %v678_v16 = vshrl.u32 %v9557_v63, 16  ;;  %v746_v17 = vshll.u32 %v9557_v63, 16  ;;  %v539_v19 = vadd.f32 %v9450_v24, %v538_v8  ;;  %v8849_v21 = vpop.f32.mrb[14].mxu0  ;;  %v9595_v34 = vsel %vm892_vm4, %v911_v18, %v915_v3  ;;  %v9620_v63 = vpop.f32.mrb[12].mxu1 }
 0x102   : > { %v9586_v26 = vrot.slane %v681_v6, 7  ;;  %v631_v28 = vmax.f32 %v547_v7, 0.0  ;;  %v550_v29 = vadd.f32 %v8849_v21, %v9450_v24  ;;  %v541_v30 = vpop.f32.mrb[15].mxu0  ;;  %v925_v36 = vshll.u32 %v9575_v11, 16  ;;  %1168 = vrot.lane.b32.xlu1 %v9595_v34, %s9334_s22  ;;  %v9629_v3 = vpop.f32.mrb[13].mxu1 }
 0x103   : > { %v9592_v33 = vrot.slane %v678_v16, 7  ;;  %1200 = vrot.lane.b32.xlu0 %v9571_v10, %s9334_s22  ;;  %v629_v39 = vmax.f32 %v539_v19, 0.0  ;;  %v542_v41 = vadd.f32 %v9450_v24, %v541_v30  ;;  %v920_v42 = vshll.u32 %v9571_v10, 16  ;;  %v9639_v18 = vpop.f32.mrb[14].mxu1 }
 0x104   : > { %v632_v40 = vmax.f32 %v550_v29, 0.0  ;;  %v9605_v44 = vrot.slane %v750_v27, 7  ;;  %v566_v46 = vadd.f32 %v9485_v58, %v9450_v24  ;;  %v558_v47 = vadd.f32 %v9450_v24, %v9488_v0 }
 0x105   : > { %v748_v45 = vor.u32 %v746_v17, %v9592_v33  ;;  %v752_v48 = vor.u32 %v750_v27, %v9586_v26  ;;  %v630_v50 = vmax.f32 %v542_v41, 0.0  ;;  %v922_v51 = vrot.slane %v920_v42, 1 }
 0x106   : > { %v9613_v49 = vpack.c.bf16 %v632_v40, %v631_v28  ;;  %v927_v52 = vrot.slane %v925_v36, 1  ;;  %v636_v53 = vmax.f32 %v566_v46, 0.0  ;;  %v634_v54 = vmax.f32 %v558_v47, 0.0  ;;  %1202 = vrot.lane.b32.xlu1 %v9563_v4, %s9334_s22  ;;  %v9646_v28 = vpop.f32.mrb[15].mxu1  ;;  %v9072_v46 = vld [vmem:[%s13614_s3 + $0x80] sm:$0xff]  }
 0x107   : > { %v9618_v62 = vsel %vm9478_vm3, %v9540_v38, %v828_v59  ;;  %v655_v1 = vpack.c.bf16 %v630_v50, %v629_v39  ;;  %v923_v0 = vor.u32 %v922_v51, %v918_v35  ;;  %v9627_v2 = vsel %vm9478_vm3, %v678_v16, %v748_v45 }
 0x108   : > { %v687_v58 = vshrl.u32 %v9613_v49, 16  ;;  %v758_v7 = vshll.u32 %v9613_v49, 16  ;;  %v9634_v38 = vpack.c.bf16 %v636_v53, %v635_v15  ;;  %v9636_v59 = vpack.c.bf16 %v634_v54, %v633_v55  ;;  %v9075_v49 = vld [vmem:[%s13614_s3 + $0xd0] sm:$0xff]  }
 0x109   : > { %v932_v8 = vshll.u32 %v9563_v4, 16  ;;  %v684_v16 = vshrl.u32 %v655_v1, 16  ;;  %v754_v21 = vshll.u32 %v655_v1, 16  ;;  %v937_v27 = vshll.u32 %v9618_v62, 16 }
 0x10a   : > { %v9643_v19 = vrot.slane %v687_v58, 7  ;;  %v9649_v57 = vsel %vm892_vm4, %v923_v0, %v927_v52  ;;  %v693_v15 = vshrl.u32 %v9634_v38, 16  ;;  %v690_v55 = vshrl.u32 %v9636_v59, 16  ;;  %1204 = vrot.lane.b32.xlu1 %v9627_v2, %s9334_s22 }
 0x10b   : > { %v930_v29 = vshrl.u32 %v9563_v4, 16  ;;  %v829_v30 = vrot.slane %v746_v17, 7  ;;  %v9654_v35 = vrot.slane %v758_v7, 7  ;;  %v753_v36 = vrot.slane %v684_v16, 7  ;;  %1170 = vrot.lane.b32.xlu0 %v9649_v57, %s9334_s22  ;;  %v9071_v17 = vld [vmem:[%s13614_s3 + $0xc0] sm:$0xff]  }
 0x10c   : > { %v766_v39 = vshll.u32 %v9634_v38, 16  ;;  %v760_v40 = vor.u32 %v758_v7, %v9643_v19  ;;  %v831_v41 = vrot.slane %v754_v21, 7  ;;  %v762_v42 = vshll.u32 %v9636_v59, 16  ;;  %7968 = vmatprep.subr.bf16.mxu0 %v9071_v17 }
 0x10d   : > { %v934_v45 = vrot.slane %v932_v8, 1  ;;  %v756_v47 = vor.u32 %v754_v21, %v753_v36  ;;  %v9671_v50 = vrot.slane %v693_v15, 7  ;;  %v939_v51 = vrot.slane %v937_v27, 1  ;;  %7969 = vmatpush3.bf16.msra.mxu0 %v9072_v46 }
 0x10e   : > { %v9677_v52 = vsel %vm9478_vm3, %v681_v6, %v752_v48  ;;  %v9679_v53 = vrot.slane %v766_v39, 7  ;;  %v9683_v54 = vrot.slane %v690_v55, 7  ;;  %v579_v0 = vadd.f32 %v9524_v23, %v9450_v24 }
 0x10f   : > { %v935_v1 = vor.u32 %v934_v45, %v930_v29  ;;  %1206 = vrot.lane.b32.xlu1 %v9677_v52, %s9334_s22  ;;  %v9692_v60 = vsel %vm9478_vm3, %v9592_v33, %v829_v30  ;;  %v942_v6 = vshrl.u32 %v9627_v2, 16  ;;  %v944_v48 = vshll.u32 %v9627_v2, 16  ;;  %v9073_v33 = vld [vmem:[%s13614_s3 + $0xc8] sm:$0xff]  }
 0x110   : > { %v571_v7 = vadd.f32 %v9450_v24, %v9535_v31  ;;  %v639_v23 = vmax.f32 %v579_v0, 0.0  ;;  %v949_v21 = vshll.u32 %v9692_v60, 16  ;;  %v9704_v27 = vsel %vm9478_vm3, %v684_v16, %v756_v47  ;;  %v9074_v29 = vld [vmem:[%s13614_s3 + $0x88] sm:$0xff]   ;;  %7970 = vmatprep.subr.bf16.mxu0 %v9073_v33 }
 0x111   : > { %v9699_v8 = vsel %vm892_vm4, %v935_v1, %v939_v51  ;;  %v946_v31 = vrot.slane %v944_v48, 1  ;;  %v582_v45 = vadd.f32 %v9538_v37, %v9450_v24  ;;  %v574_v16 = vadd.f32 %v9450_v24, %v9544_v43  ;;  %7971 = vmatpush3.bf16.msra.mxu0 %v9074_v29 }
 0x112   : > { %1172 = vrot.lane.b32.xlu0 %v9699_v8, %s9334_s22  ;;  %v637_v30 = vmax.f32 %v571_v7, 0.0  ;;  %v951_v17 = vrot.slane %v949_v21, 1  ;;  %v9722_v46 = vsel %vm9478_vm3, %v9586_v26, %v9605_v44  ;;  %v954_v47 = vshrl.u32 %v9677_v52, 16  ;;  %7972 = vmatprep.subr.bf16.mxu0 %v9075_v49 }
 0x113   : > { %v956_v51 = vshll.u32 %v9677_v52, 16  ;;  %v947_v1 = vor.u32 %v946_v31, %v942_v6  ;;  %1208 = vrot.lane.b32.xlu1 %v9704_v27, %s9334_s22  ;;  %v640_v37 = vmax.f32 %v582_v45, 0.0  ;;  %v638_v0 = vmax.f32 %v574_v16, 0.0 }
 0x114   : > { %v961_v43 = vshll.u32 %v9722_v46, 16  ;;  %v9733_v26 = vsel %vm9478_vm3, %v687_v58, %v760_v40  ;;  %v595_v44 = vadd.f32 %v9565_v5, %v9450_v24  ;;  %v9739_v6 = vsel %vm9478_vm3, %v753_v36, %v831_v41  ;;  %v9076_v5 = vld [vmem:[%s13614_s3 + $0x90] sm:$0xff]  }
 0x115   : > { %v958_v48 = vrot.slane %v956_v51, 1  ;;  %v9742_v7 = vsel %vm892_vm4, %v947_v1, %v951_v17  ;;  %v9744_v21 = vpack.c.bf16 %v640_v37, %v639_v23  ;;  %v9746_v33 = vpack.c.bf16 %v638_v0, %v637_v30  ;;  %7973 = vmatpush3.bf16.msra.mxu0 %v9076_v5  ;;  %v9078_v0 = vld [vmem:[%s13614_s3 + $0xd8] sm:$0xff]  }
 0x116   : > { %v963_v29 = vrot.slane %v961_v43, 1  ;;  %v764_v58 = vor.u32 %v762_v42, %v9683_v54  ;;  %1174 = vrot.lane.b32.xlu0 %v9742_v7, %s9334_s22  ;;  %v966_v40 = vshrl.u32 %v9704_v27, 16  ;;  %v968_v41 = vshll.u32 %v9704_v27, 16  ;;  %v9079_v43 = vld [vmem:[%s13614_s3 + $0x98] sm:$0xff]   ;;  %7974 = vmatprep.subr.bf16.mxu0 %v9078_v0 }
 0x117   : > { %v959_v36 = vor.u32 %v958_v48, %v954_v47  ;;  %v768_v23 = vor.u32 %v766_v39, %v9671_v50  ;;  %v833_v31 = vrot.slane %v762_v42, 7  ;;  %v13619_v30 = vshrl.u32 %v9744_v21, 16  ;;  %1210 = vrot.lane.b32.xlu1 %v9733_v26, %s9334_s22 }
 0x118   : > { %v696_v45 = vshrl.u32 %v9746_v33, 16  ;;  %v970_v17 = vrot.slane %v968_v41, 1  ;;  %v973_v47 = vshll.u32 %v9739_v6, 16  ;;  %v587_v51 = vadd.f32 %v9450_v24, %v9577_v13 }
 0x119   : > { %v9765_v16 = vsel %vm892_vm4, %v959_v36, %v963_v29  ;;  %v9772_v39 = vrot.slane %v13619_v30, 7  ;;  %v774_v42 = vshll.u32 %v9744_v21, 16  ;;  %v770_v1 = vshll.u32 %v9746_v33, 16  ;;  %7975 = vmatpush3.bf16.msra.mxu0 %v9079_v43 }
 0x11a   : > { %v643_v37 = vmax.f32 %v595_v44, 0.0  ;;  %v9784_v13 = vrot.slane %v696_v45, 7  ;;  %1176 = vrot.lane.b32.xlu0 %v9765_v16, %s9334_s22  ;;  %v971_v48 = vor.u32 %v970_v17, %v966_v40  ;;  %v975_v29 = vrot.slane %v973_v47, 1 }
 0x11b   : > { %v9792_v44 = vsel %vm9478_vm3, %v690_v55, %v764_v58  ;;  %v9794_v49 = vrot.slane %v774_v42, 7  ;;  %v641_v5 = vmax.f32 %v587_v51, 0.0  ;;  %v598_v36 = vadd.f32 %v9582_v22, %v9450_v24 }
 0x11c   : > { %1212 = vrot.lane.b32.xlu1 %v9792_v44, %s9334_s22  ;;  %v590_v41 = vadd.f32 %v9450_v24, %v9590_v32  ;;  %v9803_v40 = vsel %vm892_vm4, %v971_v48, %v975_v29  ;;  %v9809_v59 = vsel %vm9478_vm3, %v9643_v19, %v9654_v35  ;;  %v978_v55 = vshrl.u32 %v9733_v26, 16 }
 0x11d   : > { %v980_v58 = vshll.u32 %v9733_v26, 16  ;;  %v644_v17 = vmax.f32 %v598_v36, 0.0  ;;  %v985_v22 = vshll.u32 %v9809_v59, 16  ;;  %v9818_v32 = vsel %vm9478_vm3, %v693_v15, %v768_v23 }
 0x11e   : > { %v642_v47 = vmax.f32 %v590_v41, 0.0  ;;  %v772_v51 = vor.u32 %v770_v1, %v9784_v13  ;;  %1178 = vrot.lane.b32.xlu0 %v9803_v40, %s9334_s22  ;;  %v611_v35 = vadd.f32 %v9620_v63, %v9450_v24  ;;  %v9828_v0 = vsel %vm9478_vm3, %v9683_v54, %v833_v31  ;;  %v9080_v54 = vld [vmem:[%s13614_s3 + $0xe0] sm:$0xff]  }
 0x11f   : > { %v982_v19 = vrot.slane %v980_v58, 1  ;;  %v9830_v38 = vpack.c.bf16 %v644_v17, %v643_v37  ;;  %v987_v15 = vrot.slane %v985_v22, 1  ;;  %v992_v23 = vshll.u32 %v9792_v44, 16  ;;  %v9081_v31 = vld [vmem:[%s13614_s3 + $0xa0] sm:$0xff]   ;;  %7976 = vmatprep.subr.bf16.mxu0 %v9080_v54 }
 0x120   : > { %v661_v48 = vpack.c.bf16 %v642_v47, %v641_v5  ;;  %1214 = vrot.lane.b32.xlu1 %v9818_v32, %s9334_s22  ;;  %v990_v29 = vshrl.u32 %v9792_v44, 16  ;;  %v997_v36 = vshll.u32 %v9828_v0, 16  ;;  %v603_v63 = vadd.f32 %v9450_v24, %v9629_v3  ;;  %7977 = vmatpush3.bf16.msra.mxu0 %v9081_v31 }
 0x121   : > { %v983_v43 = vor.u32 %v982_v19, %v978_v55  ;;  %v835_v37 = vrot.slane %v770_v1, 7  ;;  %v776_v58 = vor.u32 %v774_v42, %v9772_v39  ;;  %v994_v47 = vrot.slane %v992_v23, 1  ;;  %v9082_v23 = vld [vmem:[%s13614_s3 + $0xe8] sm:$0xff]  }
 0x122   : > { %v702_v41 = vshrl.u32 %v661_v48, 16  ;;  %v778_v55 = vshll.u32 %v661_v48, 16  ;;  %v999_v3 = vrot.slane %v997_v36, 1  ;;  %v782_v22 = vshll.u32 %v9830_v38, 16  ;;  %7978 = vmatprep.subr.bf16.mxu0 %v9082_v23 }
 0x123   : > { %v9848_v17 = vsel %vm892_vm4, %v983_v43, %v987_v15  ;;  %v647_v30 = vmax.f32 %v611_v35, 0.0  ;;  %v645_v1 = vmax.f32 %v603_v63, 0.0  ;;  %v995_v5 = vor.u32 %v994_v47, %v990_v29  ;;  %v9083_v35 = vld [vmem:[%s13614_s3 + $0xa8] sm:$0xff]  }
 0x124   : > { %v777_v19 = vrot.slane %v702_v41, 7  ;;  %1180 = vrot.lane.b32.xlu0 %v9848_v17, %s9334_s22  ;;  %v9857_v42 = vsel %vm9478_vm3, %v696_v45, %v772_v51  ;;  %v614_v48 = vadd.f32 %v9639_v18, %v9450_v24  ;;  %v606_v15 = vadd.f32 %v9450_v24, %v9646_v28  ;;  %7979 = vmatpush3.bf16.msra.mxu0 %v9083_v35 }
 0x125   : > { %v13652_v33 = vshrl.u32 %v9830_v38, 16  ;;  %v837_v45 = vrot.slane %v778_v55, 7  ;;  %1216 = vrot.lane.b32.xlu1 %v9857_v42, %s9334_s22  ;;  %v9877_v24 = vsel %vm9478_vm3, %v9671_v50, %v9679_v53  ;;  %v9880_v18 = vsel %vm892_vm4, %v995_v5, %v999_v3 }
 0x126   : > { %v780_v29 = vor.u32 %v778_v55, %v777_v19  ;;  %v648_v28 = vmax.f32 %v614_v48, 0.0  ;;  %v646_v51 = vmax.f32 %v606_v15, 0.0  ;;  %v1004_v36 = vshll.u32 %v9818_v32, 16 }
 0x127   : > { %v781_v43 = vrot.slane %v13652_v33, 7  ;;  %v1002_v63 = vshrl.u32 %v9818_v32, 16  ;;  %v1009_v54 = vshll.u32 %v9877_v24, 16  ;;  %v13653_v31 = vshrl.u32 %v9744_v21, 16  ;;  %v9084_v21 = vld [vmem:[%s13614_s3 + $0xf0] sm:$0xff]  }
 0x128   : > { %1182 = vrot.lane.b32.xlu0 %v9880_v18, %s9334_s22  ;;  %v9896_v53 = vsel %vm9478_vm3, %v9784_v13, %v835_v37  ;;  %v9898_v5 = vpack.c.bf16 %v648_v28, %v647_v30  ;;  %v663_v55 = vpack.c.bf16 %v646_v51, %v645_v1  ;;  %v1006_v47 = vrot.slane %v1004_v36, 1  ;;  %7980 = vmatprep.subr.bf16.mxu0 %v9084_v21 }
 0x129   : > { %v9891_v50 = vsel %vm9478_vm3, %v13653_v31, %v776_v58  ;;  %v1016_v3 = vshll.u32 %v9857_v42, 16  ;;  %v9085_v58 = vld [vmem:[%s13614_s3 + $0xb0] sm:$0xff]   ;;  %v784_v48 = vor.u32 %v782_v22, %v781_v43  ;;  %v1011_v15 = vrot.slane %v1009_v54, 1 }
 0x12a   : > { %1218 = vrot.lane.b32.xlu1 %v9891_v50, %s9334_s22  ;;  %v1014_v30 = vshrl.u32 %v9857_v42, 16  ;;  %v1021_v13 = vshll.u32 %v9896_v53, 16  ;;  %v708_v37 = vshrl.u32 %v663_v55, 16  ;;  %v786_v1 = vshll.u32 %v663_v55, 16  ;;  %7981 = vmatpush3.bf16.msra.mxu0 %v9085_v58 }
 0x12b   : > { %v9913_v23 = vsel %vm9478_vm3, %v702_v41, %v780_v29  ;;  %v9919_v35 = vsel %vm9478_vm3, %v9772_v39, %v9794_v49  ;;  %v1007_v33 = vor.u32 %v1006_v47, %v1002_v63  ;;  %v1018_v28 = vrot.slane %v1016_v3, 1  ;;  %v9086_v41 = vld [vmem:[%s13614_s3 + $0xf8] sm:$0xff]  }
 0x12c   : > { %v1023_v51 = vrot.slane %v1021_v13, 1  ;;  %v838_v36 = vrot.slane %v782_v22, 7  ;;  %v785_v54 = vrot.slane %v708_v37, 7  ;;  %v1026_v31 = vshrl.u32 %v9891_v50, 16  ;;  %v9087_v29 = vld [vmem:[%s13614_s3 + $0xb8] sm:$0xff]   ;;  %7982 = vmatprep.subr.bf16.mxu0 %v9086_v41 }
 0x12d   : > { %v9929_v39 = vsel %vm892_vm4, %v1007_v33, %v1011_v15  ;;  %v1019_v49 = vor.u32 %v1018_v28, %v1014_v30  ;;  %v1028_v22 = vshll.u32 %v9891_v50, 16  ;;  %v1033_v63 = vshll.u32 %v9919_v35, 16 }
 0x12e   : > { %1220 = vrot.lane.b32.xlu1 %v9913_v23, %s9334_s22  ;;  %v788_v55 = vor.u32 %v786_v1, %v785_v54  ;;  %1184 = vrot.lane.b32.xlu0 %v9929_v39, %s9334_s22  ;;  %v13654_v47 = vshrl.u32 %v9830_v38, 16  ;;  %v9945_v21 = vsel %vm9478_vm3, %v777_v19, %v837_v45  ;;  %v839_v58 = vrot.slane %v786_v1, 7 }
 0x12f   : > { %v9948_v15 = vsel %vm892_vm4, %v1019_v49, %v1023_v51  ;;  %v1030_v30 = vrot.slane %v1028_v22, 1  ;;  %v1035_v13 = vrot.slane %v1033_v63, 1  ;;  %v1038_v33 = vshrl.u32 %v9913_v23, 16  ;;  %7983 = vmatpush3.bf16.msra.mxu0 %v9087_v29 }
 0x130   : > { %v9941_v3 = vsel %vm9478_vm3, %v13654_v47, %v784_v48  ;;  %13655 = vst [vmem:[#allocation3_spill] sm:$0xff] %v9948_v15  ;;  %v1040_v28 = vshll.u32 %v9913_v23, 16  ;;  %v1045_v38 = vshll.u32 %v9945_v21, 16  ;;  %v9955_v48 = vsel %vm9478_vm3, %v781_v43, %v838_v36 }
 0x131   : > { %v1031_v19 = vor.u32 %v1030_v30, %v1026_v31  ;;  %v1052_v45 = vshll.u32 %v9941_v3, 16  ;;  %v711_v1 = vshrl.u32 %v9898_v5, 16  ;;  %v9965_v41 = vsel %vm9478_vm3, %v708_v37, %v788_v55 }
 0x132   : > { %1222 = vrot.lane.b32.xlu1 %v9941_v3, %s9334_s22  ;;  %1186 = vrot.lane.b32.xlu0 %v9948_v15, %s9334_s22  ;;  %v1042_v51 = vrot.slane %v1040_v28, 1  ;;  %v1057_v43 = vshll.u32 %v9955_v48, 16  ;;  %v1047_v31 = vrot.slane %v1045_v38, 1  ;;  %v1050_v29 = vshrl.u32 %v9941_v3, 16 }
 0x133   : > { %v9969_v36 = vsel %vm892_vm4, %v1031_v19, %v1035_v13  ;;  %v1054_v49 = vrot.slane %v1052_v45, 1  ;;  %v1107_v63 = vrot.slane %v9520_v20, 1  ;;  %v9975_v47 = vsel %vm9478_vm3, %v785_v54, %v839_v58 }
 0x134   : > { %v1043_v22 = vor.u32 %v1042_v51, %v1038_v33  ;;  %v1062_v37 = vshrl.u32 %v9965_v41, 16  ;;  %v1064_v55 = vshll.u32 %v9965_v41, 16  ;;  %v1069_v30 = vshll.u32 %v9975_v47, 16 }
 0x135   : > { %v789_v13 = vrot.slane %v711_v1, 7  ;;  %v790_v28 = vshll.u32 %v9898_v5, 16  ;;  %v1059_v33 = vrot.slane %v1057_v43, 1  ;;  %v1108_v54 = vrot.slane %v9503_v12, 1 }
 0x136   : > { %1224 = vrot.lane.b32.xlu1 %v9965_v41, %s9334_s22  ;;  %1188 = vrot.lane.b32.xlu0 %v9969_v36, %s9334_s22  ;;  %v9987_v58 = vsel %vm892_vm4, %v1043_v22, %v1047_v31  ;;  %v1055_v38 = vor.u32 %v1054_v49, %v1050_v29  ;;  %v1066_v19 = vrot.slane %v1064_v55, 1  ;;  %v1071_v45 = vrot.slane %v1069_v30, 1 }
 0x137   : > { %v9990_v51 = vsel %vm1103_vm5, %v1107_v63, %v1108_v54  ;;  %v792_v5 = vor.u32 %v790_v28, %v789_v13  ;;  %v1110_v31 = vrot.slane %v9571_v10, 1  ;;  %v1111_v29 = vrot.slane %v9575_v11, 1 }
 0x138   : > { %v1067_v15 = vor.u32 %v1066_v19, %v1062_v37  ;;  %v9997_v43 = vsel %vm892_vm4, %v1055_v38, %v1059_v33  ;;  %v1117_v63 = vrot.slane %v9692_v60, 1  ;;  %v1104_v37 = vrot.slane %v9507_v14, 1 }
 0x139   : > { %v10010_v49 = vsel %vm9478_vm3, %v711_v1, %v792_v5  ;;  %v10013_v22 = vsel %vm1103_vm5, %v1110_v31, %v1111_v29  ;;  %v1105_v11 = vrot.slane %v9499_v9, 1  ;;  %v1122_v55 = vrot.slane %v9704_v27, 1 }
 0x13a   : > { %1228 = vrot.lane.b32.xlu1 %v9990_v51, %s9334_s22  ;;  %1190 = vrot.lane.b32.xlu0 %v9987_v58, %s9334_s22  ;;  %v10000_v12 = vsel %vm892_vm4, %v1067_v15, %v1071_v45  ;;  %v1116_v15 = vrot.slane %v9627_v2, 1  ;;  %v1123_v30 = vrot.slane %v9739_v6, 1  ;;  %v1113_v60 = vrot.slane %v9563_v4, 1 }
 0x13b   : > { %v10029_v33 = vsel %vm1103_vm5, %v1104_v37, %v1105_v11  ;;  %v1114_v54 = vrot.slane %v9618_v62, 1  ;;  %v840_v9 = vrot.slane %v790_v28, 7  ;;  %v1128_v19 = vrot.slane %v9792_v44, 1 }
 0x13c   : > { %v10024_v1 = vsel %vm1103_vm5, %v1116_v15, %v1117_v63  ;;  %v10038_v38 = vsel %vm1103_vm5, %v1122_v55, %v1123_v30  ;;  %v1129_v6 = vrot.slane %v9828_v0, 1  ;;  %v1119_v5 = vrot.slane %v9677_v52, 1 }
 0x13d   : > { %v10043_v45 = vsel %vm1103_vm5, %v1113_v60, %v1114_v54  ;;  %v1120_v62 = vrot.slane %v9722_v46, 1  ;;  %v1152_v28 = vshll.u32 %v10010_v49, 16  ;;  %v891_v31 = vsel %vm9478_vm3, %v789_v13, %v840_v9 }
 0x13e   : > { %1194 = vrot.lane.b32.xlu1 %v10000_v12, %s9334_s22  ;;  %1192 = vrot.lane.b32.xlu0 %v9997_v43, %s9334_s22  ;;  %v10055_v0 = vsel %vm1103_vm5, %v1128_v19, %v1129_v6  ;;  %v1134_v29 = vrot.slane %v9857_v42, 1  ;;  %v1135_v15 = vrot.slane %v9896_v53, 1  ;;  %v1125_v63 = vrot.slane %v9733_v26, 1 }
 0x13f   : > { %v10060_v46 = vsel %vm1103_vm5, %v1119_v5, %v1120_v62  ;;  %v1126_v37 = vrot.slane %v9809_v59, 1  ;;  %v1140_v11 = vrot.slane %v9913_v23, 1  ;;  %v1141_v13 = vrot.slane %v9945_v21, 1 }
 0x140   : > { %v1150_v55 = vshrl.u32 %v10010_v49, 16  ;;  %v1154_v53 = vrot.slane %v1152_v28, 1  ;;  %v1157_v30 = vshll.u32 %v891_v31, 16  ;;  %v10072_v60 = vsel %vm1103_vm5, %v1134_v29, %v1135_v15 }
 0x141   : > { %v10075_v54 = vsel %vm1103_vm5, %v1125_v63, %v1126_v37  ;;  %v1131_v59 = vrot.slane %v9818_v32, 1  ;;  %v1132_v9 = vrot.slane %v9877_v24, 1  ;;  %v10084_v21 = vsel %vm1103_vm5, %v1140_v11, %v1141_v13 }
 0x142   : > { %1232 = vrot.lane.b32.xlu1 %v10013_v22, %s9334_s22  ;;  %1226 = vrot.lane.b32.xlu0 %v10010_v49, %s9334_s22  ;;  %v1155_v19 = vor.u32 %v1154_v53, %v1150_v55  ;;  %v1159_v6 = vrot.slane %v1157_v30, 1  ;;  %v1137_v62 = vrot.slane %v9891_v50, 1  ;;  %v1138_v28 = vrot.slane %v9919_v35, 1 }
 0x143   : > { %v10087_v5 = vsel %vm1103_vm5, %v1131_v59, %v1132_v9  ;;  %v1163_v29 = vrot.slane %v10010_v49, 1  ;;  %v1164_v15 = vrot.slane %v891_v31, 1  ;;  %v1143_v63 = vrot.slane %v9941_v3, 1  ;;  %v9077_v9 = vld [vmem:[%s13614_s3 + $0x108] sm:$0xff]  }
 0x144   : > { %v10096_v24 = vsel %vm892_vm4, %v1155_v19, %v1159_v6  ;;  %v1144_v37 = vrot.slane %v9955_v48, 1  ;;  %v10102_v11 = vsel %vm1103_vm5, %v1137_v62, %v1138_v28  ;;  %v1146_v31 = vrot.slane %v9965_v41, 1  ;;  %v9088_v62 = vld [vmem:[%s13614_s3 + $0x110] sm:$0xff]  }
 0x145   : > { %13656 = vst [vmem:[#allocation4_spill] sm:$0xff] %v10096_v24  ;;  %v10109_v35 = vsel %vm1103_vm5, %v1163_v29, %v1164_v15  ;;  %v1147_v55 = vrot.slane %v9975_v47, 1 }
 0x146   : > { %1236 = vrot.lane.b32.xlu1 %v10024_v1, %s9334_s22  ;;  %1230 = vrot.lane.b32.xlu0 %v10029_v33, %s9334_s22  ;;  %v10112_v13 = vsel %vm1103_vm5, %v1143_v63, %v1144_v37 }
 0x147   : > { %v10121_v48 = vsel %vm1103_vm5, %v1146_v31, %v1147_v55 }
 0x14a   : > { %1240 = vrot.lane.b32.xlu1 %v10038_v38, %s9334_s22  ;;  %1234 = vrot.lane.b32.xlu0 %v10043_v45, %s9334_s22 }
 0x14e   : > { %1244 = vrot.lane.b32.xlu1 %v10055_v0, %s9334_s22  ;;  %1238 = vrot.lane.b32.xlu0 %v10060_v46, %s9334_s22 }
 0x152   : > { %1248 = vrot.lane.b32.xlu1 %v10072_v60, %s9334_s22  ;;  %1242 = vrot.lane.b32.xlu0 %v10075_v54, %s9334_s22 }
 0x156   : > { %1252 = vrot.lane.b32.xlu1 %v10084_v21, %s9334_s22  ;;  %1246 = vrot.lane.b32.xlu0 %v10087_v5, %s9334_s22 }
 0x15a   : > { %1260 = vrot.lane.b32.xlu1 %v10096_v24, %s9334_s22  ;;  %1250 = vrot.lane.b32.xlu0 %v10102_v11, %s9334_s22 }
 0x15e   : > { %1258 = vrot.lane.b32.xlu1 %v10109_v35, %s9334_s22  ;;  %1254 = vrot.lane.b32.xlu0 %v10112_v13, %s9334_s22 }
 0x162   : > { %1256 = vrot.lane.b32.xlu0 %v10121_v48, %s9334_s22 }
 0x169   : > { %v1199_v59 = vpop.permute.xlu1 %1198 }
 0x16a   : > { %v1197_v53 = vpop.permute.xlu0 %1196  ;;  %v1314_v6 = vsel %vm1262_vm6, %v9990_v51, %v1199_v59 }
 0x16b   : > { %v1310_v30 = vsel %vm1262_vm6, %v10029_v33, %v1197_v53 }
 0x16c   : > { %1796 = vmatprep.mubr.bf16.mxu1 %v1310_v30 }
 0x171   : > { %v1167_v47 = vpop.permute.xlu0 %1166 }
 0x172   : > { %v1264_v19 = vsel %vm1262_vm6, %v9507_v14, %v1167_v47  ;;  %v9089_v14 = vld [vmem:[%s13614_s3 + $0x118] sm:$0xff]  }
 0x173   : > { %1797 = vmatmul.mubr.bf16.vlgmr.msra.gmra.mrb[16].mxu1 %v1264_v19  ;;  %1957 = vmatprep.mubr.bf16.mxu0 %v1264_v19 }
 0x174   : > { %8867 = vmatpush3.bf16.msra.mxu1 %v9529_v25  ;;  %1804 = vmatprep.mubr.bf16.mxu1 %v1314_v6  ;;  %v1169_v28 = vpop.permute.xlu1 %1168 }
 0x175   : > { %8868 = vmatprep.subr.bf16.mxu1 %v9077_v9  ;;  %v1201_v29 = vpop.permute.xlu0 %1200  ;;  %v1267_v51 = vsel %vm1262_vm6, %v9520_v20, %v1169_v28 }
 0x176   : > { %v1317_v25 = vsel %vm1262_vm6, %v10029_v33, %v1201_v29 }
 0x178   : > { %8869 = vmatpush3.bf16.msra.mxu1 %v9077_v9  ;;  %v1203_v15 = vpop.permute.xlu1 %1202 }
 0x179   : > { %8870 = vmatprep.subr.bf16.mxu1 %v9088_v62  ;;  %v1321_v55 = vsel %vm1262_vm6, %v10013_v22, %v1203_v15 }
 0x17b   : > { %1805 = vmatmul.mubr.bf16.gmra.mrb[20].mxu1 %v1267_v51 }
 0x17c   : > { %1812 = vmatprep.mubr.bf16.mxu1 %v1317_v25  ;;  %8871 = vmatpush3.bf16.msra.mxu1 %v9088_v62  ;;  %v1205_v37 = vpop.permute.xlu1 %1204 }
 0x17d   : > { %8872 = vmatprep.subr.bf16.mxu1 %v9089_v14  ;;  %v1171_v63 = vpop.permute.xlu0 %1170  ;;  %v1325_v9 = vsel %vm1262_vm6, %v10043_v45, %v1205_v37 }
 0x17e   : > { %v1270_v47 = vsel %vm1262_vm6, %v9571_v10, %v1171_v63 }
 0x180   : > { %8873 = vmatpush3.bf16.msra.mxu1 %v9089_v14 }
 0x181   : > { %v1207_v31 = vpop.permute.xlu1 %1206 }
 0x182   : > { %v1329_v14 = vsel %vm1262_vm6, %v10024_v1, %v1207_v31 }
 0x183   : > { %1813 = vmatmul.mubr.bf16.gmra.mrb[24].mxu1 %v1264_v19 }
 0x184   : > { %v1173_v53 = vpop.permute.xlu0 %1172  ;;  %1820 = vmatprep.mubr.bf16.mxu1 %v1321_v55 }
 0x185   : > { %v1209_v30 = vpop.permute.xlu1 %1208  ;;  %v1273_v29 = vsel %vm1262_vm6, %v9563_v4, %v1173_v53 }
 0x186   : > { %v1333_v63 = vsel %vm1262_vm6, %v10060_v46, %v1209_v30 }
 0x188   : > { %v1175_v59 = vpop.permute.xlu0 %1174 }
 0x189   : > { %v1211_v20 = vpop.permute.xlu1 %1210  ;;  %v1276_v10 = vsel %vm1262_vm6, %v9627_v2, %v1175_v59 }
 0x18a   : > { %v1337_v31 = vsel %vm1262_vm6, %v10038_v38, %v1211_v20 }
 0x18b   : > { %1821 = vmatmul.mubr.bf16.gmra.mrb[28].mxu1 %v1270_v47 }
 0x18c   : > { %1828 = vmatprep.mubr.bf16.mxu1 %v1325_v9  ;;  %v1177_v6 = vpop.permute.xlu0 %1176 }
 0x18d   : > { %v1279_v4 = vsel %vm1262_vm6, %v9677_v52, %v1177_v6 }
 0x18e   : > { %v1213_v62 = vpop.permute.xlu1 %1212 }
 0x18f   : > { %v1341_v30 = vsel %vm1262_vm6, %v10075_v54, %v1213_v62 }
 0x190   : > { %v1179_v28 = vpop.permute.xlu0 %1178 }
 0x191   : > { %v1282_v56 = vsel %vm1262_vm6, %v9704_v27, %v1179_v28 }
 0x192   : > { %v1215_v19 = vpop.permute.xlu1 %1214 }
 0x193   : > { %1829 = vmatmul.mubr.bf16.gmra.mrb[32].mxu1 %v1273_v29  ;;  %v1345_v27 = vsel %vm1262_vm6, %v10055_v0, %v1215_v19 }
 0x194   : > { %1836 = vmatprep.mubr.bf16.mxu1 %v1329_v14 }
 0x196   : > { %v1181_v15 = vpop.permute.xlu0 %1180 }
 0x197   : > { %v1217_v51 = vpop.permute.xlu1 %1216  ;;  %v1285_v6 = vsel %vm1262_vm6, %v9733_v26, %v1181_v15 }
 0x19a   : > { %v1183_v25 = vpop.permute.xlu0 %1182 }
 0x19b   : > { %1837 = vmatmul.mubr.bf16.gmra.mrb[36].mxu1 %v1276_v10 }
 0x19c   : > { %v1219_v37 = vpop.permute.xlu1 %1218  ;;  %1844 = vmatprep.mubr.bf16.mxu1 %v1333_v63 }
 0x1a0   : > { %v1221_v55 = vpop.permute.xlu1 %1220  ;;  %v1185_v9 = vpop.permute.xlu0 %1184 }
 0x1a1   : > { %v1291_v15 = vsel %vm1262_vm6, %v9818_v32, %v1185_v9 }
 0x1a3   : > { %1845 = vmatmul.mubr.bf16.gmra.mrb[40].mxu1 %v1279_v4 }
 0x1a4   : > { %v1223_v53 = vpop.permute.xlu1 %1222  ;;  %1852 = vmatprep.mubr.bf16.mxu1 %v1337_v31  ;;  %v1187_v14 = vpop.permute.xlu0 %1186 }
 0x1a8   : > { %v1225_v2 = vpop.permute.xlu1 %1224  ;;  %v1189_v59 = vpop.permute.xlu0 %1188 }
 0x1ab   : > { %1853 = vmatmul.mubr.bf16.gmra.mrb[44].mxu1 %v1282_v56 }
 0x1ac   : > { %v1229_v63 = vpop.permute.xlu1 %1228  ;;  %1860 = vmatprep.mubr.bf16.mxu1 %v1341_v30  ;;  %v1191_v24 = vpop.permute.xlu0 %1190 }
 0x1ad   : > { %v1373_v52 = vsel %vm1262_vm6, %v9595_v34, %v1229_v63  ;;  %v1288_v34 = vsel %vm1262_vm6, %v9792_v44, %v1183_v25 }
 0x1ae   : > { %1958 = vmatmul.mubr.bf16.vlgmr.msra.gmra.mrb[16].mxu0 %v1373_v52 }
 0x1af   : > { %1965 = vmatprep.mubr.bf16.mxu0 %v1270_v47  ;;  %v1349_v47 = vsel %vm1262_vm6, %v10087_v5, %v1217_v51 }
 0x1b0   : > { %v1193_v20 = vpop.permute.xlu0 %1192  ;;  %v1195_v31 = vpop.permute.xlu1 %1194 }
 0x1b3   : > { %1861 = vmatmul.mubr.bf16.gmra.mrb[48].mxu1 %v1285_v6 }
 0x1b4   : > { %1868 = vmatprep.mubr.bf16.mxu1 %v1345_v27  ;;  %v1227_v28 = vpop.permute.xlu0 %1226  ;;  %v1233_v26 = vpop.permute.xlu1 %1232 }
 0x1b5   : > { %v1381_v19 = vsel %vm1262_vm6, %v9649_v57, %v1233_v26  ;;  %v1357_v57 = vsel %vm1262_vm6, %v10102_v11, %v1221_v55  ;;  %v1300_v55 = vsel %vm1262_vm6, %v9913_v23, %v1191_v24 }
 0x1b8   : > { %v1231_v62 = vpop.permute.xlu0 %1230  ;;  %v1237_v32 = vpop.permute.xlu1 %1236 }
 0x1b9   : > { %v1377_v30 = vsel %vm1262_vm6, %v9554_v61, %v1231_v62  ;;  %v1353_v61 = vsel %vm1262_vm6, %v10072_v60, %v1219_v37  ;;  %v1389_v25 = vsel %vm1262_vm6, %v9742_v7, %v1237_v32  ;;  %v1365_v7 = vsel %vm1262_vm6, %v10112_v13, %v1225_v2 }
 0x1ba   : > { %1966 = vmatmul.mubr.bf16.gmra.mrb[20].mxu0 %v1377_v30  ;;  %v9090_v30 = vld [vmem:[%s13614_s3 + $0x160] sm:$0xff]  }
 0x1bb   : > { %1869 = vmatmul.mubr.bf16.gmra.mrb[52].mxu1 %v1288_v34  ;;  %1973 = vmatprep.mubr.bf16.mxu0 %v1273_v29  ;;  %v1294_v29 = vsel %vm1262_vm6, %v9857_v42, %v1187_v14 }
 0x1bc   : > { %1876 = vmatprep.mubr.bf16.mxu1 %v1349_v47  ;;  %v1235_v44 = vpop.permute.xlu0 %1234  ;;  %8100 = vmatprep.subr.bf16.mxu0 %v9090_v30 }
 0x1bd   : > { %v1385_v51 = vsel %vm1262_vm6, %v9699_v8, %v1235_v44  ;;  %v1361_v8 = vsel %vm1262_vm6, %v10084_v21, %v1223_v53 }
 0x1c0   : > { %v1239_v42 = vpop.permute.xlu0 %1238 }
 0x1c1   : > { %v1393_v37 = vsel %vm1262_vm6, %v9765_v16, %v1239_v42  ;;  %v1369_v16 = vsel %vm1262_vm6, %v10121_v48, %v1227_v28  ;;  %v9093_v42 = vld [vmem:[%s13614_s3 + $0x128] sm:$0xff]  }
 0x1c2   : > { %1974 = vmatmul.mubr.bf16.gmra.mrb[24].mxu0 %v1381_v19 }
 0x1c3   : > { %1877 = vmatmul.mubr.bf16.gmra.mrb[56].mxu1 %v1291_v15  ;;  %1981 = vmatprep.mubr.bf16.mxu0 %v1276_v10  ;;  %v1297_v10 = vsel %vm1262_vm6, %v9891_v50, %v1189_v59  ;;  %v1241_v50 = vpop.permute.xlu1 %1240 }
 0x1c4   : > { %1884 = vmatprep.mubr.bf16.mxu1 %v1353_v61  ;;  %v1397_v9 = vsel %vm1262_vm6, %v9803_v40, %v1241_v50  ;;  %v1243_v23 = vpop.permute.xlu0 %1242 }
 0x1c5   : > { %v1401_v24 = vsel %vm1262_vm6, %v9848_v17, %v1243_v23 }
 0x1c7   : > { %v1245_v40 = vpop.permute.xlu1 %1244 }
 0x1c8   : > { %v1247_v17 = vpop.permute.xlu0 %1246 }
 0x1ca   : > { %1982 = vmatmul.mubr.bf16.gmra.mrb[28].mxu0 %v1385_v51 }
 0x1cb   : > { %1885 = vmatmul.mubr.bf16.gmra.mrb[60].mxu1 %v1294_v29  ;;  %1989 = vmatprep.mubr.bf16.mxu0 %v1279_v4  ;;  %v1306_v4 = vsel %vm1262_vm6, %v9965_v41, %v1195_v31  ;;  %v1409_v41 = vsel %vm1262_vm6, %v9929_v39, %v1247_v17 }
 0x1cc   : > { %1892 = vmatprep.mubr.bf16.mxu1 %v1357_v57  ;;  %v1251_v39 = vpop.permute.xlu0 %1250 }
 0x1d2   : > { %1990 = vmatmul.mubr.bf16.gmra.mrb[32].mxu0 %v1389_v25 }
 0x1d3   : > { %1893 = vmatmul.mubr.bf16.gmra.mrb[64].mxu1 %v1297_v10  ;;  %1997 = vmatprep.mubr.bf16.mxu0 %v1282_v56  ;;  %v1303_v56 = vsel %vm1262_vm6, %v9941_v3, %v1193_v20  ;;  %v1405_v3 = vsel %vm1262_vm6, %v9880_v18, %v1245_v40  ;;  %v1249_v18 = vpop.permute.xlu1 %1248 }
 0x1d4   : > { %1900 = vmatprep.mubr.bf16.mxu1 %v1361_v8  ;;  %v9092_v8 = vld [vmem:[%s13614_s3 + $0x168] sm:$0xff]  }
 0x1da   : > { %1998 = vmatmul.mubr.bf16.gmra.mrb[36].mxu0 %v1393_v37 }
 0x1db   : > { %1901 = vmatmul.mubr.bf16.gmra.mrb[68].mxu1 %v1300_v55  ;;  %2005 = vmatprep.mubr.bf16.mxu0 %v1285_v6 }
 0x1dc   : > { %1908 = vmatprep.mubr.bf16.mxu1 %v1365_v7 }
 0x1e2   : > { %2006 = vmatmul.mubr.bf16.gmra.mrb[40].mxu0 %v1397_v9 }
 0x1e3   : > { %1909 = vmatmul.mubr.bf16.gmra.mrb[72].mxu1 %v1303_v56  ;;  %2013 = vmatprep.mubr.bf16.mxu0 %v1288_v34  ;;  %v9091_v34 = vld [vmem:[%s13614_s3 + $0x120] sm:$0xff]  }
 0x1e4   : > { %1916 = vmatprep.mubr.bf16.mxu1 %v1369_v16  ;;  %8101 = vmatpush3.bf16.msra.mxu0 %v9091_v34 }
 0x1e5   : > { %8102 = vmatprep.subr.bf16.mxu0 %v9092_v8 }
 0x1e8   : > { %8103 = vmatpush3.bf16.msra.mxu0 %v9093_v42  ;;  %v9096_v42 = vld [vmem:[%s13614_s3 + $0x178] sm:$0xff]  }
 0x1ea   : > { %2014 = vmatmul.mubr.bf16.gmra.mrb[44].mxu0 %v1401_v24 }
 0x1eb   : > { %1917 = vmatmul.mubr.bf16.gmra.mrb[76].mxu1 %v1306_v4  ;;  %2021 = vmatprep.mubr.bf16.mxu0 %v1291_v15 }
 0x1ec   : > { %8874 = vmatprep.mubr.msk.bf16.mxu1 %vm1262_vm6, %v10029_v33  ;;  %v13657_v33 = vld [vmem:[#allocation3_spill] sm:$0xff] }
 0x1f2   : > { %2022 = vmatmul.mubr.bf16.gmra.mrb[48].mxu0 %v1405_v3 }
 0x1f3   : > { %8875 = vmatmul.mubr.msk.bf16.vlgmr.msra.gmra.mrb[80].mxu1 %vm1262_vm6, %v10013_v22  ;;  %2029 = vmatprep.mubr.bf16.mxu0 %v1294_v29  ;;  %v1413_v22 = vsel %vm1262_vm6, %v13657_v33, %v1249_v18 }
 0x1f4   : > { %8878 = vmatprep.mubr.msk.bf16.mxu1 %vm1262_vm6, %v10043_v45  ;;  %v1253_v45 = vpop.permute.xlu1 %1252 }
 0x1fa   : > { %2030 = vmatmul.mubr.bf16.gmra.mrb[52].mxu0 %v1409_v41 }
 0x1fb   : > { %8879 = vmatmul.mubr.msk.bf16.gmra.mrb[84].mxu1 %vm1262_vm6, %v10024_v1  ;;  %2037 = vmatprep.mubr.bf16.mxu0 %v1297_v10  ;;  %v1417_v1 = vsel %vm1262_vm6, %v9969_v36, %v1251_v39  ;;  %v1255_v36 = vpop.permute.xlu0 %1254  ;;  %v9094_v39 = vld [vmem:[%s13614_s3 + $0x170] sm:$0xff]  }
 0x1fc   : > { %8882 = vmatprep.mubr.msk.bf16.mxu1 %vm1262_vm6, %v10060_v46  ;;  %v1261_v46 = vpop.permute.xlu1 %1260  ;;  %8104 = vmatprep.subr.bf16.mxu0 %v9094_v39 }
 0x202   : > { %2038 = vmatmul.mubr.bf16.gmra.mrb[56].mxu0 %v1413_v22  ;;  %v10306_v22 = vld [vmem:[%s13615_s4] ss:$0 sm:$0xff] }
 0x203   : > { %8883 = vmatmul.mubr.msk.bf16.gmra.mrb[88].mxu1 %vm1262_vm6, %v10038_v38  ;;  %2045 = vmatprep.mubr.bf16.mxu0 %v1300_v55  ;;  %v1421_v38 = vsel %vm1262_vm6, %v9987_v58, %v1253_v45  ;;  %v1257_v58 = vpop.permute.xlu0 %1256 }
 0x204   : > { %8886 = vmatprep.mubr.msk.bf16.mxu1 %vm1262_vm6, %v10075_v54  ;;  %v1436_v54 = vsel %vm1262_vm6, %v10010_v49, %v1261_v46  ;;  %v13658_v49 = vld [vmem:[#allocation4_spill] sm:$0xff] }
 0x20a   : > { %2046 = vmatmul.mubr.bf16.gmra.mrb[60].mxu0 %v1417_v1 }
 0x20b   : > { %8887 = vmatmul.mubr.msk.bf16.gmra.mrb[92].mxu1 %vm1262_vm6, %v10055_v0  ;;  %2053 = vmatprep.mubr.bf16.mxu0 %v1303_v56  ;;  %v1425_v0 = vsel %vm1262_vm6, %v9997_v43, %v1255_v36  ;;  %v1259_v43 = vpop.permute.xlu1 %1258 }
 0x20c   : > { %8890 = vmatprep.mubr.msk.bf16.mxu1 %vm1262_vm6, %v10087_v5 }
 0x212   : > { %2054 = vmatmul.mubr.bf16.gmra.mrb[64].mxu0 %v1421_v38  ;;  %v9095_v38 = vld [vmem:[%s13614_s3 + $0x130] sm:$0xff]  }
 0x213   : > { %8891 = vmatmul.mubr.msk.bf16.gmra.mrb[96].mxu1 %vm1262_vm6, %v10072_v60  ;;  %2061 = vmatprep.mubr.bf16.mxu0 %v1306_v4  ;;  %v1429_v60 = vsel %vm1262_vm6, %v10000_v12, %v1257_v58 }
 0x214   : > { %8894 = vmatprep.mubr.msk.bf16.mxu1 %vm1262_vm6, %v10102_v11  ;;  %8105 = vmatpush3.bf16.msra.mxu0 %v9095_v38 }
 0x215   : > { %8106 = vmatprep.subr.bf16.mxu0 %v9096_v42 }
 0x21a   : > { %2062 = vmatmul.mubr.bf16.gmra.mrb[68].mxu0 %v1425_v0 }
 0x21b   : > { %8895 = vmatmul.mubr.msk.bf16.gmra.mrb[100].mxu1 %vm1262_vm6, %v10084_v21  ;;  %2069 = vmatprep.mubr.bf16.mxu0 %v1436_v54  ;;  %v1433_v21 = vsel %vm1262_vm6, %v13658_v49, %v1259_v43 }
 0x21c   : > { %8898 = vmatprep.mubr.msk.bf16.mxu1 %vm1262_vm6, %v10112_v13 }
 0x222   : > { %2070 = vmatmul.mubr.bf16.gmra.mrb[72].mxu0 %v1429_v60 }
 0x223   : > { %8899 = vmatmul.mubr.msk.bf16.gmra.mrb[104].mxu1 %vm1262_vm6, %v10121_v48  ;;  %2077 = vmatprep.mubr.bf16.mxu0 %v1306_v4 }
 0x224   : > { %8902 = vmatprep.mubr.msk.bf16.mxu1 %vm1262_vm6, %v10109_v35 }
 0x22a   : > { %2078 = vmatmul.mubr.bf16.gmra.mrb[76].mxu0 %v1433_v21 }
 0x22b   : > { %8903 = vmatmul.mubr.msk.bf16.gmra.mrb[108].mxu1 %vm1262_vm6, %v10121_v48 }
 0x246   : > { %v7872_v5 = vpop.f32.mrb[16].mxu1 }
 0x247   : > { %v7873_v11 = vpop.f32.mrb[17].mxu1 }
 0x248   : > { %v7874_v13 = vadd.f32 %v7873_v11, %v7872_v5  ;;  %v7875_v12 = vpop.f32.mrb[18].mxu1 }
 0x249   : > { %v7876_v53 = vpop.f32.mrb[19].mxu1 }
 0x24a   : > { %v10263_v14 = vadd.f32 %v7876_v53, %v7875_v12  ;;  %v1799_v58 = vadd.f32 %v7874_v13, %v10306_v22 }
 0x24c   : > { %v1802_v21 = vadd.f32 %v10263_v14, %v10306_v22 }
 0x24e   : > { %v7878_v2 = vpop.f32.mrb[20].mxu1 }
 0x24f   : > { %v7879_v59 = vpop.f32.mrb[21].mxu1 }
 0x250   : > { %v10265_v63 = vadd.f32 %v7879_v59, %v7878_v2  ;;  %v7881_v35 = vpop.f32.mrb[22].mxu1 }
 0x251   : > { %v7882_v52 = vpop.f32.mrb[23].mxu1 }
 0x252   : > { %v10267_v20 = vadd.f32 %v7882_v52, %v7881_v35  ;;  %v1807_v14 = vadd.f32 %v10265_v63, %v10306_v22 }
 0x256   : > { %v7884_v6 = vpop.f32.mrb[24].mxu1 }
 0x257   : > { %v7885_v27 = vpop.f32.mrb[25].mxu1 }
 0x258   : > { %v10269_v28 = vadd.f32 %v7885_v27, %v7884_v6  ;;  %v7887_v48 = vpop.f32.mrb[26].mxu1 }
 0x259   : > { %v7888_v31 = vpop.f32.mrb[27].mxu1 }
 0x25a   : > { %v10271_v62 = vadd.f32 %v7888_v31, %v7887_v48 }
 0x25c   : > { %v1818_v39 = vadd.f32 %v10271_v62, %v10306_v22  ;;  %v9099_v62 = vld [vmem:[%s13614_s3 + $0x140] sm:$0xff]  }
 0x25e   : > { %v7890_v47 = vpop.f32.mrb[28].mxu1 }
 0x25f   : > { %v7891_v26 = vpop.f32.mrb[29].mxu1 }
 0x260   : > { %v10279_v19 = vadd.f32 %v7891_v26, %v7890_v47  ;;  %v7893_v15 = vpop.f32.mrb[30].mxu1 }
 0x261   : > { %v7894_v61 = vpop.f32.mrb[31].mxu1 }
 0x262   : > { %v10281_v44 = vadd.f32 %v7894_v61, %v7893_v15 }
 0x266   : > { %v7896_v51 = vpop.f32.mrb[32].mxu1 }
 0x267   : > { %v7897_v29 = vpop.f32.mrb[33].mxu1 }
 0x268   : > { %v10283_v57 = vadd.f32 %v7897_v29, %v7896_v51  ;;  %v7899_v32 = vpop.f32.mrb[34].mxu1  ;;  %v1810_v29 = vadd.f32 %v10267_v20, %v10306_v22  ;;  %v1815_v20 = vadd.f32 %v10269_v28, %v10306_v22 }
 0x269   : > { %v7900_v25 = vpop.f32.mrb[35].mxu1 }
 0x26a   : > { %v10285_v10 = vadd.f32 %v7900_v25, %v7899_v32 }
 0x26e   : > { %v7902_v37 = vpop.f32.mrb[36].mxu1 }
 0x26f   : > { %v7903_v55 = vpop.f32.mrb[37].mxu1 }
 0x270   : > { %v10293_v7 = vadd.f32 %v7903_v55, %v7902_v37  ;;  %v7905_v50 = vpop.f32.mrb[38].mxu1  ;;  %v9097_v55 = vld [vmem:[%s13614_s3 + $0x138] sm:$0xff]  }
 0x271   : > { %v7906_v9 = vpop.f32.mrb[39].mxu1  ;;  %8107 = vmatpush3.bf16.msra.mxu0 %v9097_v55 }
 0x272   : > { %v10295_v56 = vadd.f32 %v7906_v9, %v7905_v50 }
 0x276   : > { %v7908_v16 = vpop.f32.mrb[40].mxu1 }
 0x277   : > { %v7909_v23 = vpop.f32.mrb[41].mxu1 }
 0x278   : > { %v10297_v24 = vadd.f32 %v7909_v23, %v7908_v16  ;;  %v7911_v4 = vpop.f32.mrb[42].mxu1 }
 0x279   : > { %v7912_v40 = vpop.f32.mrb[43].mxu1 }
 0x27a   : > { %v10299_v3 = vadd.f32 %v7912_v40, %v7911_v4 }
 0x27e   : > { %v7914_v17 = vpop.f32.mrb[44].mxu1 }
 0x27f   : > { %v7915_v41 = vpop.f32.mrb[45].mxu1 }
 0x280   : > { %v10301_v18 = vadd.f32 %v7915_v41, %v7914_v17  ;;  %v7917_v33 = vpop.f32.mrb[46].mxu1 }
 0x281   : > { %v7984_v1 = vpop.f32.mrb[16].mxu0  ;;  %v7918_v45 = vpop.f32.mrb[47].mxu1 }
 0x282   : > { %v7985_v36 = vpop.f32.mrb[17].mxu0  ;;  %v10314_v46 = vadd.f32 %v7918_v45, %v7917_v33 }
 0x283   : > { %v7986_v0 = vadd.f32 %v7985_v36, %v7984_v1  ;;  %v7987_v54 = vpop.f32.mrb[18].mxu0 }
 0x284   : > { %v7988_v60 = vpop.f32.mrb[19].mxu0 }
 0x285   : > { %v7989_v43 = vadd.f32 %v7988_v60, %v7987_v54  ;;  %v10317_v49 = vadd.f32 %v7986_v0, %v1799_v58 }
 0x286   : > { %v7920_v5 = vpop.f32.mrb[48].mxu1 }
 0x287   : > { %v7921_v11 = vpop.f32.mrb[49].mxu1  ;;  %v10321_v12 = vadd.f32 %v7989_v43, %v1802_v21  ;;  %v1823_v43 = vadd.f32 %v10279_v19, %v10306_v22  ;;  %v9098_v21 = vld [vmem:[%s13614_s3 + $0x180] sm:$0xff]  }
 0x288   : > { %v10323_v53 = vadd.f32 %v7921_v11, %v7920_v5  ;;  %v7923_v2 = vpop.f32.mrb[50].mxu1  ;;  %8108 = vmatprep.subr.bf16.mxu0 %v9098_v21 }
 0x289   : > { %v7924_v59 = vpop.f32.mrb[51].mxu1  ;;  %8109 = vmatpush3.bf16.msra.mxu0 %v9099_v62 }
 0x28a   : > { %v10325_v35 = vadd.f32 %v7924_v59, %v7923_v2 }
 0x28d   : > { %v7990_v52 = vpop.f32.mrb[20].mxu0 }
 0x28e   : > { %v7926_v13 = vpop.f32.mrb[52].mxu1  ;;  %v7991_v6 = vpop.f32.mrb[21].mxu0 }
 0x28f   : > { %v7927_v27 = vpop.f32.mrb[53].mxu1  ;;  %v7992_v48 = vadd.f32 %v7991_v6, %v7990_v52  ;;  %v7993_v31 = vpop.f32.mrb[22].mxu0 }
 0x290   : > { %v10327_v30 = vadd.f32 %v7927_v27, %v7926_v13  ;;  %v7929_v34 = vpop.f32.mrb[54].mxu1  ;;  %v7994_v47 = vpop.f32.mrb[23].mxu0  ;;  %v1826_v13 = vadd.f32 %v10281_v44, %v10306_v22 }
 0x291   : > { %v7930_v26 = vpop.f32.mrb[55].mxu1  ;;  %v7995_v15 = vadd.f32 %v7994_v47, %v7993_v31  ;;  %v10333_v51 = vadd.f32 %v7992_v48, %v1807_v14 }
 0x292   : > { %v10331_v61 = vadd.f32 %v7930_v26, %v7929_v34 }
 0x293   : > { %v10337_v32 = vadd.f32 %v7995_v15, %v1810_v29  ;;  %v1831_v15 = vadd.f32 %v10283_v57, %v10306_v22 }
 0x295   : > { %v7996_v25 = vpop.f32.mrb[24].mxu0 }
 0x296   : > { %v7932_v8 = vpop.f32.mrb[56].mxu1  ;;  %v7997_v37 = vpop.f32.mrb[25].mxu0 }
 0x297   : > { %v7933_v63 = vpop.f32.mrb[57].mxu1  ;;  %v7998_v50 = vadd.f32 %v7997_v37, %v7996_v25  ;;  %v7999_v9 = vpop.f32.mrb[26].mxu0  ;;  %v1834_v37 = vadd.f32 %v10285_v10, %v10306_v22  ;;  %v9101_v10 = vld [vmem:[%s13614_s3 + $0x148] sm:$0xff]  }
 0x298   : > { %v10345_v16 = vadd.f32 %v7933_v63, %v7932_v8  ;;  %v7935_v23 = vpop.f32.mrb[58].mxu1  ;;  %v8000_v4 = vpop.f32.mrb[27].mxu0 }
 0x299   : > { %v7936_v40 = vpop.f32.mrb[59].mxu1  ;;  %v8001_v17 = vadd.f32 %v8000_v4, %v7999_v9  ;;  %v10351_v33 = vadd.f32 %v7998_v50, %v1815_v20 }
 0x29a   : > { %v10349_v41 = vadd.f32 %v7936_v40, %v7935_v23 }
 0x29b   : > { %v10355_v1 = vadd.f32 %v8001_v17, %v1818_v39  ;;  %v1839_v17 = vadd.f32 %v10293_v7, %v10306_v22  ;;  %v9100_v39 = vld [vmem:[%s13614_s3 + $0x188] sm:$0xff]  }
 0x29c   : > { %8110 = vmatprep.subr.bf16.mxu0 %v9100_v39 }
 0x29d   : > { %v8002_v45 = vpop.f32.mrb[28].mxu0  ;;  %8111 = vmatpush3.bf16.msra.mxu0 %v9101_v10  ;;  %v1858_v10 = vadd.f32 %v10314_v46, %v10306_v22  ;;  %v9104_v46 = vld [vmem:[%s13614_s3 + $0x198] sm:$0xff]  }
 0x29e   : > { %v7938_v38 = vpop.f32.mrb[60].mxu1  ;;  %v8003_v36 = vpop.f32.mrb[29].mxu0 }
 0x29f   : > { %v7939_v0 = vpop.f32.mrb[61].mxu1  ;;  %v8004_v54 = vadd.f32 %v8003_v36, %v8002_v45  ;;  %v8005_v28 = vpop.f32.mrb[30].mxu0 }
 0x2a0   : > { %v10357_v58 = vadd.f32 %v7939_v0, %v7938_v38  ;;  %v7941_v60 = vpop.f32.mrb[62].mxu1  ;;  %v8006_v5 = vpop.f32.mrb[31].mxu0 }
 0x2a1   : > { %v7942_v11 = vpop.f32.mrb[63].mxu1  ;;  %v8007_v2 = vadd.f32 %v8006_v5, %v8005_v28  ;;  %v10369_v52 = vadd.f32 %v8004_v54, %v1823_v43  ;;  %v1842_v28 = vadd.f32 %v10295_v56, %v10306_v22 }
 0x2a2   : > { %v10367_v59 = vadd.f32 %v7942_v11, %v7941_v60 }
 0x2a3   : > { %v10373_v19 = vadd.f32 %v8007_v2, %v1826_v13 }
 0x2a5   : > { %v8008_v6 = vpop.f32.mrb[32].mxu0 }
 0x2a6   : > { %v7944_v27 = vpop.f32.mrb[64].mxu1  ;;  %v8009_v48 = vpop.f32.mrb[33].mxu0 }
 0x2a7   : > { %v7945_v31 = vpop.f32.mrb[65].mxu1  ;;  %v8010_v34 = vadd.f32 %v8009_v48, %v8008_v6  ;;  %v8011_v14 = vpop.f32.mrb[34].mxu0  ;;  %v1847_v6 = vadd.f32 %v10297_v24, %v10306_v22 }
 0x2a8   : > { %v10375_v47 = vadd.f32 %v7945_v31, %v7944_v27  ;;  %v7947_v26 = vpop.f32.mrb[66].mxu1  ;;  %v8012_v29 = vpop.f32.mrb[35].mxu0 }
 0x2a9   : > { %v7948_v25 = vpop.f32.mrb[67].mxu1  ;;  %v8013_v8 = vadd.f32 %v8012_v29, %v8011_v14  ;;  %v10381_v42 = vadd.f32 %v8010_v34, %v1831_v15  ;;  %v1850_v14 = vadd.f32 %v10299_v3, %v10306_v22  ;;  %v9103_v3 = vld [vmem:[%s13614_s3 + $0x150] sm:$0xff]  }
 0x2aa   : > { %v10379_v44 = vadd.f32 %v7948_v25, %v7947_v26 }
 0x2ab   : > { %v10385_v63 = vadd.f32 %v8013_v8, %v1834_v37 }
 0x2ad   : > { %v8014_v55 = vpop.f32.mrb[36].mxu0 }
 0x2ae   : > { %v7950_v50 = vpop.f32.mrb[68].mxu1  ;;  %v8015_v9 = vpop.f32.mrb[37].mxu0 }
 0x2af   : > { %v7951_v23 = vpop.f32.mrb[69].mxu1  ;;  %v8016_v20 = vadd.f32 %v8015_v9, %v8014_v55  ;;  %v8017_v4 = vpop.f32.mrb[38].mxu0  ;;  %v1855_v9 = vadd.f32 %v10301_v18, %v10306_v22 }
 0x2b0   : > { %v10387_v40 = vadd.f32 %v7951_v23, %v7950_v50  ;;  %v7953_v57 = vpop.f32.mrb[70].mxu1  ;;  %v8018_v45 = vpop.f32.mrb[39].mxu0  ;;  %v9102_v23 = vld [vmem:[%s13614_s3 + $0x190] sm:$0xff]  }
 0x2b1   : > { %v7954_v38 = vpop.f32.mrb[71].mxu1  ;;  %v8019_v36 = vadd.f32 %v8018_v45, %v8017_v4  ;;  %v10399_v54 = vadd.f32 %v8016_v20, %v1839_v17  ;;  %8112 = vmatprep.subr.bf16.mxu0 %v9102_v23 }
 0x2b2   : > { %v10397_v0 = vadd.f32 %v7954_v38, %v7953_v57  ;;  %8113 = vmatpush3.bf16.msra.mxu0 %v9103_v3  ;;  %v10481_v3 = vadd.f32 %v10375_v47, %v10306_v22 }
 0x2b3   : > { %v10403_v7 = vadd.f32 %v8019_v36, %v1842_v28  ;;  %8114 = vmatprep.subr.bf16.mxu0 %v9104_v46 }
 0x2b5   : > { %v8020_v60 = vpop.f32.mrb[40].mxu0 }
 0x2b6   : > { %v7956_v43 = vpop.f32.mrb[72].mxu1  ;;  %v8021_v21 = vpop.f32.mrb[41].mxu0 }
 0x2b7   : > { %v7957_v62 = vpop.f32.mrb[73].mxu1  ;;  %v8022_v5 = vadd.f32 %v8021_v21, %v8020_v60  ;;  %v8023_v11 = vpop.f32.mrb[42].mxu0 }
 0x2b8   : > { %v10405_v2 = vadd.f32 %v7957_v62, %v7956_v43  ;;  %v7959_v13 = vpop.f32.mrb[74].mxu1  ;;  %v8024_v27 = vpop.f32.mrb[43].mxu0 }
 0x2b9   : > { %v7960_v48 = vpop.f32.mrb[75].mxu1  ;;  %v8025_v31 = vadd.f32 %v8024_v27, %v8023_v11  ;;  %v10411_v34 = vadd.f32 %v8022_v5, %v1847_v6  ;;  %v1863_v11 = vadd.f32 %v10323_v53, %v10306_v22  ;;  %v1866_v53 = vadd.f32 %v10325_v35, %v10306_v22 }
 0x2ba   : > { %v10409_v56 = vadd.f32 %v7960_v48, %v7959_v13  ;;  %v9105_v13 = vld [vmem:[%s13614_s3 + $0x158] sm:$0xff]  }
 0x2bb   : > { %v10415_v26 = vadd.f32 %v8025_v31, %v1850_v14  ;;  %8115 = vmatpush3.bf16.msra.mxu0 %v9105_v13 }
 0x2bd   : > { %v8026_v15 = vpop.f32.mrb[44].mxu0 }
 0x2be   : > { %v7962_v29 = vpop.f32.mrb[76].mxu1  ;;  %v8027_v25 = vpop.f32.mrb[45].mxu0 }
 0x2bf   : > { %v7963_v8 = vpop.f32.mrb[77].mxu1  ;;  %v8028_v37 = vadd.f32 %v8027_v25, %v8026_v15  ;;  %v8029_v55 = vpop.f32.mrb[46].mxu0  ;;  %v10455_v25 = vadd.f32 %v10331_v61, %v10306_v22  ;;  %v10473_v61 = vadd.f32 %v10349_v41, %v10306_v22 }
 0x2c0   : > { %v10417_v50 = vadd.f32 %v7963_v8, %v7962_v29  ;;  %v7965_v24 = vpop.f32.mrb[78].mxu1  ;;  %v8030_v20 = vpop.f32.mrb[47].mxu0  ;;  %v1871_v29 = vadd.f32 %v10327_v30, %v10306_v22  ;;  %v10469_v30 = vadd.f32 %v10367_v59, %v10306_v22 }
 0x2c1   : > { %v7966_v4 = vpop.f32.mrb[79].mxu1  ;;  %v8031_v57 = vadd.f32 %v8030_v20, %v8029_v55  ;;  %v10429_v39 = vadd.f32 %v8028_v37, %v1855_v9  ;;  %v10465_v55 = vadd.f32 %v10357_v58, %v10306_v22  ;;  %v10485_v58 = vadd.f32 %v10379_v44, %v10306_v22 }
 0x2c2   : > { %v10427_v17 = vadd.f32 %v7966_v4, %v7965_v24 }
 0x2c3   : > { %v10433_v18 = vadd.f32 %v8031_v57, %v1858_v10  ;;  %v10490_v10 = vadd.f32 %v10397_v0, %v10306_v22 }
 0x2c5   : > { %v8032_v45 = vpop.f32.mrb[48].mxu0 }
 0x2c6   : > { %v8876_v38 = vpop.f32.mrb[80].mxu1  ;;  %v8033_v36 = vpop.f32.mrb[49].mxu0 }
 0x2c7   : > { %v2129_v28 = vadd.f32 %v8876_v38, %v10333_v51  ;;  %v2120_v60 = vpop.f32.mrb[81].mxu1  ;;  %v8034_v43 = vadd.f32 %v8033_v36, %v8032_v45  ;;  %v8035_v21 = vpop.f32.mrb[50].mxu0 }
 0x2c8   : > { %v2121_v62 = vadd.f32 %v2120_v60, %v10317_v49  ;;  %v8877_v5 = vpop.f32.mrb[82].mxu1  ;;  %v8036_v6 = vpop.f32.mrb[51].mxu0 }
 0x2c9   : > { %v2132_v51 = vadd.f32 %v8877_v5, %v10337_v32  ;;  %v2123_v27 = vpop.f32.mrb[83].mxu1  ;;  %v8037_v48 = vadd.f32 %v8036_v6, %v8035_v21  ;;  %v10447_v49 = vadd.f32 %v8034_v43, %v1863_v11  ;;  %v2249_v14 = vmax.f32 %v2129_v28, 0.0 }
 0x2ca   : > { %v2124_v31 = vadd.f32 %v2123_v27, %v10321_v12  ;;  %v2247_v32 = vmax.f32 %v2121_v62, 0.0  ;;  %v10461_v12 = vadd.f32 %v10345_v16, %v10306_v22  ;;  %v10477_v16 = vadd.f32 %v10387_v40, %v10306_v22 }
 0x2cb   : > { %v2250_v15 = vmax.f32 %v2132_v51, 0.0  ;;  %v10457_v37 = vadd.f32 %v8037_v48, %v1866_v53  ;;  %v10514_v53 = vadd.f32 %v10409_v56, %v10306_v22 }
 0x2cc   : > { %v2248_v8 = vmax.f32 %v2124_v31, 0.0 }
 0x2cd   : > { %v2280_v35 = vpack.c.bf16 %v2250_v15, %v2249_v14  ;;  %v8038_v24 = vpop.f32.mrb[52].mxu0 }
 0x2ce   : > { %v2279_v9 = vpack.c.bf16 %v2248_v8, %v2247_v32  ;;  %v8880_v23 = vpop.f32.mrb[84].mxu1  ;;  %v8039_v59 = vpop.f32.mrb[53].mxu0 }
 0x2cf   : > { %v2296_v20 = vshrl.u32 %v2280_v35, 16  ;;  %v2360_v4 = vshll.u32 %v2280_v35, 16  ;;  %v2145_v41 = vadd.f32 %v8880_v23, %v10369_v52  ;;  %v2136_v57 = vpop.f32.mrb[85].mxu1  ;;  %v8040_v40 = vadd.f32 %v8039_v59, %v8038_v24  ;;  %v8041_v45 = vpop.f32.mrb[54].mxu0 }
 0x2d0   : > { %v2299_v38 = vshrl.u32 %v2279_v9, 16  ;;  %v2364_v36 = vshll.u32 %v2279_v9, 16  ;;  %v2137_v47 = vadd.f32 %v2136_v57, %v10351_v33  ;;  %v8881_v28 = vpop.f32.mrb[86].mxu1  ;;  %v8042_v60 = vpop.f32.mrb[55].mxu0  ;;  %v10496_v52 = vadd.f32 %v10405_v2, %v10306_v22  ;;  %v10503_v33 = vld [vmem:[%s13614_s3 + $0x220] sm:$0xff]  }
 0x2d1   : > { %v2359_v44 = vrot.slane %v2296_v20, 7  ;;  %v2455_v43 = vrot.slane %v2360_v4, 7  ;;  %v2148_v21 = vadd.f32 %v8881_v28, %v10373_v19  ;;  %v2139_v62 = vpop.f32.mrb[87].mxu1  ;;  %v10498_v5 = vadd.f32 %v8042_v60, %v8041_v45  ;;  %8906 = vmatprep.subr.bf16.mxu0 %v10503_v33 }
 0x2d2   : > { %v2363_v0 = vrot.slane %v2299_v38, 7  ;;  %v2456_v11 = vrot.slane %v2364_v36, 7  ;;  %v2253_v46 = vmax.f32 %v2145_v41, 0.0  ;;  %v2140_v51 = vadd.f32 %v2139_v62, %v10355_v1 }
 0x2d3   : > { %v2362_v13 = vor.u32 %v2360_v4, %v2359_v44  ;;  %v2254_v6 = vmax.f32 %v2148_v21, 0.0  ;;  %v10508_v27 = vsel %vm9478_vm3, %v2359_v44, %v2455_v43  ;;  %v2251_v48 = vmax.f32 %v2137_v47, 0.0 }
 0x2d4   : > { %v2366_v2 = vor.u32 %v2364_v36, %v2363_v0  ;;  %v10510_v31 = vadd.f32 %v8040_v40, %v1871_v29  ;;  %v2252_v15 = vmax.f32 %v2140_v51, 0.0  ;;  %v10525_v32 = vsel %vm9478_vm3, %v2363_v0, %v2456_v11 }
 0x2d5   : > { %v10517_v14 = vpack.c.bf16 %v2254_v6, %v2253_v46  ;;  %v10521_v1 = vsel %vm9478_vm3, %v2296_v20, %v2362_v13  ;;  %v8044_v8 = vpop.f32.mrb[56].mxu0  ;;  %v2527_v24 = vshll.u32 %v10508_v27, 16  ;;  %v10535_v9 = vadd.f32 %v10417_v50, %v10306_v22 }
 0x2d6   : > { %v8884_v29 = vpop.f32.mrb[88].mxu1  ;;  %v10529_v35 = vsel %vm9478_vm3, %v2299_v38, %v2366_v2  ;;  %v2522_v56 = vshll.u32 %v10521_v1, 16  ;;  %v8045_v23 = vpop.f32.mrb[57].mxu0  ;;  %v2281_v20 = vpack.c.bf16 %v2252_v15, %v2251_v48  ;;  %v10543_v57 = vadd.f32 %v10427_v17, %v10306_v22 }
 0x2d7   : > { %v2305_v59 = vshrl.u32 %v10517_v14, 16  ;;  %v2161_v4 = vadd.f32 %v8884_v29, %v10399_v54  ;;  %v2152_v41 = vpop.f32.mrb[89].mxu1  ;;  %2821 = vrot.lane.b32.xlu0 %v10529_v35, %s9334_s22  ;;  %v10545_v40 = vadd.f32 %v8045_v23, %v8044_v8  ;;  %v8047_v45 = vpop.f32.mrb[58].mxu0  ;;  %v2539_v47 = vshll.u32 %v10525_v32, 16 }
 0x2d8   : > { %v2153_v50 = vadd.f32 %v2152_v41, %v10381_v42  ;;  %v8885_v38 = vpop.f32.mrb[90].mxu1  ;;  %v2524_v36 = vrot.slane %v2522_v56, 1  ;;  %v8048_v28 = vpop.f32.mrb[59].mxu0  ;;  %v2302_v60 = vshrl.u32 %v2281_v20, 16  ;;  %v2368_v44 = vshll.u32 %v2281_v20, 16 }
 0x2d9   : > { %v10551_v54 = vrot.slane %v2305_v59, 7  ;;  %v2155_v43 = vpop.f32.mrb[91].mxu1  ;;  %v2520_v22 = vshrl.u32 %v10521_v1, 16  ;;  %v10554_v17 = vadd.f32 %v8048_v28, %v8047_v45  ;;  %v2372_v21 = vshll.u32 %v10517_v14, 16 }
 0x2da   : > { %v2164_v42 = vadd.f32 %v8885_v38, %v10403_v7  ;;  %v2529_v62 = vrot.slane %v2527_v24, 1  ;;  %v2367_v0 = vrot.slane %v2302_v60, 7  ;;  %v2457_v11 = vrot.slane %v2368_v44, 7 }
 0x2db   : > { %v2156_v46 = vadd.f32 %v2155_v43, %v10385_v63  ;;  %2823 = vrot.lane.b32.xlu0 %v10521_v1, %s9334_s22  ;;  %v2532_v13 = vshrl.u32 %v10529_v35, 16  ;;  %v2257_v6 = vmax.f32 %v2161_v4, 0.0  ;;  %v2525_v2 = vor.u32 %v2524_v36, %v2520_v22 }
 0x2dc   : > { %v2258_v51 = vmax.f32 %v2164_v42, 0.0  ;;  %v2534_v48 = vshll.u32 %v10529_v35, 16  ;;  %v2374_v15 = vor.u32 %v2372_v21, %v10551_v54  ;;  %v2370_v8 = vor.u32 %v2368_v44, %v2367_v0 }
 0x2dd   : > { %v2255_v29 = vmax.f32 %v2153_v50, 0.0  ;;  %v2256_v7 = vmax.f32 %v2156_v46, 0.0  ;;  %v8050_v56 = vpop.f32.mrb[60].mxu0  ;;  %v10567_v63 = vsel %vm892_vm4, %v2525_v2, %v2529_v62  ;;  %v10571_v4 = vsel %vm9478_vm3, %v2367_v0, %v2457_v11 }
 0x2de   : > { %v10564_v24 = vpack.c.bf16 %v2258_v51, %v2257_v6  ;;  %13660 = vst [vmem:[#allocation3_spill] sm:$0xff] %v10567_v63  ;;  %v8888_v23 = vpop.f32.mrb[92].mxu1  ;;  %v2536_v20 = vrot.slane %v2534_v48, 1  ;;  %v8051_v41 = vpop.f32.mrb[61].mxu0  ;;  %2791 = vrot.lane.b32.xlu1 %v10567_v63, %s9334_s22  ;;  %v10580_v36 = vsel %vm9478_vm3, %v2302_v60, %v2370_v8  ;;  %v10584_v28 = vadd.f32 %v10498_v5, %v10455_v25 }
 0x2df   : > { %v10573_v45 = vpack.c.bf16 %v2256_v7, %v2255_v29  ;;  %v2177_v50 = vadd.f32 %v8888_v23, %v10429_v39  ;;  %v2168_v38 = vpop.f32.mrb[93].mxu1  ;;  %v10586_v44 = vadd.f32 %v8051_v41, %v8050_v56  ;;  %v8053_v43 = vpop.f32.mrb[62].mxu0  ;;  %2825 = vrot.lane.b32.xlu0 %v10580_v36, %s9334_s22  ;;  %v2458_v0 = vrot.slane %v2372_v21, 7 }
 0x2e0   : > { %v13624_v22 = vshrl.u32 %v10564_v24, 16  ;;  %v2380_v42 = vshll.u32 %v10564_v24, 16  ;;  %v2169_v62 = vadd.f32 %v2168_v38, %v10411_v34  ;;  %v8889_v39 = vpop.f32.mrb[94].mxu1  ;;  %v8054_v60 = vpop.f32.mrb[63].mxu0  ;;  %v2541_v51 = vrot.slane %v2539_v47, 1 }
 0x2e1   : > { %v2308_v11 = vshrl.u32 %v10573_v45, 16  ;;  %v2376_v25 = vshll.u32 %v10573_v45, 16  ;;  %v2180_v5 = vadd.f32 %v8889_v39, %v10433_v18  ;;  %v2171_v46 = vpop.f32.mrb[95].mxu1  ;;  %v10596_v6 = vadd.f32 %v8054_v60, %v8053_v43 }
 0x2e2   : > { %v10602_v34 = vsel %vm9478_vm3, %v2305_v59, %v2374_v15  ;;  %v2551_v2 = vshll.u32 %v10571_v4, 16  ;;  %v2261_v48 = vmax.f32 %v2177_v50, 0.0  ;;  %v2172_v29 = vadd.f32 %v2171_v46, %v10415_v26 }
 0x2e3   : > { %v2375_v21 = vrot.slane %v2308_v11, 7  ;;  %v2262_v8 = vmax.f32 %v2180_v5, 0.0  ;;  %v10608_v18 = vrot.slane %v13624_v22, 7  ;;  %v10610_v7 = vrot.slane %v2380_v42, 7 }
 0x2e4   : > { %v2537_v47 = vor.u32 %v2536_v20, %v2532_v13  ;;  %v2546_v14 = vshll.u32 %v10580_v36, 16  ;;  %v2459_v56 = vrot.slane %v2376_v25, 7  ;;  %v2259_v23 = vmax.f32 %v2169_v62, 0.0 }
 0x2e5   : > { %v10613_v59 = vpack.c.bf16 %v2262_v8, %v2261_v48  ;;  %v2260_v15 = vmax.f32 %v2172_v29, 0.0  ;;  %v2378_v41 = vor.u32 %v2376_v25, %v2375_v21  ;;  %v8056_v45 = vpop.f32.mrb[64].mxu0  ;;  %v2544_v38 = vshrl.u32 %v10580_v36, 16 }
 0x2e6   : > { %v10616_v50 = vsel %vm892_vm4, %v2537_v47, %v2541_v51  ;;  %v8892_v26 = vpop.f32.mrb[96].mxu1  ;;  %v2548_v43 = vrot.slane %v2546_v14, 1  ;;  %v8057_v39 = vpop.f32.mrb[65].mxu0  ;;  %v2553_v48 = vrot.slane %v2551_v2, 1  ;;  %v2382_v47 = vor.u32 %v2380_v42, %v10608_v18 }
 0x2e7   : > { %13661 = vst [vmem:[#allocation4_spill] sm:$0xff] %v10616_v50  ;;  %v13625_v60 = vshrl.u32 %v10613_v59, 16  ;;  %v13627_v13 = vshll.u32 %v10613_v59, 16  ;;  %v10621_v20 = vpack.c.bf16 %v2260_v15, %v2259_v23  ;;  %2793 = vrot.lane.b32.xlu1 %v10616_v50, %s9334_s22  ;;  %v2193_v62 = vadd.f32 %v8892_v26, %v10510_v31  ;;  %v2184_v25 = vpop.f32.mrb[97].mxu1  ;;  %v8059_v46 = vpop.f32.mrb[66].mxu0 }
 0x2e8   : > { %v10626_v5 = vadd.f32 %v8057_v39, %v8056_v45  ;;  %v2549_v51 = vor.u32 %v2548_v43, %v2544_v38  ;;  %v2185_v8 = vadd.f32 %v2184_v25, %v10447_v49  ;;  %v8893_v29 = vpop.f32.mrb[98].mxu1  ;;  %v8060_v14 = vpop.f32.mrb[67].mxu0  ;;  %v10634_v22 = vsel %vm9478_vm3, %v10551_v54, %v2458_v0 }
 0x2e9   : > { %v13626_v23 = vshrl.u32 %v10621_v20, 16  ;;  %v2187_v15 = vpop.f32.mrb[99].mxu1  ;;  %v2556_v31 = vshrl.u32 %v10602_v34, 16  ;;  %v10637_v45 = vadd.f32 %v8060_v14, %v8059_v46  ;;  %v10641_v2 = vrot.slane %v13625_v60, 7 }
 0x2ea   : > { %v10644_v49 = vsel %vm892_vm4, %v2549_v51, %v2553_v48  ;;  %v10648_v42 = vsel %vm9478_vm3, %v2308_v11, %v2378_v41  ;;  %v10652_v26 = vrot.slane %v13627_v13, 7  ;;  %v2384_v54 = vshll.u32 %v10621_v20, 16 }
 0x2eb   : > { %13662 = vst [vmem:[#allocation2_spill] sm:$0xff] %v10644_v49  ;;  %2827 = vrot.lane.b32.xlu1 %v10602_v34, %s9334_s22  ;;  %v2265_v0 = vmax.f32 %v2193_v62, 0.0  ;;  %2795 = vrot.lane.b32.xlu0 %v10644_v49, %s9334_s22  ;;  %v2196_v38 = vadd.f32 %v8893_v29, %v10584_v28  ;;  %v2263_v43 = vmax.f32 %v2185_v8, 0.0  ;;  %v2188_v39 = vadd.f32 %v2187_v15, %v10457_v37 }
 0x2ec   : > { %v2558_v11 = vshll.u32 %v10602_v34, 16  ;;  %v2563_v41 = vshll.u32 %v10634_v22, 16  ;;  %v10665_v25 = vrot.slane %v13626_v23, 7  ;;  %v2048_v62 = vadd.f32 %v10586_v44, %v10465_v55 }
 0x2ed   : > { %v2266_v46 = vmax.f32 %v2196_v38, 0.0  ;;  %v10671_v51 = vsel %vm9478_vm3, %v2375_v21, %v2459_v56  ;;  %v8062_v28 = vpop.f32.mrb[68].mxu0  ;;  %v2264_v48 = vmax.f32 %v2188_v39, 0.0  ;;  %v13663_v29 = vshrl.u32 %v10564_v24, 16 }
 0x2ee   : > { %v2560_v8 = vrot.slane %v2558_v11, 1  ;;  %v2565_v37 = vrot.slane %v2563_v41, 1  ;;  %v8896_v15 = vpop.f32.mrb[100].mxu1  ;;  %v8063_v60 = vpop.f32.mrb[69].mxu0  ;;  %v2570_v44 = vshll.u32 %v10648_v42, 16  ;;  %v2575_v21 = vshll.u32 %v10671_v51, 16 }
 0x2ef   : > { %v10677_v14 = vsel %vm9478_vm3, %v13663_v29, %v2382_v47  ;;  %v10679_v38 = vpack.c.bf16 %v2266_v46, %v2265_v0  ;;  %2829 = vrot.lane.b32.xlu1 %v10648_v42, %s9334_s22  ;;  %v10683_v55 = vadd.f32 %v8896_v15, %v2048_v62  ;;  %v2200_v56 = vpop.f32.mrb[101].mxu1  ;;  %v8064_v39 = vadd.f32 %v8063_v60, %v8062_v28  ;;  %v8065_v24 = vpop.f32.mrb[70].mxu0 }
 0x2f0   : > { %v10687_v11 = vpack.c.bf16 %v2264_v48, %v2263_v43  ;;  %v2561_v47 = vor.u32 %v2560_v8, %v2556_v31  ;;  %v2040_v41 = vadd.f32 %v10545_v40, %v10461_v12  ;;  %v8897_v0 = vpop.f32.mrb[102].mxu1  ;;  %v8066_v46 = vpop.f32.mrb[71].mxu0  ;;  %v2568_v15 = vshrl.u32 %v10648_v42, 16 }
 0x2f1   : > { %v13629_v29 = vshrl.u32 %v10679_v38, 16  ;;  %v13631_v62 = vshll.u32 %v10679_v38, 16  ;;  %v2572_v23 = vrot.slane %v2570_v44, 1  ;;  %v2203_v13 = vpop.f32.mrb[103].mxu1  ;;  %v2386_v49 = vor.u32 %v2384_v54, %v10665_v25 }
 0x2f2   : > { %v10695_v60 = vadd.f32 %v8066_v46, %v8065_v24  ;;  %v13630_v43 = vshrl.u32 %v10687_v11, 16  ;;  %v10699_v31 = vsel %vm892_vm4, %v2561_v47, %v2565_v37  ;;  %v13665_v12 = vshll.u32 %v10613_v59, 16  ;;  %v9108_v47 = vld [vmem:[%s13614_s3 + $0x1a0] sm:$0xff]  }
 0x2f3   : > { %13664 = vst [vmem:[#allocation5_spill] sm:$0xff] %v10699_v31  ;;  %v2461_v28 = vrot.slane %v2384_v54, 7  ;;  %2797 = vrot.lane.b32.xlu0 %v10699_v31, %s9334_s22  ;;  %2831 = vrot.lane.b32.xlu1 %v10677_v14, %s9334_s22  ;;  %v2573_v48 = vor.u32 %v2572_v23, %v2568_v15  ;;  %v2577_v8 = vrot.slane %v2575_v21, 1  ;;  %v2392_v44 = vshll.u32 %v10687_v11, 16  ;;  %v9107_v54 = vld [vmem:[%s13614_s3 + $0x1e0] sm:$0xff]  }
 0x2f4   : > { %v2390_v40 = vor.u32 %v13665_v12, %v10641_v2  ;;  %v2269_v24 = vmax.f32 %v10683_v55, 0.0  ;;  %v2201_v46 = vadd.f32 %v2200_v56, %v2040_v41  ;;  %v2051_v37 = vadd.f32 %v10596_v6, %v10469_v30  ;;  %8212 = vmatprep.subr.bf16.mxu1 %v9107_v54 }
 0x2f5   : > { %v10720_v23 = vrot.slane %v13629_v29, 7  ;;  %v10724_v21 = vrot.slane %v13631_v62, 7  ;;  %v10727_v55 = vsel %vm892_vm4, %v2573_v48, %v2577_v8  ;;  %v2043_v30 = vadd.f32 %v10554_v17, %v10473_v61  ;;  %v8068_v56 = vpop.f32.mrb[72].mxu0  ;;  %8213 = vmatpush3.bf16.msra.mxu1 %v9108_v47 }
 0x2f6   : > { %13666 = vst [vmem:[#allocation6_spill] sm:$0xff] %v10727_v55  ;;  %v10733_v6 = vrot.slane %v13630_v43, 7  ;;  %v2212_v41 = vadd.f32 %v8897_v0, %v2051_v37  ;;  %v13667_v15 = vshrl.u32 %v10621_v20, 16  ;;  %v10745_v48 = vsel %vm9478_vm3, %v10608_v18, %v10610_v7  ;;  %v8900_v8 = vpop.f32.mrb[104].mxu1  ;;  %v8069_v61 = vpop.f32.mrb[73].mxu0 }
 0x2f7   : > { %2799 = vrot.lane.b32.xlu0 %v10727_v55, %s9334_s22  ;;  %v2267_v17 = vmax.f32 %v2201_v46, 0.0  ;;  %v2204_v0 = vadd.f32 %v2203_v13, %v2043_v30  ;;  %v2582_v20 = vshll.u32 %v10677_v14, 16  ;;  %v2216_v37 = vpop.f32.mrb[105].mxu1  ;;  %v8071_v18 = vpop.f32.mrb[74].mxu0  ;;  %v2580_v54 = vshrl.u32 %v10677_v14, 16 }
 0x2f8   : > { %v10739_v12 = vsel %vm9478_vm3, %v13667_v15, %v2386_v49  ;;  %v2587_v49 = vshll.u32 %v10745_v48, 16  ;;  %v10753_v15 = vadd.f32 %v8069_v61, %v8068_v56  ;;  %v2270_v7 = vmax.f32 %v2212_v41, 0.0  ;;  %v8901_v43 = vpop.f32.mrb[106].mxu1  ;;  %v8072_v46 = vpop.f32.mrb[75].mxu0 }
 0x2f9   : > { %2833 = vrot.lane.b32.xlu1 %v10739_v12, %s9334_s22  ;;  %v2064_v29 = vadd.f32 %v8064_v39, %v10477_v16  ;;  %v2268_v13 = vmax.f32 %v2204_v0, 0.0  ;;  %v2584_v30 = vrot.slane %v2582_v20, 1  ;;  %v13668_v62 = vshrl.u32 %v10613_v59, 16  ;;  %v2219_v41 = vpop.f32.mrb[107].mxu1 }
 0x2fa   : > { %v10766_v56 = vsel %vm9478_vm3, %v10665_v25, %v2461_v28  ;;  %v10768_v61 = vadd.f32 %v8072_v46, %v8071_v18  ;;  %v10770_v16 = vpack.c.bf16 %v2270_v7, %v2269_v24  ;;  %v2589_v39 = vrot.slane %v2587_v49, 1 }
 0x2fb   : > { %v10761_v55 = vsel %vm9478_vm3, %v13668_v62, %v2390_v40  ;;  %v2225_v47 = vadd.f32 %v8900_v8, %v2064_v29  ;;  %v10772_v0 = vpack.c.bf16 %v2268_v13, %v2267_v17  ;;  %v2585_v20 = vor.u32 %v2584_v30, %v2580_v54  ;;  %v9109_v29 = vld [vmem:[%s13614_s3 + $0x1e8] sm:$0xff]  }
 0x2fc   : > { %v2594_v59 = vshll.u32 %v10739_v12, 16  ;;  %v2599_v62 = vshll.u32 %v10766_v56, 16  ;;  %v2394_v25 = vor.u32 %v2392_v44, %v10733_v6  ;;  %v2463_v40 = vrot.slane %v2392_v44, 7  ;;  %v9110_v8 = vld [vmem:[%s13614_s3 + $0x1a8] sm:$0xff]   ;;  %8214 = vmatprep.subr.bf16.mxu1 %v9109_v29 }
 0x2fd   : > { %2835 = vrot.lane.b32.xlu1 %v10761_v55, %s9334_s22  ;;  %v2056_v24 = vadd.f32 %v10626_v5, %v10481_v3  ;;  %v13637_v17 = vshrl.u32 %v10772_v0, 16  ;;  %v10790_v49 = vsel %vm892_vm4, %v2585_v20, %v2589_v39  ;;  %v2592_v44 = vshrl.u32 %v10739_v12, 16  ;;  %v8074_v46 = vpop.f32.mrb[76].mxu0  ;;  %8215 = vmatpush3.bf16.msra.mxu1 %v9110_v8 }
 0x2fe   : > { %13669 = vst [vmem:[#allocation7_spill] sm:$0xff] %v10790_v49  ;;  %v2596_v18 = vrot.slane %v2594_v59, 1  ;;  %v13670_v7 = vshll.u32 %v10679_v38, 16  ;;  %v2404_v5 = vshll.u32 %v10770_v16, 16  ;;  %v2400_v54 = vshll.u32 %v10772_v0, 16  ;;  %2801 = vrot.lane.b32.xlu0 %v10790_v49, %s9334_s22  ;;  %v8904_v30 = vpop.f32.mrb[108].mxu1 }
 0x2ff   : > { %v2217_v13 = vadd.f32 %v2216_v37, %v2056_v24  ;;  %v10802_v39 = vrot.slane %v13637_v17, 7  ;;  %v8075_v20 = vpop.f32.mrb[77].mxu0  ;;  %v2601_v28 = vrot.slane %v2599_v62, 1  ;;  %v2232_v31 = vpop.f32.mrb[109].mxu1  ;;  %v13671_v63 = vshrl.u32 %v10770_v16, 16  ;;  %v9112_v62 = vld [vmem:[%s13614_s3 + $0x1f0] sm:$0xff]  }
 0x300   : > { %v2398_v3 = vor.u32 %v13670_v7, %v10720_v23  ;;  %v2597_v59 = vor.u32 %v2596_v18, %v2592_v44  ;;  %v2067_v7 = vadd.f32 %v10695_v60, %v10490_v10  ;;  %v8076_v49 = vadd.f32 %v8075_v20, %v8074_v46  ;;  %v8077_v24 = vpop.f32.mrb[78].mxu0  ;;  %v10812_v17 = vpop.f32.mrb[110].mxu1  ;;  %v9113_v10 = vld [vmem:[%s13614_s3 + $0x1b0] sm:$0xff]   ;;  %8216 = vmatprep.subr.bf16.mxu1 %v9112_v62 }
 0x301   : > { %v10808_v50 = vrot.slane %v13671_v63, 7  ;;  %v2273_v37 = vmax.f32 %v2225_v47, 0.0  ;;  %v2059_v29 = vadd.f32 %v10637_v45, %v10485_v58  ;;  %v2402_v60 = vor.u32 %v2400_v54, %v10802_v39  ;;  %v8078_v47 = vpop.f32.mrb[79].mxu0  ;;  %v2235_v45 = vpop.f32.mrb[111].mxu1  ;;  %8217 = vmatpush3.bf16.msra.mxu1 %v9113_v10 }
 0x302   : > { %v10822_v63 = vsel %vm892_vm4, %v2597_v59, %v2601_v28  ;;  %v2228_v8 = vadd.f32 %v8901_v43, %v2067_v7  ;;  %v13672_v44 = vshrl.u32 %v10687_v11, 16  ;;  %v8079_v18 = vadd.f32 %v8078_v47, %v8077_v24 }
 0x303   : > { %2803 = vrot.lane.b32.xlu0 %v10822_v63, %s9334_s22  ;;  %v2271_v46 = vmax.f32 %v2217_v13, 0.0  ;;  %v2220_v20 = vadd.f32 %v2219_v41, %v2059_v29  ;;  %v10838_v43 = vsel %vm9478_vm3, %v10641_v2, %v10652_v26  ;;  %v2606_v28 = vshll.u32 %v10761_v55, 16 }
 0x304   : > { %v10828_v58 = vsel %vm9478_vm3, %v13672_v44, %v2394_v25  ;;  %v2274_v11 = vmax.f32 %v2228_v8, 0.0  ;;  %v2604_v25 = vshrl.u32 %v10761_v55, 16  ;;  %v2611_v59 = vshll.u32 %v10838_v43, 16 }
 0x305   : > { %2837 = vrot.lane.b32.xlu1 %v10828_v58, %s9334_s22  ;;  %v2272_v7 = vmax.f32 %v2220_v20, 0.0  ;;  %v13673_v41 = vshrl.u32 %v10679_v38, 16  ;;  %v2080_v24 = vadd.f32 %v8076_v49, %v10535_v9  ;;  %v10853_v2 = vsel %vm9478_vm3, %v10733_v6, %v2463_v40  ;;  %v9114_v40 = vld [vmem:[%s13614_s3 + $0x1f8] sm:$0xff]  }
 0x306   : > { %v10855_v26 = vpack.c.bf16 %v2274_v11, %v2273_v37  ;;  %v2608_v29 = vrot.slane %v2606_v28, 1  ;;  %v2616_v62 = vshrl.u32 %v10828_v58, 16  ;;  %v2618_v47 = vshll.u32 %v10828_v58, 16  ;;  %v9115_v49 = vld [vmem:[%s13614_s3 + $0x1b8] sm:$0xff]   ;;  %8218 = vmatprep.subr.bf16.mxu1 %v9114_v40 }
 0x307   : > { %v10847_v13 = vsel %vm9478_vm3, %v13673_v41, %v2398_v3  ;;  %v10859_v38 = vpack.c.bf16 %v2272_v7, %v2271_v46  ;;  %v2241_v3 = vadd.f32 %v8904_v30, %v2080_v24  ;;  %v2623_v9 = vshll.u32 %v10853_v2, 16  ;;  %8219 = vmatpush3.bf16.msra.mxu1 %v9115_v49  ;;  %v9116_v41 = vld [vmem:[%s13614_s3 + $0x200] sm:$0xff]  }
 0x308   : > { %v2072_v6 = vadd.f32 %v10753_v15, %v10496_v52  ;;  %v2335_v37 = vshrl.u32 %v10855_v26, 16  ;;  %v2609_v10 = vor.u32 %v2608_v29, %v2604_v25  ;;  %v2613_v8 = vrot.slane %v2611_v59, 1  ;;  %v9117_v24 = vld [vmem:[%s13614_s3 + $0x1c0] sm:$0xff]   ;;  %8220 = vmatprep.subr.bf16.mxu1 %v9116_v41 }
 0x309   : > { %2839 = vrot.lane.b32.xlu1 %v10847_v13, %s9334_s22  ;;  %v2620_v44 = vrot.slane %v2618_v47, 1  ;;  %v2406_v30 = vor.u32 %v2404_v5, %v10808_v50  ;;  %v2466_v46 = vrot.slane %v2404_v5, 7  ;;  %v2465_v20 = vrot.slane %v2400_v54, 7 }
 0x30a   : > { %v2332_v11 = vshrl.u32 %v10859_v38, 16  ;;  %v10877_v52 = vrot.slane %v2335_v37, 7  ;;  %v10880_v15 = vsel %vm892_vm4, %v2609_v10, %v2613_v8  ;;  %v2625_v7 = vrot.slane %v2623_v9, 1 }
 0x30b   : > { %v2621_v28 = vor.u32 %v2620_v44, %v2616_v62  ;;  %v2412_v25 = vshll.u32 %v10855_v26, 16  ;;  %2805 = vrot.lane.b32.xlu0 %v10880_v15, %s9334_s22  ;;  %v2233_v5 = vadd.f32 %v2232_v31, %v2072_v6  ;;  %v2083_v54 = vadd.f32 %v8079_v18, %v10543_v57  ;;  %8221 = vmatpush3.bf16.msra.mxu1 %v9117_v24 }
 0x30c   : > { %v10883_v59 = vrot.slane %v2332_v11, 7  ;;  %v2408_v29 = vshll.u32 %v10859_v38, 16  ;;  %v2075_v47 = vadd.f32 %v10768_v61, %v10514_v53  ;;  %v13674_v31 = vshrl.u32 %v10772_v0, 16 }
 0x30d   : > { %v10896_v62 = vsel %vm892_vm4, %v2621_v28, %v2625_v7  ;;  %v2414_v18 = vor.u32 %v2412_v25, %v10877_v52  ;;  %v2277_v9 = vmax.f32 %v2241_v3, 0.0  ;;  %v2244_v6 = vadd.f32 %v10812_v17, %v2083_v54 }
 0x30e   : > { %v10904_v57 = vsel %vm9478_vm3, %v13674_v31, %v2402_v60  ;;  %v10916_v53 = vsel %vm9478_vm3, %v10720_v23, %v10724_v21  ;;  %v2410_v61 = vor.u32 %v2408_v29, %v10883_v59  ;;  %v2236_v0 = vadd.f32 %v2235_v45, %v2075_v47  ;;  %v9118_v21 = vld [vmem:[%s13614_s3 + $0x208] sm:$0xff]  }
 0x30f   : > { %2841 = vrot.lane.b32.xlu1 %v10904_v57, %s9334_s22  ;;  %v2630_v60 = vshll.u32 %v10847_v13, 16  ;;  %v2635_v38 = vshll.u32 %v10916_v53, 16  ;;  %2807 = vrot.lane.b32.xlu0 %v10896_v62, %s9334_s22  ;;  %v2275_v17 = vmax.f32 %v2233_v5, 0.0  ;;  %v2278_v3 = vmax.f32 %v2244_v6, 0.0  ;;  %v9119_v45 = vld [vmem:[%s13614_s3 + $0x1c8] sm:$0xff]   ;;  %v9120_v6 = vld [vmem:[%s13614_s3 + $0x210] sm:$0xff]  }
 0x310   : > { %v2628_v40 = vshrl.u32 %v10847_v13, 16  ;;  %v10927_v23 = vsel %vm9478_vm3, %v10802_v39, %v2465_v20  ;;  %v2276_v49 = vmax.f32 %v2236_v0, 0.0  ;;  %v13675_v8 = vshrl.u32 %v10770_v16, 16  ;;  %8222 = vmatprep.subr.bf16.mxu1 %v9118_v21  ;;  %v9121_v0 = vld [vmem:[%s13614_s3 + $0x1d0] sm:$0xff]  }
 0x311   : > { %v2632_v10 = vrot.slane %v2630_v60, 1  ;;  %v2642_v28 = vshll.u32 %v10904_v57, 16  ;;  %v10942_v39 = vpack.c.bf16 %v2278_v3, %v2277_v9  ;;  %v2637_v20 = vrot.slane %v2635_v38, 1  ;;  %8223 = vmatpush3.bf16.msra.mxu1 %v9119_v45 }
 0x312   : > { %v10939_v44 = vsel %vm9478_vm3, %v13675_v8, %v2406_v30  ;;  %v2640_v7 = vshrl.u32 %v10904_v57, 16  ;;  %v2647_v5 = vshll.u32 %v10927_v23, 16  ;;  %v2293_v54 = vpack.c.bf16 %v2276_v49, %v2275_v17  ;;  %8224 = vmatprep.subr.bf16.mxu1 %v9120_v6 }
 0x313   : > { %2843 = vrot.lane.b32.xlu1 %v10939_v44, %s9334_s22  ;;  %v2633_v41 = vor.u32 %v2632_v10, %v2628_v40  ;;  %v2644_v16 = vrot.slane %v2642_v28, 1  ;;  %v10951_v30 = vsel %vm9478_vm3, %v10808_v50, %v2466_v46  ;;  %v2467_v24 = vrot.slane %v2408_v29, 7  ;;  %v9122_v10 = vld [vmem:[%s13614_s3 + $0x218] sm:$0xff]  }
 0x314   : > { %v2649_v47 = vrot.slane %v2647_v5, 1  ;;  %v10955_v31 = vsel %vm9478_vm3, %v2332_v11, %v2410_v61  ;;  %v2654_v9 = vshll.u32 %v10939_v44, 16  ;;  %v2338_v60 = vshrl.u32 %v2293_v54, 16 }
 0x315   : > { %v2416_v50 = vshll.u32 %v2293_v54, 16  ;;  %v10965_v46 = vsel %vm892_vm4, %v2633_v41, %v2637_v20  ;;  %v2645_v29 = vor.u32 %v2644_v16, %v2640_v7  ;;  %v2652_v11 = vshrl.u32 %v10939_v44, 16  ;;  %8225 = vmatpush3.bf16.msra.mxu1 %v9121_v0 }
 0x316   : > { %2809 = vrot.lane.b32.xlu0 %v10965_v46, %s9334_s22  ;;  %v2656_v61 = vrot.slane %v2654_v9, 1  ;;  %v2659_v38 = vshll.u32 %v10951_v30, 16  ;;  %v2415_v17 = vrot.slane %v2338_v60, 7  ;;  %v10980_v40 = vsel %vm9478_vm3, %v2335_v37, %v2414_v18  ;;  %v9123_v37 = vld [vmem:[%s13614_s3 + $0x1d8] sm:$0xff]   ;;  %8226 = vmatprep.subr.bf16.mxu1 %v9122_v10 }
 0x317   : > { %2845 = vrot.lane.b32.xlu1 %v10955_v31, %s9334_s22  ;;  %v10974_v3 = vsel %vm892_vm4, %v2645_v29, %v2649_v47  ;;  %v2468_v21 = vrot.slane %v2412_v25, 7  ;;  %v10987_v49 = vsel %vm9478_vm3, %v10883_v59, %v2467_v24  ;;  %v2469_v8 = vrot.slane %v2416_v50, 7 }
 0x318   : > { %v2657_v45 = vor.u32 %v2656_v61, %v2652_v11  ;;  %v2418_v18 = vor.u32 %v2416_v50, %v2415_v17  ;;  %v2666_v26 = vshll.u32 %v10955_v31, 16  ;;  %v2671_v25 = vshll.u32 %v10987_v49, 16 }
 0x319   : > { %v2661_v59 = vrot.slane %v2659_v38, 1  ;;  %v2678_v28 = vshll.u32 %v10980_v40, 16  ;;  %v2664_v20 = vshrl.u32 %v10955_v31, 16  ;;  %v2341_v54 = vshrl.u32 %v10942_v39, 16  ;;  %8227 = vmatpush3.bf16.msra.mxu1 %v9123_v37 }
 0x31a   : > { %2811 = vrot.lane.b32.xlu0 %v10974_v3, %s9334_s22  ;;  %v2668_v7 = vrot.slane %v2666_v26, 1  ;;  %v11005_v5 = vsel %vm9478_vm3, %v2338_v60, %v2418_v18  ;;  %v2673_v16 = vrot.slane %v2671_v25, 1  ;;  %v11014_v24 = vsel %vm9478_vm3, %v10877_v52, %v2468_v21 }
 0x31b   : > { %2847 = vrot.lane.b32.xlu1 %v10980_v40, %s9334_s22  ;;  %v11009_v41 = vsel %vm892_vm4, %v2657_v45, %v2661_v59  ;;  %v2680_v9 = vrot.slane %v2678_v28, 1  ;;  %v2732_v6 = vrot.slane %v10529_v35, 1  ;;  %v11019_v0 = vsel %vm9478_vm3, %v2415_v17, %v2469_v8 }
 0x31c   : > { %v2669_v47 = vor.u32 %v2668_v7, %v2664_v20  ;;  %v2676_v60 = vshrl.u32 %v10980_v40, 16  ;;  %v2690_v52 = vshll.u32 %v11005_v5, 16  ;;  %v2683_v29 = vshll.u32 %v11014_v24, 16 }
 0x31d   : > { %v2733_v11 = vrot.slane %v10525_v32, 1  ;;  %v2695_v61 = vshll.u32 %v11019_v0, 16  ;;  %v2688_v38 = vshrl.u32 %v11005_v5, 16  ;;  %v2419_v21 = vrot.slane %v2341_v54, 7 }
 0x31e   : > { %2813 = vrot.lane.b32.xlu0 %v11009_v41, %s9334_s22  ;;  %v11028_v50 = vsel %vm892_vm4, %v2669_v47, %v2673_v16  ;;  %v2692_v17 = vrot.slane %v2690_v52, 1  ;;  %v2681_v45 = vor.u32 %v2680_v9, %v2676_v60  ;;  %v2420_v18 = vshll.u32 %v10942_v39, 16 }
 0x31f   : > { %2849 = vrot.lane.b32.xlu1 %v11005_v5, %s9334_s22  ;;  %v11035_v10 = vsel %vm1103_vm5, %v2732_v6, %v2733_v11  ;;  %v2685_v32 = vrot.slane %v2683_v29, 1  ;;  %v2697_v8 = vrot.slane %v2695_v61, 1  ;;  %v2735_v28 = vrot.slane %v10580_v36, 1 }
 0x320   : > { %v2693_v37 = vor.u32 %v2692_v17, %v2688_v38  ;;  %v2422_v26 = vor.u32 %v2420_v18, %v2419_v21  ;;  %v2736_v20 = vrot.slane %v10571_v4, 1  ;;  %v2729_v7 = vrot.slane %v10521_v1, 1 }
 0x321   : > { %v11043_v25 = vsel %vm892_vm4, %v2681_v45, %v2685_v32  ;;  %v2741_v47 = vrot.slane %v10648_v42, 1  ;;  %v2730_v9 = vrot.slane %v10508_v27, 1  ;;  %v2742_v4 = vrot.slane %v10671_v51, 1 }
 0x322   : > { %2815 = vrot.lane.b32.xlu0 %v11028_v50, %s9334_s22  ;;  %v11046_v59 = vsel %vm892_vm4, %v2693_v37, %v2697_v8  ;;  %v11056_v39 = vsel %vm9478_vm3, %v2341_v54, %v2422_v26  ;;  %v11060_v16 = vsel %vm1103_vm5, %v2735_v28, %v2736_v20  ;;  %v2738_v6 = vrot.slane %v10602_v34, 1 }
 0x323   : > { %2853 = vrot.lane.b32.xlu1 %v11035_v10, %s9334_s22  ;;  %v11070_v54 = vsel %vm1103_vm5, %v2729_v7, %v2730_v9  ;;  %v11074_v60 = vsel %vm1103_vm5, %v2741_v47, %v2742_v4  ;;  %v2747_v52 = vrot.slane %v10739_v12, 1  ;;  %v2739_v27 = vrot.slane %v10634_v22, 1 }
 0x324   : > { %v2748_v51 = vrot.slane %v10766_v56, 1  ;;  %v2744_v11 = vrot.slane %v10677_v14, 1  ;;  %v2753_v38 = vrot.slane %v10828_v58, 1  ;;  %v2745_v22 = vrot.slane %v10745_v48, 1 }
 0x325   : > { %v11084_v29 = vsel %vm1103_vm5, %v2738_v6, %v2739_v27  ;;  %v2754_v56 = vrot.slane %v10853_v2, 1  ;;  %v2470_v17 = vrot.slane %v2420_v18, 7  ;;  %v2750_v45 = vrot.slane %v10761_v55, 1 }
 0x326   : > { %2817 = vrot.lane.b32.xlu0 %v11043_v25, %s9334_s22  ;;  %v11088_v61 = vsel %vm1103_vm5, %v2747_v52, %v2748_v51  ;;  %v11099_v37 = vsel %vm1103_vm5, %v2744_v11, %v2745_v22  ;;  %v2759_v8 = vrot.slane %v10904_v57, 1  ;;  %v2777_v26 = vshll.u32 %v11056_v39, 16 }
 0x327   : > { %2819 = vrot.lane.b32.xlu1 %v11046_v59, %s9334_s22  ;;  %v11102_v32 = vsel %vm1103_vm5, %v2753_v38, %v2754_v56  ;;  %v2751_v48 = vrot.slane %v10838_v43, 1  ;;  %v2760_v2 = vrot.slane %v10927_v23, 1  ;;  %v2518_v28 = vsel %vm9478_vm3, %v2419_v21, %v2470_v17 }
 0x328   : > { %v2756_v20 = vrot.slane %v10847_v13, 1  ;;  %v2765_v47 = vrot.slane %v10955_v31, 1  ;;  %v2779_v9 = vrot.slane %v2777_v26, 1  ;;  %v2757_v43 = vrot.slane %v10916_v53, 1 }
 0x329   : > { %v11113_v18 = vsel %vm1103_vm5, %v2750_v45, %v2751_v48  ;;  %v11119_v7 = vsel %vm1103_vm5, %v2759_v8, %v2760_v2  ;;  %v2766_v23 = vrot.slane %v10987_v49, 1  ;;  %v2775_v21 = vshrl.u32 %v11056_v39, 16 }
 0x32a   : > { %2851 = vrot.lane.b32.xlu0 %v11056_v39, %s9334_s22  ;;  %v2782_v4 = vshll.u32 %v2518_v28, 16  ;;  %v11130_v6 = vsel %vm1103_vm5, %v2756_v20, %v2757_v43  ;;  %v2762_v52 = vrot.slane %v10939_v44, 1  ;;  %v2763_v53 = vrot.slane %v10951_v30, 1 }
 0x32b   : > { %2857 = vrot.lane.b32.xlu1 %v11060_v16, %s9334_s22  ;;  %v11134_v27 = vsel %vm1103_vm5, %v2765_v47, %v2766_v23  ;;  %v2780_v51 = vor.u32 %v2779_v9, %v2775_v21  ;;  %v2768_v38 = vrot.slane %v10980_v40, 1  ;;  %v2788_v56 = vrot.slane %v11056_v39, 1  ;;  %v9111_v9 = vld [vmem:[%s13614_s3 + $0x228] sm:$0xff]   ;;  %v9124_v23 = vld [vmem:[%s13614_s3 + $0x230] sm:$0xff]  }
 0x32c   : > { %v2784_v49 = vrot.slane %v2782_v4, 1  ;;  %v11142_v11 = vsel %vm1103_vm5, %v2762_v52, %v2763_v53  ;;  %v2769_v17 = vrot.slane %v11014_v24, 1  ;;  %v2789_v30 = vrot.slane %v2518_v28, 1 }
 0x32d   : > { %v2771_v8 = vrot.slane %v11005_v5, 1  ;;  %v2772_v48 = vrot.slane %v11019_v0, 1 }
 0x32e   : > { %2855 = vrot.lane.b32.xlu0 %v11070_v54, %s9334_s22  ;;  %v11146_v22 = vsel %vm892_vm4, %v2780_v51, %v2784_v49  ;;  %v11155_v45 = vsel %vm1103_vm5, %v2768_v38, %v2769_v17  ;;  %v11159_v26 = vsel %vm1103_vm5, %v2788_v56, %v2789_v30 }
 0x32f   : > { %2861 = vrot.lane.b32.xlu1 %v11074_v60, %s9334_s22  ;;  %v11167_v2 = vsel %vm1103_vm5, %v2771_v8, %v2772_v48 }
 0x332   : > { %2859 = vrot.lane.b32.xlu0 %v11084_v29, %s9334_s22 }
 0x333   : > { %2865 = vrot.lane.b32.xlu1 %v11088_v61, %s9334_s22 }
 0x336   : > { %2863 = vrot.lane.b32.xlu0 %v11099_v37, %s9334_s22 }
 0x337   : > { %2869 = vrot.lane.b32.xlu1 %v11102_v32, %s9334_s22 }
 0x33a   : > { %2867 = vrot.lane.b32.xlu0 %v11113_v18, %s9334_s22 }
 0x33b   : > { %2873 = vrot.lane.b32.xlu1 %v11119_v7, %s9334_s22 }
 0x33e   : > { %2871 = vrot.lane.b32.xlu0 %v11130_v6, %s9334_s22 }
 0x33f   : > { %2877 = vrot.lane.b32.xlu1 %v11134_v27, %s9334_s22 }
 0x342   : > { %2875 = vrot.lane.b32.xlu0 %v11142_v11, %s9334_s22 }
 0x343   : > { %2885 = vrot.lane.b32.xlu1 %v11146_v22, %s9334_s22 }
 0x346   : > { %2879 = vrot.lane.b32.xlu0 %v11155_v45, %s9334_s22 }
 0x347   : > { %2883 = vrot.lane.b32.xlu1 %v11159_v26, %s9334_s22 }
 0x349   : > { %v2822_v24 = vpop.permute.xlu0 %2821 }
 0x34a   : > { %2881 = vrot.lane.b32.xlu0 %v11167_v2, %s9334_s22  ;;  %v2934_v28 = vsel %vm1262_vm6, %v11070_v54, %v2822_v24 }
 0x34b   : > { %3422 = vmatprep.mubr.bf16.mxu0 %v2934_v28 }
 0x34d   : > { %v2824_v20 = vpop.permute.xlu0 %2823 }
 0x34e   : > { %v2938_v43 = vsel %vm1262_vm6, %v11035_v10, %v2824_v20 }
 0x350   : > { %v2792_v47 = vpop.permute.xlu1 %2791 }
 0x351   : > { %v2888_v0 = vsel %vm1262_vm6, %v10521_v1, %v2792_v47  ;;  %v2826_v21 = vpop.permute.xlu0 %2825  ;;  %v9125_v1 = vld [vmem:[%s13614_s3 + $0x238] sm:$0xff]  }
 0x352   : > { %3423 = vmatmul.mubr.bf16.vlgmr.msra.gmra.mrb[80].mxu0 %v2888_v0  ;;  %3583 = vmatprep.mubr.bf16.mxu1 %v2888_v0 }
 0x353   : > { %8907 = vmatpush3.bf16.msra.mxu0 %v10503_v33  ;;  %3430 = vmatprep.mubr.bf16.mxu0 %v2938_v43  ;;  %v2941_v33 = vsel %vm1262_vm6, %v11070_v54, %v2826_v21 }
 0x354   : > { %8908 = vmatprep.subr.bf16.mxu0 %v9111_v9 }
 0x357   : > { %8909 = vmatpush3.bf16.msra.mxu0 %v9111_v9 }
 0x358   : > { %8910 = vmatprep.subr.bf16.mxu0 %v9124_v23 }
 0x359   : > { %v2794_v4 = vpop.permute.xlu1 %2793 }
 0x35a   : > { %v2891_v52 = vsel %vm1262_vm6, %v10529_v35, %v2794_v4 }
 0x35b   : > { %3431 = vmatmul.mubr.bf16.gmra.mrb[84].mxu0 %v2891_v52 }
 0x35c   : > { %3438 = vmatprep.mubr.bf16.mxu0 %v2941_v33  ;;  %8911 = vmatpush3.bf16.msra.mxu0 %v9124_v23 }
 0x35d   : > { %v2828_v10 = vpop.permute.xlu1 %2827  ;;  %8912 = vmatprep.subr.bf16.mxu0 %v9125_v1  ;;  %v2796_v51 = vpop.permute.xlu0 %2795 }
 0x35e   : > { %v2945_v49 = vsel %vm1262_vm6, %v11060_v16, %v2828_v10  ;;  %v2894_v30 = vsel %vm1262_vm6, %v10580_v36, %v2796_v51 }
 0x360   : > { %8913 = vmatpush3.bf16.msra.mxu0 %v9125_v1 }
 0x361   : > { %v2830_v53 = vpop.permute.xlu1 %2829 }
 0x362   : > { %v2949_v8 = vsel %vm1262_vm6, %v11084_v29, %v2830_v53 }
 0x363   : > { %3439 = vmatmul.mubr.bf16.gmra.mrb[88].mxu0 %v2888_v0 }
 0x364   : > { %3446 = vmatprep.mubr.bf16.mxu0 %v2945_v49 }
 0x365   : > { %v2798_v38 = vpop.permute.xlu0 %2797  ;;  %v2832_v56 = vpop.permute.xlu1 %2831 }
 0x366   : > { %v2897_v28 = vsel %vm1262_vm6, %v10602_v34, %v2798_v38  ;;  %v2953_v20 = vsel %vm1262_vm6, %v11074_v60, %v2832_v56 }
 0x369   : > { %v2800_v35 = vpop.permute.xlu0 %2799 }
 0x36a   : > { %v2900_v36 = vsel %vm1262_vm6, %v10648_v42, %v2800_v35 }
 0x36b   : > { %v2834_v17 = vpop.permute.xlu1 %2833  ;;  %3447 = vmatmul.mubr.bf16.gmra.mrb[92].mxu0 %v2894_v30 }
 0x36c   : > { %3454 = vmatprep.mubr.bf16.mxu0 %v2949_v8  ;;  %v2957_v43 = vsel %vm1262_vm6, %v11099_v37, %v2834_v17  ;;  %v13676_v8 = vld [vmem:[#allocation4_spill] sm:$0xff] }
 0x36f   : > { %v2836_v48 = vpop.permute.xlu1 %2835 }
 0x370   : > { %v2802_v24 = vpop.permute.xlu0 %2801  ;;  %v2961_v52 = vsel %vm1262_vm6, %v11088_v61, %v2836_v48 }
 0x371   : > { %v2903_v1 = vsel %vm1262_vm6, %v10677_v14, %v2802_v24 }
 0x373   : > { %3455 = vmatmul.mubr.bf16.gmra.mrb[96].mxu0 %v2897_v28 }
 0x374   : > { %3462 = vmatprep.mubr.bf16.mxu0 %v2953_v20 }
 0x375   : > { %v2804_v9 = vpop.permute.xlu0 %2803 }
 0x376   : > { %v2906_v53 = vsel %vm1262_vm6, %v10739_v12, %v2804_v9 }
 0x377   : > { %v2838_v47 = vpop.permute.xlu1 %2837 }
 0x378   : > { %v2965_v49 = vsel %vm1262_vm6, %v11113_v18, %v2838_v47 }
 0x37b   : > { %v2840_v0 = vpop.permute.xlu1 %2839  ;;  %3463 = vmatmul.mubr.bf16.gmra.mrb[100].mxu0 %v2900_v36 }
 0x37c   : > { %3470 = vmatprep.mubr.bf16.mxu0 %v2957_v43  ;;  %v2969_v24 = vsel %vm1262_vm6, %v11102_v32, %v2840_v0 }
 0x37d   : > { %v2806_v23 = vpop.permute.xlu0 %2805 }
 0x37e   : > { %v2909_v35 = vsel %vm1262_vm6, %v10761_v55, %v2806_v23  ;;  %v13677_v23 = vld [vmem:[#allocation3_spill] sm:$0xff] }
 0x381   : > { %v2842_v21 = vpop.permute.xlu1 %2841  ;;  %v2808_v4 = vpop.permute.xlu0 %2807 }
 0x382   : > { %v2912_v47 = vsel %vm1262_vm6, %v10828_v58, %v2808_v4  ;;  %v2973_v9 = vsel %vm1262_vm6, %v11130_v6, %v2842_v21  ;;  %v13678_v4 = vld [vmem:[#allocation2_spill] sm:$0xff] }
 0x383   : > { %3471 = vmatmul.mubr.bf16.gmra.mrb[104].mxu0 %v2903_v1 }
 0x384   : > { %3478 = vmatprep.mubr.bf16.mxu0 %v2961_v52 }
 0x385   : > { %v2844_v34 = vpop.permute.xlu1 %2843 }
 0x386   : > { %v2977_v0 = vsel %vm1262_vm6, %v11119_v7, %v2844_v34 }
 0x388   : > { %v2810_v33 = vpop.permute.xlu0 %2809 }
 0x389   : > { %v2846_v10 = vpop.permute.xlu1 %2845 }
 0x38b   : > { %3479 = vmatmul.mubr.bf16.gmra.mrb[108].mxu0 %v2906_v53 }
 0x38c   : > { %v2812_v42 = vpop.permute.xlu0 %2811  ;;  %3486 = vmatprep.mubr.bf16.mxu0 %v2965_v49 }
 0x38d   : > { %v2848_v51 = vpop.permute.xlu1 %2847  ;;  %v2918_v49 = vsel %vm1262_vm6, %v10904_v57, %v2812_v42  ;;  %v13680_v57 = vld [vmem:[#allocation6_spill] sm:$0xff] }
 0x390   : > { %v2814_v38 = vpop.permute.xlu0 %2813 }
 0x391   : > { %v2850_v56 = vpop.permute.xlu1 %2849  ;;  %v2921_v34 = vsel %vm1262_vm6, %v10939_v44, %v2814_v38  ;;  %v13681_v44 = vld [vmem:[#allocation7_spill] sm:$0xff] }
 0x393   : > { %3487 = vmatmul.mubr.bf16.gmra.mrb[112].mxu0 %v2909_v35 }
 0x394   : > { %v2816_v14 = vpop.permute.xlu0 %2815  ;;  %3494 = vmatprep.mubr.bf16.mxu0 %v2969_v24 }
 0x395   : > { %v2854_v17 = vpop.permute.xlu1 %2853 }
 0x396   : > { %v2997_v48 = vsel %vm1262_vm6, %v13676_v8, %v2854_v17 }
 0x397   : > { %3584 = vmatmul.mubr.bf16.vlgmr.msra.gmra.mrb[112].mxu1 %v2997_v48 }
 0x398   : > { %3591 = vmatprep.mubr.bf16.mxu1 %v2894_v30  ;;  %v2818_v12 = vpop.permute.xlu0 %2817  ;;  %v2915_v30 = vsel %vm1262_vm6, %v10847_v13, %v2810_v33  ;;  %v13679_v13 = vld [vmem:[#allocation5_spill] sm:$0xff] }
 0x399   : > { %v2820_v55 = vpop.permute.xlu1 %2819 }
 0x39b   : > { %3495 = vmatmul.mubr.bf16.gmra.mrb[116].mxu0 %v2912_v47 }
 0x39c   : > { %v2852_v20 = vpop.permute.xlu0 %2851  ;;  %3502 = vmatprep.mubr.bf16.mxu0 %v2973_v9 }
 0x39d   : > { %v2858_v58 = vpop.permute.xlu1 %2857 }
 0x39e   : > { %v3005_v21 = vsel %vm1262_vm6, %v13678_v4, %v2858_v58  ;;  %v9127_v4 = vld [vmem:[%s13614_s3 + $0x240] sm:$0xff]  }
 0x3a0   : > { %v2856_v43 = vpop.permute.xlu0 %2855 }
 0x3a1   : > { %v3001_v52 = vsel %vm1262_vm6, %v13677_v23, %v2856_v43  ;;  %v2862_v8 = vpop.permute.xlu1 %2861 }
 0x3a2   : > { %3592 = vmatmul.mubr.bf16.gmra.mrb[116].mxu1 %v3001_v52  ;;  %v3013_v42 = vsel %vm1262_vm6, %v13680_v57, %v2862_v8 }
 0x3a3   : > { %3599 = vmatprep.mubr.bf16.mxu1 %v2897_v28  ;;  %3503 = vmatmul.mubr.bf16.gmra.mrb[120].mxu0 %v2915_v30  ;;  %v2981_v28 = vsel %vm1262_vm6, %v11142_v11, %v2846_v10  ;;  %v2924_v10 = vsel %vm1262_vm6, %v10955_v31, %v2816_v14 }
 0x3a4   : > { %3510 = vmatprep.mubr.bf16.mxu0 %v2977_v0  ;;  %v2860_v17 = vpop.permute.xlu0 %2859 }
 0x3a5   : > { %v3009_v33 = vsel %vm1262_vm6, %v13679_v13, %v2860_v17  ;;  %v2866_v24 = vpop.permute.xlu1 %2865 }
 0x3a6   : > { %v3021_v31 = vsel %vm1262_vm6, %v10822_v63, %v2866_v24 }
 0x3a8   : > { %v2864_v48 = vpop.permute.xlu0 %2863 }
 0x3a9   : > { %v3017_v38 = vsel %vm1262_vm6, %v13681_v44, %v2864_v48 }
 0x3aa   : > { %3600 = vmatmul.mubr.bf16.gmra.mrb[120].mxu1 %v3005_v21 }
 0x3ab   : > { %3607 = vmatprep.mubr.bf16.mxu1 %v2900_v36  ;;  %3511 = vmatmul.mubr.bf16.gmra.mrb[124].mxu0 %v2918_v49  ;;  %v2985_v36 = vsel %vm1262_vm6, %v11134_v27, %v2848_v51  ;;  %v2927_v51 = vsel %vm1262_vm6, %v10980_v40, %v2818_v12 }
 0x3ac   : > { %3518 = vmatprep.mubr.bf16.mxu0 %v2981_v28  ;;  %v2868_v14 = vpop.permute.xlu0 %2867 }
 0x3ad   : > { %v3025_v40 = vsel %vm1262_vm6, %v10880_v15, %v2868_v14 }
 0x3b2   : > { %3608 = vmatmul.mubr.bf16.gmra.mrb[124].mxu1 %v3009_v33 }
 0x3b3   : > { %3615 = vmatprep.mubr.bf16.mxu1 %v2903_v1  ;;  %3519 = vmatmul.mubr.bf16.gmra.mrb[128].mxu0 %v2921_v34  ;;  %v2989_v1 = vsel %vm1262_vm6, %v11155_v45, %v2850_v56  ;;  %v2930_v56 = vsel %vm1262_vm6, %v11005_v5, %v2820_v55  ;;  %v2872_v5 = vpop.permute.xlu0 %2871 }
 0x3b4   : > { %3526 = vmatprep.mubr.bf16.mxu0 %v2985_v36  ;;  %v3033_v15 = vsel %vm1262_vm6, %v10965_v46, %v2872_v5 }
 0x3ba   : > { %3616 = vmatmul.mubr.bf16.gmra.mrb[128].mxu1 %v3013_v42  ;;  %v9128_v42 = vld [vmem:[%s13614_s3 + $0x288] sm:$0xff]  }
 0x3bb   : > { %3623 = vmatprep.mubr.bf16.mxu1 %v2906_v53  ;;  %3527 = vmatmul.mubr.bf16.gmra.mrb[132].mxu0 %v2924_v10  ;;  %v2993_v53 = vsel %vm1262_vm6, %v11167_v2, %v2852_v20 }
 0x3bc   : > { %3534 = vmatprep.mubr.bf16.mxu0 %v2989_v1 }
 0x3c2   : > { %3624 = vmatmul.mubr.bf16.gmra.mrb[132].mxu1 %v3017_v38 }
 0x3c3   : > { %3631 = vmatprep.mubr.bf16.mxu1 %v2909_v35  ;;  %3535 = vmatmul.mubr.bf16.gmra.mrb[136].mxu0 %v2927_v51  ;;  %v2870_v35 = vpop.permute.xlu1 %2869 }
 0x3c4   : > { %3542 = vmatprep.mubr.bf16.mxu0 %v2993_v53  ;;  %v3029_v63 = vsel %vm1262_vm6, %v10896_v62, %v2870_v35 }
 0x3ca   : > { %3632 = vmatmul.mubr.bf16.gmra.mrb[136].mxu1 %v3021_v31 }
 0x3cb   : > { %3639 = vmatprep.mubr.bf16.mxu1 %v2912_v47  ;;  %3543 = vmatmul.mubr.bf16.gmra.mrb[140].mxu0 %v2930_v56 }
 0x3cc   : > { %8914 = vmatprep.mubr.msk.bf16.mxu0 %vm1262_vm6, %v11070_v54  ;;  %v2876_v54 = vpop.permute.xlu0 %2875 }
 0x3cd   : > { %v3041_v46 = vsel %vm1262_vm6, %v11009_v41, %v2876_v54  ;;  %v9131_v54 = vld [vmem:[%s13614_s3 + $0x250] sm:$0xff]  }
 0x3d2   : > { %3640 = vmatmul.mubr.bf16.gmra.mrb[140].mxu1 %v3025_v40 }
 0x3d3   : > { %3647 = vmatprep.mubr.bf16.mxu1 %v2915_v30  ;;  %8915 = vmatmul.mubr.msk.bf16.vlgmr.msra.gmra.mrb[144].mxu0 %vm1262_vm6, %v11060_v16  ;;  %v2874_v16 = vpop.permute.xlu1 %2873  ;;  %v9126_v30 = vld [vmem:[%s13614_s3 + $0x280] sm:$0xff]  }
 0x3d4   : > { %8918 = vmatprep.mubr.msk.bf16.mxu0 %vm1262_vm6, %v11084_v29  ;;  %v3037_v62 = vsel %vm1262_vm6, %v10974_v3, %v2874_v16  ;;  %v2880_v29 = vpop.permute.xlu0 %2879  ;;  %8344 = vmatprep.subr.bf16.mxu1 %v9126_v30 }
 0x3d5   : > { %8345 = vmatpush3.bf16.msra.mxu1 %v9127_v4 }
 0x3d6   : > { %8346 = vmatprep.subr.bf16.mxu1 %v9128_v42 }
 0x3da   : > { %3648 = vmatmul.mubr.bf16.gmra.mrb[144].mxu1 %v3029_v63 }
 0x3db   : > { %3655 = vmatprep.mubr.bf16.mxu1 %v2918_v49  ;;  %8919 = vmatmul.mubr.msk.bf16.gmra.mrb[148].mxu0 %vm1262_vm6, %v11074_v60  ;;  %v2878_v60 = vpop.permute.xlu1 %2877 }
 0x3dc   : > { %8922 = vmatprep.mubr.msk.bf16.mxu0 %vm1262_vm6, %v11099_v37  ;;  %v3045_v3 = vsel %vm1262_vm6, %v11028_v50, %v2878_v60  ;;  %v2882_v50 = vpop.permute.xlu0 %2881 }
 0x3df   : > { %v2886_v41 = vpop.permute.xlu1 %2885 }
 0x3e0   : > { %v3060_v37 = vsel %vm1262_vm6, %v11056_v39, %v2886_v41 }
 0x3e2   : > { %3656 = vmatmul.mubr.bf16.gmra.mrb[148].mxu1 %v3033_v15 }
 0x3e3   : > { %3663 = vmatprep.mubr.bf16.mxu1 %v2921_v34  ;;  %8923 = vmatmul.mubr.msk.bf16.gmra.mrb[152].mxu0 %vm1262_vm6, %v11088_v61  ;;  %v3049_v61 = vsel %vm1262_vm6, %v11043_v25, %v2880_v29  ;;  %v2884_v25 = vpop.permute.xlu1 %2883 }
 0x3e4   : > { %8926 = vmatprep.mubr.msk.bf16.mxu0 %vm1262_vm6, %v11113_v18  ;;  %v3057_v39 = vsel %vm1262_vm6, %v11146_v22, %v2884_v25 }
 0x3ea   : > { %3664 = vmatmul.mubr.bf16.gmra.mrb[152].mxu1 %v3037_v62  ;;  %v9130_v62 = vld [vmem:[%s13614_s3 + $0x290] sm:$0xff]  }
 0x3eb   : > { %3671 = vmatprep.mubr.bf16.mxu1 %v2924_v10  ;;  %8927 = vmatmul.mubr.msk.bf16.gmra.mrb[156].mxu0 %vm1262_vm6, %v11102_v32  ;;  %v3053_v32 = vsel %vm1262_vm6, %v11046_v59, %v2882_v50  ;;  %v9129_v10 = vld [vmem:[%s13614_s3 + $0x248] sm:$0xff]  }
 0x3ec   : > { %8930 = vmatprep.mubr.msk.bf16.mxu0 %vm1262_vm6, %v11130_v6  ;;  %8347 = vmatpush3.bf16.msra.mxu1 %v9129_v10  ;;  %v9132_v10 = vld [vmem:[%s13614_s3 + $0x298] sm:$0xff]  }
 0x3ed   : > { %8348 = vmatprep.subr.bf16.mxu1 %v9130_v62 }
 0x3f0   : > { %8349 = vmatpush3.bf16.msra.mxu1 %v9131_v54 }
 0x3f1   : > { %8350 = vmatprep.subr.bf16.mxu1 %v9132_v10 }
 0x3f2   : > { %3672 = vmatmul.mubr.bf16.gmra.mrb[156].mxu1 %v3041_v46 }
 0x3f3   : > { %3679 = vmatprep.mubr.bf16.mxu1 %v2927_v51  ;;  %8931 = vmatmul.mubr.msk.bf16.gmra.mrb[160].mxu0 %vm1262_vm6, %v11119_v7 }
 0x3f4   : > { %8934 = vmatprep.mubr.msk.bf16.mxu0 %vm1262_vm6, %v11142_v11 }
 0x3fa   : > { %3680 = vmatmul.mubr.bf16.gmra.mrb[160].mxu1 %v3045_v3  ;;  %v11362_v3 = vld [vmem:[%s13615_s4 + $0x1] ss:$0 sm:$0xff] }
 0x3fb   : > { %3687 = vmatprep.mubr.bf16.mxu1 %v2930_v56  ;;  %8935 = vmatmul.mubr.msk.bf16.gmra.mrb[164].mxu0 %vm1262_vm6, %v11134_v27 }
 0x3fc   : > { %8938 = vmatprep.mubr.msk.bf16.mxu0 %vm1262_vm6, %v11155_v45 }
 0x402   : > { %3688 = vmatmul.mubr.bf16.gmra.mrb[164].mxu1 %v3049_v61 }
 0x403   : > { %3695 = vmatprep.mubr.bf16.mxu1 %v3060_v37  ;;  %8939 = vmatmul.mubr.msk.bf16.gmra.mrb[168].mxu0 %vm1262_vm6, %v11167_v2 }
 0x404   : > { %8942 = vmatprep.mubr.msk.bf16.mxu0 %vm1262_vm6, %v11159_v26 }
 0x40a   : > { %3696 = vmatmul.mubr.bf16.gmra.mrb[168].mxu1 %v3053_v32 }
 0x40b   : > { %3703 = vmatprep.mubr.bf16.mxu1 %v2930_v56  ;;  %8943 = vmatmul.mubr.msk.bf16.gmra.mrb[172].mxu0 %vm1262_vm6, %v11167_v2 }
 0x412   : > { %3704 = vmatmul.mubr.bf16.gmra.mrb[172].mxu1 %v3057_v39 }
 0x425   : > { %v8116_v18 = vpop.f32.mrb[80].mxu0 }
 0x426   : > { %v8117_v7 = vpop.f32.mrb[81].mxu0 }
 0x427   : > { %v11309_v6 = vadd.f32 %v8117_v7, %v8116_v18  ;;  %v8119_v27 = vpop.f32.mrb[82].mxu0 }
 0x428   : > { %v8120_v11 = vpop.f32.mrb[83].mxu0 }
 0x429   : > { %v11311_v45 = vadd.f32 %v8120_v11, %v8119_v27  ;;  %v3425_v25 = vadd.f32 %v11309_v6, %v11362_v3 }
 0x42e   : > { %v8122_v26 = vpop.f32.mrb[84].mxu0 }
 0x42f   : > { %v8123_v59 = vpop.f32.mrb[85].mxu0 }
 0x430   : > { %v11313_v12 = vadd.f32 %v8123_v59, %v8122_v26  ;;  %v8125_v20 = vpop.f32.mrb[86].mxu0  ;;  %v3428_v26 = vadd.f32 %v11311_v45, %v11362_v3 }
 0x431   : > { %v8126_v47 = vpop.f32.mrb[87].mxu0 }
 0x432   : > { %v11315_v2 = vadd.f32 %v8126_v47, %v8125_v20  ;;  %v3433_v4 = vadd.f32 %v11313_v12, %v11362_v3  ;;  %v9133_v12 = vld [vmem:[%s13614_s3 + $0x258] sm:$0xff]  }
 0x433   : > { %8351 = vmatpush3.bf16.msra.mxu1 %v9133_v12 }
 0x436   : > { %v8128_v9 = vpop.f32.mrb[88].mxu0 }
 0x437   : > { %v8129_v55 = vpop.f32.mrb[89].mxu0 }
 0x438   : > { %v11317_v22 = vadd.f32 %v8129_v55, %v8128_v9  ;;  %v8131_v43 = vpop.f32.mrb[90].mxu0 }
 0x439   : > { %v8132_v23 = vpop.f32.mrb[91].mxu0 }
 0x43a   : > { %v11319_v52 = vadd.f32 %v8132_v23, %v8131_v43 }
 0x43c   : > { %v3444_v62 = vadd.f32 %v11319_v52, %v11362_v3 }
 0x43e   : > { %v8134_v0 = vpop.f32.mrb[92].mxu0 }
 0x43f   : > { %v8135_v58 = vpop.f32.mrb[93].mxu0 }
 0x440   : > { %v11327_v21 = vadd.f32 %v8135_v58, %v8134_v0  ;;  %v8137_v49 = vpop.f32.mrb[94].mxu0 }
 0x441   : > { %v8138_v28 = vpop.f32.mrb[95].mxu0 }
 0x442   : > { %v11329_v17 = vadd.f32 %v8138_v28, %v8137_v49 }
 0x446   : > { %v8140_v13 = vpop.f32.mrb[96].mxu0 }
 0x447   : > { %v8141_v33 = vpop.f32.mrb[97].mxu0 }
 0x448   : > { %v11331_v34 = vadd.f32 %v8141_v33, %v8140_v13  ;;  %v8143_v36 = vpop.f32.mrb[98].mxu0  ;;  %v3436_v33 = vadd.f32 %v11315_v2, %v11362_v3 }
 0x449   : > { %v8144_v8 = vpop.f32.mrb[99].mxu0 }
 0x44a   : > { %v11333_v57 = vadd.f32 %v8144_v8, %v8143_v36 }
 0x44e   : > { %v8146_v1 = vpop.f32.mrb[100].mxu0 }
 0x44f   : > { %v8147_v48 = vpop.f32.mrb[101].mxu0 }
 0x450   : > { %v11341_v44 = vadd.f32 %v8147_v48, %v8146_v1  ;;  %v8149_v38 = vpop.f32.mrb[102].mxu0 }
 0x451   : > { %v8150_v51 = vpop.f32.mrb[103].mxu0 }
 0x452   : > { %v11343_v53 = vadd.f32 %v8150_v51, %v8149_v38 }
 0x456   : > { %v8152_v24 = vpop.f32.mrb[104].mxu0 }
 0x457   : > { %v8153_v31 = vpop.f32.mrb[105].mxu0 }
 0x458   : > { %v11345_v56 = vadd.f32 %v8153_v31, %v8152_v24  ;;  %v8155_v14 = vpop.f32.mrb[106].mxu0 }
 0x459   : > { %v8156_v40 = vpop.f32.mrb[107].mxu0 }
 0x45a   : > { %v11347_v35 = vadd.f32 %v8156_v40, %v8155_v14  ;;  %v3441_v14 = vadd.f32 %v11317_v22, %v11362_v3  ;;  %v9135_v22 = vld [vmem:[%s13614_s3 + $0x260] sm:$0xff]  }
 0x45e   : > { %v8158_v63 = vpop.f32.mrb[108].mxu0 }
 0x45f   : > { %v8159_v5 = vpop.f32.mrb[109].mxu0 }
 0x460   : > { %v11349_v15 = vadd.f32 %v8159_v5, %v8158_v63  ;;  %v8161_v16 = vpop.f32.mrb[110].mxu0 }
 0x461   : > { %v8162_v46 = vpop.f32.mrb[111].mxu0 }
 0x462   : > { %v11357_v60 = vadd.f32 %v8162_v46, %v8161_v16 }
 0x466   : > { %v8164_v29 = vpop.f32.mrb[112].mxu0 }
 0x467   : > { %v8165_v61 = vpop.f32.mrb[113].mxu0 }
 0x468   : > { %v11364_v50 = vadd.f32 %v8165_v61, %v8164_v29  ;;  %v8167_v32 = vpop.f32.mrb[114].mxu0 }
 0x469   : > { %v8168_v7 = vpop.f32.mrb[115].mxu0 }
 0x46a   : > { %v8228_v41 = vpop.f32.mrb[112].mxu1  ;;  %v11368_v11 = vadd.f32 %v8168_v7, %v8167_v32  ;;  %v3449_v7 = vadd.f32 %v11327_v21, %v11362_v3 }
 0x46b   : > { %v8229_v37 = vpop.f32.mrb[113].mxu1 }
 0x46c   : > { %v8230_v39 = vadd.f32 %v8229_v37, %v8228_v41  ;;  %v8231_v18 = vpop.f32.mrb[114].mxu1  ;;  %v9134_v37 = vld [vmem:[%s13614_s3 + $0x2a0] sm:$0xff]  }
 0x46d   : > { %v8232_v27 = vpop.f32.mrb[115].mxu1  ;;  %8352 = vmatprep.subr.bf16.mxu1 %v9134_v37 }
 0x46e   : > { %v8233_v59 = vadd.f32 %v8232_v27, %v8231_v18  ;;  %v11372_v20 = vadd.f32 %v8230_v39, %v3425_v25  ;;  %v8170_v9 = vpop.f32.mrb[116].mxu0  ;;  %8353 = vmatpush3.bf16.msra.mxu1 %v9135_v22 }
 0x46f   : > { %v8171_v55 = vpop.f32.mrb[117].mxu0 }
 0x470   : > { %v11374_v47 = vadd.f32 %v8233_v59, %v3428_v26  ;;  %v11376_v43 = vadd.f32 %v8171_v55, %v8170_v9  ;;  %v8173_v23 = vpop.f32.mrb[118].mxu0  ;;  %v3452_v55 = vadd.f32 %v11329_v17, %v11362_v3 }
 0x471   : > { %v8174_v6 = vpop.f32.mrb[119].mxu0 }
 0x472   : > { %v11378_v30 = vadd.f32 %v8174_v6, %v8173_v23 }
 0x475   : > { %v8234_v0 = vpop.f32.mrb[116].mxu1 }
 0x476   : > { %v8235_v58 = vpop.f32.mrb[117].mxu1  ;;  %v8176_v13 = vpop.f32.mrb[120].mxu0 }
 0x477   : > { %v8236_v49 = vadd.f32 %v8235_v58, %v8234_v0  ;;  %v8237_v45 = vpop.f32.mrb[118].mxu1  ;;  %v8177_v8 = vpop.f32.mrb[121].mxu0 }
 0x478   : > { %v8238_v28 = vpop.f32.mrb[119].mxu1  ;;  %v11389_v1 = vadd.f32 %v8177_v8, %v8176_v13  ;;  %v8179_v48 = vpop.f32.mrb[122].mxu0 }
 0x479   : > { %v8239_v36 = vadd.f32 %v8238_v28, %v8237_v45  ;;  %v11384_v42 = vadd.f32 %v8236_v49, %v3433_v4  ;;  %v8180_v38 = vpop.f32.mrb[123].mxu0 }
 0x47a   : > { %v11396_v2 = vadd.f32 %v8180_v38, %v8179_v48  ;;  %v3460_v48 = vadd.f32 %v11333_v57, %v11362_v3 }
 0x47b   : > { %v11394_v51 = vadd.f32 %v8239_v36, %v3436_v33  ;;  %v3457_v33 = vadd.f32 %v11331_v34, %v11362_v3  ;;  %v9137_v34 = vld [vmem:[%s13614_s3 + $0x268] sm:$0xff]  }
 0x47d   : > { %v8240_v24 = vpop.f32.mrb[120].mxu1 }
 0x47e   : > { %v8241_v31 = vpop.f32.mrb[121].mxu1  ;;  %v8182_v16 = vpop.f32.mrb[124].mxu0 }
 0x47f   : > { %v8242_v40 = vadd.f32 %v8241_v31, %v8240_v24  ;;  %v8243_v63 = vpop.f32.mrb[122].mxu1  ;;  %v8183_v46 = vpop.f32.mrb[125].mxu0 }
 0x480   : > { %v8244_v5 = vpop.f32.mrb[123].mxu1  ;;  %v11404_v41 = vadd.f32 %v8183_v46, %v8182_v16  ;;  %v8185_v61 = vpop.f32.mrb[126].mxu0 }
 0x481   : > { %v8245_v54 = vadd.f32 %v8244_v5, %v8243_v63  ;;  %v11402_v29 = vadd.f32 %v8242_v40, %v3441_v14  ;;  %v8186_v32 = vpop.f32.mrb[127].mxu0  ;;  %v9136_v40 = vld [vmem:[%s13614_s3 + $0x2a8] sm:$0xff]  }
 0x482   : > { %v11414_v39 = vadd.f32 %v8186_v32, %v8185_v61  ;;  %8354 = vmatprep.subr.bf16.mxu1 %v9136_v40  ;;  %v3468_v32 = vadd.f32 %v11343_v53, %v11362_v3 }
 0x483   : > { %v11412_v25 = vadd.f32 %v8245_v54, %v3444_v62  ;;  %8355 = vmatpush3.bf16.msra.mxu1 %v9137_v34  ;;  %v3465_v54 = vadd.f32 %v11341_v44, %v11362_v3  ;;  %v3481_v34 = vadd.f32 %v11349_v15, %v11362_v3  ;;  %v9140_v15 = vld [vmem:[%s13614_s3 + $0x2b8] sm:$0xff]  }
 0x485   : > { %v8246_v52 = vpop.f32.mrb[124].mxu1 }
 0x486   : > { %v8247_v18 = vpop.f32.mrb[125].mxu1  ;;  %v8188_v9 = vpop.f32.mrb[128].mxu0 }
 0x487   : > { %v8248_v27 = vadd.f32 %v8247_v18, %v8246_v52  ;;  %v8249_v26 = vpop.f32.mrb[126].mxu1  ;;  %v8189_v6 = vpop.f32.mrb[129].mxu0 }
 0x488   : > { %v8250_v59 = vpop.f32.mrb[127].mxu1  ;;  %v11422_v58 = vadd.f32 %v8189_v6, %v8188_v9  ;;  %v8191_v4 = vpop.f32.mrb[130].mxu0  ;;  %v3473_v6 = vadd.f32 %v11345_v56, %v11362_v3  ;;  %v9139_v56 = vld [vmem:[%s13614_s3 + $0x270] sm:$0xff]  }
 0x489   : > { %v8251_v23 = vadd.f32 %v8250_v59, %v8249_v26  ;;  %v11420_v0 = vadd.f32 %v8248_v27, %v3449_v7  ;;  %v8192_v49 = vpop.f32.mrb[131].mxu0 }
 0x48a   : > { %v11426_v28 = vadd.f32 %v8192_v49, %v8191_v4 }
 0x48b   : > { %v11424_v45 = vadd.f32 %v8251_v23, %v3452_v55 }
 0x48d   : > { %v8252_v21 = vpop.f32.mrb[128].mxu1 }
 0x48e   : > { %v8253_v13 = vpop.f32.mrb[129].mxu1  ;;  %v8194_v10 = vpop.f32.mrb[132].mxu0 }
 0x48f   : > { %v8254_v36 = vadd.f32 %v8253_v13, %v8252_v21  ;;  %v8255_v8 = vpop.f32.mrb[130].mxu1  ;;  %v8195_v38 = vpop.f32.mrb[133].mxu0  ;;  %v3476_v13 = vadd.f32 %v11347_v35, %v11362_v3 }
 0x490   : > { %v8256_v17 = vpop.f32.mrb[131].mxu1  ;;  %v11434_v31 = vadd.f32 %v8195_v38, %v8194_v10  ;;  %v8197_v14 = vpop.f32.mrb[134].mxu0 }
 0x491   : > { %v8257_v12 = vadd.f32 %v8256_v17, %v8255_v8  ;;  %v11432_v24 = vadd.f32 %v8254_v36, %v3457_v33  ;;  %v8198_v63 = vpop.f32.mrb[135].mxu0 }
 0x492   : > { %v11444_v16 = vadd.f32 %v8198_v63, %v8197_v14 }
 0x493   : > { %v11442_v5 = vadd.f32 %v8257_v12, %v3460_v48  ;;  %v9138_v48 = vld [vmem:[%s13614_s3 + $0x2b0] sm:$0xff]  }
 0x494   : > { %8356 = vmatprep.subr.bf16.mxu1 %v9138_v48  ;;  %v11532_v48 = vadd.f32 %v11434_v31, %v11362_v3  ;;  %v11540_v31 = vadd.f32 %v11444_v16, %v11362_v3 }
 0x495   : > { %v8258_v57 = vpop.f32.mrb[132].mxu1  ;;  %8357 = vmatpush3.bf16.msra.mxu1 %v9139_v56 }
 0x496   : > { %v8259_v62 = vpop.f32.mrb[133].mxu1  ;;  %v8200_v22 = vpop.f32.mrb[136].mxu0  ;;  %8358 = vmatprep.subr.bf16.mxu1 %v9140_v15 }
 0x497   : > { %v8260_v46 = vadd.f32 %v8259_v62, %v8258_v57  ;;  %v8261_v61 = vpop.f32.mrb[134].mxu1  ;;  %v8201_v18 = vpop.f32.mrb[137].mxu0 }
 0x498   : > { %v8262_v37 = vpop.f32.mrb[135].mxu1  ;;  %v11452_v27 = vadd.f32 %v8201_v18, %v8200_v22  ;;  %v8203_v26 = vpop.f32.mrb[138].mxu0 }
 0x499   : > { %v8263_v52 = vadd.f32 %v8262_v37, %v8261_v61  ;;  %v11450_v7 = vadd.f32 %v8260_v46, %v3465_v54  ;;  %v8204_v59 = vpop.f32.mrb[139].mxu0  ;;  %v3484_v46 = vadd.f32 %v11357_v60, %v11362_v3 }
 0x49a   : > { %v11456_v55 = vadd.f32 %v8204_v59, %v8203_v26  ;;  %v9141_v26 = vld [vmem:[%s13614_s3 + $0x278] sm:$0xff]  }
 0x49b   : > { %v11454_v9 = vadd.f32 %v8263_v52, %v3468_v32  ;;  %8359 = vmatpush3.bf16.msra.mxu1 %v9141_v26 }
 0x49d   : > { %v8264_v44 = vpop.f32.mrb[136].mxu1 }
 0x49e   : > { %v8265_v23 = vpop.f32.mrb[137].mxu1  ;;  %v8206_v21 = vpop.f32.mrb[140].mxu0 }
 0x49f   : > { %v8266_v4 = vadd.f32 %v8265_v23, %v8264_v44  ;;  %v8267_v49 = vpop.f32.mrb[138].mxu1  ;;  %v8207_v36 = vpop.f32.mrb[141].mxu0 }
 0x4a0   : > { %v8268_v53 = vpop.f32.mrb[139].mxu1  ;;  %v11464_v17 = vadd.f32 %v8207_v36, %v8206_v21  ;;  %v8209_v10 = vpop.f32.mrb[142].mxu0 }
 0x4a1   : > { %v8269_v33 = vadd.f32 %v8268_v53, %v8267_v49  ;;  %v11462_v8 = vadd.f32 %v8266_v4, %v3473_v6  ;;  %v8210_v12 = vpop.f32.mrb[143].mxu0  ;;  %v11500_v6 = vadd.f32 %v11376_v43, %v11362_v3  ;;  %v11504_v4 = vadd.f32 %v11378_v30, %v11362_v3 }
 0x4a2   : > { %v11474_v14 = vadd.f32 %v8210_v12, %v8209_v10  ;;  %v11520_v30 = vadd.f32 %v11414_v39, %v11362_v3 }
 0x4a3   : > { %v11472_v38 = vadd.f32 %v8269_v33, %v3476_v13  ;;  %v11516_v13 = vadd.f32 %v11404_v41, %v11362_v3 }
 0x4a5   : > { %v8270_v35 = vpop.f32.mrb[140].mxu1 }
 0x4a6   : > { %v8271_v40 = vpop.f32.mrb[141].mxu1  ;;  %v8916_v54 = vpop.f32.mrb[144].mxu0 }
 0x4a7   : > { %v8272_v63 = vadd.f32 %v8271_v40, %v8270_v35  ;;  %v8273_v57 = vpop.f32.mrb[142].mxu1  ;;  %v3755_v37 = vadd.f32 %v8916_v54, %v11384_v42  ;;  %v3746_v22 = vpop.f32.mrb[145].mxu0  ;;  %v3489_v42 = vadd.f32 %v11364_v50, %v11362_v3  ;;  %v11508_v50 = vadd.f32 %v11389_v1, %v11362_v3 }
 0x4a8   : > { %v8274_v62 = vpop.f32.mrb[143].mxu1  ;;  %v3747_v52 = vadd.f32 %v3746_v22, %v11372_v20  ;;  %v8917_v18 = vpop.f32.mrb[146].mxu0  ;;  %v3492_v20 = vadd.f32 %v11368_v11, %v11362_v3  ;;  %v11512_v11 = vadd.f32 %v11396_v2, %v11362_v3  ;;  %v11524_v1 = vadd.f32 %v11422_v58, %v11362_v3 }
 0x4a9   : > { %v8275_v61 = vadd.f32 %v8274_v62, %v8273_v57  ;;  %v11481_v32 = vadd.f32 %v8272_v63, %v3481_v34  ;;  %v3758_v59 = vadd.f32 %v8917_v18, %v11394_v51  ;;  %v3749_v60 = vpop.f32.mrb[147].mxu0  ;;  %v3875_v49 = vmax.f32 %v3755_v37, 0.0 }
 0x4aa   : > { %v3750_v23 = vadd.f32 %v3749_v60, %v11374_v47  ;;  %v3873_v21 = vmax.f32 %v3747_v52, 0.0  ;;  %v11528_v2 = vadd.f32 %v11426_v28, %v11362_v3 }
 0x4ab   : > { %v11491_v44 = vadd.f32 %v8275_v61, %v3484_v46  ;;  %v3876_v53 = vmax.f32 %v3758_v59, 0.0 }
 0x4ac   : > { %v3874_v43 = vmax.f32 %v3750_v23, 0.0 }
 0x4ad   : > { %v8276_v51 = vpop.f32.mrb[144].mxu1  ;;  %v3906_v10 = vpack.c.bf16 %v3876_v53, %v3875_v49  ;;  %v11562_v53 = vadd.f32 %v11456_v55, %v11362_v3 }
 0x4ae   : > { %v8277_v47 = vpop.f32.mrb[145].mxu1  ;;  %v3905_v56 = vpack.c.bf16 %v3874_v43, %v3873_v21  ;;  %v8920_v12 = vpop.f32.mrb[148].mxu0 }
 0x4af   : > { %v8278_v33 = vadd.f32 %v8277_v47, %v8276_v51  ;;  %v8279_v36 = vpop.f32.mrb[146].mxu1  ;;  %v3922_v35 = vshrl.u32 %v3906_v10, 16  ;;  %v3986_v40 = vshll.u32 %v3906_v10, 16  ;;  %v3771_v34 = vadd.f32 %v8920_v12, %v11420_v0  ;;  %v3762_v63 = vpop.f32.mrb[149].mxu0  ;;  %v11546_v0 = vld [vmem:[%s13614_s3 + $0x340] sm:$0xff]  }
 0x4b0   : > { %v8280_v41 = vpop.f32.mrb[147].mxu1  ;;  %v3925_v57 = vshrl.u32 %v3905_v56, 16  ;;  %v3990_v58 = vshll.u32 %v3905_v56, 16  ;;  %v3763_v62 = vadd.f32 %v3762_v63, %v11402_v29  ;;  %v8921_v54 = vpop.f32.mrb[150].mxu0  ;;  %v11550_v29 = vadd.f32 %v11452_v27, %v11362_v3  ;;  %8946 = vmatprep.subr.bf16.mxu1 %v11546_v0 }
 0x4b1   : > { %v8281_v39 = vadd.f32 %v8280_v41, %v8279_v36  ;;  %v11536_v28 = vadd.f32 %v8278_v33, %v3489_v42  ;;  %v3985_v46 = vrot.slane %v3922_v35, 7  ;;  %v4081_v61 = vrot.slane %v3986_v40, 7  ;;  %v3765_v22 = vpop.f32.mrb[151].mxu0 }
 0x4b2   : > { %v3774_v37 = vadd.f32 %v8921_v54, %v11424_v45  ;;  %v3989_v52 = vrot.slane %v3925_v57, 7  ;;  %v4082_v18 = vrot.slane %v3990_v58, 7  ;;  %v3766_v15 = vadd.f32 %v3765_v22, %v11412_v25 }
 0x4b3   : > { %v3988_v26 = vor.u32 %v3986_v40, %v3985_v46  ;;  %v3879_v59 = vmax.f32 %v3771_v34, 0.0  ;;  %v11553_v42 = vadd.f32 %v8281_v39, %v3492_v20  ;;  %v3877_v51 = vmax.f32 %v3763_v62, 0.0 }
 0x4b4   : > { %v3880_v60 = vmax.f32 %v3774_v37, 0.0  ;;  %v3992_v23 = vor.u32 %v3990_v58, %v3989_v52  ;;  %v3878_v49 = vmax.f32 %v3766_v15, 0.0  ;;  %v11558_v27 = vsel %vm9478_vm3, %v3985_v46, %v4081_v61 }
 0x4b5   : > { %v8282_v16 = vpop.f32.mrb[148].mxu1  ;;  %v11570_v20 = vsel %vm9478_vm3, %v3922_v35, %v3988_v26  ;;  %v11579_v55 = vsel %vm9478_vm3, %v3989_v52, %v4082_v18  ;;  %v4153_v40 = vshll.u32 %v11558_v27, 16  ;;  %v11590_v34 = vadd.f32 %v11464_v17, %v11362_v3 }
 0x4b6   : > { %v8283_v45 = vpop.f32.mrb[149].mxu1  ;;  %v11566_v21 = vpack.c.bf16 %v3880_v60, %v3879_v59  ;;  %v3907_v33 = vpack.c.bf16 %v3878_v49, %v3877_v51  ;;  %v8924_v36 = vpop.f32.mrb[152].mxu0  ;;  %v11574_v10 = vsel %vm9478_vm3, %v3925_v57, %v3992_v23  ;;  %v4148_v41 = vshll.u32 %v11570_v20, 16 }
 0x4b7   : > { %v11564_v25 = vadd.f32 %v8283_v45, %v8282_v16  ;;  %v8285_v47 = vpop.f32.mrb[150].mxu1  ;;  %v3787_v39 = vadd.f32 %v8924_v36, %v11450_v7  ;;  %v3778_v35 = vpop.f32.mrb[153].mxu0  ;;  %4447 = vrot.lane.b32.xlu0 %v11574_v10, %s9334_s22  ;;  %v4146_v61 = vshrl.u32 %v11570_v20, 16  ;;  %v4165_v37 = vshll.u32 %v11579_v55, 16 }
 0x4b8   : > { %v8286_v43 = vpop.f32.mrb[151].mxu1  ;;  %v3931_v12 = vshrl.u32 %v11566_v21, 16  ;;  %v3928_v63 = vshrl.u32 %v3907_v33, 16  ;;  %v3779_v57 = vadd.f32 %v3778_v35, %v11432_v24  ;;  %v8925_v58 = vpop.f32.mrb[154].mxu0  ;;  %v4150_v62 = vrot.slane %v4148_v41, 1 }
 0x4b9   : > { %v11581_v56 = vadd.f32 %v8286_v43, %v8285_v47  ;;  %v3790_v46 = vadd.f32 %v8925_v58, %v11454_v9  ;;  %v3781_v7 = vpop.f32.mrb[155].mxu0  ;;  %v3998_v22 = vshll.u32 %v11566_v21, 16  ;;  %v3994_v18 = vshll.u32 %v3907_v33, 16 }
 0x4ba   : > { %v11593_v54 = vrot.slane %v3931_v12, 7  ;;  %v3993_v52 = vrot.slane %v3928_v63, 7  ;;  %v3782_v17 = vadd.f32 %v3781_v7, %v11442_v5  ;;  %v3883_v16 = vmax.f32 %v3787_v39, 0.0 }
 0x4bb   : > { %v3884_v24 = vmax.f32 %v3790_v46, 0.0  ;;  %4449 = vrot.lane.b32.xlu0 %v11570_v20, %s9334_s22  ;;  %v4151_v26 = vor.u32 %v4150_v62, %v4146_v61  ;;  %v4155_v59 = vrot.slane %v4153_v40, 1  ;;  %v3881_v45 = vmax.f32 %v3779_v57, 0.0 }
 0x4bc   : > { %v3996_v60 = vor.u32 %v3994_v18, %v3993_v52  ;;  %v3882_v23 = vmax.f32 %v3782_v17, 0.0  ;;  %v4160_v51 = vshll.u32 %v11574_v10, 16  ;;  %v4000_v21 = vor.u32 %v3998_v22, %v11593_v54 }
 0x4bd   : > { %v8288_v15 = vpop.f32.mrb[152].mxu1  ;;  %v11606_v5 = vpack.c.bf16 %v3884_v24, %v3883_v16  ;;  %v11609_v43 = vsel %vm892_vm4, %v4151_v26, %v4155_v59  ;;  %v4158_v35 = vshrl.u32 %v11574_v10, 16  ;;  %v11622_v57 = vadd.f32 %v11474_v14, %v11362_v3 }
 0x4be   : > { %v8289_v9 = vpop.f32.mrb[153].mxu1  ;;  %v11611_v36 = vpack.c.bf16 %v3882_v23, %v3881_v45  ;;  %4417 = vrot.lane.b32.xlu1 %v11609_v43, %s9334_s22  ;;  %v8928_v41 = vpop.f32.mrb[156].mxu0  ;;  %v11617_v39 = vsel %vm9478_vm3, %v3928_v63, %v3996_v60  ;;  %v4162_v40 = vrot.slane %v4160_v51, 1  ;;  %v4083_v62 = vrot.slane %v3994_v18, 7 }
 0x4bf   : > { %v11603_v49 = vadd.f32 %v8289_v9, %v8288_v15  ;;  %v8291_v47 = vpop.f32.mrb[154].mxu1  ;;  %v3803_v46 = vadd.f32 %v8928_v41, %v11481_v32  ;;  %v3794_v7 = vpop.f32.mrb[157].mxu0  ;;  %4451 = vrot.lane.b32.xlu0 %v11617_v39, %s9334_s22  ;;  %v3937_v61 = vshrl.u32 %v11606_v5, 16  ;;  %v4084_v24 = vrot.slane %v3998_v22, 7 }
 0x4c0   : > { %v8292_v33 = vpop.f32.mrb[155].mxu1  ;;  %v3934_v63 = vshrl.u32 %v11611_v36, 16  ;;  %v3795_v17 = vadd.f32 %v3794_v7, %v11462_v8  ;;  %v8929_v15 = vpop.f32.mrb[158].mxu0  ;;  %v4163_v16 = vor.u32 %v4162_v40, %v4158_v35  ;;  %v4167_v26 = vrot.slane %v4165_v37, 1 }
 0x4c1   : > { %v11624_v58 = vadd.f32 %v8292_v33, %v8291_v47  ;;  %v3806_v3 = vadd.f32 %v8929_v15, %v11491_v44  ;;  %v3797_v14 = vpop.f32.mrb[159].mxu0  ;;  %v11635_v32 = vsel %vm9478_vm3, %v3931_v12, %v4000_v21  ;;  %v4006_v18 = vshll.u32 %v11606_v5, 16 }
 0x4c2   : > { %v11638_v59 = vrot.slane %v3934_v63, 7  ;;  %v4002_v9 = vshll.u32 %v11611_v36, 16  ;;  %v3798_v60 = vadd.f32 %v3797_v14, %v11472_v38  ;;  %v3887_v45 = vmax.f32 %v3803_v46, 0.0 }
 0x4c3   : > { %v3888_v23 = vmax.f32 %v3806_v3, 0.0  ;;  %v11643_v22 = vsel %vm892_vm4, %v4163_v16, %v4167_v26  ;;  %v3658_v44 = vadd.f32 %v11564_v25, %v11500_v6  ;;  %v11649_v12 = vrot.slane %v3937_v61, 7 }
 0x4c4   : > { %v3885_v51 = vmax.f32 %v3795_v17, 0.0  ;;  %v3886_v47 = vmax.f32 %v3798_v60, 0.0  ;;  %4419 = vrot.lane.b32.xlu1 %v11643_v22, %s9334_s22  ;;  %v11655_v38 = vsel %vm9478_vm3, %v3993_v52, %v4083_v62  ;;  %v4004_v36 = vor.u32 %v4002_v9, %v11638_v59 }
 0x4c5   : > { %v8294_v8 = vpop.f32.mrb[156].mxu1  ;;  %v11658_v41 = vpack.c.bf16 %v3888_v23, %v3887_v45  ;;  %v4172_v6 = vshll.u32 %v11617_v39, 16  ;;  %v11661_v25 = vrot.slane %v4006_v18, 7  ;;  %v4177_v7 = vshll.u32 %v11655_v38, 16 }
 0x4c6   : > { %v8295_v37 = vpop.f32.mrb[157].mxu1  ;;  %v11663_v40 = vpack.c.bf16 %v3886_v47, %v3885_v51  ;;  %v8932_v46 = vpop.f32.mrb[160].mxu0  ;;  %v3661_v52 = vadd.f32 %v11581_v56, %v11504_v4  ;;  %v4085_v17 = vrot.slane %v4002_v9, 7  ;;  %v4008_v14 = vor.u32 %v4006_v18, %v11649_v12 }
 0x4c7   : > { %v8296_v21 = vadd.f32 %v8295_v37, %v8294_v8  ;;  %v8297_v33 = vpop.f32.mrb[158].mxu1  ;;  %v13638_v15 = vshrl.u32 %v11658_v41, 16  ;;  %v3819_v16 = vadd.f32 %v8932_v46, %v3658_v44  ;;  %v3810_v3 = vpop.f32.mrb[161].mxu0  ;;  %v4170_v60 = vshrl.u32 %v11617_v39, 16 }
 0x4c8   : > { %v8298_v35 = vpop.f32.mrb[159].mxu1  ;;  %v13640_v26 = vshrl.u32 %v11663_v40, 16  ;;  %4453 = vrot.lane.b32.xlu1 %v11635_v32, %s9334_s22  ;;  %v4174_v8 = vrot.slane %v4172_v6, 1  ;;  %v8933_v45 = vpop.f32.mrb[162].mxu0  ;;  %v4014_v4 = vshll.u32 %v11658_v41, 16  ;;  %v3811_v56 = vadd.f32 %v3810_v3, %v11536_v28 }
 0x4c9   : > { %v11668_v62 = vadd.f32 %v8298_v35, %v8297_v33  ;;  %v3813_v9 = vpop.f32.mrb[163].mxu0  ;;  %v11680_v23 = vsel %vm9478_vm3, %v3934_v63, %v4004_v36  ;;  %v11685_v18 = vsel %vm9478_vm3, %v11593_v54, %v4084_v24  ;;  %v4010_v44 = vshll.u32 %v11663_v40, 16 }
 0x4ca   : > { %v4175_v37 = vor.u32 %v4174_v8, %v4170_v60  ;;  %v4179_v51 = vrot.slane %v4177_v7, 1  ;;  %v3822_v47 = vadd.f32 %v8933_v45, %v3661_v52  ;;  %v11690_v6 = vrot.slane %v13638_v15, 7 }
 0x4cb   : > { %v11694_v28 = vrot.slane %v13640_v26, 7  ;;  %v3891_v63 = vmax.f32 %v3819_v16, 0.0  ;;  %v3814_v36 = vadd.f32 %v3813_v9, %v11553_v42  ;;  %v3889_v24 = vmax.f32 %v3811_v56, 0.0 }
 0x4cc   : > { %v11698_v54 = vsel %vm892_vm4, %v4175_v37, %v4179_v51  ;;  %v3892_v46 = vmax.f32 %v3822_v47, 0.0  ;;  %4455 = vrot.lane.b32.xlu1 %v11680_v23, %s9334_s22  ;;  %v4184_v7 = vshll.u32 %v11635_v32, 16  ;;  %v4182_v42 = vshrl.u32 %v11635_v32, 16 }
 0x4cd   : > { %v8300_v33 = vpop.f32.mrb[160].mxu1  ;;  %13682 = vst [vmem:[#allocation4_spill] sm:$0xff] %v11698_v54  ;;  %4421 = vrot.lane.b32.xlu0 %v11698_v54, %s9334_s22  ;;  %v3890_v16 = vmax.f32 %v3814_v36, 0.0  ;;  %v4189_v60 = vshll.u32 %v11685_v18, 16  ;;  %v3674_v9 = vadd.f32 %v8296_v21, %v11516_v13  ;;  %v11715_v51 = vsel %vm9478_vm3, %v11638_v59, %v4085_v17 }
 0x4ce   : > { %v8301_v35 = vpop.f32.mrb[161].mxu1  ;;  %v11709_v45 = vpack.c.bf16 %v3892_v46, %v3891_v63  ;;  %v4186_v56 = vrot.slane %v4184_v7, 1  ;;  %v8936_v37 = vpop.f32.mrb[164].mxu0  ;;  %v11717_v47 = vrot.slane %v4014_v4, 7  ;;  %v11727_v63 = vsel %vm9478_vm3, %v3937_v61, %v4008_v14  ;;  %v9143_v14 = vld [vmem:[%s13614_s3 + $0x300] sm:$0xff]  }
 0x4cf   : > { %v11703_v52 = vadd.f32 %v8301_v35, %v8300_v33  ;;  %v8303_v3 = vpop.f32.mrb[162].mxu1  ;;  %v11721_v36 = vpack.c.bf16 %v3890_v16, %v3889_v24  ;;  %v3826_v35 = vpop.f32.mrb[165].mxu0  ;;  %v4087_v13 = vrot.slane %v4010_v44, 7  ;;  %v4191_v46 = vrot.slane %v4189_v60, 1  ;;  %8456 = vmatprep.subr.bf16.mxu0 %v9143_v14 }
 0x4d0   : > { %v8304_v8 = vpop.f32.mrb[163].mxu1  ;;  %v4187_v21 = vor.u32 %v4186_v56, %v4182_v42  ;;  %4457 = vrot.lane.b32.xlu1 %v11727_v63, %s9334_s22  ;;  %v3835_v59 = vadd.f32 %v8936_v37, %v3674_v9  ;;  %v8937_v17 = vpop.f32.mrb[166].mxu0  ;;  %v4012_v7 = vor.u32 %v4010_v44, %v11694_v28  ;;  %v4201_v5 = vshll.u32 %v11715_v51, 16 }
 0x4d1   : > { %v11719_v33 = vadd.f32 %v8304_v8, %v8303_v3  ;;  %v13639_v24 = vshrl.u32 %v11721_v36, 16  ;;  %v4196_v3 = vshll.u32 %v11680_v23, 16  ;;  %v3829_v16 = vpop.f32.mrb[167].mxu0  ;;  %v4016_v61 = vor.u32 %v4014_v4, %v11690_v6 }
 0x4d2   : > { %v11738_v42 = vsel %vm892_vm4, %v4187_v21, %v4191_v46  ;;  %v4194_v60 = vshrl.u32 %v11680_v23, 16  ;;  %v4018_v44 = vshll.u32 %v11721_v36, 16  ;;  %v3895_v9 = vmax.f32 %v3835_v59, 0.0  ;;  %v9144_v59 = vld [vmem:[%s13614_s3 + $0x2c0] sm:$0xff]  }
 0x4d3   : > { %13683 = vst [vmem:[#allocation3_spill] sm:$0xff] %v11738_v42  ;;  %4423 = vrot.lane.b32.xlu0 %v11738_v42, %s9334_s22  ;;  %v4198_v37 = vrot.slane %v4196_v3, 1  ;;  %v11747_v4 = vrot.slane %v13639_v24, 7  ;;  %v3666_v21 = vadd.f32 %v11603_v49, %v11508_v50  ;;  %v3677_v46 = vadd.f32 %v11668_v62, %v11520_v30  ;;  %8457 = vmatpush3.bf16.msra.mxu0 %v9144_v59 }
 0x4d4   : > { %v3669_v56 = vadd.f32 %v11624_v58, %v11512_v11  ;;  %v4203_v42 = vrot.slane %v4201_v5, 1  ;;  %v13684_v50 = vshrl.u32 %v11663_v40, 16  ;;  %v11793_v14 = vsel %vm9478_vm3, %v11694_v28, %v4087_v13 }
 0x4d5   : > { %v8306_v8 = vpop.f32.mrb[164].mxu1  ;;  %v4199_v26 = vor.u32 %v4198_v37, %v4194_v60  ;;  %v3827_v11 = vadd.f32 %v3826_v35, %v3666_v21  ;;  %v3838_v58 = vadd.f32 %v8937_v17, %v3677_v46  ;;  %v4208_v35 = vshll.u32 %v11727_v63, 16 }
 0x4d6   : > { %v8307_v15 = vpop.f32.mrb[165].mxu1  ;;  %v11765_v30 = vsel %vm9478_vm3, %v13684_v50, %v4012_v7  ;;  %v3830_v62 = vadd.f32 %v3829_v16, %v3669_v56  ;;  %v8940_v5 = vpop.f32.mrb[168].mxu0  ;;  %v4206_v7 = vshrl.u32 %v11727_v63, 16  ;;  %v13687_v46 = vshrl.u32 %v11709_v45, 16 }
 0x4d7   : > { %v8308_v3 = vadd.f32 %v8307_v15, %v8306_v8  ;;  %v8309_v24 = vpop.f32.mrb[166].mxu1  ;;  %4459 = vrot.lane.b32.xlu1 %v11765_v30, %s9334_s22  ;;  %v11773_v15 = vsel %vm9478_vm3, %v11649_v12, %v11661_v25  ;;  %v11776_v40 = vsel %vm892_vm4, %v4199_v26, %v4203_v42  ;;  %v3842_v17 = vpop.f32.mrb[169].mxu0  ;;  %v3893_v16 = vmax.f32 %v3827_v11, 0.0 }
 0x4d8   : > { %v8310_v49 = vpop.f32.mrb[167].mxu1  ;;  %13685 = vst [vmem:[#allocation2_spill] sm:$0xff] %v11776_v40  ;;  %4425 = vrot.lane.b32.xlu0 %v11776_v40, %s9334_s22  ;;  %v3896_v8 = vmax.f32 %v3838_v58, 0.0  ;;  %v3894_v56 = vmax.f32 %v3830_v62, 0.0  ;;  %v4213_v12 = vshll.u32 %v11773_v15, 16  ;;  %v8941_v25 = vpop.f32.mrb[170].mxu0  ;;  %v3682_v40 = vadd.f32 %v11703_v52, %v11524_v1 }
 0x4d9   : > { %v8311_v60 = vadd.f32 %v8310_v49, %v8309_v24  ;;  %v4210_v24 = vrot.slane %v4208_v35, 1  ;;  %v13686_v26 = vshrl.u32 %v11658_v41, 16  ;;  %v3690_v37 = vadd.f32 %v8308_v3, %v11532_v48  ;;  %v3845_v21 = vpop.f32.mrb[171].mxu0  ;;  %v9149_v1 = vld [vmem:[%s13614_s3 + $0x2d0] sm:$0xff]  }
 0x4da   : > { %v11797_v50 = vrot.slane %v13687_v46, 7  ;;  %v11799_v59 = vpack.c.bf16 %v3896_v8, %v3895_v9  ;;  %v11801_v49 = vpack.c.bf16 %v3894_v56, %v3893_v16  ;;  %v4215_v41 = vrot.slane %v4213_v12, 1 }
 0x4db   : > { %v11787_v42 = vsel %vm9478_vm3, %v13686_v26, %v4016_v61  ;;  %v4211_v48 = vor.u32 %v4210_v24, %v4206_v7  ;;  %v11805_v3 = vadd.f32 %v8940_v5, %v3690_v37  ;;  %v4220_v28 = vshll.u32 %v11765_v30, 16  ;;  %v9145_v7 = vld [vmem:[%s13614_s3 + $0x308] sm:$0xff]  }
 0x4dc   : > { %4461 = vrot.lane.b32.xlu1 %v11787_v42, %s9334_s22  ;;  %v4225_v13 = vshll.u32 %v11793_v14, 16  ;;  %v13688_v11 = vshll.u32 %v11709_v45, 16  ;;  %v4020_v9 = vor.u32 %v4018_v44, %v11747_v4  ;;  %v4089_v62 = vrot.slane %v4018_v44, 7  ;;  %v9146_v26 = vld [vmem:[%s13614_s3 + $0x2c8] sm:$0xff]   ;;  %8458 = vmatprep.subr.bf16.mxu0 %v9145_v7 }
 0x4dd   : > { %v8312_v61 = vpop.f32.mrb[168].mxu1  ;;  %v11819_v56 = vsel %vm892_vm4, %v4211_v48, %v4215_v41  ;;  %v4218_v12 = vshrl.u32 %v11765_v30, 16  ;;  %v4222_v24 = vrot.slane %v4220_v28, 1  ;;  %8459 = vmatpush3.bf16.msra.mxu0 %v9146_v26  ;;  %v13690_v46 = vshrl.u32 %v11799_v59, 16 }
 0x4de   : > { %v11811_v58 = vrot.slane %v13688_v11, 7  ;;  %v8313_v35 = vpop.f32.mrb[169].mxu1  ;;  %v13689_v44 = vmov %v13688_v11  ;;  %4427 = vrot.lane.b32.xlu0 %v11819_v56, %s9334_s22  ;;  %v8944_v41 = vpop.f32.mrb[172].mxu0  ;;  %v4227_v16 = vrot.slane %v4225_v13, 1  ;;  %v3693_v54 = vadd.f32 %v8311_v60, %v11540_v31  ;;  %v9148_v13 = vld [vmem:[%s13614_s3 + $0x310] sm:$0xff]  }
 0x4df   : > { %v8314_v5 = vadd.f32 %v8313_v35, %v8312_v61  ;;  %v8315_v8 = vpop.f32.mrb[170].mxu1  ;;  %v4024_v37 = vor.u32 %v13689_v44, %v11797_v50  ;;  %v4223_v28 = vor.u32 %v4222_v24, %v4218_v12  ;;  %v3858_v44 = vpop.f32.mrb[173].mxu0  ;;  %v11839_v11 = vrot.slane %v13690_v46, 7  ;;  %8460 = vmatprep.subr.bf16.mxu0 %v9148_v13 }
 0x4e0   : > { %v8316_v35 = vpop.f32.mrb[171].mxu1  ;;  %v3899_v61 = vmax.f32 %v11805_v3, 0.0  ;;  %v3685_v7 = vadd.f32 %v11719_v33, %v11528_v2  ;;  %v3843_v12 = vadd.f32 %v3842_v17, %v3682_v40  ;;  %v13691_v3 = vshrl.u32 %v11721_v36, 16 }
 0x4e1   : > { %v11833_v48 = vadd.f32 %v8316_v35, %v8315_v8  ;;  %v11845_v8 = vpop.f32.mrb[174].mxu0  ;;  %v11854_v52 = vsel %vm892_vm4, %v4223_v28, %v4227_v16  ;;  %v11866_v2 = vsel %vm9478_vm3, %v11690_v6, %v11717_v47  ;;  %v13692_v60 = vshrl.u32 %v11801_v49, 16  ;;  %8461 = vmatpush3.bf16.msra.mxu0 %v9149_v1  ;;  %v9151_v1 = vld [vmem:[%s13614_s3 + $0x2d8] sm:$0xff]  }
 0x4e2   : > { %v11860_v31 = vsel %vm9478_vm3, %v13691_v3, %v4020_v9  ;;  %v11868_v33 = vpop.f32.mrb[175].mxu0  ;;  %4429 = vrot.lane.b32.xlu0 %v11854_v52, %s9334_s22  ;;  %v3854_v36 = vadd.f32 %v8941_v25, %v3693_v54  ;;  %v3846_v40 = vadd.f32 %v3845_v21, %v3685_v7  ;;  %v4232_v17 = vshll.u32 %v11787_v42, 16 }
 0x4e3   : > { %v11872_v24 = vrot.slane %v13692_v60, 7  ;;  %4463 = vrot.lane.b32.xlu1 %v11860_v31, %s9334_s22  ;;  %v3897_v16 = vmax.f32 %v3843_v12, 0.0  ;;  %v4230_v6 = vshrl.u32 %v11787_v42, 16  ;;  %v4237_v47 = vshll.u32 %v11866_v2, 16 }
 0x4e4   : > { %v11884_v26 = vsel %vm9478_vm3, %v11747_v4, %v4089_v62  ;;  %v3900_v54 = vmax.f32 %v3854_v36, 0.0  ;;  %v3898_v25 = vmax.f32 %v3846_v40, 0.0  ;;  %v4234_v21 = vrot.slane %v4232_v17, 1 }
 0x4e5   : > { %v8318_v9 = vpop.f32.mrb[172].mxu1  ;;  %v13693_v35 = vshrl.u32 %v11709_v45, 16  ;;  %v4242_v3 = vshrl.u32 %v11860_v31, 16  ;;  %v4244_v60 = vshll.u32 %v11860_v31, 16  ;;  %v4249_v4 = vshll.u32 %v11884_v26, 16 }
 0x4e6   : > { %v8319_v46 = vpop.f32.mrb[173].mxu1  ;;  %v11895_v62 = vpack.c.bf16 %v3900_v54, %v3899_v61  ;;  %v11897_v13 = vpack.c.bf16 %v3898_v25, %v3897_v16  ;;  %v4235_v40 = vor.u32 %v4234_v21, %v4230_v6  ;;  %v3698_v45 = vadd.f32 %v8314_v5, %v11550_v29 }
 0x4e7   : > { %v11890_v28 = vsel %vm9478_vm3, %v13693_v35, %v4024_v37  ;;  %v8320_v7 = vadd.f32 %v8319_v46, %v8318_v9  ;;  %v8321_v12 = vpop.f32.mrb[174].mxu1  ;;  %v9150_v37 = vld [vmem:[%s13614_s3 + $0x318] sm:$0xff]   ;;  %v4239_v61 = vrot.slane %v4237_v47, 1  ;;  %v4246_v16 = vrot.slane %v4244_v60, 1 }
 0x4e8   : > { %v8322_v36 = vpop.f32.mrb[175].mxu1  ;;  %4465 = vrot.lane.b32.xlu1 %v11890_v28, %s9334_s22  ;;  %v13694_v6 = vshll.u32 %v11801_v49, 16  ;;  %v3961_v54 = vshrl.u32 %v11895_v62, 16  ;;  %v3958_v29 = vshrl.u32 %v11897_v13, 16  ;;  %v4251_v5 = vrot.slane %v4249_v4, 1  ;;  %8462 = vmatprep.subr.bf16.mxu0 %v9150_v37 }
 0x4e9   : > { %v8323_v17 = vadd.f32 %v8322_v36, %v8321_v12  ;;  %v3706_v9 = vadd.f32 %v8320_v7, %v11590_v34  ;;  %v11915_v25 = vsel %vm892_vm4, %v4235_v40, %v4239_v61  ;;  %v4247_v35 = vor.u32 %v4246_v16, %v4242_v3  ;;  %8463 = vmatpush3.bf16.msra.mxu0 %v9151_v1 }
 0x4ea   : > { %v4028_v46 = vor.u32 %v13694_v6, %v11872_v24  ;;  %v3859_v12 = vadd.f32 %v3858_v44, %v3698_v45  ;;  %v13695_v34 = vshll.u32 %v11799_v59, 16  ;;  %v13697_v36 = vmov %v13694_v6  ;;  %4431 = vrot.lane.b32.xlu0 %v11915_v25, %s9334_s22  ;;  %v9153_v44 = vld [vmem:[%s13614_s3 + $0x2e0] sm:$0xff]  }
 0x4eb   : > { %v3867_v21 = vadd.f32 %v8944_v41, %v3706_v9  ;;  %v4091_v6 = vrot.slane %v13697_v36, 7  ;;  %v4038_v4 = vshll.u32 %v11895_v62, 16  ;;  %v9152_v41 = vld [vmem:[%s13614_s3 + $0x320] sm:$0xff]   ;;  %v11935_v3 = vrot.slane %v3961_v54, 7 }
 0x4ec   : > { %v4032_v47 = vor.u32 %v13695_v34, %v11839_v11  ;;  %v13696_v7 = vmov %v13695_v34  ;;  %v4034_v40 = vshll.u32 %v11897_v13, 16  ;;  %v11939_v45 = vsel %vm892_vm4, %v4247_v35, %v4251_v5  ;;  %8464 = vmatprep.subr.bf16.mxu0 %v9152_v41 }
 0x4ed   : > { %v4092_v60 = vrot.slane %v13696_v7, 7  ;;  %v3709_v37 = vadd.f32 %v8323_v17, %v11622_v57  ;;  %v4033_v1 = vrot.slane %v3958_v29, 7  ;;  %v3903_v61 = vmax.f32 %v3867_v21, 0.0  ;;  %8465 = vmatpush3.bf16.msra.mxu0 %v9153_v44 }
 0x4ee   : > { %v3701_v9 = vadd.f32 %v11833_v48, %v11562_v53  ;;  %v13698_v16 = vshrl.u32 %v11801_v49, 16  ;;  %v3901_v7 = vmax.f32 %v3859_v12, 0.0  ;;  %v11959_v57 = vsel %vm9478_vm3, %v11797_v50, %v11811_v58  ;;  %4433 = vrot.lane.b32.xlu0 %v11939_v45, %s9334_s22  ;;  %v9154_v50 = vld [vmem:[%s13614_s3 + $0x328] sm:$0xff]  }
 0x4ef   : > { %v3870_v5 = vadd.f32 %v11845_v8, %v3709_v37  ;;  %v4256_v53 = vshll.u32 %v11890_v28, 16  ;;  %v4254_v48 = vshrl.u32 %v11890_v28, 16  ;;  %v4261_v8 = vshll.u32 %v11959_v57, 16  ;;  %v9155_v58 = vld [vmem:[%s13614_s3 + $0x2e8] sm:$0xff]   ;;  %8466 = vmatprep.subr.bf16.mxu0 %v9154_v50 }
 0x4f0   : > { %v11950_v34 = vsel %vm9478_vm3, %v13698_v16, %v4028_v46  ;;  %v3862_v49 = vadd.f32 %v11868_v33, %v3701_v9  ;;  %v11970_v17 = vsel %vm9478_vm3, %v11872_v24, %v4091_v6  ;;  %v13699_v33 = vshrl.u32 %v11799_v59, 16 }
 0x4f1   : > { %4467 = vrot.lane.b32.xlu1 %v11950_v34, %s9334_s22  ;;  %v3904_v46 = vmax.f32 %v3870_v5, 0.0  ;;  %v4258_v21 = vrot.slane %v4256_v53, 1  ;;  %v4268_v12 = vshll.u32 %v11950_v34, 16  ;;  %v4036_v24 = vor.u32 %v4034_v40, %v4033_v1  ;;  %8467 = vmatpush3.bf16.msra.mxu0 %v9155_v58 }
 0x4f2   : > { %v11982_v35 = vsel %vm9478_vm3, %v13699_v33, %v4032_v47  ;;  %v3902_v36 = vmax.f32 %v3862_v49, 0.0  ;;  %v4266_v6 = vshrl.u32 %v11950_v34, 16  ;;  %v4273_v41 = vshll.u32 %v11970_v17, 16  ;;  %v9157_v49 = vld [vmem:[%s13614_s3 + $0x2f0] sm:$0xff]  }
 0x4f3   : > { %v11987_v44 = vpack.c.bf16 %v3904_v46, %v3903_v61  ;;  %v4259_v37 = vor.u32 %v4258_v21, %v4254_v48  ;;  %v4263_v9 = vrot.slane %v4261_v8, 1  ;;  %v4270_v59 = vrot.slane %v4268_v12, 1  ;;  %v9156_v61 = vld [vmem:[%s13614_s3 + $0x330] sm:$0xff]  }
 0x4f4   : > { %v4040_v47 = vor.u32 %v4038_v4, %v11935_v3  ;;  %v3919_v16 = vpack.c.bf16 %v3902_v36, %v3901_v7  ;;  %v11995_v5 = vsel %vm9478_vm3, %v11839_v11, %v4092_v60  ;;  %v4280_v53 = vshll.u32 %v11982_v35, 16  ;;  %8468 = vmatprep.subr.bf16.mxu0 %v9156_v61 }
 0x4f5   : > { %4469 = vrot.lane.b32.xlu1 %v11982_v35, %s9334_s22  ;;  %v4093_v48 = vrot.slane %v4034_v40, 7  ;;  %v12005_v8 = vsel %vm892_vm4, %v4259_v37, %v4263_v9  ;;  %v4271_v7 = vor.u32 %v4270_v59, %v4266_v6  ;;  %v4275_v50 = vrot.slane %v4273_v41, 1  ;;  %8469 = vmatpush3.bf16.msra.mxu0 %v9157_v49 }
 0x4f6   : > { %v3964_v58 = vshrl.u32 %v3919_v16, 16  ;;  %v4042_v46 = vshll.u32 %v3919_v16, 16  ;;  %4435 = vrot.lane.b32.xlu0 %v12005_v8, %s9334_s22  ;;  %v12013_v11 = vsel %vm9478_vm3, %v3958_v29, %v4036_v24  ;;  %v4282_v60 = vrot.slane %v4280_v53, 1  ;;  %v9158_v29 = vld [vmem:[%s13614_s3 + $0x338] sm:$0xff]  }
 0x4f7   : > { %v12016_v40 = vsel %vm892_vm4, %v4271_v7, %v4275_v50  ;;  %v4278_v21 = vshrl.u32 %v11982_v35, 16  ;;  %v4285_v33 = vshll.u32 %v11995_v5, 16  ;;  %v4094_v12 = vrot.slane %v4038_v4, 7  ;;  %v9159_v24 = vld [vmem:[%s13614_s3 + $0x2f8] sm:$0xff]   ;;  %8470 = vmatprep.subr.bf16.mxu0 %v9158_v29 }
 0x4f8   : > { %v4041_v36 = vrot.slane %v3964_v58, 7  ;;  %v12026_v13 = vsel %vm9478_vm3, %v3961_v54, %v4040_v47  ;;  %v12036_v41 = vsel %vm9478_vm3, %v4033_v1, %v4093_v48  ;;  %v4292_v4 = vshll.u32 %v12013_v11, 16 }
 0x4f9   : > { %4471 = vrot.lane.b32.xlu1 %v12013_v11, %s9334_s22  ;;  %v4283_v6 = vor.u32 %v4282_v60, %v4278_v21  ;;  %v4095_v37 = vrot.slane %v4042_v46, 7  ;;  %v4297_v54 = vshll.u32 %v12036_v41, 16  ;;  %v4287_v9 = vrot.slane %v4285_v33, 1  ;;  %8471 = vmatpush3.bf16.msra.mxu0 %v9159_v24 }
 0x4fa   : > { %v4044_v62 = vor.u32 %v4042_v46, %v4041_v36  ;;  %4437 = vrot.lane.b32.xlu0 %v12016_v40, %s9334_s22  ;;  %v4290_v59 = vshrl.u32 %v12013_v11, 16  ;;  %v4294_v47 = vrot.slane %v4292_v4, 1  ;;  %v4304_v1 = vshll.u32 %v12026_v13, 16 }
 0x4fb   : > { %v3967_v16 = vshrl.u32 %v11987_v44, 16  ;;  %v12054_v61 = vsel %vm9478_vm3, %v11935_v3, %v4094_v12  ;;  %v12057_v49 = vsel %vm892_vm4, %v4283_v6, %v4287_v9  ;;  %v4299_v7 = vrot.slane %v4297_v54, 1 }
 0x4fc   : > { %v12049_v53 = vsel %vm9478_vm3, %v3964_v58, %v4044_v62  ;;  %v4295_v48 = vor.u32 %v4294_v47, %v4290_v59  ;;  %v4306_v50 = vrot.slane %v4304_v1, 1  ;;  %v4358_v46 = vrot.slane %v11574_v10, 1 }
 0x4fd   : > { %4473 = vrot.lane.b32.xlu1 %v12026_v13, %s9334_s22  ;;  %v12064_v58 = vsel %vm9478_vm3, %v4041_v36, %v4095_v37  ;;  %v4316_v60 = vshll.u32 %v12049_v53, 16  ;;  %v4302_v21 = vshrl.u32 %v12026_v13, 16  ;;  %v4309_v33 = vshll.u32 %v12054_v61, 16 }
 0x4fe   : > { %4439 = vrot.lane.b32.xlu0 %v12057_v49, %s9334_s22  ;;  %v12068_v3 = vsel %vm892_vm4, %v4295_v48, %v4299_v7  ;;  %v4359_v12 = vrot.slane %v11579_v55, 1  ;;  %v4314_v29 = vshrl.u32 %v12049_v53, 16  ;;  %v4321_v36 = vshll.u32 %v12064_v58, 16 }
 0x4ff   : > { %v4318_v24 = vrot.slane %v4316_v60, 1  ;;  %v4045_v6 = vrot.slane %v3967_v16, 7  ;;  %v4307_v4 = vor.u32 %v4306_v50, %v4302_v21  ;;  %v4046_v54 = vshll.u32 %v11987_v44, 16 }
 0x500   : > { %v12080_v62 = vsel %vm1103_vm5, %v4358_v46, %v4359_v12  ;;  %v4311_v9 = vrot.slane %v4309_v33, 1  ;;  %v4323_v55 = vrot.slane %v4321_v36, 1  ;;  %v4361_v48 = vrot.slane %v11617_v39, 1 }
 0x501   : > { %4475 = vrot.lane.b32.xlu1 %v12049_v53, %s9334_s22  ;;  %v4319_v37 = vor.u32 %v4318_v24, %v4314_v29  ;;  %v4048_v59 = vor.u32 %v4046_v54, %v4045_v6  ;;  %v4362_v44 = vrot.slane %v11655_v38, 1  ;;  %v4355_v50 = vrot.slane %v11570_v20, 1 }
 0x502   : > { %4441 = vrot.lane.b32.xlu0 %v12068_v3, %s9334_s22  ;;  %v12086_v47 = vsel %vm892_vm4, %v4307_v4, %v4311_v9  ;;  %v4367_v60 = vrot.slane %v11680_v23, 1  ;;  %v4356_v21 = vrot.slane %v11558_v27, 1  ;;  %v4368_v38 = vrot.slane %v11715_v51, 1 }
 0x503   : > { %v12091_v1 = vsel %vm892_vm4, %v4319_v37, %v4323_v55  ;;  %v12099_v7 = vsel %vm9478_vm3, %v3967_v16, %v4048_v59  ;;  %v12105_v46 = vsel %vm1103_vm5, %v4361_v48, %v4362_v44  ;;  %v4364_v33 = vrot.slane %v11635_v32, 1 }
 0x504   : > { %v12113_v16 = vsel %vm1103_vm5, %v4355_v50, %v4356_v21  ;;  %v12119_v12 = vsel %vm1103_vm5, %v4367_v60, %v4368_v38  ;;  %v4373_v29 = vrot.slane %v11765_v30, 1  ;;  %v4365_v27 = vrot.slane %v11685_v18, 1 }
 0x505   : > { %4479 = vrot.lane.b32.xlu1 %v12080_v62, %s9334_s22  ;;  %v4374_v51 = vrot.slane %v11793_v14, 1  ;;  %v4370_v36 = vrot.slane %v11727_v63, 1  ;;  %v4379_v37 = vrot.slane %v11860_v31, 1  ;;  %v4371_v18 = vrot.slane %v11773_v15, 1 }
 0x506   : > { %4443 = vrot.lane.b32.xlu0 %v12086_v47, %s9334_s22  ;;  %v12127_v24 = vsel %vm1103_vm5, %v4364_v33, %v4365_v27  ;;  %v4380_v14 = vrot.slane %v11884_v26, 1  ;;  %v4096_v9 = vrot.slane %v4046_v54, 7  ;;  %v4376_v59 = vrot.slane %v11787_v42, 1 }
 0x507   : > { %v12133_v4 = vsel %vm1103_vm5, %v4373_v29, %v4374_v51  ;;  %v12141_v55 = vsel %vm1103_vm5, %v4370_v36, %v4371_v18  ;;  %v4385_v44 = vrot.slane %v11950_v34, 1  ;;  %v4403_v15 = vshll.u32 %v12099_v7, 16 }
 0x508   : > { %v12147_v48 = vsel %vm1103_vm5, %v4379_v37, %v4380_v14  ;;  %v4377_v50 = vrot.slane %v11866_v2, 1  ;;  %v4386_v26 = vrot.slane %v11970_v17, 1  ;;  %v4382_v60 = vrot.slane %v11890_v28, 1 }
 0x509   : > { %4445 = vrot.lane.b32.xlu1 %v12091_v1, %s9334_s22  ;;  %v4144_v21 = vsel %vm9478_vm3, %v4045_v6, %v4096_v9  ;;  %v4391_v2 = vrot.slane %v12013_v11, 1  ;;  %v4405_v33 = vrot.slane %v4403_v15, 1  ;;  %v4383_v29 = vrot.slane %v11959_v57, 1 }
 0x50a   : > { %4477 = vrot.lane.b32.xlu0 %v12099_v7, %s9334_s22  ;;  %v12156_v54 = vsel %vm1103_vm5, %v4376_v59, %v4377_v50  ;;  %v12164_v38 = vsel %vm1103_vm5, %v4385_v44, %v4386_v26  ;;  %v4392_v17 = vrot.slane %v12036_v41, 1  ;;  %v4401_v27 = vshrl.u32 %v12099_v7, 16 }
 0x50b   : > { %v4408_v51 = vshll.u32 %v4144_v21, 16  ;;  %v12173_v6 = vsel %vm1103_vm5, %v4382_v60, %v4383_v29  ;;  %v4388_v36 = vrot.slane %v11982_v35, 1  ;;  %v4389_v18 = vrot.slane %v11995_v5, 1 }
 0x50c   : > { %v12179_v37 = vsel %vm1103_vm5, %v4391_v2, %v4392_v17  ;;  %v4406_v57 = vor.u32 %v4405_v33, %v4401_v27  ;;  %v4394_v9 = vrot.slane %v12026_v13, 1  ;;  %v4414_v44 = vrot.slane %v12099_v7, 1 }
 0x50d   : > { %4483 = vrot.lane.b32.xlu1 %v12105_v46, %s9334_s22  ;;  %v4410_v41 = vrot.slane %v4408_v51, 1  ;;  %v12185_v14 = vsel %vm1103_vm5, %v4388_v36, %v4389_v18  ;;  %v4395_v15 = vrot.slane %v12054_v61, 1  ;;  %v4415_v5 = vrot.slane %v4144_v21, 1  ;;  %v9160_v36 = vld [vmem:[%s13614_s3 + $0x350] sm:$0xff]  }
 0x50e   : > { %4481 = vrot.lane.b32.xlu0 %v12113_v16, %s9334_s22  ;;  %v4397_v26 = vrot.slane %v12049_v53, 1  ;;  %v4398_v2 = vrot.slane %v12064_v58, 1  ;;  %v9147_v58 = vld [vmem:[%s13614_s3 + $0x348] sm:$0xff]  }
 0x50f   : > { %v12191_v59 = vsel %vm892_vm4, %v4406_v57, %v4410_v41  ;;  %v12198_v50 = vsel %vm1103_vm5, %v4394_v9, %v4395_v15  ;;  %v12204_v60 = vsel %vm1103_vm5, %v4414_v44, %v4415_v5 }
 0x510   : > { %v12210_v61 = vsel %vm1103_vm5, %v4397_v26, %v4398_v2 }
 0x511   : > { %4487 = vrot.lane.b32.xlu1 %v12119_v12, %s9334_s22 }
 0x512   : > { %4485 = vrot.lane.b32.xlu0 %v12127_v24, %s9334_s22 }
 0x515   : > { %4491 = vrot.lane.b32.xlu1 %v12133_v4, %s9334_s22 }
 0x516   : > { %4489 = vrot.lane.b32.xlu0 %v12141_v55, %s9334_s22 }
 0x519   : > { %4495 = vrot.lane.b32.xlu1 %v12147_v48, %s9334_s22 }
 0x51a   : > { %4493 = vrot.lane.b32.xlu0 %v12156_v54, %s9334_s22 }
 0x51d   : > { %4499 = vrot.lane.b32.xlu1 %v12164_v38, %s9334_s22 }
 0x51e   : > { %4497 = vrot.lane.b32.xlu0 %v12173_v6, %s9334_s22 }
 0x521   : > { %4503 = vrot.lane.b32.xlu1 %v12179_v37, %s9334_s22 }
 0x522   : > { %4501 = vrot.lane.b32.xlu0 %v12185_v14, %s9334_s22 }
 0x525   : > { %4511 = vrot.lane.b32.xlu1 %v12191_v59, %s9334_s22 }
 0x526   : > { %4505 = vrot.lane.b32.xlu0 %v12198_v50, %s9334_s22 }
 0x529   : > { %4509 = vrot.lane.b32.xlu1 %v12204_v60, %s9334_s22  ;;  %v4448_v21 = vpop.permute.xlu0 %4447 }
 0x52a   : > { %4507 = vrot.lane.b32.xlu0 %v12210_v61, %s9334_s22  ;;  %v4560_v33 = vsel %vm1262_vm6, %v12113_v16, %v4448_v21 }
 0x52b   : > { %5048 = vmatprep.mubr.bf16.mxu1 %v4560_v33 }
 0x52d   : > { %v4450_v29 = vpop.permute.xlu0 %4449 }
 0x52e   : > { %v4564_v51 = vsel %vm1262_vm6, %v12080_v62, %v4450_v29 }
 0x530   : > { %v4418_v17 = vpop.permute.xlu1 %4417 }
 0x531   : > { %v4514_v27 = vsel %vm1262_vm6, %v11570_v20, %v4418_v17  ;;  %v4452_v18 = vpop.permute.xlu0 %4451  ;;  %v9161_v20 = vld [vmem:[%s13614_s3 + $0x358] sm:$0xff]  }
 0x532   : > { %5049 = vmatmul.mubr.bf16.vlgmr.msra.gmra.mrb[176].mxu1 %v4514_v27  ;;  %5209 = vmatprep.mubr.bf16.mxu0 %v4514_v27 }
 0x533   : > { %8947 = vmatpush3.bf16.msra.mxu1 %v11546_v0  ;;  %5056 = vmatprep.mubr.bf16.mxu1 %v4564_v51  ;;  %v4567_v0 = vsel %vm1262_vm6, %v12113_v16, %v4452_v18 }
 0x534   : > { %8948 = vmatprep.subr.bf16.mxu1 %v9147_v58 }
 0x536   : > { %v4420_v57 = vpop.permute.xlu1 %4419 }
 0x537   : > { %8949 = vmatpush3.bf16.msra.mxu1 %v9147_v58  ;;  %v4517_v41 = vsel %vm1262_vm6, %v11574_v10, %v4420_v57 }
 0x538   : > { %8950 = vmatprep.subr.bf16.mxu1 %v9160_v36 }
 0x53a   : > { %v4454_v62 = vpop.permute.xlu1 %4453  ;;  %5057 = vmatmul.mubr.bf16.gmra.mrb[180].mxu1 %v4517_v41 }
 0x53b   : > { %5064 = vmatprep.mubr.bf16.mxu1 %v4567_v0  ;;  %8951 = vmatpush3.bf16.msra.mxu1 %v9160_v36  ;;  %v4571_v5 = vsel %vm1262_vm6, %v12105_v46, %v4454_v62 }
 0x53c   : > { %8952 = vmatprep.subr.bf16.mxu1 %v9161_v20 }
 0x53e   : > { %v4456_v9 = vpop.permute.xlu1 %4455 }
 0x53f   : > { %v4422_v44 = vpop.permute.xlu0 %4421  ;;  %8953 = vmatpush3.bf16.msra.mxu1 %v9161_v20  ;;  %v4575_v33 = vsel %vm1262_vm6, %v12127_v24, %v4456_v9 }
 0x540   : > { %v4520_v10 = vsel %vm1262_vm6, %v11617_v39, %v4422_v44 }
 0x542   : > { %v4458_v15 = vpop.permute.xlu1 %4457  ;;  %5065 = vmatmul.mubr.bf16.gmra.mrb[184].mxu1 %v4514_v27 }
 0x543   : > { %5072 = vmatprep.mubr.bf16.mxu1 %v4571_v5  ;;  %v4579_v27 = vsel %vm1262_vm6, %v12119_v12, %v4458_v15 }
 0x545   : > { %v4424_v26 = vpop.permute.xlu0 %4423 }
 0x546   : > { %v4523_v58 = vsel %vm1262_vm6, %v11635_v32, %v4424_v26 }
 0x549   : > { %v4460_v2 = vpop.permute.xlu1 %4459 }
 0x54a   : > { %v4426_v21 = vpop.permute.xlu0 %4425  ;;  %5073 = vmatmul.mubr.bf16.gmra.mrb[188].mxu1 %v4520_v10  ;;  %v4583_v18 = vsel %vm1262_vm6, %v12141_v55, %v4460_v2 }
 0x54b   : > { %5080 = vmatprep.mubr.bf16.mxu1 %v4575_v33  ;;  %v4526_v39 = vsel %vm1262_vm6, %v11680_v23, %v4426_v21 }
 0x54e   : > { %v4462_v29 = vpop.permute.xlu1 %4461 }
 0x54f   : > { %v4587_v0 = vsel %vm1262_vm6, %v12133_v4, %v4462_v29 }
 0x550   : > { %v4428_v17 = vpop.permute.xlu0 %4427 }
 0x551   : > { %v4529_v32 = vsel %vm1262_vm6, %v11727_v63, %v4428_v17 }
 0x552   : > { %5081 = vmatmul.mubr.bf16.gmra.mrb[192].mxu1 %v4523_v58 }
 0x553   : > { %5088 = vmatprep.mubr.bf16.mxu1 %v4579_v27 }
 0x554   : > { %v4430_v36 = vpop.permute.xlu0 %4429 }
 0x555   : > { %v4464_v51 = vpop.permute.xlu1 %4463  ;;  %v4532_v23 = vsel %vm1262_vm6, %v11765_v30, %v4430_v36 }
 0x556   : > { %v4591_v26 = vsel %vm1262_vm6, %v12156_v54, %v4464_v51 }
 0x55a   : > { %v4466_v57 = vpop.permute.xlu1 %4465  ;;  %5089 = vmatmul.mubr.bf16.gmra.mrb[196].mxu1 %v4526_v39 }
 0x55b   : > { %5096 = vmatprep.mubr.bf16.mxu1 %v4583_v18  ;;  %v4595_v17 = vsel %vm1262_vm6, %v12147_v48, %v4466_v57 }
 0x55c   : > { %v4432_v20 = vpop.permute.xlu0 %4431 }
 0x55d   : > { %v4535_v33 = vsel %vm1262_vm6, %v11787_v42, %v4432_v20 }
 0x560   : > { %v4434_v62 = vpop.permute.xlu0 %4433 }
 0x561   : > { %v4538_v51 = vsel %vm1262_vm6, %v11860_v31, %v4434_v62  ;;  %v13700_v62 = vld [vmem:[#allocation4_spill] sm:$0xff] }
 0x562   : > { %5097 = vmatmul.mubr.bf16.gmra.mrb[200].mxu1 %v4529_v32 }
 0x563   : > { %v4468_v41 = vpop.permute.xlu1 %4467  ;;  %5104 = vmatprep.mubr.bf16.mxu1 %v4587_v0 }
 0x564   : > { %v4599_v42 = vsel %vm1262_vm6, %v12173_v6, %v4468_v41 }
 0x567   : > { %v4470_v9 = vpop.permute.xlu1 %4469 }
 0x568   : > { %v4436_v44 = vpop.permute.xlu0 %4435  ;;  %v4603_v31 = vsel %vm1262_vm6, %v12164_v38, %v4470_v9 }
 0x56a   : > { %5105 = vmatmul.mubr.bf16.gmra.mrb[204].mxu1 %v4532_v23 }
 0x56b   : > { %v4472_v15 = vpop.permute.xlu1 %4471  ;;  %5112 = vmatprep.mubr.bf16.mxu1 %v4591_v26 }
 0x56c   : > { %v4438_v5 = vpop.permute.xlu0 %4437 }
 0x56d   : > { %v4544_v26 = vsel %vm1262_vm6, %v11950_v34, %v4438_v5  ;;  %v13702_v5 = vld [vmem:[#allocation2_spill] sm:$0xff] }
 0x56f   : > { %v4474_v2 = vpop.permute.xlu1 %4473 }
 0x570   : > { %v4440_v21 = vpop.permute.xlu0 %4439 }
 0x571   : > { %v4547_v9 = vsel %vm1262_vm6, %v11982_v35, %v4440_v21 }
 0x572   : > { %5113 = vmatmul.mubr.bf16.gmra.mrb[208].mxu1 %v4535_v33 }
 0x573   : > { %v4476_v63 = vpop.permute.xlu1 %4475  ;;  %5120 = vmatprep.mubr.bf16.mxu1 %v4595_v17 }
 0x574   : > { %v4442_v29 = vpop.permute.xlu0 %4441 }
 0x577   : > { %v4480_v27 = vpop.permute.xlu1 %4479 }
 0x578   : > { %v4623_v30 = vsel %vm1262_vm6, %v11643_v22, %v4480_v27  ;;  %v4444_v36 = vpop.permute.xlu0 %4443  ;;  %v4541_v22 = vsel %vm1262_vm6, %v11890_v28, %v4436_v44 }
 0x579   : > { %5210 = vmatmul.mubr.bf16.vlgmr.msra.gmra.mrb[176].mxu0 %v4623_v30 }
 0x57a   : > { %5217 = vmatprep.mubr.bf16.mxu0 %v4520_v10  ;;  %5121 = vmatmul.mubr.bf16.gmra.mrb[212].mxu1 %v4538_v51 }
 0x57b   : > { %5128 = vmatprep.mubr.bf16.mxu1 %v4599_v42  ;;  %v4446_v20 = vpop.permute.xlu1 %4445 }
 0x57c   : > { %v4478_v18 = vpop.permute.xlu0 %4477 }
 0x57f   : > { %v4484_v10 = vpop.permute.xlu1 %4483 }
 0x580   : > { %v4482_v0 = vpop.permute.xlu0 %4481  ;;  %v4631_v41 = vsel %vm1262_vm6, %v13700_v62, %v4484_v10 }
 0x581   : > { %v4627_v57 = vsel %vm1262_vm6, %v11609_v43, %v4482_v0  ;;  %v4607_v43 = vsel %vm1262_vm6, %v12185_v14, %v4472_v15  ;;  %v4550_v15 = vsel %vm1262_vm6, %v12013_v11, %v4442_v29 }
 0x582   : > { %5218 = vmatmul.mubr.bf16.gmra.mrb[180].mxu0 %v4627_v57  ;;  %5129 = vmatmul.mubr.bf16.gmra.mrb[216].mxu1 %v4541_v22 }
 0x583   : > { %5225 = vmatprep.mubr.bf16.mxu0 %v4523_v58  ;;  %5136 = vmatprep.mubr.bf16.mxu1 %v4603_v31  ;;  %v13701_v58 = vld [vmem:[#allocation3_spill] sm:$0xff]  ;;  %v4488_v34 = vpop.permute.xlu1 %4487 }
 0x584   : > { %v4486_v28 = vpop.permute.xlu0 %4485  ;;  %v4639_v17 = vsel %vm1262_vm6, %v13702_v5, %v4488_v34 }
 0x585   : > { %v4635_v44 = vsel %vm1262_vm6, %v13701_v58, %v4486_v28 }
 0x587   : > { %v4492_v11 = vpop.permute.xlu1 %4491 }
 0x588   : > { %v4490_v35 = vpop.permute.xlu0 %4489  ;;  %v4647_v29 = vsel %vm1262_vm6, %v11854_v52, %v4492_v11 }
 0x589   : > { %v4643_v21 = vsel %vm1262_vm6, %v11819_v56, %v4490_v35 }
 0x58a   : > { %5226 = vmatmul.mubr.bf16.gmra.mrb[184].mxu0 %v4631_v41  ;;  %5137 = vmatmul.mubr.bf16.gmra.mrb[220].mxu1 %v4544_v26  ;;  %v9163_v41 = vld [vmem:[%s13616_s5] sm:$0xff]  }
 0x58b   : > { %5233 = vmatprep.mubr.bf16.mxu0 %v4526_v39  ;;  %5144 = vmatprep.mubr.bf16.mxu1 %v4607_v43  ;;  %v4611_v39 = vsel %vm1262_vm6, %v12179_v37, %v4474_v2  ;;  %v4553_v2 = vsel %vm1262_vm6, %v12026_v13, %v4444_v36  ;;  %v4496_v52 = vpop.permute.xlu1 %4495 }
 0x58c   : > { %v4494_v56 = vpop.permute.xlu0 %4493 }
 0x58d   : > { %v4651_v13 = vsel %vm1262_vm6, %v11915_v25, %v4494_v56 }
 0x590   : > { %v4498_v25 = vpop.permute.xlu0 %4497 }
 0x592   : > { %5234 = vmatmul.mubr.bf16.gmra.mrb[188].mxu0 %v4635_v44  ;;  %5145 = vmatmul.mubr.bf16.gmra.mrb[224].mxu1 %v4547_v9 }
 0x593   : > { %5241 = vmatprep.mubr.bf16.mxu0 %v4529_v32  ;;  %5152 = vmatprep.mubr.bf16.mxu1 %v4611_v39  ;;  %v4615_v32 = vsel %vm1262_vm6, %v12198_v50, %v4476_v63  ;;  %v4556_v63 = vsel %vm1262_vm6, %v12049_v53, %v4446_v20  ;;  %v4655_v53 = vsel %vm1262_vm6, %v11939_v45, %v4496_v52  ;;  %v4500_v45 = vpop.permute.xlu1 %4499 }
 0x59a   : > { %5242 = vmatmul.mubr.bf16.gmra.mrb[192].mxu0 %v4639_v17  ;;  %5153 = vmatmul.mubr.bf16.gmra.mrb[228].mxu1 %v4550_v15  ;;  %v9164_v17 = vld [vmem:[%s13616_s5 + $0x48] sm:$0xff]  }
 0x59b   : > { %5249 = vmatprep.mubr.bf16.mxu0 %v4532_v23  ;;  %5160 = vmatprep.mubr.bf16.mxu1 %v4615_v32  ;;  %v4619_v23 = vsel %vm1262_vm6, %v12210_v61, %v4478_v18 }
 0x5a2   : > { %5250 = vmatmul.mubr.bf16.gmra.mrb[196].mxu0 %v4643_v21  ;;  %5161 = vmatmul.mubr.bf16.gmra.mrb[232].mxu1 %v4553_v2 }
 0x5a3   : > { %5257 = vmatprep.mubr.bf16.mxu0 %v4535_v33  ;;  %5168 = vmatprep.mubr.bf16.mxu1 %v4619_v23 }
 0x5aa   : > { %5258 = vmatmul.mubr.bf16.gmra.mrb[200].mxu0 %v4647_v29  ;;  %5169 = vmatmul.mubr.bf16.gmra.mrb[236].mxu1 %v4556_v63 }
 0x5ab   : > { %5265 = vmatprep.mubr.bf16.mxu0 %v4538_v51  ;;  %8954 = vmatprep.mubr.msk.bf16.mxu1 %vm1262_vm6, %v12113_v16  ;;  %v4659_v16 = vsel %vm1262_vm6, %v12005_v8, %v4498_v25  ;;  %v4502_v8 = vpop.permute.xlu0 %4501 }
 0x5b2   : > { %5266 = vmatmul.mubr.bf16.gmra.mrb[204].mxu0 %v4651_v13  ;;  %8955 = vmatmul.mubr.msk.bf16.vlgmr.msra.gmra.mrb[240].mxu1 %vm1262_vm6, %v12105_v46  ;;  %v4663_v46 = vsel %vm1262_vm6, %v12016_v40, %v4500_v45  ;;  %v4504_v40 = vpop.permute.xlu1 %4503 }
 0x5b3   : > { %5273 = vmatprep.mubr.bf16.mxu0 %v4541_v22  ;;  %8958 = vmatprep.mubr.msk.bf16.mxu1 %vm1262_vm6, %v12127_v24  ;;  %v4671_v24 = vsel %vm1262_vm6, %v12068_v3, %v4504_v40  ;;  %v9162_v22 = vld [vmem:[%s13616_s5 + $0x40] sm:$0xff]  }
 0x5b4   : > { %8588 = vmatprep.subr.bf16.mxu0 %v9162_v22 }
 0x5b5   : > { %8589 = vmatpush3.bf16.msra.mxu0 %v9163_v41 }
 0x5b6   : > { %8590 = vmatprep.subr.bf16.mxu0 %v9164_v17 }
 0x5ba   : > { %5274 = vmatmul.mubr.bf16.gmra.mrb[208].mxu0 %v4655_v53  ;;  %8959 = vmatmul.mubr.msk.bf16.gmra.mrb[244].mxu1 %vm1262_vm6, %v12119_v12  ;;  %v4667_v12 = vsel %vm1262_vm6, %v12057_v49, %v4502_v8  ;;  %v4506_v49 = vpop.permute.xlu0 %4505 }
 0x5bb   : > { %5281 = vmatprep.mubr.bf16.mxu0 %v4544_v26  ;;  %8962 = vmatprep.mubr.msk.bf16.mxu1 %vm1262_vm6, %v12141_v55  ;;  %v4675_v55 = vsel %vm1262_vm6, %v12086_v47, %v4506_v49 }
 0x5be   : > { %v4508_v3 = vpop.permute.xlu0 %4507 }
 0x5c2   : > { %5282 = vmatmul.mubr.bf16.gmra.mrb[212].mxu0 %v4659_v16  ;;  %8963 = vmatmul.mubr.msk.bf16.gmra.mrb[248].mxu1 %vm1262_vm6, %v12133_v4  ;;  %v4512_v4 = vpop.permute.xlu1 %4511 }
 0x5c3   : > { %5289 = vmatprep.mubr.bf16.mxu0 %v4547_v9  ;;  %8966 = vmatprep.mubr.msk.bf16.mxu1 %vm1262_vm6, %v12156_v54  ;;  %v4679_v54 = vsel %vm1262_vm6, %v12091_v1, %v4508_v3 }
 0x5c6   : > { %v4510_v47 = vpop.permute.xlu1 %4509 }
 0x5ca   : > { %5290 = vmatmul.mubr.bf16.gmra.mrb[216].mxu0 %v4663_v46  ;;  %8967 = vmatmul.mubr.msk.bf16.gmra.mrb[252].mxu1 %vm1262_vm6, %v12147_v48  ;;  %v4686_v48 = vsel %vm1262_vm6, %v12099_v7, %v4512_v4  ;;  %v4683_v7 = vsel %vm1262_vm6, %v12191_v59, %v4510_v47  ;;  %v9166_v46 = vld [vmem:[%s13616_s5 + $0x50] sm:$0xff]   ;;  %v12405_v4 = vld [vmem:[%s13615_s4 + $0x2] ss:$0 sm:$0xff] }
 0x5cb   : > { %5297 = vmatprep.mubr.bf16.mxu0 %v4550_v15  ;;  %8970 = vmatprep.mubr.msk.bf16.mxu1 %vm1262_vm6, %v12173_v6  ;;  %v9165_v15 = vld [vmem:[%s13616_s5 + $0x8] sm:$0xff]  }
 0x5cc   : > { %8591 = vmatpush3.bf16.msra.mxu0 %v9165_v15 }
 0x5cd   : > { %8592 = vmatprep.subr.bf16.mxu0 %v9166_v46 }
 0x5d2   : > { %5298 = vmatmul.mubr.bf16.gmra.mrb[220].mxu0 %v4667_v12  ;;  %8971 = vmatmul.mubr.msk.bf16.gmra.mrb[0].mxu1 %vm1262_vm6, %v12164_v38  ;;  %v9167_v12 = vld [vmem:[%s13616_s5 + $0x10] sm:$0xff]  }
 0x5d3   : > { %5305 = vmatprep.mubr.bf16.mxu0 %v4553_v2  ;;  %8974 = vmatprep.mubr.msk.bf16.mxu1 %vm1262_vm6, %v12185_v14 }
 0x5d4   : > { %8593 = vmatpush3.bf16.msra.mxu0 %v9167_v12 }
 0x5da   : > { %5306 = vmatmul.mubr.bf16.gmra.mrb[224].mxu0 %v4671_v24  ;;  %8975 = vmatmul.mubr.msk.bf16.gmra.mrb[4].mxu1 %vm1262_vm6, %v12179_v37 }
 0x5db   : > { %5313 = vmatprep.mubr.bf16.mxu0 %v4556_v63  ;;  %8978 = vmatprep.mubr.msk.bf16.mxu1 %vm1262_vm6, %v12198_v50 }
 0x5e2   : > { %5314 = vmatmul.mubr.bf16.gmra.mrb[228].mxu0 %v4675_v55  ;;  %8979 = vmatmul.mubr.msk.bf16.gmra.mrb[8].mxu1 %vm1262_vm6, %v12210_v61 }
 0x5e3   : > { %5321 = vmatprep.mubr.bf16.mxu0 %v4686_v48  ;;  %8982 = vmatprep.mubr.msk.bf16.mxu1 %vm1262_vm6, %v12204_v60 }
 0x5ea   : > { %5322 = vmatmul.mubr.bf16.gmra.mrb[232].mxu0 %v4679_v54  ;;  %8983 = vmatmul.mubr.msk.bf16.gmra.mrb[12].mxu1 %vm1262_vm6, %v12210_v61 }
 0x5eb   : > { %5329 = vmatprep.mubr.bf16.mxu0 %v4556_v63 }
 0x5f2   : > { %5330 = vmatmul.mubr.bf16.gmra.mrb[236].mxu0 %v4683_v7 }
 0x605   : > { %v8360_v38 = vpop.f32.mrb[176].mxu1 }
 0x606   : > { %v8361_v6 = vpop.f32.mrb[177].mxu1 }
 0x607   : > { %v12352_v37 = vadd.f32 %v8361_v6, %v8360_v38  ;;  %v8363_v14 = vpop.f32.mrb[178].mxu1 }
 0x608   : > { %v8364_v50 = vpop.f32.mrb[179].mxu1 }
 0x609   : > { %v12354_v60 = vadd.f32 %v8364_v50, %v8363_v14  ;;  %v5051_v38 = vadd.f32 %v12352_v37, %v12405_v4 }
 0x60d   : > { %v8366_v33 = vpop.f32.mrb[180].mxu1 }
 0x60e   : > { %v8367_v1 = vpop.f32.mrb[181].mxu1 }
 0x60f   : > { %v12356_v27 = vadd.f32 %v8367_v1, %v8366_v33  ;;  %v8369_v30 = vpop.f32.mrb[182].mxu1  ;;  %v5054_v33 = vadd.f32 %v12354_v60, %v12405_v4 }
 0x610   : > { %v8370_v36 = vpop.f32.mrb[183].mxu1 }
 0x611   : > { %v12358_v61 = vadd.f32 %v8370_v36, %v8369_v30 }
 0x615   : > { %v8372_v51 = vpop.f32.mrb[184].mxu1 }
 0x616   : > { %v8373_v18 = vpop.f32.mrb[185].mxu1 }
 0x617   : > { %v12360_v59 = vadd.f32 %v8373_v18, %v8372_v51  ;;  %v8375_v42 = vpop.f32.mrb[186].mxu1 }
 0x618   : > { %v8376_v20 = vpop.f32.mrb[187].mxu1 }
 0x619   : > { %v12362_v0 = vadd.f32 %v8376_v20, %v8375_v42 }
 0x61d   : > { %v8378_v57 = vpop.f32.mrb[188].mxu1 }
 0x61e   : > { %v8379_v31 = vpop.f32.mrb[189].mxu1 }
 0x61f   : > { %v12367_v10 = vadd.f32 %v8379_v31, %v8378_v57  ;;  %v8381_v62 = vpop.f32.mrb[190].mxu1 }
 0x620   : > { %v8382_v26 = vpop.f32.mrb[191].mxu1 }
 0x621   : > { %v12372_v43 = vadd.f32 %v8382_v26, %v8381_v62  ;;  %v5059_v62 = vadd.f32 %v12356_v27, %v12405_v4 }
 0x625   : > { %v8384_v28 = vpop.f32.mrb[192].mxu1 }
 0x626   : > { %v8385_v58 = vpop.f32.mrb[193].mxu1 }
 0x627   : > { %v12374_v44 = vadd.f32 %v8385_v58, %v8384_v28  ;;  %v8387_v9 = vpop.f32.mrb[194].mxu1  ;;  %v9168_v28 = vld [vmem:[%s13616_s5 + $0x58] sm:$0xff]  }
 0x628   : > { %v8388_v39 = vpop.f32.mrb[195].mxu1  ;;  %v9169_v58 = vld [vmem:[%s13616_s5 + $0x18] sm:$0xff]   ;;  %8594 = vmatprep.subr.bf16.mxu0 %v9168_v28 }
 0x629   : > { %v12376_v34 = vadd.f32 %v8388_v39, %v8387_v9  ;;  %8595 = vmatpush3.bf16.msra.mxu0 %v9169_v58  ;;  %v5083_v58 = vadd.f32 %v12374_v44, %v12405_v4  ;;  %v9173_v44 = vld [vmem:[%s13616_s5 + $0x28] sm:$0xff]  }
 0x62d   : > { %v8390_v5 = vpop.f32.mrb[196].mxu1 }
 0x62e   : > { %v8391_v32 = vpop.f32.mrb[197].mxu1 }
 0x62f   : > { %v12384_v35 = vadd.f32 %v8391_v32, %v8390_v5  ;;  %v8393_v21 = vpop.f32.mrb[198].mxu1  ;;  %v5062_v5 = vadd.f32 %v12358_v61, %v12405_v4 }
 0x630   : > { %v8394_v2 = vpop.f32.mrb[199].mxu1 }
 0x631   : > { %v12386_v23 = vadd.f32 %v8394_v2, %v8393_v21 }
 0x635   : > { %v8396_v11 = vpop.f32.mrb[200].mxu1 }
 0x636   : > { %v8397_v29 = vpop.f32.mrb[201].mxu1 }
 0x637   : > { %v12388_v63 = vadd.f32 %v8397_v29, %v8396_v11  ;;  %v8399_v56 = vpop.f32.mrb[202].mxu1 }
 0x638   : > { %v8400_v13 = vpop.f32.mrb[203].mxu1 }
 0x639   : > { %v12390_v52 = vadd.f32 %v8400_v13, %v8399_v56  ;;  %v5067_v13 = vadd.f32 %v12360_v59, %v12405_v4  ;;  %v9171_v59 = vld [vmem:[%s13616_s5 + $0x20] sm:$0xff]  }
 0x63d   : > { %v8402_v53 = vpop.f32.mrb[204].mxu1 }
 0x63e   : > { %v8403_v25 = vpop.f32.mrb[205].mxu1 }
 0x63f   : > { %v12392_v16 = vadd.f32 %v8403_v25, %v8402_v53  ;;  %v8405_v45 = vpop.f32.mrb[206].mxu1 }
 0x640   : > { %v8406_v8 = vpop.f32.mrb[207].mxu1 }
 0x641   : > { %v12400_v40 = vadd.f32 %v8406_v8, %v8405_v45  ;;  %v5070_v8 = vadd.f32 %v12362_v0, %v12405_v4 }
 0x645   : > { %v8408_v24 = vpop.f32.mrb[208].mxu1 }
 0x646   : > { %v8409_v49 = vpop.f32.mrb[209].mxu1 }
 0x647   : > { %v12407_v55 = vadd.f32 %v8409_v49, %v8408_v24  ;;  %v8411_v48 = vpop.f32.mrb[210].mxu1 }
 0x648   : > { %v8412_v54 = vpop.f32.mrb[211].mxu1 }
 0x649   : > { %v12409_v7 = vadd.f32 %v8412_v54, %v8411_v48 }
 0x64c   : > { %v8472_v3 = vpop.f32.mrb[176].mxu0 }
 0x64d   : > { %v8473_v47 = vpop.f32.mrb[177].mxu0  ;;  %v8414_v36 = vpop.f32.mrb[212].mxu1 }
 0x64e   : > { %v8474_v6 = vadd.f32 %v8473_v47, %v8472_v3  ;;  %v8475_v14 = vpop.f32.mrb[178].mxu0  ;;  %v8415_v51 = vpop.f32.mrb[213].mxu1  ;;  %v9170_v3 = vld [vmem:[%s13616_s5 + $0x60] sm:$0xff]  }
 0x64f   : > { %v8476_v50 = vpop.f32.mrb[179].mxu0  ;;  %v12419_v42 = vadd.f32 %v8415_v51, %v8414_v36  ;;  %v8417_v20 = vpop.f32.mrb[214].mxu1  ;;  %8596 = vmatprep.subr.bf16.mxu0 %v9170_v3 }
 0x650   : > { %v8477_v1 = vadd.f32 %v8476_v50, %v8475_v14  ;;  %v12415_v30 = vadd.f32 %v8474_v6, %v5051_v38  ;;  %v8418_v57 = vpop.f32.mrb[215].mxu1  ;;  %8597 = vmatpush3.bf16.msra.mxu0 %v9171_v59  ;;  %v5075_v14 = vadd.f32 %v12367_v10, %v12405_v4 }
 0x651   : > { %v12421_v22 = vadd.f32 %v8418_v57, %v8417_v20  ;;  %v5078_v20 = vadd.f32 %v12372_v43, %v12405_v4 }
 0x652   : > { %v12417_v18 = vadd.f32 %v8477_v1, %v5054_v33 }
 0x655   : > { %v8478_v37 = vpop.f32.mrb[180].mxu0  ;;  %v8420_v26 = vpop.f32.mrb[216].mxu1 }
 0x656   : > { %v8479_v31 = vpop.f32.mrb[181].mxu0  ;;  %v8421_v39 = vpop.f32.mrb[217].mxu1 }
 0x657   : > { %v8480_v41 = vadd.f32 %v8479_v31, %v8478_v37  ;;  %v8481_v60 = vpop.f32.mrb[182].mxu0  ;;  %v12433_v15 = vadd.f32 %v8421_v39, %v8420_v26  ;;  %v8423_v27 = vpop.f32.mrb[218].mxu1 }
 0x658   : > { %v8482_v9 = vpop.f32.mrb[183].mxu0  ;;  %v8424_v21 = vpop.f32.mrb[219].mxu1 }
 0x659   : > { %v8483_v17 = vadd.f32 %v8482_v9, %v8481_v60  ;;  %v12435_v32 = vadd.f32 %v8480_v41, %v5059_v62  ;;  %v12437_v2 = vadd.f32 %v8424_v21, %v8423_v27  ;;  %v5086_v27 = vadd.f32 %v12376_v34, %v12405_v4 }
 0x65b   : > { %v12439_v11 = vadd.f32 %v8483_v17, %v5062_v5 }
 0x65d   : > { %v8484_v29 = vpop.f32.mrb[184].mxu0  ;;  %v8426_v25 = vpop.f32.mrb[220].mxu1 }
 0x65e   : > { %v8485_v56 = vpop.f32.mrb[185].mxu0  ;;  %v8427_v46 = vpop.f32.mrb[221].mxu1 }
 0x65f   : > { %v8486_v53 = vadd.f32 %v8485_v56, %v8484_v29  ;;  %v8487_v61 = vpop.f32.mrb[186].mxu0  ;;  %v12445_v24 = vadd.f32 %v8427_v46, %v8426_v25  ;;  %v8429_v49 = vpop.f32.mrb[222].mxu1 }
 0x660   : > { %v8488_v45 = vpop.f32.mrb[187].mxu0  ;;  %v8430_v54 = vpop.f32.mrb[223].mxu1 }
 0x661   : > { %v8489_v12 = vadd.f32 %v8488_v45, %v8487_v61  ;;  %v12447_v48 = vadd.f32 %v8486_v53, %v5067_v13  ;;  %v12455_v47 = vadd.f32 %v8430_v54, %v8429_v49  ;;  %v9172_v53 = vld [vmem:[%s13616_s5 + $0x68] sm:$0xff]  }
 0x662   : > { %8598 = vmatprep.subr.bf16.mxu0 %v9172_v53 }
 0x663   : > { %v12457_v38 = vadd.f32 %v8489_v12, %v5070_v8  ;;  %8599 = vmatpush3.bf16.msra.mxu0 %v9173_v44  ;;  %v5091_v8 = vadd.f32 %v12384_v35, %v12405_v4  ;;  %v5107_v44 = vadd.f32 %v12392_v16, %v12405_v4  ;;  %v9176_v16 = vld [vmem:[%s13616_s5 + $0x78] sm:$0xff]  }
 0x665   : > { %v8490_v0 = vpop.f32.mrb[188].mxu0  ;;  %v8432_v1 = vpop.f32.mrb[224].mxu1 }
 0x666   : > { %v8491_v6 = vpop.f32.mrb[189].mxu0  ;;  %v8433_v51 = vpop.f32.mrb[225].mxu1 }
 0x667   : > { %v8492_v50 = vadd.f32 %v8491_v6, %v8490_v0  ;;  %v8493_v33 = vpop.f32.mrb[190].mxu0  ;;  %v12463_v37 = vadd.f32 %v8433_v51, %v8432_v1  ;;  %v8435_v31 = vpop.f32.mrb[226].mxu1  ;;  %v5094_v0 = vadd.f32 %v12386_v23, %v12405_v4 }
 0x668   : > { %v8494_v36 = vpop.f32.mrb[191].mxu0  ;;  %v8436_v41 = vpop.f32.mrb[227].mxu1 }
 0x669   : > { %v8495_v57 = vadd.f32 %v8494_v36, %v8493_v33  ;;  %v12465_v62 = vadd.f32 %v8492_v50, %v5075_v14  ;;  %v12467_v60 = vadd.f32 %v8436_v41, %v8435_v31 }
 0x66b   : > { %v12469_v26 = vadd.f32 %v8495_v57, %v5078_v20  ;;  %v5099_v57 = vadd.f32 %v12388_v63, %v12405_v4  ;;  %v9175_v63 = vld [vmem:[%s13616_s5 + $0x30] sm:$0xff]  }
 0x66d   : > { %v8496_v10 = vpop.f32.mrb[192].mxu0  ;;  %v8438_v5 = vpop.f32.mrb[228].mxu1 }
 0x66e   : > { %v8497_v28 = vpop.f32.mrb[193].mxu0  ;;  %v8439_v17 = vpop.f32.mrb[229].mxu1 }
 0x66f   : > { %v8498_v9 = vadd.f32 %v8497_v28, %v8496_v10  ;;  %v8499_v39 = vpop.f32.mrb[194].mxu0  ;;  %v12475_v29 = vadd.f32 %v8439_v17, %v8438_v5  ;;  %v8441_v56 = vpop.f32.mrb[230].mxu1  ;;  %v9174_v17 = vld [vmem:[%s13616_s5 + $0x70] sm:$0xff]  }
 0x670   : > { %v8500_v43 = vpop.f32.mrb[195].mxu0  ;;  %v8442_v61 = vpop.f32.mrb[231].mxu1  ;;  %8600 = vmatprep.subr.bf16.mxu0 %v9174_v17 }
 0x671   : > { %v8501_v21 = vadd.f32 %v8500_v43, %v8499_v39  ;;  %v12477_v13 = vadd.f32 %v8498_v9, %v5083_v58  ;;  %v12485_v25 = vadd.f32 %v8442_v61, %v8441_v56  ;;  %v5102_v58 = vadd.f32 %v12390_v52, %v12405_v4  ;;  %8601 = vmatpush3.bf16.msra.mxu0 %v9175_v63 }
 0x672   : > { %8602 = vmatprep.subr.bf16.mxu0 %v9176_v16 }
 0x673   : > { %v12487_v45 = vadd.f32 %v8501_v21, %v5086_v27 }
 0x675   : > { %v8502_v34 = vpop.f32.mrb[196].mxu0  ;;  %v8444_v3 = vpop.f32.mrb[232].mxu1 }
 0x676   : > { %v8503_v46 = vpop.f32.mrb[197].mxu0  ;;  %v8445_v54 = vpop.f32.mrb[233].mxu1 }
 0x677   : > { %v8504_v12 = vadd.f32 %v8503_v46, %v8502_v34  ;;  %v8505_v49 = vpop.f32.mrb[198].mxu0  ;;  %v12493_v14 = vadd.f32 %v8445_v54, %v8444_v3  ;;  %v8447_v50 = vpop.f32.mrb[234].mxu1  ;;  %v5110_v3 = vadd.f32 %v12400_v40, %v12405_v4 }
 0x678   : > { %v8506_v59 = vpop.f32.mrb[199].mxu0  ;;  %v8448_v1 = vpop.f32.mrb[235].mxu1 }
 0x679   : > { %v8507_v6 = vadd.f32 %v8506_v59, %v8505_v49  ;;  %v12495_v33 = vadd.f32 %v8504_v12, %v5091_v8  ;;  %v12497_v36 = vadd.f32 %v8448_v1, %v8447_v50  ;;  %v9177_v50 = vld [vmem:[%s13616_s5 + $0x38] sm:$0xff]  }
 0x67a   : > { %8603 = vmatpush3.bf16.msra.mxu0 %v9177_v50 }
 0x67b   : > { %v12499_v51 = vadd.f32 %v8507_v6, %v5094_v0 }
 0x67d   : > { %v8508_v35 = vpop.f32.mrb[200].mxu0  ;;  %v8450_v10 = vpop.f32.mrb[236].mxu1 }
 0x67e   : > { %v8509_v20 = vpop.f32.mrb[201].mxu0  ;;  %v8451_v28 = vpop.f32.mrb[237].mxu1 }
 0x67f   : > { %v8510_v31 = vadd.f32 %v8509_v20, %v8508_v35  ;;  %v8511_v41 = vpop.f32.mrb[202].mxu0  ;;  %v12505_v39 = vadd.f32 %v8451_v28, %v8450_v10  ;;  %v8453_v5 = vpop.f32.mrb[238].mxu1 }
 0x680   : > { %v8512_v23 = vpop.f32.mrb[203].mxu0  ;;  %v8454_v27 = vpop.f32.mrb[239].mxu1 }
 0x681   : > { %v8513_v9 = vadd.f32 %v8512_v23, %v8511_v41  ;;  %v12507_v43 = vadd.f32 %v8510_v31, %v5099_v57  ;;  %v12515_v21 = vadd.f32 %v8454_v27, %v8453_v5  ;;  %v9178_v57 = vld [vmem:[%s13616_s5 + $0xc0] sm:$0xff]   ;;  %v5118_v23 = vadd.f32 %v12409_v7, %v12405_v4 }
 0x682   : > { %v9179_v31 = vld [vmem:[%s13616_s5 + $0x80] sm:$0xff]   ;;  %8700 = vmatprep.subr.bf16.mxu1 %v9178_v57  ;;  %v12553_v5 = vadd.f32 %v12421_v22, %v12405_v4 }
 0x683   : > { %v12517_v56 = vadd.f32 %v8513_v9, %v5102_v58  ;;  %v12549_v9 = vadd.f32 %v12419_v42, %v12405_v4  ;;  %8701 = vmatpush3.bf16.msra.mxu1 %v9179_v31 }
 0x685   : > { %v8514_v52 = vpop.f32.mrb[204].mxu0  ;;  %v8956_v46 = vpop.f32.mrb[240].mxu1 }
 0x686   : > { %v8515_v53 = vpop.f32.mrb[205].mxu0  ;;  %v5381_v12 = vadd.f32 %v8956_v46, %v12435_v32  ;;  %v5372_v49 = vpop.f32.mrb[241].mxu1 }
 0x687   : > { %v8516_v61 = vadd.f32 %v8515_v53, %v8514_v52  ;;  %v8517_v34 = vpop.f32.mrb[206].mxu0  ;;  %v5373_v54 = vadd.f32 %v5372_v49, %v12415_v30  ;;  %v8957_v0 = vpop.f32.mrb[242].mxu1  ;;  %v12563_v49 = vadd.f32 %v12437_v2, %v12405_v4  ;;  %v12576_v2 = vld [vmem:[%s13616_s5 + $0x100] sm:$0xff]  }
 0x688   : > { %v8518_v8 = vpop.f32.mrb[207].mxu0  ;;  %v5384_v32 = vadd.f32 %v8957_v0, %v12439_v11  ;;  %v5375_v1 = vpop.f32.mrb[243].mxu1  ;;  %v5501_v30 = vmax.f32 %v5381_v12, 0.0  ;;  %v12568_v0 = vadd.f32 %v12445_v24, %v12405_v4  ;;  %8986 = vmatprep.subr.bf16.mxu0 %v12576_v2 }
 0x689   : > { %v8519_v59 = vadd.f32 %v8518_v8, %v8517_v34  ;;  %v12525_v6 = vadd.f32 %v8516_v61, %v5107_v44  ;;  %v5376_v35 = vadd.f32 %v5375_v1, %v12417_v18  ;;  %v5499_v10 = vmax.f32 %v5373_v54, 0.0 }
 0x68a   : > { %v5502_v20 = vmax.f32 %v5384_v32, 0.0  ;;  %v5115_v18 = vadd.f32 %v12407_v55, %v12405_v4  ;;  %v12557_v55 = vadd.f32 %v12433_v15, %v12405_v4 }
 0x68b   : > { %v12535_v40 = vadd.f32 %v8519_v59, %v5110_v3  ;;  %v5500_v11 = vmax.f32 %v5376_v35, 0.0 }
 0x68c   : > { %v5532_v58 = vpack.c.bf16 %v5502_v20, %v5501_v30 }
 0x68d   : > { %v8520_v41 = vpop.f32.mrb[208].mxu0  ;;  %v5531_v27 = vpack.c.bf16 %v5500_v11, %v5499_v10  ;;  %v8960_v52 = vpop.f32.mrb[244].mxu1 }
 0x68e   : > { %v8521_v28 = vpop.f32.mrb[209].mxu0  ;;  %v5548_v53 = vshrl.u32 %v5532_v58, 16  ;;  %v5612_v44 = vshll.u32 %v5532_v58, 16  ;;  %v5397_v61 = vadd.f32 %v8960_v52, %v12465_v62  ;;  %v5388_v42 = vpop.f32.mrb[245].mxu1  ;;  %v12609_v52 = vadd.f32 %v12455_v47, %v12405_v4 }
 0x68f   : > { %v8522_v17 = vadd.f32 %v8521_v28, %v8520_v41  ;;  %v8523_v63 = vpop.f32.mrb[210].mxu0  ;;  %v5551_v46 = vshrl.u32 %v5531_v27, 16  ;;  %v5616_v8 = vshll.u32 %v5531_v27, 16  ;;  %v5389_v22 = vadd.f32 %v5388_v42, %v12447_v48  ;;  %v8961_v12 = vpop.f32.mrb[246].mxu1 }
 0x690   : > { %v8524_v7 = vpop.f32.mrb[211].mxu0  ;;  %v5611_v3 = vrot.slane %v5548_v53, 7  ;;  %v5707_v59 = vrot.slane %v5612_v44, 7  ;;  %v5400_v15 = vadd.f32 %v8961_v12, %v12469_v26  ;;  %v5391_v54 = vpop.f32.mrb[247].mxu1  ;;  %v5505_v48 = vmax.f32 %v5397_v61, 0.0  ;;  %v9181_v26 = vld [vmem:[%s13616_s5 + $0xc8] sm:$0xff]  }
 0x691   : > { %v8525_v34 = vadd.f32 %v8524_v7, %v8523_v63  ;;  %v5615_v62 = vrot.slane %v5551_v46, 7  ;;  %v5708_v16 = vrot.slane %v5616_v8, 7  ;;  %v5392_v50 = vadd.f32 %v5391_v54, %v12457_v38  ;;  %8702 = vmatprep.subr.bf16.mxu1 %v9181_v26 }
 0x692   : > { %v5614_v32 = vor.u32 %v5612_v44, %v5611_v3  ;;  %v5506_v1 = vmax.f32 %v5400_v15, 0.0  ;;  %v12571_v35 = vadd.f32 %v8522_v17, %v5115_v18  ;;  %v5503_v20 = vmax.f32 %v5389_v22, 0.0  ;;  %v9182_v18 = vld [vmem:[%s13616_s5 + $0x88] sm:$0xff]   ;;  %v9184_v22 = vld [vmem:[%s13616_s5 + $0x90] sm:$0xff]  }
 0x693   : > { %v5618_v30 = vor.u32 %v5616_v8, %v5615_v62  ;;  %v5504_v57 = vmax.f32 %v5392_v50, 0.0  ;;  %v12583_v38 = vsel %vm9478_vm3, %v5611_v3, %v5707_v59  ;;  %v12591_v11 = vadd.f32 %v8525_v34, %v5118_v23  ;;  %8703 = vmatpush3.bf16.msra.mxu1 %v9182_v18 }
 0x694   : > { %v12585_v41 = vpack.c.bf16 %v5506_v1, %v5505_v48  ;;  %v12589_v10 = vsel %vm9478_vm3, %v5548_v53, %v5614_v32  ;;  %v12605_v23 = vsel %vm9478_vm3, %v5615_v62, %v5708_v16  ;;  %v12613_v7 = vadd.f32 %v12463_v37, %v12405_v4 }
 0x695   : > { %v8526_v24 = vpop.f32.mrb[212].mxu0  ;;  %v5533_v17 = vpack.c.bf16 %v5504_v57, %v5503_v20  ;;  %v8964_v63 = vpop.f32.mrb[248].mxu1  ;;  %v12601_v27 = vsel %vm9478_vm3, %v5551_v46, %v5618_v30  ;;  %v5774_v42 = vshll.u32 %v12589_v10, 16  ;;  %v12621_v34 = vadd.f32 %v12467_v60, %v12405_v4 }
 0x696   : > { %v8527_v31 = vpop.f32.mrb[213].mxu0  ;;  %v5413_v44 = vadd.f32 %v8964_v63, %v12495_v33  ;;  %v5404_v61 = vpop.f32.mrb[249].mxu1  ;;  %6073 = vrot.lane.b32.xlu0 %v12601_v27, %s9334_s22  ;;  %v9183_v33 = vld [vmem:[%s13616_s5 + $0xd0] sm:$0xff]   ;;  %v5557_v12 = vshrl.u32 %v12585_v41, 16  ;;  %v5779_v59 = vshll.u32 %v12583_v38, 16  ;;  %v5791_v15 = vshll.u32 %v12605_v23, 16 }
 0x697   : > { %v12597_v28 = vadd.f32 %v8527_v31, %v8526_v24  ;;  %v8529_v58 = vpop.f32.mrb[214].mxu0  ;;  %v5554_v46 = vshrl.u32 %v5533_v17, 16  ;;  %v5405_v37 = vadd.f32 %v5404_v61, %v12477_v13  ;;  %v8965_v8 = vpop.f32.mrb[250].mxu1  ;;  %v5620_v13 = vshll.u32 %v5533_v17, 16  ;;  %8704 = vmatprep.subr.bf16.mxu1 %v9183_v33 }
 0x698   : > { %v8530_v53 = vpop.f32.mrb[215].mxu0  ;;  %v5416_v3 = vadd.f32 %v8965_v8, %v12499_v51  ;;  %v5407_v60 = vpop.f32.mrb[251].mxu1  ;;  %v5772_v16 = vshrl.u32 %v12589_v10, 16  ;;  %v5624_v50 = vshll.u32 %v12585_v41, 16  ;;  %v5509_v32 = vmax.f32 %v5413_v44, 0.0  ;;  %8705 = vmatpush3.bf16.msra.mxu1 %v9184_v22  ;;  %v9186_v8 = vld [vmem:[%s13616_s5 + $0x98] sm:$0xff]  }
 0x699   : > { %v12623_v47 = vadd.f32 %v8530_v53, %v8529_v58  ;;  %v5619_v54 = vrot.slane %v5554_v46, 7  ;;  %v5408_v62 = vadd.f32 %v5407_v60, %v12487_v45  ;;  %v5776_v51 = vrot.slane %v5774_v42, 1 }
 0x69a   : > { %v5510_v48 = vmax.f32 %v5416_v3, 0.0  ;;  %6075 = vrot.lane.b32.xlu0 %v12589_v10, %s9334_s22  ;;  %v5507_v24 = vmax.f32 %v5405_v37, 0.0  ;;  %v5786_v20 = vshll.u32 %v12601_v27, 16  ;;  %v12644_v45 = vrot.slane %v5557_v12, 7  ;;  %v9185_v37 = vld [vmem:[%s13616_s5 + $0xd8] sm:$0xff]  }
 0x69b   : > { %v5622_v26 = vor.u32 %v5620_v13, %v5619_v54  ;;  %v5508_v30 = vmax.f32 %v5408_v62, 0.0  ;;  %v5777_v18 = vor.u32 %v5776_v51, %v5772_v16  ;;  %v5781_v58 = vrot.slane %v5779_v59, 1  ;;  %8706 = vmatprep.subr.bf16.mxu1 %v9185_v37 }
 0x69c   : > { %v12646_v31 = vpack.c.bf16 %v5510_v48, %v5509_v32  ;;  %v12650_v17 = vadd.f32 %v12475_v29, %v12405_v4  ;;  %v12666_v29 = vrot.slane %v5624_v50, 7  ;;  %v5709_v62 = vrot.slane %v5620_v13, 7  ;;  %8707 = vmatpush3.bf16.msra.mxu1 %v9186_v8 }
 0x69d   : > { %v8532_v1 = vpop.f32.mrb[216].mxu0  ;;  %v12654_v44 = vpack.c.bf16 %v5508_v30, %v5507_v24  ;;  %v8968_v61 = vpop.f32.mrb[252].mxu1  ;;  %v12658_v42 = vsel %vm9478_vm3, %v5554_v46, %v5622_v26  ;;  %v12669_v22 = vsel %vm892_vm4, %v5777_v18, %v5781_v58  ;;  %v5788_v46 = vrot.slane %v5786_v20, 1 }
 0x69e   : > { %v8533_v57 = vpop.f32.mrb[217].mxu0  ;;  %v5429_v3 = vadd.f32 %v8968_v61, %v12525_v6  ;;  %v5420_v60 = vpop.f32.mrb[253].mxu1  ;;  %6077 = vrot.lane.b32.xlu0 %v12658_v42, %s9334_s22  ;;  %6043 = vrot.lane.b32.xlu1 %v12669_v22, %s9334_s22  ;;  %v5626_v51 = vor.u32 %v5624_v50, %v12644_v45  ;;  %v5784_v26 = vshrl.u32 %v12601_v27, 16  ;;  %v5793_v24 = vrot.slane %v5791_v15, 1 }
 0x69f   : > { %v12652_v63 = vadd.f32 %v8533_v57, %v8532_v1  ;;  %v8535_v53 = vpop.f32.mrb[218].mxu0  ;;  %v5560_v16 = vshrl.u32 %v12654_v44, 16  ;;  %v5421_v32 = vadd.f32 %v5420_v60, %v12507_v43  ;;  %v8969_v48 = vpop.f32.mrb[254].mxu1  ;;  %v5563_v13 = vshrl.u32 %v12646_v31, 16 }
 0x6a0   : > { %v8536_v33 = vpop.f32.mrb[219].mxu0  ;;  %v5432_v6 = vadd.f32 %v8969_v48, %v12535_v40  ;;  %v5423_v1 = vpop.f32.mrb[255].mxu1  ;;  %v5632_v30 = vshll.u32 %v12646_v31, 16  ;;  %v5513_v20 = vmax.f32 %v5429_v3, 0.0  ;;  %v5789_v50 = vor.u32 %v5788_v46, %v5784_v26 }
 0x6a1   : > { %v12674_v59 = vadd.f32 %v8536_v33, %v8535_v53  ;;  %v5424_v57 = vadd.f32 %v5423_v1, %v12517_v56  ;;  %v12688_v43 = vrot.slane %v5560_v16, 7  ;;  %v5284_v40 = vadd.f32 %v12597_v28, %v12549_v9 }
 0x6a2   : > { %v5514_v18 = vmax.f32 %v5432_v6, 0.0  ;;  %v5628_v15 = vshll.u32 %v12654_v44, 16  ;;  %v5511_v53 = vmax.f32 %v5421_v32, 0.0  ;;  %v12695_v37 = vsel %vm9478_vm3, %v5619_v54, %v5709_v62 }
 0x6a3   : > { %v5512_v61 = vmax.f32 %v5424_v57, 0.0  ;;  %v12700_v33 = vsel %vm892_vm4, %v5789_v50, %v5793_v24  ;;  %v5798_v3 = vshll.u32 %v12658_v42, 16  ;;  %v5803_v60 = vshll.u32 %v12695_v37, 16  ;;  %v9187_v57 = vld [vmem:[%s13616_s5 + $0xe0] sm:$0xff]  }
 0x6a4   : > { %v12697_v56 = vpack.c.bf16 %v5514_v18, %v5513_v20  ;;  %v12706_v46 = vrot.slane %v5563_v13, 7  ;;  %6045 = vrot.lane.b32.xlu1 %v12700_v33, %s9334_s22  ;;  %v5287_v62 = vadd.f32 %v12623_v47, %v12553_v5  ;;  %v5630_v6 = vor.u32 %v5628_v15, %v12688_v43  ;;  %8708 = vmatprep.subr.bf16.mxu1 %v9187_v57 }
 0x6a5   : > { %v8538_v58 = vpop.f32.mrb[220].mxu0  ;;  %v12708_v32 = vpack.c.bf16 %v5512_v61, %v5511_v53  ;;  %v8972_v54 = vpop.f32.mrb[0].mxu1  ;;  %v5796_v26 = vshrl.u32 %v12658_v42, 16  ;;  %v5800_v24 = vrot.slane %v5798_v3, 1  ;;  %v12721_v18 = vadd.f32 %v12485_v25, %v12405_v4 }
 0x6a6   : > { %v8539_v8 = vpop.f32.mrb[221].mxu0  ;;  %v5445_v1 = vadd.f32 %v8972_v54, %v5284_v40  ;;  %v5436_v20 = vpop.f32.mrb[1].mxu1  ;;  %v12730_v47 = vsel %vm9478_vm3, %v5557_v12, %v5626_v51  ;;  %v12735_v53 = vrot.slane %v5632_v30, 7  ;;  %v5711_v61 = vrot.slane %v5628_v15, 7 }
 0x6a7   : > { %v8540_v9 = vadd.f32 %v8539_v8, %v8538_v58  ;;  %v8541_v28 = vpop.f32.mrb[222].mxu0  ;;  %v13646_v5 = vshrl.u32 %v12708_v32, 16  ;;  %v8973_v40 = vpop.f32.mrb[2].mxu1  ;;  %v9188_v58 = vld [vmem:[%s13616_s5 + $0xa0] sm:$0xff]   ;;  %v5801_v25 = vor.u32 %v5800_v24, %v5796_v26  ;;  %v5805_v8 = vrot.slane %v5803_v60, 1 }
 0x6a8   : > { %v8542_v48 = vpop.f32.mrb[223].mxu0  ;;  %v5439_v3 = vpop.f32.mrb[3].mxu1  ;;  %v13645_v41 = vshrl.u32 %v12697_v56, 16  ;;  %6079 = vrot.lane.b32.xlu1 %v12730_v47, %s9334_s22  ;;  %v5437_v12 = vadd.f32 %v5436_v20, %v12571_v35  ;;  %v5448_v51 = vadd.f32 %v8973_v40, %v5287_v62  ;;  %8709 = vmatpush3.bf16.msra.mxu1 %v9188_v58  ;;  %v12750_v60 = vsel %vm9478_vm3, %v5560_v16, %v5630_v6  ;;  %v9189_v35 = vld [vmem:[%s13616_s5 + $0xe8] sm:$0xff]  }
 0x6a9   : > { %v12723_v50 = vadd.f32 %v8542_v48, %v8541_v28  ;;  %v5634_v28 = vor.u32 %v5632_v30, %v12706_v46  ;;  %v12743_v54 = vsel %vm892_vm4, %v5801_v25, %v5805_v8  ;;  %v5440_v15 = vadd.f32 %v5439_v3, %v12591_v11  ;;  %v9190_v11 = vld [vmem:[%s13616_s5 + $0xa8] sm:$0xff]   ;;  %8710 = vmatprep.subr.bf16.mxu1 %v9189_v35 }
 0x6aa   : > { %v12756_v30 = vsel %vm9478_vm3, %v12644_v45, %v12666_v29  ;;  %v12766_v44 = vrot.slane %v13646_v5, 7  ;;  %v5636_v16 = vshll.u32 %v12708_v32, 16  ;;  %v5517_v48 = vmax.f32 %v5445_v1, 0.0  ;;  %6047 = vrot.lane.b32.xlu0 %v12743_v54, %s9334_s22 }
 0x6ab   : > { %v5518_v45 = vmax.f32 %v5448_v51, 0.0  ;;  %v5515_v6 = vmax.f32 %v5437_v12, 0.0  ;;  %v5516_v26 = vmax.f32 %v5440_v15, 0.0  ;;  %v5810_v24 = vshll.u32 %v12730_v47, 16 }
 0x6ac   : > { %v5815_v20 = vshll.u32 %v12756_v30, 16  ;;  %v12777_v58 = vrot.slane %v13645_v41, 7  ;;  %6081 = vrot.lane.b32.xlu1 %v12750_v60, %s9334_s22  ;;  %v5300_v25 = vadd.f32 %v8540_v9, %v12568_v0  ;;  %v5808_v51 = vshrl.u32 %v12730_v47, 16  ;;  %8711 = vmatpush3.bf16.msra.mxu1 %v9190_v11  ;;  %v9191_v11 = vld [vmem:[%s13616_s5 + $0xf0] sm:$0xff]  }
 0x6ad   : > { %v8544_v62 = vpop.f32.mrb[224].mxu0  ;;  %v12779_v1 = vpack.c.bf16 %v5518_v45, %v5517_v48  ;;  %v8976_v8 = vpop.f32.mrb[4].mxu1  ;;  %v12784_v12 = vpack.c.bf16 %v5516_v26, %v5515_v6  ;;  %v5812_v15 = vrot.slane %v5810_v24, 1  ;;  %v12790_v35 = vsel %vm9478_vm3, %v12688_v43, %v5711_v61  ;;  %8712 = vmatprep.subr.bf16.mxu1 %v9191_v11 }
 0x6ae   : > { %v8545_v29 = vpop.f32.mrb[225].mxu0  ;;  %v13644_v48 = vshll.u32 %v12697_v56, 16  ;;  %v5638_v45 = vor.u32 %v5636_v16, %v12766_v44  ;;  %v5461_v0 = vadd.f32 %v8976_v8, %v5300_v25  ;;  %v5817_v26 = vrot.slane %v5815_v20, 1 }
 0x6af   : > { %v12773_v57 = vadd.f32 %v8545_v29, %v8544_v62  ;;  %v8547_v40 = vpop.f32.mrb[226].mxu0  ;;  %v5452_v62 = vpop.f32.mrb[5].mxu1  ;;  %v5813_v6 = vor.u32 %v5812_v15, %v5808_v51  ;;  %v12800_v24 = vsel %vm9478_vm3, %v5563_v13, %v5634_v28  ;;  %v5822_v43 = vshll.u32 %v12750_v60, 16 }
 0x6b0   : > { %v8548_v3 = vpop.f32.mrb[227].mxu0  ;;  %v8977_v9 = vpop.f32.mrb[6].mxu1  ;;  %v5642_v20 = vor.u32 %v13644_v48, %v12777_v58  ;;  %v5713_v31 = vrot.slane %v5636_v16, 7  ;;  %6083 = vrot.lane.b32.xlu1 %v12800_v24, %s9334_s22  ;;  %v5820_v13 = vshrl.u32 %v12750_v60, 16  ;;  %v5827_v28 = vshll.u32 %v12790_v35, 16 }
 0x6b1   : > { %v12794_v29 = vadd.f32 %v8548_v3, %v8547_v40  ;;  %v5455_v61 = vpop.f32.mrb[7].mxu1  ;;  %v9192_v40 = vld [vmem:[%s13616_s5 + $0xb0] sm:$0xff]   ;;  %v12819_v3 = vsel %vm892_vm4, %v5813_v6, %v5817_v26  ;;  %v5824_v51 = vrot.slane %v5822_v43, 1  ;;  %v5521_v16 = vmax.f32 %v5461_v0, 0.0 }
 0x6b2   : > { %13703 = vst [vmem:[#allocation5_spill] sm:$0xff] %v12819_v3  ;;  %6049 = vrot.lane.b32.xlu0 %v12819_v3, %s9334_s22  ;;  %v5292_v41 = vadd.f32 %v12652_v63, %v12557_v55  ;;  %v5303_v25 = vadd.f32 %v12723_v50, %v12609_v52  ;;  %8713 = vmatpush3.bf16.msra.mxu1 %v9192_v40  ;;  %v5829_v6 = vrot.slane %v5827_v28, 1  ;;  %v13704_v43 = vshrl.u32 %v12708_v32, 16  ;;  %v9193_v63 = vld [vmem:[%s13616_s5 + $0xf8] sm:$0xff]  }
 0x6b3   : > { %v5825_v5 = vor.u32 %v5824_v51, %v5820_v13  ;;  %v5295_v26 = vadd.f32 %v12674_v59, %v12563_v49  ;;  %v12842_v52 = vsel %vm9478_vm3, %v12706_v46, %v12735_v53  ;;  %v9194_v59 = vld [vmem:[%s13616_s5 + $0xb8] sm:$0xff]   ;;  %8714 = vmatprep.subr.bf16.mxu1 %v9193_v63  ;;  %v5163_v63 = vadd.f32 %v12493_v14, %v12405_v4 }
 0x6b4   : > { %v12834_v11 = vsel %vm9478_vm3, %v13704_v43, %v5638_v45  ;;  %v5453_v3 = vadd.f32 %v5452_v62, %v5292_v41  ;;  %v5464_v55 = vadd.f32 %v8977_v9, %v5303_v25  ;;  %v5832_v62 = vshrl.u32 %v12800_v24, 16 }
 0x6b5   : > { %v8550_v15 = vpop.f32.mrb[228].mxu0  ;;  %6085 = vrot.lane.b32.xlu1 %v12834_v11, %s9334_s22  ;;  %v8980_v49 = vpop.f32.mrb[8].mxu1  ;;  %v12851_v50 = vsel %vm892_vm4, %v5825_v5, %v5829_v6  ;;  %v5456_v41 = vadd.f32 %v5455_v61, %v5295_v26  ;;  %v5834_v45 = vshll.u32 %v12800_v24, 16  ;;  %v5839_v13 = vshll.u32 %v12842_v52, 16 }
 0x6b6   : > { %v8551_v8 = vpop.f32.mrb[229].mxu0  ;;  %v5468_v46 = vpop.f32.mrb[9].mxu1  ;;  %6051 = vrot.lane.b32.xlu0 %v12851_v50, %s9334_s22  ;;  %v5519_v9 = vmax.f32 %v5453_v3, 0.0  ;;  %v5522_v40 = vmax.f32 %v5464_v55, 0.0  ;;  %v13705_v5 = vshrl.u32 %v12697_v56, 16  ;;  %8715 = vmatpush3.bf16.msra.mxu1 %v9194_v59  ;;  %v12876_v43 = vsel %vm9478_vm3, %v12766_v44, %v5713_v31 }
 0x6b7   : > { %v8552_v0 = vadd.f32 %v8551_v8, %v8550_v15  ;;  %v8553_v48 = vpop.f32.mrb[230].mxu0  ;;  %v8981_v28 = vpop.f32.mrb[10].mxu1  ;;  %v5520_v25 = vmax.f32 %v5456_v41, 0.0  ;;  %v5836_v8 = vrot.slane %v5834_v45, 1  ;;  %v13706_v15 = vshrl.u32 %v12784_v12, 16 }
 0x6b8   : > { %v8554_v32 = vpop.f32.mrb[231].mxu0  ;;  %v12862_v61 = vsel %vm9478_vm3, %v13705_v5, %v5642_v20  ;;  %v12869_v6 = vpack.c.bf16 %v5522_v40, %v5521_v16  ;;  %v5841_v26 = vrot.slane %v5839_v13, 1  ;;  %v5846_v55 = vshll.u32 %v12834_v11, 16 }
 0x6b9   : > { %v8555_v53 = vadd.f32 %v8554_v32, %v8553_v48  ;;  %v5316_v51 = vadd.f32 %v8552_v0, %v12650_v17  ;;  %v5471_v48 = vpop.f32.mrb[11].mxu1  ;;  %v12867_v3 = vrot.slane %v13706_v15, 7  ;;  %6087 = vrot.lane.b32.xlu1 %v12862_v61, %s9334_s22  ;;  %v12878_v20 = vpack.c.bf16 %v5520_v25, %v5519_v9 }
 0x6ba   : > { %v5837_v17 = vor.u32 %v5836_v8, %v5832_v62  ;;  %v5166_v16 = vadd.f32 %v12497_v36, %v12405_v4  ;;  %v5851_v32 = vshll.u32 %v12876_v43, 16  ;;  %v5308_v41 = vadd.f32 %v12773_v57, %v12613_v7 }
 0x6bb   : > { %v5477_v0 = vadd.f32 %v8980_v49, %v5316_v51  ;;  %v5171_v44 = vadd.f32 %v12505_v39, %v12405_v4  ;;  %v12892_v31 = vadd.f32 %v12515_v21, %v12405_v4  ;;  %v13707_v49 = vshll.u32 %v12697_v56, 16 }
 0x6bc   : > { %v12897_v45 = vsel %vm892_vm4, %v5837_v17, %v5841_v26  ;;  %v5844_v39 = vshrl.u32 %v12834_v11, 16  ;;  %v5848_v7 = vrot.slane %v5846_v55, 1  ;;  %v13709_v4 = vshrl.u32 %v12779_v1, 16 }
 0x6bd   : > { %v8556_v59 = vpop.f32.mrb[232].mxu0  ;;  %v5714_v62 = vrot.slane %v13707_v49, 7  ;;  %13708 = vst [vmem:[#allocation6_spill] sm:$0xff] %v12897_v45  ;;  %6053 = vrot.lane.b32.xlu0 %v12897_v45, %s9334_s22  ;;  %v8984_v57 = vpop.f32.mrb[12].mxu1  ;;  %v13710_v56 = vshll.u32 %v12784_v12, 16  ;;  %v5469_v51 = vadd.f32 %v5468_v46, %v5308_v41  ;;  %v5319_v55 = vadd.f32 %v8555_v53, %v12721_v18 }
 0x6be   : > { %v8557_v14 = vpop.f32.mrb[233].mxu0  ;;  %v12905_v21 = vrot.slane %v13709_v4, 7  ;;  %v5484_v15 = vpop.f32.mrb[13].mxu1  ;;  %v5849_v17 = vor.u32 %v5848_v7, %v5844_v39  ;;  %v5578_v4 = vshrl.u32 %v12878_v20, 16  ;;  %v5984_v36 = vrot.slane %v12601_v27, 1 }
 0x6bf   : > { %v8558_v9 = vadd.f32 %v8557_v14, %v8556_v59  ;;  %v8559_v40 = vpop.f32.mrb[234].mxu0  ;;  %v5646_v13 = vor.u32 %v13710_v56, %v12867_v3  ;;  %v13711_v25 = vmov %v13710_v56  ;;  %v5853_v59 = vrot.slane %v5851_v32, 1  ;;  %v8985_v49 = vpop.f32.mrb[14].mxu1 }
 0x6c0   : > { %v12912_v8 = vrot.slane %v13711_v25, 7  ;;  %v8560_v5 = vpop.f32.mrb[235].mxu0  ;;  %v5581_v14 = vshrl.u32 %v12869_v6, 16  ;;  %v5311_v56 = vadd.f32 %v12794_v29, %v12621_v34  ;;  %v5487_v25 = vpop.f32.mrb[15].mxu1  ;;  %v5525_v45 = vmax.f32 %v5477_v0, 0.0 }
 0x6c1   : > { %v8561_v26 = vadd.f32 %v8560_v5, %v8559_v40  ;;  %v12921_v46 = vsel %vm892_vm4, %v5849_v17, %v5853_v59  ;;  %v5480_v41 = vadd.f32 %v8981_v28, %v5319_v55  ;;  %v5985_v32 = vrot.slane %v12605_v23, 1 }
 0x6c2   : > { %6055 = vrot.lane.b32.xlu0 %v12921_v46, %s9334_s22  ;;  %v5523_v18 = vmax.f32 %v5469_v51, 0.0  ;;  %v5472_v53 = vadd.f32 %v5471_v48, %v5311_v56  ;;  %v12929_v40 = vsel %vm9478_vm3, %v12777_v58, %v5714_v62  ;;  %v5858_v34 = vshll.u32 %v12862_v61, 16 }
 0x6c3   : > { %v5526_v0 = vmax.f32 %v5480_v41, 0.0  ;;  %v12933_v39 = vsel %vm1103_vm5, %v5984_v36, %v5985_v32  ;;  %v13712_v28 = vshrl.u32 %v12784_v12, 16  ;;  %v5863_v48 = vshll.u32 %v12929_v40, 16 }
 0x6c4   : > { %v5524_v5 = vmax.f32 %v5472_v53, 0.0  ;;  %6105 = vrot.lane.b32.xlu1 %v12933_v39, %s9334_s22  ;;  %v5856_v58 = vshrl.u32 %v12862_v61, 16  ;;  %v5860_v62 = vrot.slane %v5858_v34, 1  ;;  %v5324_v51 = vadd.f32 %v8558_v9, %v5163_v63 }
 0x6c5   : > { %v8562_v29 = vpop.f32.mrb[236].mxu0  ;;  %v12939_v23 = vsel %vm9478_vm3, %v13712_v28, %v5646_v13  ;;  %v12945_v59 = vpack.c.bf16 %v5526_v0, %v5525_v45  ;;  %v5981_v12 = vrot.slane %v12589_v10, 1  ;;  %v5327_v55 = vadd.f32 %v8561_v26, %v5166_v16 }
 0x6c6   : > { %v8563_v7 = vpop.f32.mrb[237].mxu0  ;;  %v12948_v13 = vpack.c.bf16 %v5524_v5, %v5523_v18  ;;  %6089 = vrot.lane.b32.xlu0 %v12939_v23, %s9334_s22  ;;  %v5861_v41 = vor.u32 %v5860_v62, %v5856_v58  ;;  %v5865_v32 = vrot.slane %v5863_v48, 1  ;;  %v5485_v53 = vadd.f32 %v5484_v15, %v5324_v51 }
 0x6c7   : > { %v8564_v17 = vadd.f32 %v8563_v7, %v8562_v29  ;;  %v8565_v36 = vpop.f32.mrb[238].mxu0  ;;  %v5651_v34 = vrot.slane %v5578_v4, 7  ;;  %v5982_v45 = vrot.slane %v12583_v38, 1  ;;  %v13713_v29 = vshll.u32 %v12779_v1, 16 }
 0x6c8   : > { %v8566_v56 = vpop.f32.mrb[239].mxu0  ;;  %v12959_v26 = vsel %vm892_vm4, %v5861_v41, %v5865_v32  ;;  %v5652_v18 = vshll.u32 %v12878_v20, 16  ;;  %v5655_v48 = vrot.slane %v5581_v14, 7  ;;  %v5488_v7 = vadd.f32 %v5487_v25, %v5327_v55 }
 0x6c9   : > { %v8567_v63 = vadd.f32 %v8566_v56, %v8565_v36  ;;  %v5332_v9 = vadd.f32 %v8564_v17, %v5171_v44  ;;  %v5650_v16 = vor.u32 %v13713_v29, %v12905_v21  ;;  %6057 = vrot.lane.b32.xlu1 %v12959_v26, %s9334_s22  ;;  %v12965_v0 = vsel %vm1103_vm5, %v5981_v12, %v5982_v45 }
 0x6ca   : > { %v13714_v38 = vmov %v13713_v29  ;;  %6107 = vrot.lane.b32.xlu0 %v12965_v0, %s9334_s22  ;;  %v5654_v5 = vor.u32 %v5652_v18, %v5651_v34  ;;  %v5527_v58 = vmax.f32 %v5485_v53, 0.0  ;;  %v5528_v51 = vmax.f32 %v5488_v7, 0.0 }
 0x6cb   : > { %v5493_v15 = vadd.f32 %v8984_v57, %v5332_v9  ;;  %v5335_v44 = vadd.f32 %v8567_v63, %v12892_v31  ;;  %v5716_v28 = vrot.slane %v13714_v38, 7  ;;  %v12978_v57 = vsel %vm9478_vm3, %v12867_v3, %v12912_v8 }
 0x6cc   : > { %v13715_v17 = vshrl.u32 %v12779_v1, 16  ;;  %v5870_v12 = vshll.u32 %v12939_v23, 16  ;;  %v5875_v55 = vshll.u32 %v12978_v57, 16  ;;  %v5987_v3 = vrot.slane %v12658_v42, 1 }
 0x6cd   : > { %v5496_v62 = vadd.f32 %v8985_v49, %v5335_v44  ;;  %v5529_v31 = vmax.f32 %v5493_v15, 0.0  ;;  %v5868_v49 = vshrl.u32 %v12939_v23, 16  ;;  %v12992_v8 = vpack.c.bf16 %v5528_v51, %v5527_v58 }
 0x6ce   : > { %v12984_v36 = vsel %vm9478_vm3, %v13715_v17, %v5650_v16  ;;  %v5872_v56 = vrot.slane %v5870_v12, 1  ;;  %v5988_v1 = vrot.slane %v12695_v37, 1  ;;  %v12998_v41 = vsel %vm9478_vm3, %v12905_v21, %v5716_v28 }
 0x6cf   : > { %v5530_v25 = vmax.f32 %v5496_v62, 0.0  ;;  %6091 = vrot.lane.b32.xlu1 %v12984_v36, %s9334_s22  ;;  %v5656_v32 = vshll.u32 %v12869_v6, 16  ;;  %v5584_v53 = vshrl.u32 %v12948_v13, 16  ;;  %v5877_v45 = vrot.slane %v5875_v55, 1 }
 0x6d0   : > { %v5873_v9 = vor.u32 %v5872_v56, %v5868_v49  ;;  %v13005_v29 = vsel %vm1103_vm5, %v5987_v3, %v5988_v1  ;;  %v5882_v16 = vshll.u32 %v12984_v36, 16  ;;  %v5717_v37 = vrot.slane %v5652_v18, 7 }
 0x6d1   : > { %v13002_v63 = vpack.c.bf16 %v5530_v25, %v5529_v31  ;;  %v5658_v15 = vor.u32 %v5656_v32, %v5655_v48  ;;  %v5887_v21 = vshll.u32 %v12998_v41, 16  ;;  %v13018_v38 = vsel %vm9478_vm3, %v5578_v4, %v5654_v5 }
 0x6d2   : > { %v13012_v44 = vsel %vm892_vm4, %v5873_v9, %v5877_v45  ;;  %v5880_v28 = vshrl.u32 %v12984_v36, 16  ;;  %v5884_v7 = vrot.slane %v5882_v16, 1  ;;  %v5587_v58 = vshrl.u32 %v12945_v59, 16 }
 0x6d3   : > { %6109 = vrot.lane.b32.xlu1 %v13005_v29, %s9334_s22  ;;  %v5659_v18 = vrot.slane %v5584_v53, 7  ;;  %6059 = vrot.lane.b32.xlu0 %v13012_v44, %s9334_s22  ;;  %v5718_v62 = vrot.slane %v5656_v32, 7  ;;  %v5889_v51 = vrot.slane %v5887_v21, 1  ;;  %v5660_v17 = vshll.u32 %v12948_v13, 16 }
 0x6d4   : > { %v5885_v31 = vor.u32 %v5884_v7, %v5880_v28  ;;  %v13029_v20 = vsel %vm9478_vm3, %v5581_v14, %v5658_v15  ;;  %v13033_v4 = vsel %vm9478_vm3, %v5651_v34, %v5717_v37  ;;  %v5894_v5 = vshll.u32 %v13018_v38, 16 }
 0x6d5   : > { %v5990_v25 = vrot.slane %v12730_v47, 1  ;;  %v5663_v49 = vrot.slane %v5587_v58, 7  ;;  %v5662_v55 = vor.u32 %v5660_v17, %v5659_v18  ;;  %v5991_v14 = vrot.slane %v12756_v30, 1 }
 0x6d6   : > { %v13037_v12 = vsel %vm892_vm4, %v5885_v31, %v5889_v51  ;;  %v5896_v6 = vrot.slane %v5894_v5, 1  ;;  %v5892_v13 = vshrl.u32 %v13018_v38, 16  ;;  %v5899_v34 = vshll.u32 %v13033_v4, 16 }
 0x6d7   : > { %6093 = vrot.lane.b32.xlu0 %v13018_v38, %s9334_s22  ;;  %6061 = vrot.lane.b32.xlu1 %v13037_v12, %s9334_s22  ;;  %v5906_v3 = vshll.u32 %v13029_v20, 16  ;;  %v5664_v56 = vshll.u32 %v12945_v59, 16  ;;  %v13051_v1 = vsel %vm9478_vm3, %v5655_v48, %v5718_v62  ;;  %v13054_v32 = vsel %vm1103_vm5, %v5990_v25, %v5991_v14 }
 0x6d8   : > { %v5897_v9 = vor.u32 %v5896_v6, %v5892_v13  ;;  %v5993_v45 = vrot.slane %v12750_v60, 1  ;;  %v5590_v15 = vshrl.u32 %v12992_v8, 16  ;;  %v13064_v59 = vsel %vm9478_vm3, %v5584_v53, %v5662_v55 }
 0x6d9   : > { %v5908_v16 = vrot.slane %v5906_v3, 1  ;;  %v5666_v30 = vor.u32 %v5664_v56, %v5663_v49  ;;  %v5901_v48 = vrot.slane %v5899_v34, 1  ;;  %v5994_v37 = vrot.slane %v12790_v35, 1 }
 0x6da   : > { %v5904_v21 = vshrl.u32 %v13029_v20, 16  ;;  %v5911_v28 = vshll.u32 %v13051_v1, 16  ;;  %v5719_v7 = vrot.slane %v5660_v17, 7  ;;  %v5918_v5 = vshll.u32 %v13064_v59, 16 }
 0x6db   : > { %6111 = vrot.lane.b32.xlu0 %v13054_v32, %s9334_s22  ;;  %6095 = vrot.lane.b32.xlu1 %v13029_v20, %s9334_s22  ;;  %v13070_v62 = vsel %vm892_vm4, %v5897_v9, %v5901_v48  ;;  %v13073_v31 = vsel %vm1103_vm5, %v5993_v45, %v5994_v37  ;;  %v5667_v25 = vrot.slane %v5590_v15, 7  ;;  %v13082_v35 = vsel %vm9478_vm3, %v5587_v58, %v5666_v30 }
 0x6dc   : > { %v5909_v51 = vor.u32 %v5908_v16, %v5904_v21  ;;  %v5913_v53 = vrot.slane %v5911_v28, 1  ;;  %v5720_v17 = vrot.slane %v5664_v56, 7  ;;  %v5668_v55 = vshll.u32 %v12992_v8, 16 }
 0x6dd   : > { %v13087_v6 = vsel %vm9478_vm3, %v5659_v18, %v5719_v7  ;;  %v5996_v13 = vrot.slane %v12800_v24, 1  ;;  %v5920_v34 = vrot.slane %v5918_v5, 1  ;;  %v5930_v3 = vshll.u32 %v13082_v35, 16 }
 0x6de   : > { %v13090_v14 = vsel %vm892_vm4, %v5909_v51, %v5913_v53  ;;  %v5670_v9 = vor.u32 %v5668_v55, %v5667_v25  ;;  %v5997_v8 = vrot.slane %v12842_v52, 1  ;;  %v5916_v58 = vshrl.u32 %v13064_v59, 16 }
 0x6df   : > { %6063 = vrot.lane.b32.xlu0 %v13070_v62, %s9334_s22  ;;  %6113 = vrot.lane.b32.xlu1 %v13073_v31, %s9334_s22  ;;  %v5923_v18 = vshll.u32 %v13087_v6, 16  ;;  %v5593_v56 = vshrl.u32 %v13002_v63, 16  ;;  %v13104_v45 = vsel %vm9478_vm3, %v5663_v49, %v5720_v17  ;;  %v5999_v48 = vrot.slane %v12834_v11, 1 }
 0x6e0   : > { %v13107_v16 = vsel %vm1103_vm5, %v5996_v13, %v5997_v8  ;;  %v5921_v30 = vor.u32 %v5920_v34, %v5916_v58  ;;  %v5932_v37 = vrot.slane %v5930_v3, 1  ;;  %v13116_v52 = vsel %vm9478_vm3, %v5590_v15, %v5670_v9 }
 0x6e1   : > { %v5925_v21 = vrot.slane %v5923_v18, 1  ;;  %v6000_v49 = vrot.slane %v12876_v43, 1  ;;  %v5928_v28 = vshrl.u32 %v13082_v35, 16  ;;  %v5935_v7 = vshll.u32 %v13104_v45, 16 }
 0x6e2   : > { %v5671_v51 = vrot.slane %v5593_v56, 7  ;;  %v5721_v5 = vrot.slane %v5668_v55, 7  ;;  %v5942_v34 = vshll.u32 %v13116_v52, 16  ;;  %v5672_v43 = vshll.u32 %v13002_v63, 16 }
 0x6e3   : > { %6097 = vrot.lane.b32.xlu0 %v13064_v59, %s9334_s22  ;;  %6065 = vrot.lane.b32.xlu1 %v13090_v14, %s9334_s22  ;;  %v13122_v53 = vsel %vm892_vm4, %v5921_v30, %v5925_v21  ;;  %v13125_v17 = vsel %vm1103_vm5, %v5999_v48, %v6000_v49  ;;  %v5933_v13 = vor.u32 %v5932_v37, %v5928_v28  ;;  %v5937_v15 = vrot.slane %v5935_v7, 1 }
 0x6e4   : > { %v5769_v55 = vsel %vm9478_vm3, %v5667_v25, %v5721_v5  ;;  %v5674_v3 = vor.u32 %v5672_v43, %v5671_v51  ;;  %v6002_v8 = vrot.slane %v12862_v61, 1  ;;  %v5944_v58 = vrot.slane %v5942_v34, 1 }
 0x6e5   : > { %v13136_v9 = vsel %vm892_vm4, %v5933_v13, %v5937_v15  ;;  %v6003_v18 = vrot.slane %v12929_v40, 1  ;;  %v5940_v63 = vshrl.u32 %v13116_v52, 16  ;;  %v5947_v30 = vshll.u32 %v5769_v55, 16 }
 0x6e6   : > { %v13150_v48 = vsel %vm9478_vm3, %v5593_v56, %v5674_v3  ;;  %v6005_v21 = vrot.slane %v12939_v23, 1  ;;  %v6006_v49 = vrot.slane %v12978_v57, 1  ;;  %v5722_v28 = vrot.slane %v5672_v43, 7 }
 0x6e7   : > { %6115 = vrot.lane.b32.xlu0 %v13107_v16, %s9334_s22  ;;  %6099 = vrot.lane.b32.xlu1 %v13082_v35, %s9334_s22  ;;  %v13146_v25 = vsel %vm1103_vm5, %v6002_v8, %v6003_v18  ;;  %v5945_v37 = vor.u32 %v5944_v58, %v5940_v63  ;;  %v5949_v40 = vrot.slane %v5947_v30, 1  ;;  %v6008_v7 = vrot.slane %v12984_v36, 1 }
 0x6e8   : > { %v13163_v56 = vsel %vm1103_vm5, %v6005_v21, %v6006_v49  ;;  %v6011_v13 = vrot.slane %v13018_v38, 1  ;;  %v6029_v34 = vshll.u32 %v13150_v48, 16  ;;  %v6009_v57 = vrot.slane %v12998_v41, 1 }
 0x6e9   : > { %v13160_v5 = vsel %vm892_vm4, %v5945_v37, %v5949_v40  ;;  %v6012_v43 = vrot.slane %v13033_v4, 1  ;;  %v6014_v15 = vrot.slane %v13029_v20, 1  ;;  %v5770_v3 = vsel %vm9478_vm3, %v5671_v51, %v5722_v28 }
 0x6ea   : > { %v13177_v8 = vsel %vm1103_vm5, %v6008_v7, %v6009_v57  ;;  %v6017_v18 = vrot.slane %v13064_v59, 1  ;;  %v6031_v63 = vrot.slane %v6029_v34, 1  ;;  %v6015_v41 = vrot.slane %v13051_v1, 1 }
 0x6eb   : > { %6067 = vrot.lane.b32.xlu0 %v13122_v53, %s9334_s22  ;;  %6117 = vrot.lane.b32.xlu1 %v13125_v17, %s9334_s22  ;;  %v13180_v58 = vsel %vm1103_vm5, %v6011_v13, %v6012_v43  ;;  %v6018_v19 = vrot.slane %v13087_v6, 1  ;;  %v6027_v4 = vshrl.u32 %v13150_v48, 16  ;;  %v6034_v51 = vshll.u32 %v5770_v3, 16 }
 0x6ec   : > { %v13191_v30 = vsel %vm1103_vm5, %v6014_v15, %v6015_v41  ;;  %v6020_v21 = vrot.slane %v13082_v35, 1  ;;  %v6021_v1 = vrot.slane %v13104_v45, 1  ;;  %v6023_v7 = vrot.slane %v13116_v52, 1 }
 0x6ed   : > { %v13194_v37 = vsel %vm1103_vm5, %v6017_v18, %v6018_v19  ;;  %v6032_v40 = vor.u32 %v6031_v63, %v6027_v4  ;;  %v6036_v6 = vrot.slane %v6034_v51, 1  ;;  %v6040_v13 = vrot.slane %v13150_v48, 1  ;;  %v9196_v4 = vld [vmem:[%s13616_s5 + $0x110] sm:$0xff]  }
 0x6ee   : > { %v13203_v49 = vsel %vm1103_vm5, %v6020_v21, %v6021_v1  ;;  %v6024_v34 = vrot.slane %v5769_v55, 1  ;;  %v6041_v57 = vrot.slane %v5770_v3, 1  ;;  %v9195_v3 = vld [vmem:[%s13616_s5 + $0x108] sm:$0xff]  }
 0x6ef   : > { %6101 = vrot.lane.b32.xlu0 %v13116_v52, %s9334_s22  ;;  %6069 = vrot.lane.b32.xlu1 %v13136_v9, %s9334_s22  ;;  %v13206_v28 = vsel %vm892_vm4, %v6032_v40, %v6036_v6 }
 0x6f0   : > { %v13215_v45 = vsel %vm1103_vm5, %v6023_v7, %v6024_v34  ;;  %v13218_v43 = vsel %vm1103_vm5, %v6040_v13, %v6041_v57 }
 0x6f3   : > { %6119 = vrot.lane.b32.xlu0 %v13146_v25, %s9334_s22  ;;  %6103 = vrot.lane.b32.xlu1 %v13150_v48, %s9334_s22 }
 0x6f7   : > { %6071 = vrot.lane.b32.xlu0 %v13160_v5, %s9334_s22  ;;  %6121 = vrot.lane.b32.xlu1 %v13163_v56, %s9334_s22 }
 0x6fb   : > { %6123 = vrot.lane.b32.xlu0 %v13177_v8, %s9334_s22  ;;  %6125 = vrot.lane.b32.xlu1 %v13180_v58, %s9334_s22 }
 0x6ff   : > { %6127 = vrot.lane.b32.xlu0 %v13191_v30, %s9334_s22  ;;  %6129 = vrot.lane.b32.xlu1 %v13194_v37, %s9334_s22 }
 0x703   : > { %6131 = vrot.lane.b32.xlu0 %v13203_v49, %s9334_s22  ;;  %6137 = vrot.lane.b32.xlu1 %v13206_v28, %s9334_s22 }
 0x707   : > { %6133 = vrot.lane.b32.xlu0 %v13215_v45, %s9334_s22  ;;  %6135 = vrot.lane.b32.xlu1 %v13218_v43, %s9334_s22 }
 0x708   : > { %v6074_v15 = vpop.permute.xlu0 %6073 }
 0x709   : > { %v6186_v18 = vsel %vm1262_vm6, %v12965_v0, %v6074_v15 }
 0x70a   : > { %6672 = vmatprep.mubr.bf16.mxu0 %v6186_v18 }
 0x70c   : > { %v6076_v63 = vpop.permute.xlu0 %6075 }
 0x70d   : > { %v6190_v19 = vsel %vm1262_vm6, %v12933_v39, %v6076_v63 }
 0x710   : > { %v6044_v55 = vpop.permute.xlu1 %6043  ;;  %v6078_v21 = vpop.permute.xlu0 %6077 }
 0x711   : > { %v6140_v41 = vsel %vm1262_vm6, %v12589_v10, %v6044_v55  ;;  %v9197_v10 = vld [vmem:[%s13616_s5 + $0x118] sm:$0xff]  }
 0x712   : > { %6673 = vmatmul.mubr.bf16.vlgmr.msra.gmra.mrb[240].mxu0 %v6140_v41  ;;  %6833 = vmatprep.mubr.bf16.mxu1 %v6140_v41 }
 0x713   : > { %8987 = vmatpush3.bf16.msra.mxu0 %v12576_v2  ;;  %6680 = vmatprep.mubr.bf16.mxu0 %v6190_v19  ;;  %v6193_v2 = vsel %vm1262_vm6, %v12965_v0, %v6078_v21 }
 0x714   : > { %8988 = vmatprep.subr.bf16.mxu0 %v9195_v3 }
 0x716   : > { %v6046_v51 = vpop.permute.xlu1 %6045 }
 0x717   : > { %8989 = vmatpush3.bf16.msra.mxu0 %v9195_v3  ;;  %v6143_v40 = vsel %vm1262_vm6, %v12601_v27, %v6046_v51 }
 0x718   : > { %8990 = vmatprep.subr.bf16.mxu0 %v9196_v4 }
 0x71a   : > { %v6080_v39 = vpop.permute.xlu1 %6079  ;;  %6681 = vmatmul.mubr.bf16.gmra.mrb[244].mxu0 %v6143_v40 }
 0x71b   : > { %6688 = vmatprep.mubr.bf16.mxu0 %v6193_v2  ;;  %8991 = vmatpush3.bf16.msra.mxu0 %v9196_v4  ;;  %v6197_v7 = vsel %vm1262_vm6, %v13005_v29, %v6080_v39 }
 0x71c   : > { %8992 = vmatprep.subr.bf16.mxu0 %v9197_v10  ;;  %v6048_v1 = vpop.permute.xlu0 %6047 }
 0x71d   : > { %v6146_v15 = vsel %vm1262_vm6, %v12658_v42, %v6048_v1 }
 0x71e   : > { %v6082_v6 = vpop.permute.xlu1 %6081 }
 0x71f   : > { %8993 = vmatpush3.bf16.msra.mxu0 %v9197_v10  ;;  %v6201_v18 = vsel %vm1262_vm6, %v13054_v32, %v6082_v6 }
 0x722   : > { %6689 = vmatmul.mubr.bf16.gmra.mrb[248].mxu0 %v6140_v41  ;;  %v6084_v13 = vpop.permute.xlu1 %6083 }
 0x723   : > { %6696 = vmatprep.mubr.bf16.mxu0 %v6197_v7  ;;  %v6205_v41 = vsel %vm1262_vm6, %v13073_v31, %v6084_v13 }
 0x724   : > { %v6050_v34 = vpop.permute.xlu0 %6049 }
 0x725   : > { %v6149_v3 = vsel %vm1262_vm6, %v12730_v47, %v6050_v34 }
 0x727   : > { %v6086_v27 = vpop.permute.xlu1 %6085 }
 0x728   : > { %v6052_v57 = vpop.permute.xlu0 %6051  ;;  %v6209_v47 = vsel %vm1262_vm6, %v13107_v16, %v6086_v27 }
 0x729   : > { %v6152_v21 = vsel %vm1262_vm6, %v12750_v60, %v6052_v57 }
 0x72a   : > { %6697 = vmatmul.mubr.bf16.gmra.mrb[252].mxu0 %v6146_v15 }
 0x72b   : > { %6704 = vmatprep.mubr.bf16.mxu0 %v6201_v18  ;;  %v6088_v55 = vpop.permute.xlu1 %6087 }
 0x72c   : > { %v6213_v60 = vsel %vm1262_vm6, %v13125_v17, %v6088_v55 }
 0x72f   : > { %v6054_v63 = vpop.permute.xlu0 %6053 }
 0x732   : > { %6705 = vmatmul.mubr.bf16.gmra.mrb[0].mxu0 %v6149_v3 }
 0x733   : > { %6712 = vmatprep.mubr.bf16.mxu0 %v6205_v41 }
 0x734   : > { %v6056_v19 = vpop.permute.xlu0 %6055 }
 0x736   : > { %v6106_v4 = vpop.permute.xlu1 %6105 }
 0x737   : > { %v6249_v42 = vsel %vm1262_vm6, %v12700_v33, %v6106_v4  ;;  %v6155_v33 = vsel %vm1262_vm6, %v12800_v24, %v6054_v63 }
 0x738   : > { %v6090_v51 = vpop.permute.xlu0 %6089  ;;  %6834 = vmatmul.mubr.bf16.vlgmr.msra.gmra.mrb[16].mxu1 %v6249_v42 }
 0x739   : > { %6841 = vmatprep.mubr.bf16.mxu1 %v6146_v15  ;;  %v6217_v24 = vsel %vm1262_vm6, %v13146_v25, %v6090_v51  ;;  %v13716_v15 = vld [vmem:[#allocation5_spill] sm:$0xff] }
 0x73a   : > { %6713 = vmatmul.mubr.bf16.gmra.mrb[4].mxu0 %v6152_v21 }
 0x73b   : > { %v6058_v10 = vpop.permute.xlu1 %6057  ;;  %6720 = vmatprep.mubr.bf16.mxu0 %v6209_v47 }
 0x73c   : > { %v6108_v40 = vpop.permute.xlu0 %6107  ;;  %v6161_v55 = vsel %vm1262_vm6, %v12862_v61, %v6058_v10 }
 0x73d   : > { %v6253_v39 = vsel %vm1262_vm6, %v12669_v22, %v6108_v40  ;;  %v6158_v22 = vsel %vm1262_vm6, %v12834_v11, %v6056_v19 }
 0x740   : > { %6842 = vmatmul.mubr.bf16.gmra.mrb[20].mxu1 %v6253_v39 }
 0x741   : > { %v6092_v2 = vpop.permute.xlu1 %6091  ;;  %6849 = vmatprep.mubr.bf16.mxu1 %v6149_v3 }
 0x742   : > { %6721 = vmatmul.mubr.bf16.gmra.mrb[8].mxu0 %v6155_v33  ;;  %v6221_v11 = vsel %vm1262_vm6, %v13163_v56, %v6092_v2 }
 0x743   : > { %6728 = vmatprep.mubr.bf16.mxu0 %v6213_v60 }
 0x745   : > { %v6110_v1 = vpop.permute.xlu1 %6109  ;;  %v6060_v6 = vpop.permute.xlu0 %6059 }
 0x746   : > { %v6257_v7 = vsel %vm1262_vm6, %v12743_v54, %v6110_v1  ;;  %v6164_v4 = vsel %vm1262_vm6, %v12939_v23, %v6060_v6 }
 0x748   : > { %6850 = vmatmul.mubr.bf16.gmra.mrb[24].mxu1 %v6257_v7 }
 0x749   : > { %v6094_v13 = vpop.permute.xlu0 %6093  ;;  %v6062_v34 = vpop.permute.xlu1 %6061  ;;  %6857 = vmatprep.mubr.bf16.mxu1 %v6152_v21  ;;  %v13717_v21 = vld [vmem:[#allocation6_spill] sm:$0xff] }
 0x74a   : > { %6729 = vmatmul.mubr.bf16.gmra.mrb[12].mxu0 %v6158_v22  ;;  %v6225_v61 = vsel %vm1262_vm6, %v13177_v8, %v6094_v13 }
 0x74b   : > { %6736 = vmatprep.mubr.bf16.mxu0 %v6217_v24 }
 0x74d   : > { %v6112_v57 = vpop.permute.xlu0 %6111  ;;  %v6096_v27 = vpop.permute.xlu1 %6095 }
 0x74e   : > { %v6261_v18 = vsel %vm1262_vm6, %v13716_v15, %v6112_v57  ;;  %v6229_v23 = vsel %vm1262_vm6, %v13180_v58, %v6096_v27 }
 0x750   : > { %6858 = vmatmul.mubr.bf16.gmra.mrb[28].mxu1 %v6261_v18 }
 0x751   : > { %v6064_v63 = vpop.permute.xlu0 %6063  ;;  %v6114_v54 = vpop.permute.xlu1 %6113  ;;  %6865 = vmatprep.mubr.bf16.mxu1 %v6155_v33 }
 0x752   : > { %6737 = vmatmul.mubr.bf16.gmra.mrb[16].mxu0 %v6161_v55  ;;  %v6265_v19 = vsel %vm1262_vm6, %v12851_v50, %v6114_v54  ;;  %v6167_v50 = vsel %vm1262_vm6, %v12984_v36, %v6062_v34  ;;  %v6170_v1 = vsel %vm1262_vm6, %v13018_v38, %v6064_v63 }
 0x753   : > { %6744 = vmatprep.mubr.bf16.mxu0 %v6221_v11 }
 0x755   : > { %v6098_v3 = vpop.permute.xlu0 %6097  ;;  %v6066_v41 = vpop.permute.xlu1 %6065 }
 0x756   : > { %v6233_v36 = vsel %vm1262_vm6, %v13191_v30, %v6098_v3 }
 0x758   : > { %6866 = vmatmul.mubr.bf16.gmra.mrb[32].mxu1 %v6265_v19 }
 0x759   : > { %6873 = vmatprep.mubr.bf16.mxu1 %v6158_v22  ;;  %v6116_v42 = vpop.permute.xlu0 %6115  ;;  %v6100_v51 = vpop.permute.xlu1 %6099 }
 0x75a   : > { %6745 = vmatmul.mubr.bf16.gmra.mrb[20].mxu0 %v6164_v4  ;;  %v6269_v10 = vsel %vm1262_vm6, %v13717_v21, %v6116_v42  ;;  %v6237_v13 = vsel %vm1262_vm6, %v13194_v37, %v6100_v51 }
 0x75b   : > { %6752 = vmatprep.mubr.bf16.mxu0 %v6225_v61 }
 0x75d   : > { %v6068_v47 = vpop.permute.xlu0 %6067  ;;  %v6118_v40 = vpop.permute.xlu1 %6117 }
 0x75e   : > { %v6273_v2 = vsel %vm1262_vm6, %v12921_v46, %v6118_v40  ;;  %v6173_v46 = vsel %vm1262_vm6, %v13029_v20, %v6066_v41 }
 0x760   : > { %6874 = vmatmul.mubr.bf16.gmra.mrb[36].mxu1 %v6269_v10 }
 0x761   : > { %6881 = vmatprep.mubr.bf16.mxu1 %v6161_v55  ;;  %v6102_v39 = vpop.permute.xlu0 %6101  ;;  %v6070_v33 = vpop.permute.xlu1 %6069 }
 0x762   : > { %6753 = vmatmul.mubr.bf16.gmra.mrb[24].mxu0 %v6167_v50  ;;  %v6241_v24 = vsel %vm1262_vm6, %v13203_v49, %v6102_v39  ;;  %v6179_v27 = vsel %vm1262_vm6, %v13082_v35, %v6070_v33 }
 0x763   : > { %6760 = vmatprep.mubr.bf16.mxu0 %v6229_v23  ;;  %v13369_v23 = vld [vmem:[%s13617_s6] ss:$0 sm:$0xff] }
 0x765   : > { %v6120_v60 = vpop.permute.xlu0 %6119  ;;  %v6104_v6 = vpop.permute.xlu1 %6103 }
 0x766   : > { %v6277_v7 = vsel %vm1262_vm6, %v12959_v26, %v6120_v60  ;;  %v6176_v26 = vsel %vm1262_vm6, %v13064_v59, %v6068_v47 }
 0x768   : > { %6882 = vmatmul.mubr.bf16.gmra.mrb[40].mxu1 %v6273_v2 }
 0x769   : > { %6889 = vmatprep.mubr.bf16.mxu1 %v6164_v4  ;;  %v6122_v38 = vpop.permute.xlu1 %6121  ;;  %v6072_v34 = vpop.permute.xlu0 %6071 }
 0x76a   : > { %6761 = vmatmul.mubr.bf16.gmra.mrb[28].mxu0 %v6170_v1  ;;  %v6281_v22 = vsel %vm1262_vm6, %v13012_v44, %v6122_v38  ;;  %v6245_v44 = vsel %vm1262_vm6, %v13215_v45, %v6104_v6  ;;  %v6182_v18 = vsel %vm1262_vm6, %v13116_v52, %v6072_v34 }
 0x76b   : > { %6768 = vmatprep.mubr.bf16.mxu0 %v6233_v36 }
 0x76d   : > { %v6124_v20 = vpop.permute.xlu0 %6123  ;;  %v6126_v15 = vpop.permute.xlu1 %6125 }
 0x76e   : > { %v6285_v57 = vsel %vm1262_vm6, %v13037_v12, %v6124_v20  ;;  %v6289_v59 = vsel %vm1262_vm6, %v13070_v62, %v6126_v15 }
 0x770   : > { %6890 = vmatmul.mubr.bf16.gmra.mrb[44].mxu1 %v6277_v7 }
 0x771   : > { %6897 = vmatprep.mubr.bf16.mxu1 %v6167_v50  ;;  %v6128_v12 = vpop.permute.xlu0 %6127  ;;  %v6130_v63 = vpop.permute.xlu1 %6129 }
 0x772   : > { %6769 = vmatmul.mubr.bf16.gmra.mrb[32].mxu0 %v6173_v46  ;;  %v6293_v35 = vsel %vm1262_vm6, %v13090_v14, %v6128_v12  ;;  %v6297_v62 = vsel %vm1262_vm6, %v13122_v53, %v6130_v63 }
 0x773   : > { %6776 = vmatprep.mubr.bf16.mxu0 %v6237_v13 }
 0x775   : > { %v6138_v14 = vpop.permute.xlu1 %6137 }
 0x778   : > { %6898 = vmatmul.mubr.bf16.gmra.mrb[48].mxu1 %v6281_v22 }
 0x779   : > { %6905 = vmatprep.mubr.bf16.mxu1 %v6170_v1 }
 0x77a   : > { %6777 = vmatmul.mubr.bf16.gmra.mrb[36].mxu0 %v6176_v26 }
 0x77b   : > { %6784 = vmatprep.mubr.bf16.mxu0 %v6241_v24 }
 0x780   : > { %6906 = vmatmul.mubr.bf16.gmra.mrb[52].mxu1 %v6285_v57 }
 0x781   : > { %6913 = vmatprep.mubr.bf16.mxu1 %v6173_v46 }
 0x782   : > { %6785 = vmatmul.mubr.bf16.gmra.mrb[40].mxu0 %v6179_v27 }
 0x783   : > { %6792 = vmatprep.mubr.bf16.mxu0 %v6245_v44 }
 0x788   : > { %6914 = vmatmul.mubr.bf16.gmra.mrb[56].mxu1 %v6289_v59 }
 0x789   : > { %6921 = vmatprep.mubr.bf16.mxu1 %v6176_v26 }
 0x78a   : > { %6793 = vmatmul.mubr.bf16.gmra.mrb[44].mxu0 %v6182_v18 }
 0x78b   : > { %8994 = vmatprep.mubr.msk.bf16.mxu0 %vm1262_vm6, %v12965_v0  ;;  %v6132_v0 = vpop.permute.xlu0 %6131 }
 0x78f   : > { %v6134_v52 = vpop.permute.xlu0 %6133 }
 0x790   : > { %6922 = vmatmul.mubr.bf16.gmra.mrb[60].mxu1 %v6293_v35 }
 0x791   : > { %6929 = vmatprep.mubr.bf16.mxu1 %v6179_v27 }
 0x792   : > { %8995 = vmatmul.mubr.msk.bf16.vlgmr.msra.gmra.mrb[48].mxu0 %vm1262_vm6, %v13005_v29  ;;  %v6301_v29 = vsel %vm1262_vm6, %v13136_v9, %v6132_v0 }
 0x793   : > { %8998 = vmatprep.mubr.msk.bf16.mxu0 %vm1262_vm6, %v13054_v32  ;;  %v6312_v32 = vsel %vm1262_vm6, %v13150_v48, %v6138_v14 }
 0x798   : > { %6930 = vmatmul.mubr.bf16.gmra.mrb[64].mxu1 %v6297_v62 }
 0x799   : > { %6937 = vmatprep.mubr.bf16.mxu1 %v6182_v18 }
 0x79a   : > { %8999 = vmatmul.mubr.msk.bf16.gmra.mrb[52].mxu0 %vm1262_vm6, %v13073_v31  ;;  %v6305_v31 = vsel %vm1262_vm6, %v13160_v5, %v6134_v52 }
 0x79b   : > { %9002 = vmatprep.mubr.msk.bf16.mxu0 %vm1262_vm6, %v13107_v16  ;;  %v6136_v16 = vpop.permute.xlu1 %6135 }
 0x79c   : > { %v6309_v53 = vsel %vm1262_vm6, %v13206_v28, %v6136_v16 }
 0x7a0   : > { %6938 = vmatmul.mubr.bf16.gmra.mrb[68].mxu1 %v6301_v29 }
 0x7a1   : > { %6945 = vmatprep.mubr.bf16.mxu1 %v6312_v32 }
 0x7a2   : > { %9003 = vmatmul.mubr.msk.bf16.gmra.mrb[56].mxu0 %vm1262_vm6, %v13125_v17 }
 0x7a3   : > { %9006 = vmatprep.mubr.msk.bf16.mxu0 %vm1262_vm6, %v13146_v25 }
 0x7a8   : > { %6946 = vmatmul.mubr.bf16.gmra.mrb[72].mxu1 %v6305_v31 }
 0x7a9   : > { %6953 = vmatprep.mubr.bf16.mxu1 %v6182_v18 }
 0x7aa   : > { %9007 = vmatmul.mubr.msk.bf16.gmra.mrb[60].mxu0 %vm1262_vm6, %v13163_v56 }
 0x7ab   : > { %9010 = vmatprep.mubr.msk.bf16.mxu0 %vm1262_vm6, %v13177_v8 }
 0x7b0   : > { %6954 = vmatmul.mubr.bf16.gmra.mrb[76].mxu1 %v6309_v53 }
 0x7b2   : > { %9011 = vmatmul.mubr.msk.bf16.gmra.mrb[64].mxu0 %vm1262_vm6, %v13180_v58 }
 0x7b3   : > { %9014 = vmatprep.mubr.msk.bf16.mxu0 %vm1262_vm6, %v13191_v30 }
 0x7ba   : > { %9015 = vmatmul.mubr.msk.bf16.gmra.mrb[68].mxu0 %vm1262_vm6, %v13194_v37 }
 0x7bb   : > { %9018 = vmatprep.mubr.msk.bf16.mxu0 %vm1262_vm6, %v13203_v49 }
 0x7c2   : > { %9019 = vmatmul.mubr.msk.bf16.gmra.mrb[72].mxu0 %vm1262_vm6, %v13215_v45 }
 0x7c3   : > { %9022 = vmatprep.mubr.msk.bf16.mxu0 %vm1262_vm6, %v13218_v43 }
 0x7ca   : > { %9023 = vmatmul.mubr.msk.bf16.gmra.mrb[76].mxu0 %vm1262_vm6, %v13215_v45 }
 0x7e5   : > { %v8604_v17 = vpop.f32.mrb[240].mxu0 }
 0x7e6   : > { %v8605_v9 = vpop.f32.mrb[241].mxu0 }
 0x7e7   : > { %v8606_v25 = vadd.f32 %v8605_v9, %v8604_v17  ;;  %v8607_v48 = vpop.f32.mrb[242].mxu0 }
 0x7e8   : > { %v8608_v5 = vpop.f32.mrb[243].mxu0 }
 0x7e9   : > { %v8609_v56 = vadd.f32 %v8608_v5, %v8607_v48  ;;  %v6675_v1 = vadd.f32 %v8606_v25, %v13369_v23 }
 0x7eb   : > { %v6678_v46 = vadd.f32 %v8609_v56, %v13369_v23 }
 0x7ed   : > { %v8610_v8 = vpop.f32.mrb[244].mxu0 }
 0x7ee   : > { %v8611_v58 = vpop.f32.mrb[245].mxu0 }
 0x7ef   : > { %v8612_v30 = vadd.f32 %v8611_v58, %v8610_v8  ;;  %v8613_v37 = vpop.f32.mrb[246].mxu0 }
 0x7f0   : > { %v8614_v49 = vpop.f32.mrb[247].mxu0 }
 0x7f1   : > { %v8615_v28 = vadd.f32 %v8614_v49, %v8613_v37  ;;  %v6683_v15 = vadd.f32 %v8612_v30, %v13369_v23 }
 0x7f3   : > { %v6686_v63 = vadd.f32 %v8615_v28, %v13369_v23 }
 0x7f5   : > { %v8616_v54 = vpop.f32.mrb[248].mxu0 }
 0x7f6   : > { %v8617_v55 = vpop.f32.mrb[249].mxu0 }
 0x7f7   : > { %v8618_v11 = vadd.f32 %v8617_v55, %v8616_v54  ;;  %v8619_v3 = vpop.f32.mrb[250].mxu0 }
 0x7f8   : > { %v8620_v43 = vpop.f32.mrb[251].mxu0 }
 0x7f9   : > { %v8621_v41 = vadd.f32 %v8620_v43, %v8619_v3  ;;  %v6691_v9 = vadd.f32 %v8618_v11, %v13369_v23 }
 0x7fb   : > { %v6694_v8 = vadd.f32 %v8621_v41, %v13369_v23 }
 0x7fd   : > { %v8622_v19 = vpop.f32.mrb[252].mxu0 }
 0x7fe   : > { %v8623_v45 = vpop.f32.mrb[253].mxu0 }
 0x7ff   : > { %v8624_v4 = vadd.f32 %v8623_v45, %v8622_v19  ;;  %v8625_v42 = vpop.f32.mrb[254].mxu0 }
 0x800   : > { %v8626_v61 = vpop.f32.mrb[255].mxu0 }
 0x801   : > { %v13362_v51 = vadd.f32 %v8626_v61, %v8625_v42  ;;  %v6699_v19 = vadd.f32 %v8624_v4, %v13369_v23 }
 0x805   : > { %v8628_v21 = vpop.f32.mrb[0].mxu0 }
 0x806   : > { %v8629_v10 = vpop.f32.mrb[1].mxu0 }
 0x807   : > { %v13364_v47 = vadd.f32 %v8629_v10, %v8628_v21  ;;  %v8631_v50 = vpop.f32.mrb[2].mxu0  ;;  %v6702_v21 = vadd.f32 %v13362_v51, %v13369_v23 }
 0x808   : > { %v8632_v40 = vpop.f32.mrb[3].mxu0 }
 0x809   : > { %v13371_v39 = vadd.f32 %v8632_v40, %v8631_v50 }
 0x80b   : > { %v8716_v2 = vpop.f32.mrb[16].mxu1 }
 0x80c   : > { %v8717_v33 = vpop.f32.mrb[17].mxu1 }
 0x80d   : > { %v8718_v36 = vadd.f32 %v8717_v33, %v8716_v2  ;;  %v8719_v60 = vpop.f32.mrb[18].mxu1  ;;  %v8634_v7 = vpop.f32.mrb[4].mxu0 }
 0x80e   : > { %v8720_v6 = vpop.f32.mrb[19].mxu1  ;;  %v8635_v38 = vpop.f32.mrb[5].mxu0 }
 0x80f   : > { %v8721_v13 = vadd.f32 %v8720_v6, %v8719_v60  ;;  %v13375_v34 = vadd.f32 %v8718_v36, %v6675_v1  ;;  %v13377_v22 = vadd.f32 %v8635_v38, %v8634_v7  ;;  %v8637_v26 = vpop.f32.mrb[6].mxu0  ;;  %v6707_v7 = vadd.f32 %v13364_v47, %v13369_v23 }
 0x810   : > { %v8638_v24 = vpop.f32.mrb[7].mxu0 }
 0x811   : > { %v13379_v20 = vadd.f32 %v8721_v13, %v6678_v46  ;;  %v13381_v57 = vadd.f32 %v8638_v24, %v8637_v26  ;;  %v6710_v26 = vadd.f32 %v13371_v39, %v13369_v23 }
 0x813   : > { %v8722_v27 = vpop.f32.mrb[20].mxu1 }
 0x814   : > { %v8723_v44 = vpop.f32.mrb[21].mxu1 }
 0x815   : > { %v8724_v59 = vadd.f32 %v8723_v44, %v8722_v27  ;;  %v8725_v18 = vpop.f32.mrb[22].mxu1  ;;  %v8640_v35 = vpop.f32.mrb[8].mxu0 }
 0x816   : > { %v8726_v12 = vpop.f32.mrb[23].mxu1  ;;  %v8641_v0 = vpop.f32.mrb[9].mxu0 }
 0x817   : > { %v8727_v62 = vadd.f32 %v8726_v12, %v8725_v18  ;;  %v13385_v14 = vadd.f32 %v8724_v59, %v6683_v15  ;;  %v13387_v29 = vadd.f32 %v8641_v0, %v8640_v35  ;;  %v8643_v32 = vpop.f32.mrb[10].mxu0 }
 0x818   : > { %v8644_v52 = vpop.f32.mrb[11].mxu0 }
 0x819   : > { %v13389_v31 = vadd.f32 %v8727_v62, %v6686_v63  ;;  %v13391_v16 = vadd.f32 %v8644_v52, %v8643_v32  ;;  %v6715_v62 = vadd.f32 %v13377_v22, %v13369_v23 }
 0x81b   : > { %v8728_v53 = vpop.f32.mrb[24].mxu1 }
 0x81c   : > { %v8729_v17 = vpop.f32.mrb[25].mxu1 }
 0x81d   : > { %v8730_v25 = vadd.f32 %v8729_v17, %v8728_v53  ;;  %v8731_v48 = vpop.f32.mrb[26].mxu1  ;;  %v8646_v56 = vpop.f32.mrb[12].mxu0  ;;  %v6718_v53 = vadd.f32 %v13381_v57, %v13369_v23 }
 0x81e   : > { %v8732_v5 = vpop.f32.mrb[27].mxu1  ;;  %v8647_v30 = vpop.f32.mrb[13].mxu0 }
 0x81f   : > { %v8733_v58 = vadd.f32 %v8732_v5, %v8731_v48  ;;  %v13395_v37 = vadd.f32 %v8730_v25, %v6691_v9  ;;  %v13397_v49 = vadd.f32 %v8647_v30, %v8646_v56  ;;  %v8649_v28 = vpop.f32.mrb[14].mxu0 }
 0x820   : > { %v8650_v54 = vpop.f32.mrb[15].mxu0 }
 0x821   : > { %v13399_v55 = vadd.f32 %v8733_v58, %v6694_v8  ;;  %v13401_v3 = vadd.f32 %v8650_v54, %v8649_v28  ;;  %v6723_v28 = vadd.f32 %v13387_v29, %v13369_v23 }
 0x823   : > { %v8734_v43 = vpop.f32.mrb[28].mxu1 }
 0x824   : > { %v8735_v11 = vpop.f32.mrb[29].mxu1 }
 0x825   : > { %v8736_v45 = vadd.f32 %v8735_v11, %v8734_v43  ;;  %v8737_v42 = vpop.f32.mrb[30].mxu1  ;;  %v8652_v41 = vpop.f32.mrb[16].mxu0 }
 0x826   : > { %v8738_v61 = vpop.f32.mrb[31].mxu1  ;;  %v8653_v50 = vpop.f32.mrb[17].mxu0 }
 0x827   : > { %v8739_v10 = vadd.f32 %v8738_v61, %v8737_v42  ;;  %v13406_v40 = vadd.f32 %v8736_v45, %v6699_v19  ;;  %v13408_v2 = vadd.f32 %v8653_v50, %v8652_v41  ;;  %v8655_v33 = vpop.f32.mrb[18].mxu0  ;;  %v6726_v19 = vadd.f32 %v13391_v16, %v13369_v23 }
 0x828   : > { %v8656_v1 = vpop.f32.mrb[19].mxu0 }
 0x829   : > { %v13410_v36 = vadd.f32 %v8739_v10, %v6702_v21  ;;  %v13412_v60 = vadd.f32 %v8656_v1, %v8655_v33 }
 0x82b   : > { %v8740_v4 = vpop.f32.mrb[32].mxu1 }
 0x82c   : > { %v8741_v6 = vpop.f32.mrb[33].mxu1 }
 0x82d   : > { %v8742_v46 = vadd.f32 %v8741_v6, %v8740_v4  ;;  %v8743_v13 = vpop.f32.mrb[34].mxu1  ;;  %v8658_v38 = vpop.f32.mrb[20].mxu0  ;;  %v6731_v4 = vadd.f32 %v13397_v49, %v13369_v23 }
 0x82e   : > { %v8744_v51 = vpop.f32.mrb[35].mxu1  ;;  %v8659_v27 = vpop.f32.mrb[21].mxu0 }
 0x82f   : > { %v8745_v24 = vadd.f32 %v8744_v51, %v8743_v13  ;;  %v13418_v44 = vadd.f32 %v8742_v46, %v6707_v7  ;;  %v13420_v15 = vadd.f32 %v8659_v27, %v8658_v38  ;;  %v8661_v59 = vpop.f32.mrb[22].mxu0  ;;  %v6734_v13 = vadd.f32 %v13401_v3, %v13369_v23 }
 0x830   : > { %v8662_v18 = vpop.f32.mrb[23].mxu0 }
 0x831   : > { %v13422_v12 = vadd.f32 %v8745_v24, %v6710_v26  ;;  %v13424_v35 = vadd.f32 %v8662_v18, %v8661_v59 }
 0x833   : > { %v8746_v47 = vpop.f32.mrb[36].mxu1 }
 0x834   : > { %v8747_v63 = vpop.f32.mrb[37].mxu1 }
 0x835   : > { %v8748_v0 = vadd.f32 %v8747_v63, %v8746_v47  ;;  %v8749_v32 = vpop.f32.mrb[38].mxu1  ;;  %v8664_v52 = vpop.f32.mrb[24].mxu0 }
 0x836   : > { %v8750_v39 = vpop.f32.mrb[39].mxu1  ;;  %v8665_v9 = vpop.f32.mrb[25].mxu0 }
 0x837   : > { %v8751_v17 = vadd.f32 %v8750_v39, %v8749_v32  ;;  %v13430_v25 = vadd.f32 %v8748_v0, %v6715_v62  ;;  %v13432_v48 = vadd.f32 %v8665_v9, %v8664_v52  ;;  %v8667_v5 = vpop.f32.mrb[26].mxu0  ;;  %v6739_v62 = vadd.f32 %v13408_v2, %v13369_v23 }
 0x838   : > { %v8668_v56 = vpop.f32.mrb[27].mxu0  ;;  %v6742_v52 = vadd.f32 %v13412_v60, %v13369_v23 }
 0x839   : > { %v13434_v8 = vadd.f32 %v8751_v17, %v6718_v53  ;;  %v13436_v58 = vadd.f32 %v8668_v56, %v8667_v5 }
 0x83b   : > { %v8752_v22 = vpop.f32.mrb[40].mxu1 }
 0x83c   : > { %v8753_v30 = vpop.f32.mrb[41].mxu1 }
 0x83d   : > { %v8754_v54 = vadd.f32 %v8753_v30, %v8752_v22  ;;  %v8755_v43 = vpop.f32.mrb[42].mxu1  ;;  %v8670_v11 = vpop.f32.mrb[28].mxu0 }
 0x83e   : > { %v8756_v57 = vpop.f32.mrb[43].mxu1  ;;  %v8671_v42 = vpop.f32.mrb[29].mxu0 }
 0x83f   : > { %v8757_v45 = vadd.f32 %v8756_v57, %v8755_v43  ;;  %v13442_v61 = vadd.f32 %v8754_v54, %v6723_v28  ;;  %v13444_v41 = vadd.f32 %v8671_v42, %v8670_v11  ;;  %v8673_v21 = vpop.f32.mrb[30].mxu0  ;;  %v6747_v43 = vadd.f32 %v13420_v15, %v13369_v23 }
 0x840   : > { %v8674_v10 = vpop.f32.mrb[31].mxu0 }
 0x841   : > { %v13446_v50 = vadd.f32 %v8757_v45, %v6726_v19  ;;  %v13448_v33 = vadd.f32 %v8674_v10, %v8673_v21  ;;  %v6750_v45 = vadd.f32 %v13424_v35, %v13369_v23 }
 0x843   : > { %v8758_v29 = vpop.f32.mrb[44].mxu1 }
 0x844   : > { %v8759_v1 = vpop.f32.mrb[45].mxu1 }
 0x845   : > { %v8760_v6 = vadd.f32 %v8759_v1, %v8758_v29  ;;  %v8761_v7 = vpop.f32.mrb[46].mxu1  ;;  %v8676_v46 = vpop.f32.mrb[32].mxu0 }
 0x846   : > { %v8762_v16 = vpop.f32.mrb[47].mxu1  ;;  %v8677_v38 = vpop.f32.mrb[33].mxu0 }
 0x847   : > { %v8763_v51 = vadd.f32 %v8762_v16, %v8761_v7  ;;  %v13454_v26 = vadd.f32 %v8760_v6, %v6731_v4  ;;  %v13456_v24 = vadd.f32 %v8677_v38, %v8676_v46  ;;  %v8679_v27 = vpop.f32.mrb[34].mxu0  ;;  %v6755_v46 = vadd.f32 %v13432_v48, %v13369_v23 }
 0x848   : > { %v8680_v59 = vpop.f32.mrb[35].mxu0 }
 0x849   : > { %v13458_v18 = vadd.f32 %v8763_v51, %v6734_v13  ;;  %v13460_v47 = vadd.f32 %v8680_v59, %v8679_v27  ;;  %v6758_v27 = vadd.f32 %v13436_v58, %v13369_v23 }
 0x84b   : > { %v8764_v49 = vpop.f32.mrb[48].mxu1 }
 0x84c   : > { %v8765_v63 = vpop.f32.mrb[49].mxu1 }
 0x84d   : > { %v8766_v0 = vadd.f32 %v8765_v63, %v8764_v49  ;;  %v8767_v32 = vpop.f32.mrb[50].mxu1  ;;  %v8682_v39 = vpop.f32.mrb[36].mxu0 }
 0x84e   : > { %v8768_v3 = vpop.f32.mrb[51].mxu1  ;;  %v8683_v17 = vpop.f32.mrb[37].mxu0 }
 0x84f   : > { %v8769_v53 = vadd.f32 %v8768_v3, %v8767_v32  ;;  %v13466_v9 = vadd.f32 %v8766_v0, %v6739_v62  ;;  %v13468_v5 = vadd.f32 %v8683_v17, %v8682_v39  ;;  %v8685_v56 = vpop.f32.mrb[38].mxu0 }
 0x850   : > { %v8686_v22 = vpop.f32.mrb[39].mxu0 }
 0x851   : > { %v13470_v30 = vadd.f32 %v8769_v53, %v6742_v52  ;;  %v13472_v28 = vadd.f32 %v8686_v22, %v8685_v56  ;;  %v6763_v53 = vadd.f32 %v13444_v41, %v13369_v23 }
 0x853   : > { %v8770_v2 = vpop.f32.mrb[52].mxu1 }
 0x854   : > { %v8771_v54 = vpop.f32.mrb[53].mxu1 }
 0x855   : > { %v8772_v57 = vadd.f32 %v8771_v54, %v8770_v2  ;;  %v8773_v11 = vpop.f32.mrb[54].mxu1  ;;  %v8688_v19 = vpop.f32.mrb[40].mxu0  ;;  %v6766_v2 = vadd.f32 %v13448_v33, %v13369_v23 }
 0x856   : > { %v8774_v60 = vpop.f32.mrb[55].mxu1  ;;  %v8689_v21 = vpop.f32.mrb[41].mxu0 }
 0x857   : > { %v8775_v42 = vadd.f32 %v8774_v60, %v8773_v11  ;;  %v13478_v10 = vadd.f32 %v8772_v57, %v6747_v43  ;;  %v13480_v29 = vadd.f32 %v8689_v21, %v8688_v19  ;;  %v8691_v1 = vpop.f32.mrb[42].mxu0 }
 0x858   : > { %v8692_v4 = vpop.f32.mrb[43].mxu0 }
 0x859   : > { %v13482_v6 = vadd.f32 %v8775_v42, %v6750_v45  ;;  %v13484_v7 = vadd.f32 %v8692_v4, %v8691_v1 }
 0x85b   : > { %v8776_v15 = vpop.f32.mrb[56].mxu1 }
 0x85c   : > { %v8777_v16 = vpop.f32.mrb[57].mxu1 }
 0x85d   : > { %v8778_v13 = vadd.f32 %v8777_v16, %v8776_v15  ;;  %v8779_v51 = vpop.f32.mrb[58].mxu1  ;;  %v8694_v38 = vpop.f32.mrb[44].mxu0 }
 0x85e   : > { %v8780_v35 = vpop.f32.mrb[59].mxu1  ;;  %v8695_v49 = vpop.f32.mrb[45].mxu0 }
 0x85f   : > { %v8781_v59 = vadd.f32 %v8780_v35, %v8779_v51  ;;  %v13490_v63 = vadd.f32 %v8778_v13, %v6755_v46  ;;  %v13492_v62 = vadd.f32 %v8695_v49, %v8694_v38  ;;  %v8697_v0 = vpop.f32.mrb[46].mxu0  ;;  %v6771_v46 = vadd.f32 %v13456_v24, %v13369_v23 }
 0x860   : > { %v8698_v32 = vpop.f32.mrb[47].mxu0  ;;  %v6774_v35 = vadd.f32 %v13460_v47, %v13369_v23 }
 0x861   : > { %v13494_v3 = vadd.f32 %v8781_v59, %v6758_v27  ;;  %v13496_v39 = vadd.f32 %v8698_v32, %v8697_v0 }
 0x863   : > { %v8782_v48 = vpop.f32.mrb[60].mxu1 }
 0x864   : > { %v8783_v52 = vpop.f32.mrb[61].mxu1 }
 0x865   : > { %v8784_v17 = vadd.f32 %v8783_v52, %v8782_v48  ;;  %v8785_v56 = vpop.f32.mrb[62].mxu1  ;;  %v8996_v22 = vpop.f32.mrb[48].mxu0 }
 0x866   : > { %v8786_v58 = vpop.f32.mrb[63].mxu1  ;;  %v7005_v43 = vadd.f32 %v8996_v22, %v13385_v14  ;;  %v6996_v57 = vpop.f32.mrb[49].mxu0 }
 0x867   : > { %v8787_v54 = vadd.f32 %v8786_v58, %v8785_v56  ;;  %v13503_v11 = vadd.f32 %v8784_v17, %v6763_v53  ;;  %v6997_v60 = vadd.f32 %v6996_v57, %v13375_v34  ;;  %v8997_v19 = vpop.f32.mrb[50].mxu0 }
 0x868   : > { %v7805_v45 = vmul.f32 -1.442695, %v7005_v43  ;;  %v7008_v42 = vadd.f32 %v8997_v19, %v13389_v31  ;;  %v6999_v41 = vpop.f32.mrb[51].mxu0 }
 0x869   : > { %v13507_v21 = vadd.f32 %v8787_v54, %v6766_v2  ;;  %v7803_v1 = vmul.f32 -1.442695, %v6997_v60  ;;  %v7000_v4 = vadd.f32 %v6999_v41, %v13379_v20 }
 0x86a   : > { %9198 = vpow2.f32 %v7805_v45  ;;  %v7806_v33 = vmul.f32 -1.442695, %v7008_v42 }
 0x86b   : > { %v8788_v15 = vpop.f32.mrb[64].mxu1  ;;  %9200 = vpow2.f32 %v7803_v1  ;;  %v7804_v14 = vmul.f32 -1.442695, %v7000_v4 }
 0x86c   : > { %v8789_v16 = vpop.f32.mrb[65].mxu1  ;;  %9202 = vpow2.f32 %v7806_v33 }
 0x86d   : > { %v8790_v34 = vadd.f32 %v8789_v16, %v8788_v15  ;;  %v8791_v13 = vpop.f32.mrb[66].mxu1  ;;  %9204 = vpow2.f32 %v7804_v14  ;;  %v9000_v31 = vpop.f32.mrb[52].mxu0 }
 0x86e   : > { %v8792_v51 = vpop.f32.mrb[67].mxu1  ;;  %v7021_v20 = vadd.f32 %v9000_v31, %v13406_v40  ;;  %v7012_v27 = vpop.f32.mrb[53].mxu0 }
 0x86f   : > { %v8793_v38 = vadd.f32 %v8792_v51, %v8791_v13  ;;  %v13515_v59 = vadd.f32 %v8790_v34, %v6771_v46  ;;  %v7013_v49 = vadd.f32 %v7012_v27, %v13395_v37  ;;  %v9001_v0 = vpop.f32.mrb[54].mxu0  ;;  %v6779_v37 = vadd.f32 %v13468_v5, %v13369_v23 }
 0x870   : > { %v7809_v32 = vmul.f32 -1.442695, %v7021_v20  ;;  %v7024_v24 = vadd.f32 %v9001_v0, %v13410_v36  ;;  %v7015_v48 = vpop.f32.mrb[55].mxu0  ;;  %v6782_v5 = vadd.f32 %v13472_v28, %v13369_v23 }
 0x871   : > { %v13519_v52 = vadd.f32 %v8793_v38, %v6774_v35  ;;  %v7807_v53 = vmul.f32 -1.442695, %v7013_v49  ;;  %v7016_v17 = vadd.f32 %v7015_v48, %v13399_v55 }
 0x872   : > { %9206 = vpow2.f32 %v7809_v32  ;;  %v7810_v47 = vmul.f32 -1.442695, %v7024_v24 }
 0x873   : > { %v8794_v56 = vpop.f32.mrb[68].mxu1  ;;  %9208 = vpow2.f32 %v7807_v53  ;;  %v7808_v40 = vmul.f32 -1.442695, %v7016_v17 }
 0x874   : > { %v8795_v58 = vpop.f32.mrb[69].mxu1  ;;  %v9199_v22 = vpop.eup %9198  ;;  %9210 = vpow2.f32 %v7810_v47 }
 0x875   : > { %v8796_v2 = vadd.f32 %v8795_v58, %v8794_v56  ;;  %v8797_v54 = vpop.f32.mrb[70].mxu1  ;;  %v9201_v36 = vpop.eup %9200  ;;  %v7221_v43 = vadd.f32 1.0, %v9199_v22  ;;  %9212 = vpow2.f32 %v7808_v40 }
 0x876   : > { %v8798_v57 = vpop.f32.mrb[71].mxu1  ;;  %v9004_v60 = vpop.f32.mrb[56].mxu0  ;;  %v7219_v55 = vadd.f32 1.0, %v9201_v36 }
 0x877   : > { %v9203_v19 = vpop.eup %9202  ;;  %v8799_v45 = vadd.f32 %v8798_v57, %v8797_v54  ;;  %v7037_v42 = vadd.f32 %v9004_v60, %v13430_v25  ;;  %v7028_v41 = vpop.f32.mrb[57].mxu0  ;;  %v13525_v1 = vadd.f32 %v8796_v2, %v6779_v37  ;;  %9214 = vrcp.f32 %v7221_v43 }
 0x878   : > { %v9205_v4 = vpop.eup %9204  ;;  %v7222_v15 = vadd.f32 1.0, %v9203_v19  ;;  %v7029_v33 = vadd.f32 %v7028_v41, %v13418_v44  ;;  %v9005_v16 = vpop.f32.mrb[58].mxu0  ;;  %9216 = vrcp.f32 %v7219_v55 }
 0x879   : > { %v7220_v14 = vadd.f32 1.0, %v9205_v4  ;;  %v7813_v46 = vmul.f32 -1.442695, %v7037_v42  ;;  %v7040_v34 = vadd.f32 %v9005_v16, %v13434_v8  ;;  %v7031_v13 = vpop.f32.mrb[59].mxu0  ;;  %v13532_v31 = vadd.f32 %v8799_v45, %v6782_v5 }
 0x87a   : > { %9218 = vrcp.f32 %v7222_v15  ;;  %v7811_v25 = vmul.f32 -1.442695, %v7029_v33  ;;  %v7032_v51 = vadd.f32 %v7031_v13, %v13422_v12  ;;  %v6787_v8 = vadd.f32 %v13480_v29, %v13369_v23 }
 0x87b   : > { %9220 = vrcp.f32 %v7220_v14  ;;  %v8800_v28 = vpop.f32.mrb[72].mxu1  ;;  %v7814_v35 = vmul.f32 -1.442695, %v7040_v34  ;;  %v6790_v12 = vadd.f32 %v13484_v7, %v13369_v23 }
 0x87c   : > { %v8801_v38 = vpop.f32.mrb[73].mxu1  ;;  %9222 = vpow2.f32 %v7813_v46  ;;  %v7812_v44 = vmul.f32 -1.442695, %v7032_v51  ;;  %v9207_v20 = vpop.eup %9206 }
 0x87d   : > { %v8802_v27 = vadd.f32 %v8801_v38, %v8800_v28  ;;  %v8803_v49 = vpop.f32.mrb[74].mxu1  ;;  %9224 = vpow2.f32 %v7811_v25  ;;  %v9209_v0 = vpop.eup %9208  ;;  %v7225_v32 = vadd.f32 1.0, %v9207_v20 }
 0x87e   : > { %v8804_v24 = vpop.f32.mrb[75].mxu1  ;;  %9226 = vpow2.f32 %v7814_v35  ;;  %v9008_v48 = vpop.f32.mrb[60].mxu0  ;;  %v7223_v17 = vadd.f32 1.0, %v9209_v0  ;;  %v6798_v35 = vadd.f32 %v13496_v39, %v13369_v23 }
 0x87f   : > { %v9211_v53 = vpop.eup %9210  ;;  %v8805_v56 = vadd.f32 %v8804_v24, %v8803_v49  ;;  %9228 = vpow2.f32 %v7812_v44  ;;  %v7053_v47 = vadd.f32 %v9008_v48, %v13454_v26  ;;  %v7044_v58 = vpop.f32.mrb[61].mxu0  ;;  %v13546_v37 = vadd.f32 %v8802_v27, %v6787_v8 }
 0x880   : > { %v9213_v40 = vpop.eup %9212  ;;  %9230 = vrcp.f32 %v7225_v32  ;;  %v7226_v29 = vadd.f32 1.0, %v9211_v53  ;;  %v7045_v7 = vadd.f32 %v7044_v58, %v13442_v61  ;;  %v9009_v22 = vpop.f32.mrb[62].mxu0 }
 0x881   : > { %9232 = vrcp.f32 %v7223_v17  ;;  %v7224_v2 = vadd.f32 1.0, %v9213_v40  ;;  %v7817_v54 = vmul.f32 -1.442695, %v7053_v47  ;;  %v7056_v26 = vadd.f32 %v9009_v22, %v13458_v18  ;;  %v7047_v36 = vpop.f32.mrb[63].mxu0  ;;  %v9215_v43 = vpop.eup %9214 }
 0x882   : > { %9234 = vrcp.f32 %v7226_v29  ;;  %v7815_v57 = vmul.f32 -1.442695, %v7045_v7  ;;  %v7048_v60 = vadd.f32 %v7047_v36, %v13446_v50  ;;  %v13550_v19 = vadd.f32 %v8805_v56, %v6790_v12  ;;  %v9217_v55 = vpop.eup %9216  ;;  %7317 = vst [vmem:[%s13543_s30 + $0x10] sm:$0xff] %v9215_v43 }
 0x883   : > { %9236 = vrcp.f32 %v7224_v2  ;;  %v8806_v61 = vpop.f32.mrb[76].mxu1  ;;  %v7818_v45 = vmul.f32 -1.442695, %v7056_v26  ;;  %7315 = vst [vmem:[%s13543_s30] sm:$0xff] %v9217_v55  ;;  %v6795_v50 = vadd.f32 %v13492_v62, %v13369_v23 }
 0x884   : > { %v9219_v42 = vpop.eup %9218  ;;  %v8807_v41 = vpop.f32.mrb[77].mxu1  ;;  %9238 = vpow2.f32 %v7817_v54  ;;  %v7816_v18 = vmul.f32 -1.442695, %v7048_v60 }
 0x885   : > { %v9221_v4 = vpop.eup %9220  ;;  %7318 = vst [vmem:[%s13543_s30 + $0x18] sm:$0xff] %v9219_v42  ;;  %v8808_v5 = vadd.f32 %v8807_v41, %v8806_v61  ;;  %v8809_v15 = vpop.f32.mrb[78].mxu1  ;;  %9240 = vpow2.f32 %v7815_v57 }
 0x886   : > { %v9223_v33 = vpop.eup %9222  ;;  %7316 = vst [vmem:[%s13543_s30 + $0x8] sm:$0xff] %v9221_v4  ;;  %v8810_v16 = vpop.f32.mrb[79].mxu1  ;;  %9242 = vpow2.f32 %v7818_v45 }
 0x887   : > { %v9012_v14 = vpop.f32.mrb[64].mxu0  ;;  %v9225_v46 = vpop.eup %9224  ;;  %v7229_v34 = vadd.f32 1.0, %v9223_v33  ;;  %v8811_v13 = vadd.f32 %v8810_v16, %v8809_v15  ;;  %9244 = vpow2.f32 %v7816_v18  ;;  %v13562_v20 = vadd.f32 %v8808_v5, %v6795_v50 }
 0x888   : > { %v7069_v25 = vadd.f32 %v9012_v14, %v13478_v10  ;;  %v7060_v51 = vpop.f32.mrb[65].mxu0  ;;  %v9227_v28 = vpop.eup %9226  ;;  %v7227_v38 = vadd.f32 1.0, %v9225_v46 }
 0x889   : > { %v7061_v44 = vadd.f32 %v7060_v51, %v13466_v9  ;;  %v9013_v62 = vpop.f32.mrb[66].mxu0  ;;  %v9229_v27 = vpop.eup %9228  ;;  %9246 = vrcp.f32 %v7229_v34  ;;  %v7230_v49 = vadd.f32 1.0, %v9227_v28  ;;  %v13567_v48 = vadd.f32 %v8811_v13, %v6798_v35 }
 0x88a   : > { %v7821_v0 = vmul.f32 -1.442695, %v7069_v25  ;;  %v7072_v8 = vadd.f32 %v9013_v62, %v13482_v6  ;;  %v7063_v10 = vpop.f32.mrb[67].mxu0  ;;  %v9231_v12 = vpop.eup %9230  ;;  %9248 = vrcp.f32 %v7227_v38  ;;  %v7228_v32 = vadd.f32 1.0, %v9229_v27 }
 0x88b   : > { %v7819_v23 = vmul.f32 -1.442695, %v7061_v44  ;;  %v7064_v39 = vadd.f32 %v7063_v10, %v13470_v30  ;;  %v9233_v9 = vpop.eup %9232  ;;  %7321 = vst [vmem:[%s13543_s30 + $0x30] sm:$0xff] %v9231_v12  ;;  %9250 = vrcp.f32 %v7230_v49 }
 0x88c   : > { %v7822_v24 = vmul.f32 -1.442695, %v7072_v8  ;;  %v9235_v53 = vpop.eup %9234  ;;  %7319 = vst [vmem:[%s13543_s30 + $0x20] sm:$0xff] %v9233_v9  ;;  %9252 = vrcp.f32 %v7228_v32 }
 0x88d   : > { %v7820_v17 = vmul.f32 -1.442695, %v7064_v39  ;;  %v9237_v6 = vpop.eup %9236  ;;  %7322 = vst [vmem:[%s13543_s30 + $0x38] sm:$0xff] %v9235_v53  ;;  %9254 = vpow2.f32 %v7821_v0  ;;  %v9016_v47 = vpop.f32.mrb[68].mxu0 }
 0x88e   : > { %v9239_v56 = vpop.eup %9238  ;;  %7320 = vst [vmem:[%s13543_s30 + $0x28] sm:$0xff] %v9237_v6  ;;  %9256 = vpow2.f32 %v7819_v23  ;;  %v7085_v30 = vadd.f32 %v9016_v47, %v13503_v11  ;;  %v7076_v29 = vpop.f32.mrb[69].mxu0 }
 0x88f   : > { %v9241_v58 = vpop.eup %9240  ;;  %v7233_v40 = vadd.f32 1.0, %v9239_v56  ;;  %9258 = vpow2.f32 %v7822_v24  ;;  %v7077_v2 = vadd.f32 %v7076_v29, %v13490_v63  ;;  %v9017_v54 = vpop.f32.mrb[70].mxu0 }
 0x890   : > { %v9243_v7 = vpop.eup %9242  ;;  %v7231_v22 = vadd.f32 1.0, %v9241_v58  ;;  %9260 = vpow2.f32 %v7820_v17  ;;  %v7825_v43 = vmul.f32 -1.442695, %v7085_v30  ;;  %v7088_v57 = vadd.f32 %v9017_v54, %v13507_v21  ;;  %v7079_v60 = vpop.f32.mrb[71].mxu0 }
 0x891   : > { %v9245_v26 = vpop.eup %9244  ;;  %9262 = vrcp.f32 %v7233_v40  ;;  %v7234_v36 = vadd.f32 1.0, %v9243_v7  ;;  %v7823_v11 = vmul.f32 -1.442695, %v7077_v2  ;;  %v7080_v61 = vadd.f32 %v7079_v60, %v13494_v3 }
 0x892   : > { %9264 = vrcp.f32 %v7231_v22  ;;  %v7232_v55 = vadd.f32 1.0, %v9245_v26  ;;  %v7826_v63 = vmul.f32 -1.442695, %v7088_v57 }
 0x893   : > { %v9247_v45 = vpop.eup %9246  ;;  %9266 = vrcp.f32 %v7234_v36  ;;  %v7824_v41 = vmul.f32 -1.442695, %v7080_v61 }
 0x894   : > { %v9249_v42 = vpop.eup %9248  ;;  %7325 = vst [vmem:[%s13543_s30 + $0x50] sm:$0xff] %v9247_v45  ;;  %9268 = vrcp.f32 %v7232_v55 }
 0x895   : > { %v9251_v18 = vpop.eup %9250  ;;  %7323 = vst [vmem:[%s13543_s30 + $0x40] sm:$0xff] %v9249_v42  ;;  %9270 = vpow2.f32 %v7825_v43  ;;  %v9020_v21 = vpop.f32.mrb[72].mxu0 }
 0x896   : > { %v9253_v4 = vpop.eup %9252  ;;  %7326 = vst [vmem:[%s13543_s30 + $0x58] sm:$0xff] %v9251_v18  ;;  %9272 = vpow2.f32 %v7823_v11  ;;  %v7101_v3 = vadd.f32 %v9020_v21, %v13525_v1  ;;  %v7092_v15 = vpop.f32.mrb[73].mxu0 }
 0x897   : > { %v9255_v5 = vpop.eup %9254  ;;  %7324 = vst [vmem:[%s13543_s30 + $0x48] sm:$0xff] %v9253_v4  ;;  %9274 = vpow2.f32 %v7826_v63  ;;  %v7093_v16 = vadd.f32 %v7092_v15, %v13515_v59  ;;  %v9021_v14 = vpop.f32.mrb[74].mxu0 }
 0x898   : > { %v9257_v33 = vpop.eup %9256  ;;  %v7237_v50 = vadd.f32 1.0, %v9255_v5  ;;  %9276 = vpow2.f32 %v7824_v41  ;;  %v7104_v13 = vadd.f32 %v9021_v14, %v13532_v31  ;;  %v7095_v25 = vpop.f32.mrb[75].mxu0  ;;  %v7829_v35 = vmul.f32 -1.442695, %v7101_v3 }
 0x899   : > { %v9259_v46 = vpop.eup %9258  ;;  %v7235_v34 = vadd.f32 1.0, %v9257_v33  ;;  %v7096_v1 = vadd.f32 %v7095_v25, %v13519_v52  ;;  %v7827_v59 = vmul.f32 -1.442695, %v7093_v16 }
 0x89a   : > { %v9261_v51 = vpop.eup %9260  ;;  %9278 = vrcp.f32 %v7237_v50  ;;  %v7238_v28 = vadd.f32 1.0, %v9259_v46  ;;  %v7830_v27 = vmul.f32 -1.442695, %v7104_v13 }
 0x89b   : > { %v9263_v38 = vpop.eup %9262  ;;  %9280 = vrcp.f32 %v7235_v34  ;;  %v7236_v44 = vadd.f32 1.0, %v9261_v51  ;;  %v7828_v31 = vmul.f32 -1.442695, %v7096_v1 }
 0x89c   : > { %v9265_v62 = vpop.eup %9264  ;;  %7329 = vst [vmem:[%s13543_s30 + $0x70] sm:$0xff] %v9263_v38  ;;  %9282 = vrcp.f32 %v7238_v28 }
 0x89d   : > { %v9267_v49 = vpop.eup %9266  ;;  %7327 = vst [vmem:[%s13543_s30 + $0x60] sm:$0xff] %v9265_v62  ;;  %9284 = vrcp.f32 %v7236_v44  ;;  %v9024_v8 = vpop.f32.mrb[76].mxu0 }
 0x89e   : > { %v9269_v0 = vpop.eup %9268  ;;  %7330 = vst [vmem:[%s13543_s30 + $0x78] sm:$0xff] %v9267_v49  ;;  %9286 = vpow2.f32 %v7829_v35  ;;  %v7117_v52 = vadd.f32 %v9024_v8, %v13562_v20  ;;  %v7108_v12 = vpop.f32.mrb[77].mxu0 }
 0x89f   : > { %v9271_v10 = vpop.eup %9270  ;;  %7328 = vst [vmem:[%s13543_s30 + $0x68] sm:$0xff] %v9269_v0  ;;  %9288 = vpow2.f32 %v7827_v59  ;;  %v7109_v39 = vadd.f32 %v7108_v12, %v13546_v37  ;;  %v9025_v9 = vpop.f32.mrb[78].mxu0 }
 0x8a0   : > { %v9273_v32 = vpop.eup %9272  ;;  %v7241_v23 = vadd.f32 1.0, %v9271_v10  ;;  %9290 = vpow2.f32 %v7830_v27  ;;  %v7120_v17 = vadd.f32 %v9025_v9, %v13567_v48  ;;  %v7111_v6 = vpop.f32.mrb[79].mxu0  ;;  %v7833_v58 = vmul.f32 -1.442695, %v7117_v52 }
 0x8a1   : > { %v9275_v24 = vpop.eup %9274  ;;  %v7239_v53 = vadd.f32 1.0, %v9273_v32  ;;  %9292 = vpow2.f32 %v7828_v31  ;;  %v7112_v20 = vadd.f32 %v7111_v6, %v13550_v19  ;;  %v7831_v37 = vmul.f32 -1.442695, %v7109_v39 }
 0x8a2   : > { %v9277_v56 = vpop.eup %9276  ;;  %9294 = vrcp.f32 %v7241_v23  ;;  %v7242_v47 = vadd.f32 1.0, %v9275_v24  ;;  %v7834_v29 = vmul.f32 -1.442695, %v7120_v17 }
 0x8a3   : > { %9296 = vrcp.f32 %v7239_v53  ;;  %v7240_v40 = vadd.f32 1.0, %v9277_v56  ;;  %v7832_v48 = vmul.f32 -1.442695, %v7112_v20 }
 0x8a4   : > { %v9279_v30 = vpop.eup %9278  ;;  %9298 = vrcp.f32 %v7242_v47 }
 0x8a5   : > { %v9281_v7 = vpop.eup %9280  ;;  %7333 = vst [vmem:[%s13543_s30 + $0x90] sm:$0xff] %v9279_v30  ;;  %9300 = vrcp.f32 %v7240_v40 }
 0x8a6   : > { %v9283_v22 = vpop.eup %9282  ;;  %7331 = vst [vmem:[%s13543_s30 + $0x80] sm:$0xff] %v9281_v7  ;;  %9302 = vpow2.f32 %v7833_v58 }
 0x8a7   : > { %v9285_v2 = vpop.eup %9284  ;;  %7334 = vst [vmem:[%s13543_s30 + $0x98] sm:$0xff] %v9283_v22  ;;  %9304 = vpow2.f32 %v7831_v37 }
 0x8a8   : > { %v9287_v54 = vpop.eup %9286  ;;  %7332 = vst [vmem:[%s13543_s30 + $0x88] sm:$0xff] %v9285_v2  ;;  %9306 = vpow2.f32 %v7834_v29 }
 0x8a9   : > { %v9289_v19 = vpop.eup %9288  ;;  %v7245_v26 = vadd.f32 1.0, %v9287_v54  ;;  %9308 = vpow2.f32 %v7832_v48 }
 0x8aa   : > { %v9291_v36 = vpop.eup %9290  ;;  %v7243_v43 = vadd.f32 1.0, %v9289_v19 }
 0x8ab   : > { %v9293_v57 = vpop.eup %9292  ;;  %9310 = vrcp.f32 %v7245_v26  ;;  %v7246_v60 = vadd.f32 1.0, %v9291_v36 }
 0x8ac   : > { %v9295_v55 = vpop.eup %9294  ;;  %9312 = vrcp.f32 %v7243_v43  ;;  %v7244_v11 = vadd.f32 1.0, %v9293_v57 }
 0x8ad   : > { %v9297_v61 = vpop.eup %9296  ;;  %7337 = vst [vmem:[%s13543_s30 + $0xb0] sm:$0xff] %v9295_v55  ;;  %9314 = vrcp.f32 %v7246_v60 }
 0x8ae   : > { %v9299_v45 = vpop.eup %9298  ;;  %7335 = vst [vmem:[%s13543_s30 + $0xa0] sm:$0xff] %v9297_v61  ;;  %9316 = vrcp.f32 %v7244_v11 }
 0x8af   : > { %v9301_v63 = vpop.eup %9300  ;;  %7338 = vst [vmem:[%s13543_s30 + $0xb8] sm:$0xff] %v9299_v45 }
 0x8b0   : > { %v9303_v42 = vpop.eup %9302  ;;  %7336 = vst [vmem:[%s13543_s30 + $0xa8] sm:$0xff] %v9301_v63 }
 0x8b1   : > { %v9305_v41 = vpop.eup %9304  ;;  %v7249_v18 = vadd.f32 1.0, %v9303_v42 }
 0x8b2   : > { %v9307_v4 = vpop.eup %9306  ;;  %v7247_v21 = vadd.f32 1.0, %v9305_v41 }
 0x8b3   : > { %v9309_v5 = vpop.eup %9308  ;;  %9318 = vrcp.f32 %v7249_v18  ;;  %v7250_v3 = vadd.f32 1.0, %v9307_v4 }
 0x8b4   : > { %9320 = vrcp.f32 %v7247_v21  ;;  %v7248_v15 = vadd.f32 1.0, %v9309_v5 }
 0x8b5   : > { %v9311_v33 = vpop.eup %9310  ;;  %9322 = vrcp.f32 %v7250_v3 }
 0x8b6   : > { %v9313_v50 = vpop.eup %9312  ;;  %7341 = vst [vmem:[%s13543_s30 + $0xd0] sm:$0xff] %v9311_v33  ;;  %9324 = vrcp.f32 %v7248_v15 }
 0x8b7   : > { %v9315_v16 = vpop.eup %9314  ;;  %7339 = vst [vmem:[%s13543_s30 + $0xc0] sm:$0xff] %v9313_v50 }
 0x8b8   : > { %v9317_v14 = vpop.eup %9316  ;;  %7342 = vst [vmem:[%s13543_s30 + $0xd8] sm:$0xff] %v9315_v16 }
 0x8b9   : > { %7340 = vst [vmem:[%s13543_s30 + $0xc8] sm:$0xff] %v9317_v14 }
 0x8bd   : > { %v9319_v46 = vpop.eup %9318 }
 0x8be   : > { %v9321_v34 = vpop.eup %9320  ;;  %7345 = vst [vmem:[%s13543_s30 + $0xf0] sm:$0xff] %v9319_v46 }
 0x8bf   : > { %v9323_v13 = vpop.eup %9322  ;;  %7343 = vst [vmem:[%s13543_s30 + $0xe0] sm:$0xff] %v9321_v34 }
 0x8c0   : > { %v9325_v25 = vpop.eup %9324  ;;  %7346 = vst [vmem:[%s13543_s30 + $0xf8] sm:$0xff] %v9323_v13 }
 0x8c1   : > { %7344 = vst [vmem:[%s13543_s30 + $0xe8] sm:$0xff] %v9325_v25 }
 0x8c2 PF: > { %s17_s24 = sadd.s32 1, %s9332_s24  }
 0x8c3   : > { %p14_p4 = scmp.ge.s32.totalorder %s17_s24, 4  }
 0x8c5   :  { %16 = sbr.rel (!%p14_p4) target bundleno = 1 (0x1), region = 82 }

</bundles_post_ra>
